<compile_context>
chip_gen: v5e
topology: v5e:2x2
jax: 0.10.0
libtpu: 0.0.40
codegen_flags: <defaults>
</compile_context>

<pallas_src>
import functools

import jax
import jax.numpy as jnp
from jax import lax
from jax.experimental import pallas as pl
from jax.experimental.pallas import tpu as pltpu


def _layernorm(v, gamma, beta, eps=1e-5):
    # PyTorch nn.LayerNorm: biased variance, eps inside sqrt.
    mu = jnp.mean(v, axis=-1, keepdims=True)
    var = jnp.mean((v - mu) ** 2, axis=-1, keepdims=True)
    return (v - mu) * lax.rsqrt(var + eps) * gamma + beta


def encoder_layer_kernel(
    x_ref,                                # (BT, S, D)  f32
    wq_ref, wk_ref, wv_ref, wo_ref,       # (D, D)      bf16
    w1_ref, w2_ref,                       # (D, dff), (dff, D) bf16
    vec_ref,                              # (9, D) f32: bq,bk,bv,bo,b2,g1,be1,g2,be2
    b1_ref,                               # (1, dff)    f32
    o_ref,                                # (BT, S, D)
    *, num_heads, depth, block_b, seq_len,
):
    f32 = jnp.float32
    bf16 = jnp.bfloat16
    rows = block_b * seq_len
    d_model = num_heads * depth

    # Flatten the sequence block so every projection / FFN matmul sees M = BT*S rows.
    x = x_ref[...].reshape(rows, d_model).astype(f32)     # residual kept in f32
    x16 = x.astype(bf16)

    vec = vec_ref[...]                                     # (9, D) f32
    bq, bk, bv, bo, b2 = vec[0:1], vec[1:2], vec[2:3], vec[3:4], vec[4:5]
    g1, be1, g2, be2 = vec[5:6], vec[6:7], vec[7:8], vec[8:9]

    # --- QKV projections: bf16 MXU matmuls, f32 accumulation ---
    q = jnp.dot(x16, wq_ref[...], preferred_element_type=f32) + bq
    k = jnp.dot(x16, wk_ref[...], preferred_element_type=f32) + bk
    v = jnp.dot(x16, wv_ref[...], preferred_element_type=f32) + bv

    # Cast once as full (rows, D) arrays before any per-head slicing.
    q16, k16, v16 = q.astype(bf16), k.astype(bf16), v.astype(bf16)

    scale = 1.0 / float(depth) ** 0.5

    # --- attention: per head, batched over the sequences in this block.
    # The W_O projection is accumulated head-by-head (sublane-aligned weight
    # slice) -- no lane-sparse stores, no scratch slab, no concatenate.
    attn = jnp.zeros((rows, d_model), f32)
    for h in range(num_heads):
        lo = h * depth
        qh = q16[:, lo:lo + depth].reshape(block_b, seq_len, depth)
        kh = k16[:, lo:lo + depth].reshape(block_b, seq_len, depth)
        vh = v16[:, lo:lo + depth].reshape(block_b, seq_len, depth)

        s = jnp.einsum("bqd,bkd->bqk", qh, kh,
                       preferred_element_type=f32) * scale        # (BT, S, S) f32
        s = s - jnp.max(s, axis=-1, keepdims=True)
        p = jnp.exp(s)
        p = p * pl.reciprocal(jnp.sum(p, axis=-1, keepdims=True), approx=True)

        ho = jnp.einsum("bqk,bkd->bqd", p.astype(bf16), vh,
                        preferred_element_type=f32)                # (BT, S, depth)
        attn = attn + jnp.dot(ho.reshape(rows, depth).astype(bf16),
                              wo_ref[lo:lo + depth, :],
                              preferred_element_type=f32)          # (rows, D)
    attn = attn + bo

    # --- residual + LayerNorm 1 (f32 elementwise) ---
    h1 = _layernorm(x + attn, g1, be1)

    # --- feed-forward: Linear -> ReLU -> Linear (bf16 MXU matmuls) ---
    ff = jnp.dot(h1.astype(bf16), w1_ref[...],
                 preferred_element_type=f32) + b1_ref[...]
    ff = jnp.maximum(ff, 0.0)
    ff = jnp.dot(ff.astype(bf16), w2_ref[...], preferred_element_type=f32) + b2

    # --- residual + LayerNorm 2; lane-dense (D multiple of 128) store ---
    out = _layernorm(h1 + ff, g2, be2)
    o_ref[...] = out.reshape(block_b, seq_len, d_model).astype(o_ref.dtype)


def _pick_block_b(batch, seq_len, target_rows=256):
    """Sequences per grid step: aim for >=256 MXU rows, keep >=2 grid steps."""
    divs = [d for d in range(1, batch + 1) if batch % d == 0]
    for d in divs:
        if d * seq_len >= target_rows and batch // d >= 2:
            return d
    multi = [d for d in divs if batch // d >= 2]
    if multi:
        return multi[-1]
    return batch


def _vmem_limit_bytes():
    # ~75% of physical per-core VMEM: ~48 MiB on v7x (64 MiB physical),
    # ~96 MiB on v5e/v6e (128 MiB physical). Fallback is safe everywhere.
    try:
        cap = int(pltpu.get_tpu_info().vmem_capacity_bytes)
        return int(cap * 0.75)
    except Exception:
        return 48 * 1024 * 1024


def encoder_layer(x, params, *, num_heads, block_b=None):
    B, S, D = x.shape
    depth = D // num_heads
    dff = params["w1"].shape[1]
    if block_b is None:
        block_b = _pick_block_b(B, S)
    assert B % block_b == 0

    bf16 = jnp.bfloat16
    wq = params["wq"].astype(bf16)
    wk = params["wk"].astype(bf16)
    wv = params["wv"].astype(bf16)
    wo = params["wo"].astype(bf16)
    w1 = params["w1"].astype(bf16)
    w2 = params["w2"].astype(bf16)

    # Fuse the nine (1, D) per-channel vectors into one slab (fewer DMA
    # descriptors / per-step overhead).  b1 is (1, dff) and stays separate.
    vec = jnp.concatenate(
        [params[n] for n in ("bq", "bk", "bv", "bo", "b2",
                             "g1", "be1", "g2", "be2")], axis=0
    ).astype(jnp.float32)                                   # (9, D)
    b1 = params["b1"].astype(jnp.float32)                   # (1, dff)

    def whole(shape):
        # Weight-like operand: constant block index across the whole grid.
        # TODO(synk): on v7x at production sizes, add pipeline_mode=pl.Buffered(1)
        #   here (constant-index weights never re-fetch; double-buffering wastes VMEM).
        return pl.BlockSpec(shape, lambda b: (0, 0))

    in_specs = [
        pl.BlockSpec((block_b, S, D), lambda b: (b, 0, 0)),          # x
        whole((D, D)), whole((D, D)), whole((D, D)), whole((D, D)),  # WQ..WO
        whole((D, dff)), whole((dff, D)),                            # FFN W1, W2
        whole((9, D)),                                               # fused bias/LN slab
        whole((1, dff)),                                             # FFN b1
    ]

    kernel = functools.partial(encoder_layer_kernel,
                               num_heads=num_heads, depth=depth,
                               block_b=block_b, seq_len=S)

    return pl.pallas_call(
        kernel,
        out_shape=jax.ShapeDtypeStruct((B, S, D), x.dtype),
        grid_spec=pltpu.PrefetchScalarGridSpec(
            num_scalar_prefetch=0,
            grid=(B // block_b,),
            in_specs=in_specs,
            out_specs=pl.BlockSpec((block_b, S, D), lambda b: (b, 0, 0)),
        ),
        compiler_params=pltpu.CompilerParams(
            dimension_semantics=("parallel",),
            vmem_limit_bytes=_vmem_limit_bytes(),
        ),
    )(x, wq, wk, wv, wo, w1, w2, vec, b1)


# ---------------------------------------------------------------------------
# References
# ---------------------------------------------------------------------------
def encoder_layer_reference_f32(x, params, *, num_heads):
    """Pure-f32 reference mirroring the PyTorch forward pass (original semantics)."""
    B, S, D = x.shape
    depth = D // num_heads

    def ln(v, g, b, eps=1e-5):
        mu = jnp.mean(v, axis=-1, keepdims=True)
        var = jnp.mean((v - mu) ** 2, axis=-1, keepdims=True)
        return (v - mu) / jnp.sqrt(var + eps) * g + b

    q = x @ params["wq"] + params["bq"]
    k = x @ params["wk"] + params["bk"]
    v = x @ params["wv"] + params["bv"]

    def split(t):
        return t.reshape(B, S, num_heads, depth).transpose(0, 2, 1, 3)

    qh, kh, vh = split(q), split(k), split(v)
    s = jnp.einsum("bhqd,bhkd->bhqk", qh, kh) / jnp.sqrt(jnp.float32(depth))
    p = jax.nn.softmax(s, axis=-1)
    out = jnp.einsum("bhqk,bhkd->bhqd", p, vh).transpose(0, 2, 1, 3).reshape(B, S, D)
    out = out @ params["wo"] + params["bo"]

    h1 = ln(x + out, params["g1"], params["be1"])
    ff = jnp.maximum(h1 @ params["w1"] + params["b1"], 0.0) @ params["w2"] + params["b2"]
    return ln(h1 + ff, params["g2"], params["be2"])


def encoder_layer_reference_mixed(x, params, *, num_heads):
    """Mirror of the kernel's math: bf16 matmul operands, f32 accumulation."""
    B, S, D = x.shape
    depth = D // num_heads
    hi = lax.Precision.HIGHEST

    def r32(t):
        return t.astype(jnp.bfloat16).astype(jnp.float32)

    def mm(a, b):
        return jnp.matmul(r32(a), r32(b), precision=hi)

    def ln(v, g, b, eps=1e-5):
        mu = jnp.mean(v, axis=-1, keepdims=True)
        var = jnp.mean((v - mu) ** 2, axis=-1, keepdims=True)
        return (v - mu) / jnp.sqrt(var + eps) * g + b

    q = mm(x, params["wq"]) + params["bq"]
    k = mm(x, params["wk"]) + params["bk"]
    v = mm(x, params["wv"]) + params["bv"]

    def split(t):
        return t.reshape(B, S, num_heads, depth).transpose(0, 2, 1, 3)

    qh, kh, vh = split(q), split(k), split(v)
    s = jnp.einsum("bhqd,bhkd->bhqk", r32(qh), r32(kh),
                   precision=hi) / jnp.sqrt(jnp.float32(depth))
    p = jax.nn.softmax(s, axis=-1)
    oh = jnp.einsum("bhqk,bhkd->bhqd", r32(p), r32(vh), precision=hi)
    attn = oh.transpose(0, 2, 1, 3).reshape(B, S, D)
    attn = mm(attn, params["wo"]) + params["bo"]

    h1 = ln(x + attn, params["g1"], params["be1"])
    ff = jnp.maximum(mm(h1, params["w1"]) + params["b1"], 0.0)
    ff = mm(ff, params["w2"]) + params["b2"]
    return ln(h1 + ff, params["g2"], params["be2"])


def make_params(key, d_model):
    dff = 4 * d_model
    keys = jax.random.split(key, 12)
    s = 0.05
    return {
        "wq": s * jax.random.normal(keys[0], (d_model, d_model), jnp.float32),
        "bq": s * jax.random.normal(keys[1], (1, d_model), jnp.float32),
        "wk": s * jax.random.normal(keys[2], (d_model, d_model), jnp.float32),
        "bk": s * jax.random.normal(keys[3], (1, d_model), jnp.float32),
        "wv": s * jax.random.normal(keys[4], (d_model, d_model), jnp.float32),
        "bv": s * jax.random.normal(keys[5], (1, d_model), jnp.float32),
        "wo": s * jax.random.normal(keys[6], (d_model, d_model), jnp.float32),
        "bo": s * jax.random.normal(keys[7], (1, d_model), jnp.float32),
        "w1": s * jax.random.normal(keys[8], (d_model, dff), jnp.float32),
        "b1": s * jax.random.normal(keys[9], (1, dff), jnp.float32),
        "w2": s * jax.random.normal(keys[10], (dff, d_model), jnp.float32),
        "b2": s * jax.random.normal(keys[11], (1, d_model), jnp.float32),
        "g1": jnp.ones((1, d_model), jnp.float32),
        "be1": jnp.zeros((1, d_model), jnp.float32),
        "g2": jnp.ones((1, d_model), jnp.float32),
        "be2": jnp.zeros((1, d_model), jnp.float32),
    }


if __name__ == "__main__":
    # Small but lane/sublane-aligned demo: D, dff multiples of 128, S multiple of 8.
    # block_b heuristic -> 2 sequences per grid step (M = 256 MXU rows, 2 grid steps).
    B, S, D, H = 4, 128, 128, 4

    key = jax.random.PRNGKey(0)
    k_x, k_p = jax.random.split(key)
    x = jax.random.normal(k_x, (B, S, D), jnp.float32)
    params = make_params(k_p, D)

    out = jax.block_until_ready(encoder_layer(x, params, num_heads=H))
    assert out.shape == (B, S, D)

    # Tight check vs. a reference mirroring the kernel's bf16/f32 mixed precision.
    ref_mixed = encoder_layer_reference_mixed(x, params, num_heads=H)
    assert jnp.allclose(out, ref_mixed, rtol=2e-2, atol=2e-2), (
        float(jnp.max(jnp.abs(out - ref_mixed))))

    # Loose check vs. the original full-f32 semantics (expected bf16 drift only).
    ref_f32 = encoder_layer_reference_f32(x, params, num_heads=H)
    assert jnp.allclose(out, ref_f32, rtol=1e-1, atol=1e-1), (
        float(jnp.max(jnp.abs(out - ref_f32))))

    print("KERNEL_OK")
</pallas_src>

<mosaic_0001>
module attributes {stable_mosaic.version = 11 : i64} {
  func.func @encoder_layer_kernel(%arg0: i32, %arg1: memref<2x128x128xf32, #tpu.memory_space<vmem>>, %arg2: memref<128x128xbf16, #tpu.memory_space<vmem>>, %arg3: memref<128x128xbf16, #tpu.memory_space<vmem>>, %arg4: memref<128x128xbf16, #tpu.memory_space<vmem>>, %arg5: memref<128x128xbf16, #tpu.memory_space<vmem>>, %arg6: memref<128x512xbf16, #tpu.memory_space<vmem>>, %arg7: memref<512x128xbf16, #tpu.memory_space<vmem>>, %arg8: memref<9x128xf32, #tpu.memory_space<vmem>>, %arg9: memref<1x512xf32, #tpu.memory_space<vmem>>, %arg10: memref<2x128x128xf32, #tpu.memory_space<vmem>>) attributes {dimension_semantics = [#tpu.dimension_semantics<parallel>], iteration_bounds = array<i64: 2>, scalar_prefetch = 0 : i64, scratch_operands = 0 : i64, tpu.core_type = #tpu.core_type<tc>, window_params = [{transform_indices = @transform_0, window_bounds = array<i64: 2, 128, 128>}, {pipeline_mode = #tpu.pipeline_mode<synchronous>, transform_indices = @transform_1, window_bounds = array<i64: 128, 128>}, {pipeline_mode = #tpu.pipeline_mode<synchronous>, transform_indices = @transform_2, window_bounds = array<i64: 128, 128>}, {pipeline_mode = #tpu.pipeline_mode<synchronous>, transform_indices = @transform_3, window_bounds = array<i64: 128, 128>}, {pipeline_mode = #tpu.pipeline_mode<synchronous>, transform_indices = @transform_4, window_bounds = array<i64: 128, 128>}, {pipeline_mode = #tpu.pipeline_mode<synchronous>, transform_indices = @transform_5, window_bounds = array<i64: 128, 512>}, {pipeline_mode = #tpu.pipeline_mode<synchronous>, transform_indices = @transform_6, window_bounds = array<i64: 512, 128>}, {pipeline_mode = #tpu.pipeline_mode<synchronous>, transform_indices = @transform_7, window_bounds = array<i64: 9, 128>}, {pipeline_mode = #tpu.pipeline_mode<synchronous>, transform_indices = @transform_8, window_bounds = array<i64: 1, 512>}, {transform_indices = @transform_9, window_bounds = array<i64: 2, 128, 128>}]} {
    %c0 = arith.constant 0 : index
    %c0_0 = arith.constant 0 : index
    %c0_1 = arith.constant 0 : index
    %0 = vector.load %arg1[%c0, %c0_0, %c0_1] : memref<2x128x128xf32, #tpu.memory_space<vmem>>, vector<2x128x128xf32>
    %1 = vector.shape_cast %0 : vector<2x128x128xf32> to vector<256x128xf32>
    %2 = arith.truncf %1 : vector<256x128xf32> to vector<256x128xbf16>
    %c0_2 = arith.constant 0 : index
    %c0_3 = arith.constant 0 : index
    %3 = vector.load %arg8[%c0_2, %c0_3] : memref<9x128xf32, #tpu.memory_space<vmem>>, vector<9x128xf32>
    %4 = vector.extract_strided_slice %3 {offsets = [0, 0], sizes = [1, 128], strides = [1, 1]} : vector<9x128xf32> to vector<1x128xf32>
    %5 = vector.extract_strided_slice %3 {offsets = [1, 0], sizes = [1, 128], strides = [1, 1]} : vector<9x128xf32> to vector<1x128xf32>
    %6 = vector.extract_strided_slice %3 {offsets = [2, 0], sizes = [1, 128], strides = [1, 1]} : vector<9x128xf32> to vector<1x128xf32>
    %7 = vector.extract_strided_slice %3 {offsets = [3, 0], sizes = [1, 128], strides = [1, 1]} : vector<9x128xf32> to vector<1x128xf32>
    %8 = vector.extract_strided_slice %3 {offsets = [4, 0], sizes = [1, 128], strides = [1, 1]} : vector<9x128xf32> to vector<1x128xf32>
    %9 = vector.extract_strided_slice %3 {offsets = [5, 0], sizes = [1, 128], strides = [1, 1]} : vector<9x128xf32> to vector<1x128xf32>
    %10 = vector.extract_strided_slice %3 {offsets = [6, 0], sizes = [1, 128], strides = [1, 1]} : vector<9x128xf32> to vector<1x128xf32>
    %11 = vector.extract_strided_slice %3 {offsets = [7, 0], sizes = [1, 128], strides = [1, 1]} : vector<9x128xf32> to vector<1x128xf32>
    %12 = vector.extract_strided_slice %3 {offsets = [8, 0], sizes = [1, 128], strides = [1, 1]} : vector<9x128xf32> to vector<1x128xf32>
    %c0_4 = arith.constant 0 : index
    %c0_5 = arith.constant 0 : index
    %13 = vector.load %arg2[%c0_4, %c0_5] : memref<128x128xbf16, #tpu.memory_space<vmem>>, vector<128x128xbf16>
    %cst = arith.constant dense<0.000000e+00> : vector<256x128xf32>
    %14 = tpu.matmul %2, %13, %cst {dimension_numbers = #tpu.dot_dimension_numbers<[1], [0], [0], [1], [0, 0, 1, 1], [], []>} : vector<256x128xbf16>, vector<128x128xbf16>, vector<256x128xf32> -> vector<256x128xf32>
    %15 = vector.broadcast %4 : vector<1x128xf32> to vector<256x128xf32>
    %16 = arith.addf %14, %15 : vector<256x128xf32>
    %c0_6 = arith.constant 0 : index
    %c0_7 = arith.constant 0 : index
    %17 = vector.load %arg3[%c0_6, %c0_7] : memref<128x128xbf16, #tpu.memory_space<vmem>>, vector<128x128xbf16>
    %cst_8 = arith.constant dense<0.000000e+00> : vector<256x128xf32>
    %18 = tpu.matmul %2, %17, %cst_8 {dimension_numbers = #tpu.dot_dimension_numbers<[1], [0], [0], [1], [0, 0, 1, 1], [], []>} : vector<256x128xbf16>, vector<128x128xbf16>, vector<256x128xf32> -> vector<256x128xf32>
    %19 = vector.broadcast %5 : vector<1x128xf32> to vector<256x128xf32>
    %20 = arith.addf %18, %19 : vector<256x128xf32>
    %c0_9 = arith.constant 0 : index
    %c0_10 = arith.constant 0 : index
    %21 = vector.load %arg4[%c0_9, %c0_10] : memref<128x128xbf16, #tpu.memory_space<vmem>>, vector<128x128xbf16>
    %cst_11 = arith.constant dense<0.000000e+00> : vector<256x128xf32>
    %22 = tpu.matmul %2, %21, %cst_11 {dimension_numbers = #tpu.dot_dimension_numbers<[1], [0], [0], [1], [0, 0, 1, 1], [], []>} : vector<256x128xbf16>, vector<128x128xbf16>, vector<256x128xf32> -> vector<256x128xf32>
    %23 = vector.broadcast %6 : vector<1x128xf32> to vector<256x128xf32>
    %24 = arith.addf %22, %23 : vector<256x128xf32>
    %25 = arith.truncf %16 : vector<256x128xf32> to vector<256x128xbf16>
    %26 = arith.truncf %20 : vector<256x128xf32> to vector<256x128xbf16>
    %27 = arith.truncf %24 : vector<256x128xf32> to vector<256x128xbf16>
    %cst_12 = arith.constant 0.000000e+00 : f32
    %28 = vector.broadcast %cst_12 : f32 to vector<256x128xf32>
    %29 = vector.extract_strided_slice %25 {offsets = [0, 0], sizes = [256, 32], strides = [1, 1]} : vector<256x128xbf16> to vector<256x32xbf16>
    %30 = vector.shape_cast %29 : vector<256x32xbf16> to vector<2x128x32xbf16>
    %31 = vector.extract_strided_slice %26 {offsets = [0, 0], sizes = [256, 32], strides = [1, 1]} : vector<256x128xbf16> to vector<256x32xbf16>
    %32 = vector.shape_cast %31 : vector<256x32xbf16> to vector<2x128x32xbf16>
    %33 = vector.extract_strided_slice %27 {offsets = [0, 0], sizes = [256, 32], strides = [1, 1]} : vector<256x128xbf16> to vector<256x32xbf16>
    %34 = vector.shape_cast %33 : vector<256x32xbf16> to vector<2x128x32xbf16>
    "tpu.trace_start"() <{level = 10 : i32, message = "bqd,bkd->bqk"}> : () -> ()
    %cst_13 = arith.constant dense<0.000000e+00> : vector<2x128x128xf32>
    %35 = tpu.matmul %30, %32, %cst_13 {dimension_numbers = #tpu.dot_dimension_numbers<[2], [2], [1], [1], [0, 0, 0, 1, 1, 1], [0], [0]>} : vector<2x128x32xbf16>, vector<2x128x32xbf16>, vector<2x128x128xf32> -> vector<2x128x128xf32>
    "tpu.trace_stop"() : () -> ()
    %cst_14 = arith.constant 0.176776692 : f32
    %36 = vector.broadcast %cst_14 : f32 to vector<2x128x128xf32>
    %37 = arith.mulf %35, %36 : vector<2x128x128xf32>
    %cst_15 = arith.constant dense<0xFF800000> : vector<2x128xf32>
    %38 = vector.multi_reduction <maximumf>, %37, %cst_15 [2] : vector<2x128x128xf32> to vector<2x128xf32>
    %39 = vector.shape_cast %38 : vector<2x128xf32> to vector<2x128x1xf32>
    %40 = vector.broadcast %39 : vector<2x128x1xf32> to vector<2x128x128xf32>
    %41 = arith.subf %37, %40 : vector<2x128x128xf32>
    %42 = math.exp %41 : vector<2x128x128xf32>
    %cst_16 = arith.constant dense<0.000000e+00> : vector<2x128xf32>
    %43 = vector.multi_reduction <add>, %42, %cst_16 [2] : vector<2x128x128xf32> to vector<2x128xf32>
    %44 = vector.shape_cast %43 : vector<2x128xf32> to vector<2x128x1xf32>
    %45 = tpu.reciprocal %44 {approx = true} : vector<2x128x1xf32> -> vector<2x128x1xf32>
    %46 = vector.broadcast %45 : vector<2x128x1xf32> to vector<2x128x128xf32>
    %47 = arith.mulf %42, %46 : vector<2x128x128xf32>
    %48 = arith.truncf %47 : vector<2x128x128xf32> to vector<2x128x128xbf16>
    "tpu.trace_start"() <{level = 10 : i32, message = "bqk,bkd->bqd"}> : () -> ()
    %cst_17 = arith.constant dense<0.000000e+00> : vector<2x128x32xf32>
    %49 = tpu.matmul %48, %34, %cst_17 {dimension_numbers = #tpu.dot_dimension_numbers<[2], [1], [1], [2], [0, 0, 0, 1, 1, 2], [0], [0]>} : vector<2x128x128xbf16>, vector<2x128x32xbf16>, vector<2x128x32xf32> -> vector<2x128x32xf32>
    "tpu.trace_stop"() : () -> ()
    %50 = vector.shape_cast %49 : vector<2x128x32xf32> to vector<256x32xf32>
    %51 = arith.truncf %50 : vector<256x32xf32> to vector<256x32xbf16>
    %c0_18 = arith.constant 0 : index
    %c0_19 = arith.constant 0 : index
    %52 = vector.load %arg5[%c0_18, %c0_19] : memref<128x128xbf16, #tpu.memory_space<vmem>>, vector<32x128xbf16>
    %cst_20 = arith.constant dense<0.000000e+00> : vector<256x128xf32>
    %53 = tpu.matmul %51, %52, %cst_20 {dimension_numbers = #tpu.dot_dimension_numbers<[1], [0], [0], [1], [0, 0, 1, 1], [], []>} : vector<256x32xbf16>, vector<32x128xbf16>, vector<256x128xf32> -> vector<256x128xf32>
    %54 = arith.addf %28, %53 : vector<256x128xf32>
    %55 = vector.extract_strided_slice %25 {offsets = [0, 32], sizes = [256, 32], strides = [1, 1]} : vector<256x128xbf16> to vector<256x32xbf16>
    %56 = vector.shape_cast %55 : vector<256x32xbf16> to vector<2x128x32xbf16>
    %57 = vector.extract_strided_slice %26 {offsets = [0, 32], sizes = [256, 32], strides = [1, 1]} : vector<256x128xbf16> to vector<256x32xbf16>
    %58 = vector.shape_cast %57 : vector<256x32xbf16> to vector<2x128x32xbf16>
    %59 = vector.extract_strided_slice %27 {offsets = [0, 32], sizes = [256, 32], strides = [1, 1]} : vector<256x128xbf16> to vector<256x32xbf16>
    %60 = vector.shape_cast %59 : vector<256x32xbf16> to vector<2x128x32xbf16>
    "tpu.trace_start"() <{level = 10 : i32, message = "bqd,bkd->bqk"}> : () -> ()
    %cst_21 = arith.constant dense<0.000000e+00> : vector<2x128x128xf32>
    %61 = tpu.matmul %56, %58, %cst_21 {dimension_numbers = #tpu.dot_dimension_numbers<[2], [2], [1], [1], [0, 0, 0, 1, 1, 1], [0], [0]>} : vector<2x128x32xbf16>, vector<2x128x32xbf16>, vector<2x128x128xf32> -> vector<2x128x128xf32>
    "tpu.trace_stop"() : () -> ()
    %cst_22 = arith.constant 0.176776692 : f32
    %62 = vector.broadcast %cst_22 : f32 to vector<2x128x128xf32>
    %63 = arith.mulf %61, %62 : vector<2x128x128xf32>
    %cst_23 = arith.constant dense<0xFF800000> : vector<2x128xf32>
    %64 = vector.multi_reduction <maximumf>, %63, %cst_23 [2] : vector<2x128x128xf32> to vector<2x128xf32>
    %65 = vector.shape_cast %64 : vector<2x128xf32> to vector<2x128x1xf32>
    %66 = vector.broadcast %65 : vector<2x128x1xf32> to vector<2x128x128xf32>
    %67 = arith.subf %63, %66 : vector<2x128x128xf32>
    %68 = math.exp %67 : vector<2x128x128xf32>
    %cst_24 = arith.constant dense<0.000000e+00> : vector<2x128xf32>
    %69 = vector.multi_reduction <add>, %68, %cst_24 [2] : vector<2x128x128xf32> to vector<2x128xf32>
    %70 = vector.shape_cast %69 : vector<2x128xf32> to vector<2x128x1xf32>
    %71 = tpu.reciprocal %70 {approx = true} : vector<2x128x1xf32> -> vector<2x128x1xf32>
    %72 = vector.broadcast %71 : vector<2x128x1xf32> to vector<2x128x128xf32>
    %73 = arith.mulf %68, %72 : vector<2x128x128xf32>
    %74 = arith.truncf %73 : vector<2x128x128xf32> to vector<2x128x128xbf16>
    "tpu.trace_start"() <{level = 10 : i32, message = "bqk,bkd->bqd"}> : () -> ()
    %cst_25 = arith.constant dense<0.000000e+00> : vector<2x128x32xf32>
    %75 = tpu.matmul %74, %60, %cst_25 {dimension_numbers = #tpu.dot_dimension_numbers<[2], [1], [1], [2], [0, 0, 0, 1, 1, 2], [0], [0]>} : vector<2x128x128xbf16>, vector<2x128x32xbf16>, vector<2x128x32xf32> -> vector<2x128x32xf32>
    "tpu.trace_stop"() : () -> ()
    %76 = vector.shape_cast %75 : vector<2x128x32xf32> to vector<256x32xf32>
    %77 = arith.truncf %76 : vector<256x32xf32> to vector<256x32xbf16>
    %c32 = arith.constant 32 : index
    %c0_26 = arith.constant 0 : index
    %78 = vector.load %arg5[%c32, %c0_26] : memref<128x128xbf16, #tpu.memory_space<vmem>>, vector<32x128xbf16>
    %cst_27 = arith.constant dense<0.000000e+00> : vector<256x128xf32>
    %79 = tpu.matmul %77, %78, %cst_27 {dimension_numbers = #tpu.dot_dimension_numbers<[1], [0], [0], [1], [0, 0, 1, 1], [], []>} : vector<256x32xbf16>, vector<32x128xbf16>, vector<256x128xf32> -> vector<256x128xf32>
    %80 = arith.addf %54, %79 : vector<256x128xf32>
    %81 = vector.extract_strided_slice %25 {offsets = [0, 64], sizes = [256, 32], strides = [1, 1]} : vector<256x128xbf16> to vector<256x32xbf16>
    %82 = vector.shape_cast %81 : vector<256x32xbf16> to vector<2x128x32xbf16>
    %83 = vector.extract_strided_slice %26 {offsets = [0, 64], sizes = [256, 32], strides = [1, 1]} : vector<256x128xbf16> to vector<256x32xbf16>
    %84 = vector.shape_cast %83 : vector<256x32xbf16> to vector<2x128x32xbf16>
    %85 = vector.extract_strided_slice %27 {offsets = [0, 64], sizes = [256, 32], strides = [1, 1]} : vector<256x128xbf16> to vector<256x32xbf16>
    %86 = vector.shape_cast %85 : vector<256x32xbf16> to vector<2x128x32xbf16>
    "tpu.trace_start"() <{level = 10 : i32, message = "bqd,bkd->bqk"}> : () -> ()
    %cst_28 = arith.constant dense<0.000000e+00> : vector<2x128x128xf32>
    %87 = tpu.matmul %82, %84, %cst_28 {dimension_numbers = #tpu.dot_dimension_numbers<[2], [2], [1], [1], [0, 0, 0, 1, 1, 1], [0], [0]>} : vector<2x128x32xbf16>, vector<2x128x32xbf16>, vector<2x128x128xf32> -> vector<2x128x128xf32>
    "tpu.trace_stop"() : () -> ()
    %cst_29 = arith.constant 0.176776692 : f32
    %88 = vector.broadcast %cst_29 : f32 to vector<2x128x128xf32>
    %89 = arith.mulf %87, %88 : vector<2x128x128xf32>
    %cst_30 = arith.constant dense<0xFF800000> : vector<2x128xf32>
    %90 = vector.multi_reduction <maximumf>, %89, %cst_30 [2] : vector<2x128x128xf32> to vector<2x128xf32>
    %91 = vector.shape_cast %90 : vector<2x128xf32> to vector<2x128x1xf32>
    %92 = vector.broadcast %91 : vector<2x128x1xf32> to vector<2x128x128xf32>
    %93 = arith.subf %89, %92 : vector<2x128x128xf32>
    %94 = math.exp %93 : vector<2x128x128xf32>
    %cst_31 = arith.constant dense<0.000000e+00> : vector<2x128xf32>
    %95 = vector.multi_reduction <add>, %94, %cst_31 [2] : vector<2x128x128xf32> to vector<2x128xf32>
    %96 = vector.shape_cast %95 : vector<2x128xf32> to vector<2x128x1xf32>
    %97 = tpu.reciprocal %96 {approx = true} : vector<2x128x1xf32> -> vector<2x128x1xf32>
    %98 = vector.broadcast %97 : vector<2x128x1xf32> to vector<2x128x128xf32>
    %99 = arith.mulf %94, %98 : vector<2x128x128xf32>
    %100 = arith.truncf %99 : vector<2x128x128xf32> to vector<2x128x128xbf16>
    "tpu.trace_start"() <{level = 10 : i32, message = "bqk,bkd->bqd"}> : () -> ()
    %cst_32 = arith.constant dense<0.000000e+00> : vector<2x128x32xf32>
    %101 = tpu.matmul %100, %86, %cst_32 {dimension_numbers = #tpu.dot_dimension_numbers<[2], [1], [1], [2], [0, 0, 0, 1, 1, 2], [0], [0]>} : vector<2x128x128xbf16>, vector<2x128x32xbf16>, vector<2x128x32xf32> -> vector<2x128x32xf32>
    "tpu.trace_stop"() : () -> ()
    %102 = vector.shape_cast %101 : vector<2x128x32xf32> to vector<256x32xf32>
    %103 = arith.truncf %102 : vector<256x32xf32> to vector<256x32xbf16>
    %c64 = arith.constant 64 : index
    %c0_33 = arith.constant 0 : index
    %104 = vector.load %arg5[%c64, %c0_33] : memref<128x128xbf16, #tpu.memory_space<vmem>>, vector<32x128xbf16>
    %cst_34 = arith.constant dense<0.000000e+00> : vector<256x128xf32>
    %105 = tpu.matmul %103, %104, %cst_34 {dimension_numbers = #tpu.dot_dimension_numbers<[1], [0], [0], [1], [0, 0, 1, 1], [], []>} : vector<256x32xbf16>, vector<32x128xbf16>, vector<256x128xf32> -> vector<256x128xf32>
    %106 = arith.addf %80, %105 : vector<256x128xf32>
    %107 = vector.extract_strided_slice %25 {offsets = [0, 96], sizes = [256, 32], strides = [1, 1]} : vector<256x128xbf16> to vector<256x32xbf16>
    %108 = vector.shape_cast %107 : vector<256x32xbf16> to vector<2x128x32xbf16>
    %109 = vector.extract_strided_slice %26 {offsets = [0, 96], sizes = [256, 32], strides = [1, 1]} : vector<256x128xbf16> to vector<256x32xbf16>
    %110 = vector.shape_cast %109 : vector<256x32xbf16> to vector<2x128x32xbf16>
    %111 = vector.extract_strided_slice %27 {offsets = [0, 96], sizes = [256, 32], strides = [1, 1]} : vector<256x128xbf16> to vector<256x32xbf16>
    %112 = vector.shape_cast %111 : vector<256x32xbf16> to vector<2x128x32xbf16>
    "tpu.trace_start"() <{level = 10 : i32, message = "bqd,bkd->bqk"}> : () -> ()
    %cst_35 = arith.constant dense<0.000000e+00> : vector<2x128x128xf32>
    %113 = tpu.matmul %108, %110, %cst_35 {dimension_numbers = #tpu.dot_dimension_numbers<[2], [2], [1], [1], [0, 0, 0, 1, 1, 1], [0], [0]>} : vector<2x128x32xbf16>, vector<2x128x32xbf16>, vector<2x128x128xf32> -> vector<2x128x128xf32>
    "tpu.trace_stop"() : () -> ()
    %cst_36 = arith.constant 0.176776692 : f32
    %114 = vector.broadcast %cst_36 : f32 to vector<2x128x128xf32>
    %115 = arith.mulf %113, %114 : vector<2x128x128xf32>
    %cst_37 = arith.constant dense<0xFF800000> : vector<2x128xf32>
    %116 = vector.multi_reduction <maximumf>, %115, %cst_37 [2] : vector<2x128x128xf32> to vector<2x128xf32>
    %117 = vector.shape_cast %116 : vector<2x128xf32> to vector<2x128x1xf32>
    %118 = vector.broadcast %117 : vector<2x128x1xf32> to vector<2x128x128xf32>
    %119 = arith.subf %115, %118 : vector<2x128x128xf32>
    %120 = math.exp %119 : vector<2x128x128xf32>
    %cst_38 = arith.constant dense<0.000000e+00> : vector<2x128xf32>
    %121 = vector.multi_reduction <add>, %120, %cst_38 [2] : vector<2x128x128xf32> to vector<2x128xf32>
    %122 = vector.shape_cast %121 : vector<2x128xf32> to vector<2x128x1xf32>
    %123 = tpu.reciprocal %122 {approx = true} : vector<2x128x1xf32> -> vector<2x128x1xf32>
    %124 = vector.broadcast %123 : vector<2x128x1xf32> to vector<2x128x128xf32>
    %125 = arith.mulf %120, %124 : vector<2x128x128xf32>
    %126 = arith.truncf %125 : vector<2x128x128xf32> to vector<2x128x128xbf16>
    "tpu.trace_start"() <{level = 10 : i32, message = "bqk,bkd->bqd"}> : () -> ()
    %cst_39 = arith.constant dense<0.000000e+00> : vector<2x128x32xf32>
    %127 = tpu.matmul %126, %112, %cst_39 {dimension_numbers = #tpu.dot_dimension_numbers<[2], [1], [1], [2], [0, 0, 0, 1, 1, 2], [0], [0]>} : vector<2x128x128xbf16>, vector<2x128x32xbf16>, vector<2x128x32xf32> -> vector<2x128x32xf32>
    "tpu.trace_stop"() : () -> ()
    %128 = vector.shape_cast %127 : vector<2x128x32xf32> to vector<256x32xf32>
    %129 = arith.truncf %128 : vector<256x32xf32> to vector<256x32xbf16>
    %c96 = arith.constant 96 : index
    %c0_40 = arith.constant 0 : index
    %130 = vector.load %arg5[%c96, %c0_40] : memref<128x128xbf16, #tpu.memory_space<vmem>>, vector<32x128xbf16>
    %cst_41 = arith.constant dense<0.000000e+00> : vector<256x128xf32>
    %131 = tpu.matmul %129, %130, %cst_41 {dimension_numbers = #tpu.dot_dimension_numbers<[1], [0], [0], [1], [0, 0, 1, 1], [], []>} : vector<256x32xbf16>, vector<32x128xbf16>, vector<256x128xf32> -> vector<256x128xf32>
    %132 = arith.addf %106, %131 : vector<256x128xf32>
    %133 = vector.broadcast %7 : vector<1x128xf32> to vector<256x128xf32>
    %134 = arith.addf %132, %133 : vector<256x128xf32>
    %135 = arith.addf %1, %134 : vector<256x128xf32>
    %cst_42 = arith.constant dense<0.000000e+00> : vector<256xf32>
    %136 = vector.multi_reduction <add>, %135, %cst_42 [1] : vector<256x128xf32> to vector<256xf32>
    %137 = vector.shape_cast %136 : vector<256xf32> to vector<256x1xf32>
    %cst_43 = arith.constant 1.280000e+02 : f32
    %138 = vector.broadcast %cst_43 : f32 to vector<256x1xf32>
    %139 = arith.divf %137, %138 : vector<256x1xf32>
    %140 = vector.broadcast %139 : vector<256x1xf32> to vector<256x128xf32>
    %141 = arith.subf %135, %140 : vector<256x128xf32>
    %142 = arith.mulf %141, %141 : vector<256x128xf32>
    %cst_44 = arith.constant dense<0.000000e+00> : vector<256xf32>
    %143 = vector.multi_reduction <add>, %142, %cst_44 [1] : vector<256x128xf32> to vector<256xf32>
    %144 = vector.shape_cast %143 : vector<256xf32> to vector<256x1xf32>
    %cst_45 = arith.constant 1.280000e+02 : f32
    %145 = vector.broadcast %cst_45 : f32 to vector<256x1xf32>
    %146 = arith.divf %144, %145 : vector<256x1xf32>
    %147 = vector.broadcast %139 : vector<256x1xf32> to vector<256x128xf32>
    %148 = arith.subf %135, %147 : vector<256x128xf32>
    %cst_46 = arith.constant 9.99999974E-6 : f32
    %149 = vector.broadcast %cst_46 : f32 to vector<256x1xf32>
    %150 = arith.addf %146, %149 : vector<256x1xf32>
    %151 = math.rsqrt %150 : vector<256x1xf32>
    %152 = vector.broadcast %151 : vector<256x1xf32> to vector<256x128xf32>
    %153 = arith.mulf %148, %152 : vector<256x128xf32>
    %154 = vector.broadcast %9 : vector<1x128xf32> to vector<256x128xf32>
    %155 = arith.mulf %153, %154 : vector<256x128xf32>
    %156 = vector.broadcast %10 : vector<1x128xf32> to vector<256x128xf32>
    %157 = arith.addf %155, %156 : vector<256x128xf32>
    %158 = arith.truncf %157 : vector<256x128xf32> to vector<256x128xbf16>
    %c0_47 = arith.constant 0 : index
    %c0_48 = arith.constant 0 : index
    %159 = vector.load %arg6[%c0_47, %c0_48] : memref<128x512xbf16, #tpu.memory_space<vmem>>, vector<128x512xbf16>
    %cst_49 = arith.constant dense<0.000000e+00> : vector<256x512xf32>
    %160 = tpu.matmul %158, %159, %cst_49 {dimension_numbers = #tpu.dot_dimension_numbers<[1], [0], [0], [1], [0, 0, 1, 1], [], []>} : vector<256x128xbf16>, vector<128x512xbf16>, vector<256x512xf32> -> vector<256x512xf32>
    %c0_50 = arith.constant 0 : index
    %c0_51 = arith.constant 0 : index
    %161 = vector.load %arg9[%c0_50, %c0_51] : memref<1x512xf32, #tpu.memory_space<vmem>>, vector<1x512xf32>
    %162 = vector.broadcast %161 : vector<1x512xf32> to vector<256x512xf32>
    %163 = arith.addf %160, %162 : vector<256x512xf32>
    %cst_52 = arith.constant 0.000000e+00 : f32
    %164 = vector.broadcast %cst_52 : f32 to vector<256x512xf32>
    %165 = arith.maximumf %163, %164 : vector<256x512xf32>
    %166 = arith.truncf %165 : vector<256x512xf32> to vector<256x512xbf16>
    %c0_53 = arith.constant 0 : index
    %c0_54 = arith.constant 0 : index
    %167 = vector.load %arg7[%c0_53, %c0_54] : memref<512x128xbf16, #tpu.memory_space<vmem>>, vector<512x128xbf16>
    %cst_55 = arith.constant dense<0.000000e+00> : vector<256x128xf32>
    %168 = tpu.matmul %166, %167, %cst_55 {dimension_numbers = #tpu.dot_dimension_numbers<[1], [0], [0], [1], [0, 0, 1, 1], [], []>} : vector<256x512xbf16>, vector<512x128xbf16>, vector<256x128xf32> -> vector<256x128xf32>
    %169 = vector.broadcast %8 : vector<1x128xf32> to vector<256x128xf32>
    %170 = arith.addf %168, %169 : vector<256x128xf32>
    %171 = arith.addf %157, %170 : vector<256x128xf32>
    %cst_56 = arith.constant dense<0.000000e+00> : vector<256xf32>
    %172 = vector.multi_reduction <add>, %171, %cst_56 [1] : vector<256x128xf32> to vector<256xf32>
    %173 = vector.shape_cast %172 : vector<256xf32> to vector<256x1xf32>
    %cst_57 = arith.constant 1.280000e+02 : f32
    %174 = vector.broadcast %cst_57 : f32 to vector<256x1xf32>
    %175 = arith.divf %173, %174 : vector<256x1xf32>
    %176 = vector.broadcast %175 : vector<256x1xf32> to vector<256x128xf32>
    %177 = arith.subf %171, %176 : vector<256x128xf32>
    %178 = arith.mulf %177, %177 : vector<256x128xf32>
    %cst_58 = arith.constant dense<0.000000e+00> : vector<256xf32>
    %179 = vector.multi_reduction <add>, %178, %cst_58 [1] : vector<256x128xf32> to vector<256xf32>
    %180 = vector.shape_cast %179 : vector<256xf32> to vector<256x1xf32>
    %cst_59 = arith.constant 1.280000e+02 : f32
    %181 = vector.broadcast %cst_59 : f32 to vector<256x1xf32>
    %182 = arith.divf %180, %181 : vector<256x1xf32>
    %183 = vector.broadcast %175 : vector<256x1xf32> to vector<256x128xf32>
    %184 = arith.subf %171, %183 : vector<256x128xf32>
    %cst_60 = arith.constant 9.99999974E-6 : f32
    %185 = vector.broadcast %cst_60 : f32 to vector<256x1xf32>
    %186 = arith.addf %182, %185 : vector<256x1xf32>
    %187 = math.rsqrt %186 : vector<256x1xf32>
    %188 = vector.broadcast %187 : vector<256x1xf32> to vector<256x128xf32>
    %189 = arith.mulf %184, %188 : vector<256x128xf32>
    %190 = vector.broadcast %11 : vector<1x128xf32> to vector<256x128xf32>
    %191 = arith.mulf %189, %190 : vector<256x128xf32>
    %192 = vector.broadcast %12 : vector<1x128xf32> to vector<256x128xf32>
    %193 = arith.addf %191, %192 : vector<256x128xf32>
    %194 = vector.shape_cast %193 : vector<256x128xf32> to vector<2x128x128xf32>
    %c0_61 = arith.constant 0 : index
    %c0_62 = arith.constant 0 : index
    %c0_63 = arith.constant 0 : index
    %195 = vector.load %arg10[%c0_61, %c0_62, %c0_63] : memref<2x128x128xf32, #tpu.memory_space<vmem>>, vector<2x128x128xf32>
    tpu.vector_store %arg10[%c0_61, %c0_62, %c0_63], %194 {strides = array<i32>} : memref<2x128x128xf32, #tpu.memory_space<vmem>>, vector<2x128x128xf32>,
    return
  }
  func.func @transform_0(%arg0: i32) -> (i32, i32, i32) {
    %c0_i32 = arith.constant 0 : i32
    %c0_i32_0 = arith.constant 0 : i32
    %c0_i32_1 = arith.constant 0 : i32
    return %arg0, %c0_i32, %c0_i32_0 : i32, i32, i32
  }
  func.func @transform_1(%arg0: i32) -> (i32, i32) {
    %c0_i32 = arith.constant 0 : i32
    %c0_i32_0 = arith.constant 0 : i32
    %c0_i32_1 = arith.constant 0 : i32
    return %c0_i32, %c0_i32_0 : i32, i32
  }
  func.func @transform_2(%arg0: i32) -> (i32, i32) {
    %c0_i32 = arith.constant 0 : i32
    %c0_i32_0 = arith.constant 0 : i32
    %c0_i32_1 = arith.constant 0 : i32
    return %c0_i32, %c0_i32_0 : i32, i32
  }
  func.func @transform_3(%arg0: i32) -> (i32, i32) {
    %c0_i32 = arith.constant 0 : i32
    %c0_i32_0 = arith.constant 0 : i32
    %c0_i32_1 = arith.constant 0 : i32
    return %c0_i32, %c0_i32_0 : i32, i32
  }
  func.func @transform_4(%arg0: i32) -> (i32, i32) {
    %c0_i32 = arith.constant 0 : i32
    %c0_i32_0 = arith.constant 0 : i32
    %c0_i32_1 = arith.constant 0 : i32
    return %c0_i32, %c0_i32_0 : i32, i32
  }
  func.func @transform_5(%arg0: i32) -> (i32, i32) {
    %c0_i32 = arith.constant 0 : i32
    %c0_i32_0 = arith.constant 0 : i32
    %c0_i32_1 = arith.constant 0 : i32
    return %c0_i32, %c0_i32_0 : i32, i32
  }
  func.func @transform_6(%arg0: i32) -> (i32, i32) {
    %c0_i32 = arith.constant 0 : i32
    %c0_i32_0 = arith.constant 0 : i32
    %c0_i32_1 = arith.constant 0 : i32
    return %c0_i32, %c0_i32_0 : i32, i32
  }
  func.func @transform_7(%arg0: i32) -> (i32, i32) {
    %c0_i32 = arith.constant 0 : i32
    %c0_i32_0 = arith.constant 0 : i32
    %c0_i32_1 = arith.constant 0 : i32
    return %c0_i32, %c0_i32_0 : i32, i32
  }
  func.func @transform_8(%arg0: i32) -> (i32, i32) {
    %c0_i32 = arith.constant 0 : i32
    %c0_i32_0 = arith.constant 0 : i32
    %c0_i32_1 = arith.constant 0 : i32
    return %c0_i32, %c0_i32_0 : i32, i32
  }
  func.func @transform_9(%arg0: i32) -> (i32, i32, i32) {
    %c0_i32 = arith.constant 0 : i32
    %c0_i32_0 = arith.constant 0 : i32
    %c0_i32_1 = arith.constant 0 : i32
    return %arg0, %c0_i32, %c0_i32_0 : i32, i32, i32
  }
}

</mosaic_0001>

<bundles_post_ra>
// kernel: tpu_custom_call.1
= control target key start
LH: loop header
LB: loop body
LE: loop exit
PB: predicated region body
PF: predicated region fallthrough
CT: control target
= control target key end

     0   :  { %s14905_s0 = inlined_call_operand.hbm [shape: f32[4,128,128], index: 0, kind: input, shape index: {}]   ;;  %s14906_s1 = inlined_call_operand.hbm [shape: bf16[128,128], index: 1, kind: input, shape index: {}]   ;;  %s14907_s2 = inlined_call_operand.hbm [shape: bf16[128,128], index: 2, kind: input, shape index: {}]   ;;  %s14908_s3 = inlined_call_operand.hbm [shape: bf16[128,128], index: 3, kind: input, shape index: {}]   ;;  %s14909_s4 = inlined_call_operand.hbm [shape: bf16[128,128], index: 4, kind: input, shape index: {}]   ;;  %s14910_s5 = inlined_call_operand.hbm [shape: bf16[128,512], index: 5, kind: input, shape index: {}]   ;;  %s14911_s6 = inlined_call_operand.hbm [shape: bf16[512,128], index: 6, kind: input, shape index: {}]   ;;  %s14912_s7 = inlined_call_operand.hbm [shape: f32[9,128], index: 7, kind: input, shape index: {}]   ;;  %s14913_s8 = inlined_call_operand.vmem [shape: f32[1,512], index: 8, kind: input, shape index: {}]   ;;  %s14914_s9 = inlined_call_operand.hbm [shape: f32[4,128,128], index: 9, kind: output, shape index: {}]  }
   0x1   :  { %15034 = sst [smem:[#allocation86_spill]] %s14906_s1 }
   0x2   :  { %15035 = sst [smem:[#allocation87_spill]] %s14907_s2 }
   0x3   :  { %15036 = sst [smem:[#allocation88_spill]] %s14908_s3 }
   0x4   :  { %14 = vsyncpa [#allocation3], 0 }
   0x5   :  { %16 = vsyncpa [#allocation3 + $0x1], 0 }
   0x6   :  { %17 = vsyncpa [#allocation6], 0 }
   0x7   :  { %18 = vsyncpa [#allocation9], 0 }
   0x8   :  { %19 = vsyncpa [#allocation12], 0 }
   0x9   :  { %20 = vsyncpa [#allocation15], 0 }
   0xa   :  { %21 = vsyncpa [#allocation4], 0 }
   0xb   :  { %23 = vsyncpa [#allocation4 + $0x1], 0  ;;  %s10317_s30 = smov 0   ;;  %s10319_s10 = smov 0  }
   0xc   :  { %s10321_s11 = smov 0   ;;  %s10323_s12 = smov 0  }
   0xd LB: > { %s15037_s1 = sld [smem:[#allocation86_spill]]  ;;  %s10341_s16 = sadd.s32 4294967295, %s10246_s12   ;;  %s10246_s12 = sphi %s10323_s12, %s15468_s12   ;;  %s10242_s11 = sphi %s10321_s11, %s15467_s11   ;;  %s10238_s10 = sphi %s10319_s10, %s15466_s10   ;;  %s10234_s30 = sphi %s10317_s30, %s15465_s30  }
   0xe   : > { %p8459_p0 = scmp.ge.s32.totalorder %s10246_s12, 1  ;;  %p50_p1 = scmp.eq.s32.totalorder %s10341_s16, 0 }
   0xf   : > { %p254_p2 = scmp.lt.s32.totalorder %s10246_s12, 3  ;;  %s10248_s18 = smov [#allocation5]  }
  0x10   : > { %s267_s19 = sshll.u32 %s10248_s18, 4  ;;  %s15039_s3 = sld [smem:[#allocation88_spill]]  ;;  %s268_s19 = int_to_ptr.vmem [resolvable:$true] %s267_s19 }
  0x11   : > { %p10346_p3 = pnand %p8459_p0, %p254_p2  ;;  %s321_s26 = sshll.u32 %s14910_s5, 4  ;;  %s322_s26 = int_to_ptr.hbm [resolvable:$true] %s321_s26 }
  0x12   : > { %s10249_s27 = smov [#allocation8]   ;;  %s10250_s29 = smov 64  }
  0x13   : > { %s265_s15 = sshll.u32 %s15037_s1, 4  ;;  %p9148_p4 = pneg %p10346_p3  ;;  %s266_s15 = int_to_ptr.hbm [resolvable:$true] %s265_s15 }
  0x14   : > { %s295_s28 = sshll.u32 %s10249_s27, 4  ;;  %s10251_s13 = smov 4   ;;  %s296_s28 = int_to_ptr.vmem [resolvable:$true] %s295_s28 }
  0x15   : > { %p10358_p6 = pnand %p9148_p4, %p50_p1  ;;  %s10252_s14 = smov [#allocation11]  }
  0x16   : > { %s293_s22 = sshll.u32 %s15039_s3, 4  ;;  %s323_s18 = sshll.u32 %s10252_s14, 4  ;;  %s294_s22 = int_to_ptr.hbm [resolvable:$true] %s293_s22  ;;  %s324_s18 = int_to_ptr.vmem [resolvable:$true] %s323_s18 }
  0x17   : > { %9151 = dma.hbm_to_vmem [thread:$0]  (!%p10358_p6), %s266_s15, 1024, %s268_s19, [#allocation6], %s10250_s29, %s10250_s29, %s10251_s13  }
  0x18   : > { %9157 = dma.hbm_to_vmem [thread:$0]  (!%p10358_p6), %s294_s22, 1024, %s296_s28, [#allocation9], %s10250_s29, %s10250_s29, %s10251_s13  }
  0x19   : > { %s15041_s2 = sld [smem:[#allocation87_spill]]  ;;  %s10253_s25 = smov 256  }
  0x1a   : > { %s10254_s27 = smov 16   ;;  %s10255_s15 = smov [#allocation7]  }
  0x1b   : > { %9163 = dma.hbm_to_vmem [thread:$0]  (!%p10358_p6), %s322_s26, 4096, %s324_s18, [#allocation12], %s10253_s25, %s10253_s25, %s10254_s27  }
  0x1c   : > { %s281_s19 = sshll.u32 %s10255_s15, 4  ;;  %s307_s22 = sshll.u32 %s14909_s4, 4  ;;  %s282_s19 = int_to_ptr.vmem [resolvable:$true] %s281_s19  ;;  %s308_s22 = int_to_ptr.hbm [resolvable:$true] %s307_s22 }
  0x1d   : > { %s335_s20 = sshll.u32 %s14911_s6, 4  ;;  %s10256_s26 = smov [#allocation10]   ;;  %s336_s20 = int_to_ptr.hbm [resolvable:$true] %s335_s20 }
  0x1e   : > { %s309_s18 = sshll.u32 %s10256_s26, 4  ;;  %s10257_s1 = smov [#allocation13]   ;;  %s310_s18 = int_to_ptr.vmem [resolvable:$true] %s309_s18 }
  0x1f   : > { %s279_s24 = sshll.u32 %s15041_s2, 4  ;;  %s337_s3 = sshll.u32 %s10257_s1, 4  ;;  %s280_s24 = int_to_ptr.hbm [resolvable:$true] %s279_s24  ;;  %s338_s3 = int_to_ptr.vmem [resolvable:$true] %s337_s3 }
  0x20   : > { %9154 = dma.hbm_to_vmem [thread:$0]  (!%p10358_p6), %s280_s24, 1024, %s282_s19, [#allocation6], %s10250_s29, %s10250_s29, %s10251_s13  }
  0x21   : > { %9160 = dma.hbm_to_vmem [thread:$0]  (!%p10358_p6), %s308_s22, 1024, %s310_s18, [#allocation9], %s10250_s29, %s10250_s29, %s10251_s13  }
  0x22   : > { %s349_s25 = sshll.u32 %s14912_s7, 4  ;;  %s10258_s27 = smov [#allocation14]   ;;  %s350_s25 = int_to_ptr.hbm [resolvable:$true] %s349_s25 }
  0x23   : > { %9166 = dma.hbm_to_vmem [thread:$0]  (!%p10358_p6), %s336_s20, 4096, %s338_s3, [#allocation12], %s10250_s29, %s10250_s29, %s10251_s13  }
  0x24   : > { %s351_s15 = sshll.u32 %s10258_s27, 4  ;;  %s14915_s19 = smov 128   ;;  %s352_s15 = int_to_ptr.vmem [resolvable:$true] %s351_s15 }
  0x25   : > { %s14916_s22 = smov 8   ;;  %s8458_s28 = sadd.s32 4294967294, %s10246_s12  }
  0x26   : > { %9169 = dma.hbm_to_vmem [thread:$0]  (!%p10358_p6), %s350_s25, 256, %s352_s15, [#allocation15], %s14915_s19, %s14915_s19, %s14916_s22  }
  0x27   : > { %s10411_s14 = sadd.s32 1, %s10246_s12   ;;  %s36_s26 = sadd.s32 1, %s10242_s11 }
  0x28   : > { %s33_s29 = ssub.s32 %s10246_s12, %s10411_s14  ;;  %p43_p7 = scmp.ne.s32.totalorder %s10242_s11, %s10238_s10 }
  0x29   : > { %p34_p8 = scmp.eq.s32.totalorder %s33_s29, 0  ;;  %p44_p9 = scmp.eq.s32.totalorder %s10246_s12, 0 }
  0x2a   : > { %p49_p10 = scmp.ne.s32.totalorder %s10238_s10, %s10234_s30  ;;  %p241_p11 = scmp.eq.s32.totalorder %s10341_s16, 1 }
  0x2b   : > { %s10423_s13 = scalar_select %p34_p8, %s10242_s11, %s36_s26  }
  0x2c   : > { %p10427_p12 = por %p50_p1, %p49_p10  ;;  %p10431_p13 = por %p241_p11, %p43_p7 }
  0x2d   : > { %p247_p0 = scmp.eq.s32.totalorder %s8458_s28, 1  ;;  %p45_p2 = por %p44_p9, %p43_p7 }
  0x2e   : > { %s368_s18 = sand.u32 1, %s10242_s11   ;;  %p9185_p6 = scmp.lt.s32.totalorder %s10246_s12, 2 }
  0x2f   : > { %p10436_p4 = por %p247_p0, %p49_p10  ;;  %s8468_s3 = sshll.u32 %s368_s18, 8 }
  0x30   : > { %s9001_s21 = sshll.u32 %s10246_s12, 8  ;;  %s372_s26 = scalar_lea.vmem [#allocation2], %s8468_s3 }
  0x31   : > { %s378_s27 = scalar_lea.hbm %s14905_s0, %s9001_s21  ;;  %s381_s29 = sshll.u32 %s372_s26, 4  ;;  %s382_s29 = int_to_ptr.vmem [resolvable:$true] %s381_s29 }
  0x32   : > { %s379_s15 = sshll.u32 %s378_s27, 4  ;;  %p10445_p8 = pnand %p9185_p6, %p45_p2  ;;  %s380_s15 = int_to_ptr.hbm [resolvable:$true] %s379_s15 }
  0x33   : > { %s369_s19 = scalar_lea.sflag [#allocation3], %s368_s18  ;;  %s10134_s22 = sshra.s32 %s380_s15, 4  ;;  %s10135_s22 = int_to_ptr.hbm [resolvable:$true] %s10134_s22 }
  0x34   : > { %s10136_s2 = scalar_lea.hbm %s10135_s22, 256  ;;  %p10138_p9 = pneg %p10445_p8 }
  0x35   : > { %p10137_p7 = scmp.ne.s32.totalorder %s10135_s22, %s10136_s2  ;;  %s10141_s3 = scalar_lea.hbm %s14905_s0, 512 }
  0x36   : > { %p10142_p0 = scmp.lt.s32.totalorder %s10135_s22, %s14905_s0  ;;  %p10143_p2 = scmp.lt.s32.totalorder %s10141_s3, %s10136_s2 }
  0x37   : > { %p10139_p10 = pnand %p10138_p9, %p10137_p7 }
  0x38   : > { %p10144_p6 = por %p10143_p2, %p10142_p0 }
  0x39   : > { %p10140_p11 = pneg %p10139_p10 }
  0x3b   : > { %p10145_p5 = pnand %p10144_p6, %p10140_p11 }
  0x3d   : > { %10148 = shalt.err (!%p10145_p5)
}
  0x3e   : > { %s15046_s18 = smov 8   ;;  %s15047_s26 = smov 128  }
  0x3f   : > { %9173 = dma.hbm_to_vmem [thread:$0]  (!%p10445_p8), %s380_s15, 4096, %s382_s29, %s369_s19, %s15047_s26, %s15047_s26, %s15046_s18  }
  0x40   : > { %393 = sbr.rel (%p10346_p3) target bundleno = 4293 (0x10c5), region = 56 }
  0x45   : > { %s10465_s21 = sand.u32 1, %s10238_s10  }
  0x46   : > { %s8473_s2 = sshll.u32 %s10465_s21, 8  ;;  %s396_s22 = scalar_lea.sflag [#allocation3], %s10465_s21 }
  0x47   : > { %s10471_s24 = scalar_lea.vmem [#allocation2], %s8473_s2 }
  0x48   : > { %10209 = dma.done.wait (%p10427_p12), %s396_s22, 4096  }
  0x49   : > { %10211 = vsyncadd (%p10427_p12), %s396_s22, 4294963200 }
  0x4a   : > { %10213 = dma.done.wait (%p50_p1), [#allocation6], 2048  }
  0x4b   : > { %10215 = vsyncadd (%p50_p1), [#allocation6], 4294965248 }
  0x4c   : > { %10217 = dma.done.wait (%p50_p1), [#allocation9], 2048  }
  0x4d   : > { %10219 = vsyncadd (%p50_p1), [#allocation9], 4294965248 }
  0x4e   : > { %10221 = dma.done.wait (%p50_p1), [#allocation12], 8192  }
  0x4f   : > { %10223 = vsyncadd (%p50_p1), [#allocation12], 4294959104 }
  0x50   : > { %10225 = dma.done.wait (%p50_p1), [#allocation15], 256  }
  0x51   : > { %10227 = vsyncadd (%p50_p1), [#allocation15], 4294967040  ;;  %v9017_v0 = vld [vmem:[#allocation7 + $0x38] sm:$0xff]  ;;  %v9016_v3 = vld [vmem:[#allocation7 + $0x30] sm:$0xff]  ;;  %s10261_s17 = smov 96   ;;  %s10262_s19 = smov 64  }
  0x52   : > { %v9025_v1 = vld [vmem:[#allocation8 + $0x38] sm:$0xff]  ;;  %742 = vmatpush.bf16.msra.mxu1 %v9017_v0  ;;  %v9024_v4 = vld [vmem:[#allocation8 + $0x30] sm:$0xff]  ;;  %9100 = vmatpush.bf16.msra.mxu3 %v9017_v0  ;;  %v9015_v6 = vld [vmem:[#allocation7 + $0x28] sm:$0xff]  ;;  %vm1161_vm0 = vcmask 261120   ;;  %s10263_s23 = smov 32   ;;  %s14636_s28 = scalar_lea.vmem [#allocation16], %s8473_s2 }
  0x53   : > { %v9009_v2 = vld [vmem:[#allocation5 + $0x38] sm:$0xff]  ;;  %896 = vmatpush.bf16.msra.mxu2 %v9025_v1  ;;  %v9008_v5 = vld [vmem:[#allocation5 + $0x30] sm:$0xff]  ;;  %v9023_v7 = vld [vmem:[#allocation8 + $0x28] sm:$0xff]  ;;  %s9099_s3 = sshll.u32 %s10341_s16, 8  ;;  %s8315_s26 = sshll.u32 %s14636_s28, 4  ;;  %s8316_s26 = int_to_ptr.vmem [resolvable:$true] %s8315_s26 }
  0x54   : > { %588 = vmatpush.bf16.msra.mxu0 %v9009_v2  ;;  %v9007_v8 = vld [vmem:[#allocation5 + $0x28] sm:$0xff]  ;;  %v9014_v9 = vld [vmem:[#allocation7 + $0x20] sm:$0xff]  ;;  %v9013_v12 = vld [vmem:[#allocation7 + $0x18] sm:$0xff]  ;;  %s8314_s18 = scalar_lea.hbm %s14914_s9, %s9099_s3  ;;  %s8302_s2 = scalar_lea.sflag [#allocation4], %s10465_s21 }
  0x55   : > { %v9022_v10 = vld [vmem:[#allocation8 + $0x20] sm:$0xff]  ;;  %v9021_v13 = vld [vmem:[#allocation8 + $0x18] sm:$0xff]  ;;  %v9012_v15 = vld [vmem:[#allocation7 + $0x10] sm:$0xff]  ;;  %s8317_s16 = sshll.u32 %s8314_s18, 4  ;;  %s8318_s16 = int_to_ptr.hbm [resolvable:$true] %s8317_s16 }
  0x56   : > { %743 = vmatpush.bf16.msra.mxu1 %v9016_v3  ;;  %9101 = vmatpush.bf16.msra.mxu3 %v9016_v3  ;;  %v9006_v11 = vld [vmem:[#allocation5 + $0x20] sm:$0xff]  ;;  %v9005_v14 = vld [vmem:[#allocation5 + $0x18] sm:$0xff]  ;;  %v9020_v16 = vld [vmem:[#allocation8 + $0x10] sm:$0xff]  ;;  %s10178_s22 = sshra.s32 %s8318_s16, 4  ;;  %s10179_s22 = int_to_ptr.hbm [resolvable:$true] %s10178_s22 }
  0x57   : > { %897 = vmatpush.bf16.msra.mxu2 %v9024_v4  ;;  %v9004_v17 = vld [vmem:[#allocation5 + $0x10] sm:$0xff]  ;;  %v9011_v18 = vld [vmem:[#allocation7 + $0x8] sm:$0xff]  ;;  %v9010_v21 = vld [vmem:[#allocation7] sm:$0xff]  ;;  %p10185_p12 = scmp.lt.s32.totalorder %s10179_s22, %s14914_s9 }
  0x58   : > { %589 = vmatpush.bf16.msra.mxu0 %v9008_v5  ;;  %v9019_v19 = vld [vmem:[#allocation8 + $0x8] sm:$0xff]  ;;  %v9018_v22 = vld [vmem:[#allocation8] sm:$0xff]  ;;  %v475_v30 = vld [vmem:[%s10471_s24 + $0x10] sm:$0xff] }
  0x59   : > { %v9003_v20 = vld [vmem:[#allocation5 + $0x8] sm:$0xff]  ;;  %v473_v23 = vld [vmem:[%s10471_s24] sm:$0xff]  ;;  %v476_v31 = vld [vmem:[%s10471_s24 + $0x18] sm:$0xff] }
  0x5a   : > { %744 = vmatpush.bf16.msra.mxu1 %v9015_v6  ;;  %9102 = vmatpush.bf16.msra.mxu3 %v9015_v6  ;;  %v474_v24 = vld [vmem:[%s10471_s24 + $0x8] sm:$0xff]  ;;  %v497_v25 = vld [vmem:[%s10471_s24 + $0xc0] sm:$0xff]  ;;  %v499_v32 = vld [vmem:[%s10471_s24 + $0xd0] sm:$0xff]  ;;  %v506_v34 = vpack.c.bf16 %v476_v31, %v475_v30 }
  0x5b   : > { %898 = vmatpush.bf16.msra.mxu2 %v9023_v7  ;;  %v498_v26 = vld [vmem:[%s10471_s24 + $0xc8] sm:$0xff]  ;;  %v9002_v27 = vld [vmem:[#allocation5] sm:$0xff]  ;;  %v505_v28 = vpack.c.bf16 %v474_v24, %v473_v23  ;;  %v500_v33 = vld [vmem:[%s10471_s24 + $0xd8] sm:$0xff] }
  0x5c   : > { %590 = vmatpush.bf16.msra.mxu0 %v9007_v8  ;;  %v10497_v29 = vpack.c.bf16 %v498_v26, %v497_v25  ;;  %v10504_v35 = vpack.c.bf16 %v500_v33, %v499_v32  ;;  %v477_v36 = vld [vmem:[%s10471_s24 + $0x20] sm:$0xff]  ;;  %v478_v37 = vld [vmem:[%s10471_s24 + $0x28] sm:$0xff]  ;;  %v479_v42 = vld [vmem:[%s10471_s24 + $0x30] sm:$0xff] }
  0x5d   : > { %v501_v38 = vld [vmem:[%s10471_s24 + $0xe0] sm:$0xff]  ;;  %v502_v39 = vld [vmem:[%s10471_s24 + $0xe8] sm:$0xff]  ;;  %v507_v40 = vpack.c.bf16 %v478_v37, %v477_v36  ;;  %v480_v43 = vld [vmem:[%s10471_s24 + $0x38] sm:$0xff] }
  0x5e   : > { %745 = vmatpush.bf16.msra.mxu1 %v9014_v9  ;;  %9103 = vmatpush.bf16.msra.mxu3 %v9014_v9  ;;  %v10511_v41 = vpack.c.bf16 %v502_v39, %v501_v38  ;;  %v503_v44 = vld [vmem:[%s10471_s24 + $0xf0] sm:$0xff]  ;;  %v504_v45 = vld [vmem:[%s10471_s24 + $0xf8] sm:$0xff]  ;;  %v508_v46 = vpack.c.bf16 %v480_v43, %v479_v42  ;;  %v481_v48 = vld [vmem:[%s10471_s24 + $0x40] sm:$0xff] }
  0x5f   : > { %899 = vmatpush.bf16.msra.mxu2 %v9022_v10  ;;  %v10518_v47 = vpack.c.bf16 %v504_v45, %v503_v44  ;;  %v482_v49 = vld [vmem:[%s10471_s24 + $0x48] sm:$0xff]  ;;  %v483_v51 = vld [vmem:[%s10471_s24 + $0x50] sm:$0xff]  ;;  %v484_v52 = vld [vmem:[%s10471_s24 + $0x58] sm:$0xff] }
  0x60   : > { %591 = vmatpush.bf16.msra.mxu0 %v9006_v11  ;;  %v509_v50 = vpack.c.bf16 %v482_v49, %v481_v48  ;;  %v510_v53 = vpack.c.bf16 %v484_v52, %v483_v51  ;;  %v485_v54 = vld [vmem:[%s10471_s24 + $0x60] sm:$0xff]  ;;  %v486_v55 = vld [vmem:[%s10471_s24 + $0x68] sm:$0xff]  ;;  %v487_v57 = vld [vmem:[%s10471_s24 + $0x70] sm:$0xff] }
  0x61   : > { %v511_v56 = vpack.c.bf16 %v486_v55, %v485_v54  ;;  %v488_v58 = vld [vmem:[%s10471_s24 + $0x78] sm:$0xff]  ;;  %v489_v60 = vld [vmem:[%s10471_s24 + $0x80] sm:$0xff]  ;;  %v490_v61 = vld [vmem:[%s10471_s24 + $0x88] sm:$0xff] }
  0x62   : > { %746 = vmatpush.bf16.msra.mxu1 %v9013_v12  ;;  %9104 = vmatpush.bf16.msra.mxu3 %v9013_v12  ;;  %v512_v59 = vpack.c.bf16 %v488_v58, %v487_v57  ;;  %v521_v62 = vld [vmem:[#allocation14] sm:$0xff]  ;;  %v513_v63 = vpack.c.bf16 %v490_v61, %v489_v60  ;;  %v494_v61 = vld [vmem:[%s10471_s24 + $0xa8] sm:$0xff] }
  0x63   : > { %900 = vmatpush.bf16.msra.mxu2 %v9021_v13  ;;  %v10531_v1 = vperm.slane %v521_v62, 0  ;;  %v10533_v2 = vperm.slane %v521_v62, 1  ;;  %v10537_v6 = vperm.slane %v521_v62, 2  ;;  %v493_v60 = vld [vmem:[%s10471_s24 + $0xa0] sm:$0xff] }
  0x64   : > { %592 = vmatpush.bf16.msra.mxu0 %v9005_v14 }
  0x66   : > { %747 = vmatpush.bf16.msra.mxu1 %v9012_v15  ;;  %9105 = vmatpush.bf16.msra.mxu3 %v9012_v15 }
  0x67   : > { %901 = vmatpush.bf16.msra.mxu2 %v9020_v16 }
  0x68   : > { %593 = vmatpush.bf16.msra.mxu0 %v9004_v17 }
  0x6a   : > { %748 = vmatpush.bf16.msra.mxu1 %v9011_v18  ;;  %9106 = vmatpush.bf16.msra.mxu3 %v9011_v18 }
  0x6b   : > { %902 = vmatpush.bf16.msra.mxu2 %v9019_v19 }
  0x6c   : > { %594 = vmatpush.bf16.msra.mxu0 %v9003_v20  ;;  %v491_v20 = vld [vmem:[%s10471_s24 + $0x90] sm:$0xff] }
  0x6e   : > { %749 = vmatpush.bf16.msra.mxu1 %v9010_v21  ;;  %9107 = vmatpush.bf16.msra.mxu3 %v9010_v21  ;;  %v492_v21 = vld [vmem:[%s10471_s24 + $0x98] sm:$0xff] }
  0x6f   : > { %903 = vmatpush.bf16.msra.mxu2 %v9018_v22  ;;  %v514_v32 = vpack.c.bf16 %v492_v21, %v491_v20 }
  0x70   : > { %595 = vmatpush.bf16.msra.mxu0 %v9002_v27 }
  0x71   : > { %750 = vmatmul.bf16.vlgmr.msra.gmra.mxu1 %v505_v28  ;;  %810 = vmatmul.bf16.vlgmr.msra.gmra.mxu3 %v10497_v29 }
  0x72   : > { %904 = vmatmul.bf16.vlgmr.msra.gmra.mxu2 %v505_v28 }
  0x73   : > { %596 = vmatmul.bf16.vlgmr.msra.gmra.mxu0 %v505_v28 }
  0x81   : > { %755 = vmatmul.bf16.gmra.mxu1 %v506_v34  ;;  %815 = vmatmul.bf16.gmra.mxu3 %v10504_v35 }
  0x82   : > { %909 = vmatmul.bf16.gmra.mxu2 %v506_v34 }
  0x83   : > { %601 = vmatmul.bf16.gmra.mxu0 %v506_v34 }
  0x91   : > { %760 = vmatmul.bf16.gmra.mxu1 %v507_v40  ;;  %820 = vmatmul.bf16.gmra.mxu3 %v10511_v41 }
  0x92   : > { %914 = vmatmul.bf16.gmra.mxu2 %v507_v40 }
  0x93   : > { %606 = vmatmul.bf16.gmra.mxu0 %v507_v40 }
  0xa1   : > { %765 = vmatmul.bf16.gmra.mxu1 %v508_v46  ;;  %825 = vmatmul.bf16.gmra.mxu3 %v10518_v47 }
  0xa2   : > { %919 = vmatmul.bf16.gmra.mxu2 %v508_v46 }
  0xa3   : > { %611 = vmatmul.bf16.gmra.mxu0 %v508_v46 }
  0xb1   : > { %770 = vmatmul.bf16.gmra.mxu1 %v509_v50 }
  0xb2   : > { %924 = vmatmul.bf16.gmra.mxu2 %v509_v50 }
  0xb3   : > { %616 = vmatmul.bf16.gmra.mxu0 %v509_v50 }
  0xc1   : > { %775 = vmatmul.bf16.gmra.mxu1 %v510_v53 }
  0xc2   : > { %929 = vmatmul.bf16.gmra.mxu2 %v510_v53 }
  0xc3   : > { %621 = vmatmul.bf16.gmra.mxu0 %v510_v53 }
  0xd1   : > { %780 = vmatmul.bf16.gmra.mxu1 %v511_v56 }
  0xd2   : > { %934 = vmatmul.bf16.gmra.mxu2 %v511_v56 }
  0xd3   : > { %626 = vmatmul.bf16.gmra.mxu0 %v511_v56 }
  0xe1   : > { %785 = vmatmul.bf16.gmra.mxu1 %v512_v59 }
  0xe2   : > { %939 = vmatmul.bf16.gmra.mxu2 %v512_v59 }
  0xe3   : > { %631 = vmatmul.bf16.gmra.mxu0 %v512_v59 }
  0xee   : > { %v751_v0 = vpop.f32.mrf.mxu1 }
  0xef   : > { %v752_v5 = vadd.f32 %v751_v0, %v10533_v2 }
  0xf0   : > { %v597_v3 = vpop.f32.mrf.mxu0 }
  0xf1   : > { %790 = vmatmul.bf16.gmra.mxu1 %v513_v63  ;;  %v598_v4 = vadd.f32 %v597_v3, %v10531_v1  ;;  %v1017_v11 = vpack.c.bf16 %v752_v5, %v752_v5 }
  0xf2   : > { %944 = vmatmul.bf16.gmra.mxu2 %v513_v63 }
  0xf3   : > { %636 = vmatmul.bf16.gmra.mxu0 %v513_v63  ;;  %v985_v9 = vpack.c.bf16 %v598_v4, %v598_v4  ;;  %v1137_v22 = vunpack.c.l.b16 %v1017_v11 }
  0xf4   : > { %v811_v8 = vpop.f32.mrf.mxu3 }
  0xf5   : > { %v905_v7 = vpop.f32.mrf.mxu2  ;;  %v812_v15 = vadd.f32 %v811_v8, %v10533_v2  ;;  %v1097_v18 = vunpack.c.l.b16 %v985_v9  ;;  %v515_v9 = vpack.c.bf16 %v494_v61, %v493_v60 }
  0xf6   : > { %v753_v10 = vpop.f32.mrf.mxu1  ;;  %v906_v14 = vadd.f32 %v905_v7, %v10537_v6 }
  0xf7   : > { %v754_v12 = vadd.f32 %v753_v10, %v10533_v2  ;;  %v1041_v25 = vpack.c.bf16 %v812_v15, %v812_v15 }
  0xf8   : > { %v599_v13 = vpop.f32.mrf.mxu0  ;;  %v1049_v24 = vpack.c.bf16 %v906_v14, %v906_v14 }
  0xf9   : > { %v600_v16 = vadd.f32 %v599_v13, %v10531_v1  ;;  %v1018_v17 = vpack.c.bf16 %v754_v12, %v754_v12  ;;  %v1323_v40 = vunpack.c.l.b16 %v1041_v25 }
  0xfa   : > { %v1852_v39 = vunpack.c.l.b16 %v1049_v24 }
  0xfb   : > { %v986_v19 = vpack.c.bf16 %v600_v16, %v600_v16  ;;  %v1138_v23 = vunpack.c.l.b16 %v1018_v17 }
  0xfc   : > { %v813_v31 = vpop.f32.mrf.mxu3 }
  0xfd   : > { %v907_v26 = vpop.f32.mrf.mxu2  ;;  %v1098_v27 = vunpack.c.l.b16 %v986_v19  ;;  %v10545_v28 = vpack.c.b16 %v1138_v23, %v1137_v22  ;;  %v814_v36 = vadd.f32 %v813_v31, %v10533_v2 }
  0xfe   : > { %v908_v30 = vadd.f32 %v907_v26, %v10537_v6  ;;  %v756_v34 = vpop.f32.mrf.mxu1 }
  0xff   : > { %15048 = vst [vmem:[#allocation23_spill] sm:$0xff] %v10545_v28  ;;  %v10548_v33 = vpack.c.b16 %v1098_v27, %v1097_v18  ;;  %2114 = vrot.lane.b32.xlu2 %v10545_v28, %s10261_s17  ;;  %v1042_v42 = vpack.c.bf16 %v814_v36, %v814_v36  ;;  %v757_v45 = vadd.f32 %v756_v34, %v10533_v2 }
 0x100   : > { %v1050_v37 = vpack.c.bf16 %v908_v30, %v908_v30  ;;  %v602_v38 = vpop.f32.mrf.mxu0 }
 0x101   : > { %15049 = vst [vmem:[#allocation24_spill] sm:$0xff] %v10548_v33  ;;  %2098 = vrot.lane.b32.xlu1 %v10548_v33, %s10261_s17  ;;  %795 = vmatmul.bf16.gmra.mxu1 %v514_v32  ;;  %v1324_v44 = vunpack.c.l.b16 %v1042_v42  ;;  %v603_v51 = vadd.f32 %v602_v38, %v10531_v1  ;;  %v1019_v53 = vpack.c.bf16 %v757_v45, %v757_v45  ;;  %v495_v42 = vld [vmem:[%s10471_s24 + $0xb0] sm:$0xff] }
 0x102   : > { %v1853_v43 = vunpack.c.l.b16 %v1050_v37  ;;  %949 = vmatmul.bf16.gmra.mxu2 %v514_v32 }
 0x103   : > { %641 = vmatmul.bf16.gmra.mxu0 %v514_v32  ;;  %v10558_v48 = vpack.c.b16 %v1324_v44, %v1323_v40  ;;  %v987_v59 = vpack.c.bf16 %v603_v51, %v603_v51  ;;  %v1139_v62 = vunpack.c.l.b16 %v1019_v53 }
 0x104   : > { %v10556_v46 = vpack.c.b16 %v1853_v43, %v1852_v39  ;;  %v816_v50 = vpop.f32.mrf.mxu3  ;;  %v496_v43 = vld [vmem:[%s10471_s24 + $0xb8] sm:$0xff] }
 0x105   : > { %15051 = vst [vmem:[#allocation26_spill] sm:$0xff] %v10558_v48  ;;  %v910_v49 = vpop.f32.mrf.mxu2  ;;  %v1099_v10 = vunpack.c.l.b16 %v987_v59  ;;  %v817_v12 = vadd.f32 %v816_v50, %v10533_v2 }
 0x106   : > { %15050 = vst [vmem:[#allocation25_spill] sm:$0xff] %v10556_v46  ;;  %v758_v52 = vpop.f32.mrf.mxu1  ;;  %v911_v54 = vadd.f32 %v910_v49, %v10537_v6 }
 0x107   : > { %v759_v55 = vadd.f32 %v758_v52, %v10533_v2  ;;  %2251 = vrot.lane.b32.xlu2 %v10558_v48, %s10261_s17  ;;  %v1043_v22 = vpack.c.bf16 %v817_v12, %v817_v12 }
 0x108   : > { %v604_v56 = vpop.f32.mrf.mxu0  ;;  %v1051_v63 = vpack.c.bf16 %v911_v54, %v911_v54 }
 0x109   : > { %v605_v57 = vadd.f32 %v604_v56, %v10531_v1  ;;  %2756 = vrot.lane.b32.xlu1 %v10556_v46, %s10261_s17  ;;  %v1020_v58 = vpack.c.bf16 %v759_v55, %v759_v55  ;;  %v1325_v30 = vunpack.c.l.b16 %v1043_v22  ;;  %v516_v56 = vpack.c.bf16 %v496_v43, %v495_v42 }
 0x10a   : > { %v1854_v13 = vunpack.c.l.b16 %v1051_v63 }
 0x10b   : > { %v1140_v0 = vunpack.c.l.b16 %v1020_v58  ;;  %v988_v3 = vpack.c.bf16 %v605_v57, %v605_v57 }
 0x10c   : > { %v818_v8 = vpop.f32.mrf.mxu3 }
 0x10d   : > { %v912_v4 = vpop.f32.mrf.mxu2  ;;  %v10570_v5 = vpack.c.b16 %v1140_v0, %v1139_v62  ;;  %v1100_v15 = vunpack.c.l.b16 %v988_v3  ;;  %v819_v16 = vadd.f32 %v818_v8, %v10533_v2 }
 0x10e   : > { %v913_v7 = vadd.f32 %v912_v4, %v10537_v6  ;;  %v761_v11 = vpop.f32.mrf.mxu1 }
 0x10f   : > { %15052 = vst [vmem:[#allocation27_spill] sm:$0xff] %v10570_v5  ;;  %2116 = vrot.lane.b32.xlu2 %v10570_v5, %s10261_s17  ;;  %v10580_v21 = vpack.c.b16 %v1100_v15, %v1099_v10  ;;  %v1044_v23 = vpack.c.bf16 %v819_v16, %v819_v16  ;;  %v762_v44 = vadd.f32 %v761_v11, %v10533_v2 }
 0x110   : > { %v1052_v14 = vpack.c.bf16 %v913_v7, %v913_v7  ;;  %v607_v17 = vpop.f32.mrf.mxu0 }
 0x111   : > { %800 = vmatmul.bf16.gmra.mxu1 %v515_v9  ;;  %v608_v19 = vadd.f32 %v607_v17, %v10531_v1  ;;  %15054 = vst [vmem:[#allocation29_spill] sm:$0xff] %v10580_v21  ;;  %v1326_v32 = vunpack.c.l.b16 %v1044_v23  ;;  %v1021_v60 = vpack.c.bf16 %v762_v44, %v762_v44 }
 0x112   : > { %v1855_v18 = vunpack.c.l.b16 %v1052_v14  ;;  %954 = vmatmul.bf16.gmra.mxu2 %v515_v9 }
 0x113   : > { %646 = vmatmul.bf16.gmra.mxu0 %v515_v9  ;;  %v989_v27 = vpack.c.bf16 %v608_v19, %v608_v19  ;;  %v10593_v49 = vpack.c.b16 %v1326_v32, %v1325_v30  ;;  %v1141_v9 = vunpack.c.l.b16 %v1021_v60 }
 0x114   : > { %v10578_v20 = vpack.c.b16 %v1855_v18, %v1854_v13  ;;  %v821_v25 = vpop.f32.mrf.mxu3 }
 0x115   : > { %v915_v24 = vpop.f32.mrf.mxu2  ;;  %v822_v37 = vadd.f32 %v821_v25, %v10533_v2  ;;  %v1101_v39 = vunpack.c.l.b16 %v989_v27  ;;  %15055 = vst [vmem:[#allocation30_spill] sm:$0xff] %v10593_v49 }
 0x116   : > { %15053 = vst [vmem:[#allocation28_spill] sm:$0xff] %v10578_v20  ;;  %2758 = vrot.lane.b32.xlu0 %v10578_v20, %s10261_s17  ;;  %v763_v26 = vpop.f32.mrf.mxu1  ;;  %v916_v31 = vadd.f32 %v915_v24, %v10537_v6 }
 0x117   : > { %2100 = vrot.lane.b32.xlu2 %v10580_v21, %s10261_s17  ;;  %v764_v38 = vadd.f32 %v763_v26, %v10533_v2  ;;  %v1045_v52 = vpack.c.bf16 %v822_v37, %v822_v37 }
 0x118   : > { %v609_v34 = vpop.f32.mrf.mxu0  ;;  %v1053_v45 = vpack.c.bf16 %v916_v31, %v916_v31 }
 0x119   : > { %v610_v36 = vadd.f32 %v609_v34, %v10531_v1  ;;  %v1022_v53 = vpack.c.bf16 %v764_v38, %v764_v38  ;;  %v1327_v63 = vunpack.c.l.b16 %v1045_v52 }
 0x11a   : > { %v1856_v61 = vunpack.c.l.b16 %v1053_v45 }
 0x11b   : > { %v990_v40 = vpack.c.bf16 %v610_v36, %v610_v36  ;;  %v1142_v3 = vunpack.c.l.b16 %v1022_v53 }
 0x11c   : > { %v823_v55 = vpop.f32.mrf.mxu3 }
 0x11d   : > { %v917_v50 = vpop.f32.mrf.mxu2  ;;  %v1102_v51 = vunpack.c.l.b16 %v990_v40  ;;  %v824_v59 = vadd.f32 %v823_v55, %v10533_v2  ;;  %v10609_v13 = vpack.c.b16 %v1142_v3, %v1141_v9 }
 0x11e   : > { %v918_v54 = vadd.f32 %v917_v50, %v10537_v6  ;;  %v766_v57 = vpop.f32.mrf.mxu1 }
 0x11f   : > { %v10596_v58 = vpack.c.b16 %v1102_v51, %v1101_v39  ;;  %2253 = vrot.lane.b32.xlu2 %v10593_v49, %s10261_s17  ;;  %v1046_v0 = vpack.c.bf16 %v824_v59, %v824_v59  ;;  %15059 = vst [vmem:[#allocation34_spill] sm:$0xff] %v10609_v13  ;;  %v767_v16 = vadd.f32 %v766_v57, %v10533_v2 }
 0x120   : > { %v1054_v62 = vpack.c.bf16 %v918_v54, %v918_v54  ;;  %v612_v7 = vpop.f32.mrf.mxu0 }
 0x121   : > { %15056 = vst [vmem:[#allocation31_spill] sm:$0xff] %v10596_v58  ;;  %2102 = vrot.lane.b32.xlu0 %v10596_v58, %s10261_s17  ;;  %805 = vmatmul.bf16.gmra.mxu1 %v516_v56  ;;  %v1328_v8 = vunpack.c.l.b16 %v1046_v0  ;;  %v613_v22 = vadd.f32 %v612_v7, %v10531_v1  ;;  %v1023_v24 = vpack.c.bf16 %v767_v16, %v767_v16 }
 0x122   : > { %v1857_v4 = vunpack.c.l.b16 %v1054_v62  ;;  %959 = vmatmul.bf16.gmra.mxu2 %v516_v56 }
 0x123   : > { %651 = vmatmul.bf16.gmra.mxu0 %v516_v56  ;;  %v10607_v12 = vpack.c.b16 %v1328_v8, %v1327_v63  ;;  %v991_v27 = vpack.c.bf16 %v613_v22, %v613_v22  ;;  %v1143_v31 = vunpack.c.l.b16 %v1023_v24 }
 0x124   : > { %v10603_v10 = vpack.c.b16 %v1857_v4, %v1856_v61  ;;  %v826_v30 = vpop.f32.mrf.mxu3 }
 0x125   : > { %v10605_v11 = vpop.f32.mrf.mxu2  ;;  %15058 = vst [vmem:[#allocation33_spill] sm:$0xff] %v10607_v12  ;;  %v1103_v39 = vunpack.c.l.b16 %v991_v27  ;;  %v827_v63 = vadd.f32 %v826_v30, %v10533_v2 }
 0x126   : > { %15057 = vst [vmem:[#allocation32_spill] sm:$0xff] %v10603_v10  ;;  %2760 = vrot.lane.b32.xlu1 %v10603_v10, %s10261_s17  ;;  %v768_v14 = vpop.f32.mrf.mxu1 }
 0x127   : > { %2118 = vrot.lane.b32.xlu2 %v10609_v13, %s10261_s17  ;;  %v769_v15 = vadd.f32 %v768_v14, %v10533_v2  ;;  %v1047_v8 = vpack.c.bf16 %v827_v63, %v827_v63 }
 0x128   : > { %v614_v17 = vpop.f32.mrf.mxu0 }
 0x129   : > { %2255 = vrot.lane.b32.xlu0 %v10607_v12, %s10261_s17  ;;  %v1024_v19 = vpack.c.bf16 %v769_v15, %v769_v15  ;;  %v615_v25 = vadd.f32 %v614_v17, %v10531_v1 }
 0x12b   : > { %v1144_v26 = vunpack.c.l.b16 %v1024_v19  ;;  %v992_v34 = vpack.c.bf16 %v615_v25, %v615_v25  ;;  %v1329_v19 = vunpack.c.l.b16 %v1047_v8 }
 0x12c   : > { %v828_v56 = vpop.f32.mrf.mxu3 }
 0x12d   : > { %v922_v18 = vpop.f32.mrf.mxu2  ;;  %v10628_v38 = vpack.c.b16 %v1144_v26, %v1143_v31  ;;  %v1104_v44 = vunpack.c.l.b16 %v992_v34  ;;  %v829_v0 = vadd.f32 %v828_v56, %v10533_v2 }
 0x12e   : > { %v771_v23 = vpop.f32.mrf.mxu1  ;;  %v923_v24 = vadd.f32 %v922_v18, %v10537_v6 }
 0x12f   : > { %3288 = vrot.lane.b32.xlu2 %v10609_v13, %s10262_s19  ;;  %v772_v32 = vadd.f32 %v771_v23, %v10533_v2  ;;  %15060 = vst [vmem:[#allocation35_spill] sm:$0xff] %v10628_v38  ;;  %v10634_v52 = vpack.c.b16 %v1104_v44, %v1103_v39  ;;  %v1048_v9 = vpack.c.bf16 %v829_v0, %v829_v0 }
 0x130   : > { %v10626_v36 = vpop.f32.mrf.mxu0 }
 0x131   : > { %v1025_v42 = vpack.c.bf16 %v772_v32, %v772_v32  ;;  %15061 = vst [vmem:[#allocation36_spill] sm:$0xff] %v10634_v52  ;;  %v1330_v23 = vunpack.c.l.b16 %v1048_v9 }
 0x132   : > { %964 = vmatmul.bf16.gmra.mxu2 %v10497_v29 }
 0x133   : > { %656 = vmatmul.bf16.gmra.mxu0 %v10497_v29  ;;  %v1145_v50 = vunpack.c.l.b16 %v1025_v42  ;;  %v10664_v30 = vpack.c.b16 %v1330_v23, %v1329_v19 }
 0x135   : > { %v925_v37 = vpop.f32.mrf.mxu2  ;;  %15064 = vst [vmem:[#allocation39_spill] sm:$0xff] %v10664_v30 }
 0x136   : > { %v773_v40 = vpop.f32.mrf.mxu1  ;;  %v926_v43 = vadd.f32 %v925_v37, %v10537_v6  ;;  %v1056_v37 = vpack.c.bf16 %v923_v24, %v923_v24 }
 0x137   : > { %v774_v45 = vadd.f32 %v773_v40, %v10533_v2  ;;  %2120 = vrot.lane.b32.xlu2 %v10628_v38, %s10261_s17 }
 0x138   : > { %v1057_v51 = vpack.c.bf16 %v926_v43, %v926_v43  ;;  %v10636_v54 = vpop.f32.mrf.mxu0  ;;  %v1859_v43 = vunpack.c.l.b16 %v1056_v37 }
 0x139   : > { %v1026_v29 = vpack.c.bf16 %v774_v45, %v774_v45 }
 0x13a   : > { %v1860_v61 = vunpack.c.l.b16 %v1057_v51 }
 0x13b   : > { %v1146_v53 = vunpack.c.l.b16 %v1026_v29 }
 0x13d   : > { %v927_v55 = vpop.f32.mrf.mxu2  ;;  %v10638_v57 = vpack.c.b16 %v1146_v53, %v1145_v50 }
 0x13e   : > { %v928_v59 = vadd.f32 %v927_v55, %v10537_v6  ;;  %v776_v60 = vpop.f32.mrf.mxu1 }
 0x13f   : > { %15062 = vst [vmem:[#allocation37_spill] sm:$0xff] %v10638_v57  ;;  %3292 = vrot.lane.b32.xlu0 %v10638_v57, %s10262_s19  ;;  %2104 = vrot.lane.b32.xlu2 %v10634_v52, %s10261_s17  ;;  %v777_v7 = vadd.f32 %v776_v60, %v10533_v2 }
 0x140   : > { %v1058_v62 = vpack.c.bf16 %v928_v59, %v928_v59  ;;  %2122 = vrot.lane.b32.xlu1 %v10638_v57, %s10261_s17  ;;  %v10654_v14 = vpop.f32.mrf.mxu0 }
 0x141   : > { %v1027_v17 = vpack.c.bf16 %v777_v7, %v777_v7 }
 0x142   : > { %v1861_v3 = vunpack.c.l.b16 %v1058_v62  ;;  %969 = vmatmul.bf16.gmra.mxu2 %v10504_v35 }
 0x143   : > { %661 = vmatmul.bf16.gmra.mxu0 %v10504_v35  ;;  %v921_v35 = vadd.f32 %v10605_v11, %v10537_v6  ;;  %v1147_v26 = vunpack.c.l.b16 %v1027_v17 }
 0x144   : > { %v10651_v4 = vpack.c.b16 %v1861_v3, %v1860_v61 }
 0x145   : > { %v930_v15 = vpop.f32.mrf.mxu2  ;;  %v1055_v34 = vpack.c.bf16 %v921_v35, %v921_v35 }
 0x146   : > { %15063 = vst [vmem:[#allocation38_spill] sm:$0xff] %v10651_v4  ;;  %v778_v16 = vpop.f32.mrf.mxu1  ;;  %v931_v11 = vadd.f32 %v930_v15, %v10537_v6 }
 0x147   : > { %v779_v22 = vadd.f32 %v778_v16, %v10533_v2  ;;  %2764 = vrot.lane.b32.xlu0 %v10651_v4, %s10261_s17  ;;  %3290 = vrot.lane.b32.xlu2 %v10628_v38, %s10262_s19  ;;  %v1858_v42 = vunpack.c.l.b16 %v1055_v34 }
 0x148   : > { %v10666_v31 = vpop.f32.mrf.mxu0  ;;  %v1059_v29 = vpack.c.bf16 %v931_v11, %v931_v11 }
 0x149   : > { %v1028_v25 = vpack.c.bf16 %v779_v22, %v779_v22  ;;  %v10683_v53 = vpack.c.b16 %v1859_v43, %v1858_v42 }
 0x14a   : > { %v1862_v61 = vunpack.c.l.b16 %v1059_v29 }
 0x14b   : > { %v1148_v27 = vunpack.c.l.b16 %v1028_v25  ;;  %15066 = vst [vmem:[#allocation41_spill] sm:$0xff] %v10683_v53 }
 0x14d   : > { %v932_v32 = vpop.f32.mrf.mxu2  ;;  %v10668_v39 = vpack.c.b16 %v1148_v27, %v1147_v26 }
 0x14e   : > { %v781_v40 = vpop.f32.mrf.mxu1  ;;  %v933_v18 = vadd.f32 %v932_v32, %v10537_v6 }
 0x14f   : > { %15065 = vst [vmem:[#allocation40_spill] sm:$0xff] %v10668_v39  ;;  %3294 = vrot.lane.b32.xlu0 %v10668_v39, %s10262_s19  ;;  %2257 = vrot.lane.b32.xlu2 %v10664_v30, %s10261_s17  ;;  %v782_v44 = vadd.f32 %v781_v40, %v10533_v2 }
 0x150   : > { %2124 = vrot.lane.b32.xlu1 %v10668_v39, %s10261_s17  ;;  %v10681_v45 = vpop.f32.mrf.mxu0  ;;  %v1060_v50 = vpack.c.bf16 %v933_v18, %v933_v18 }
 0x151   : > { %v1029_v56 = vpack.c.bf16 %v782_v44, %v782_v44 }
 0x152   : > { %974 = vmatmul.bf16.gmra.mxu2 %v10511_v41 }
 0x153   : > { %666 = vmatmul.bf16.gmra.mxu0 %v10511_v41  ;;  %v1863_v41 = vunpack.c.l.b16 %v1060_v50  ;;  %v1149_v0 = vunpack.c.l.b16 %v1029_v56 }
 0x155   : > { %v935_v51 = vpop.f32.mrf.mxu2  ;;  %v10693_v9 = vpack.c.b16 %v1863_v41, %v1862_v61 }
 0x156   : > { %v783_v55 = vpop.f32.mrf.mxu1  ;;  %v936_v59 = vadd.f32 %v935_v51, %v10537_v6 }
 0x157   : > { %v784_v60 = vadd.f32 %v783_v55, %v10533_v2  ;;  %2762 = vrot.lane.b32.xlu2 %v10683_v53, %s10261_s17  ;;  %15067 = vst [vmem:[#allocation42_spill] sm:$0xff] %v10693_v9 }
 0x158   : > { %v1061_v3 = vpack.c.bf16 %v936_v59, %v936_v59  ;;  %v10691_v8 = vpop.f32.mrf.mxu0 }
 0x159   : > { %v1030_v62 = vpack.c.bf16 %v784_v60, %v784_v60  ;;  %v10689_v63 = vpop.permute.xlu2 %2114 }
 0x15a   : > { %v1864_v22 = vunpack.c.l.b16 %v1061_v3 }
 0x15b   : > { %v1150_v7 = vunpack.c.l.b16 %v1030_v62 }
 0x15d   : > { %v937_v15 = vpop.f32.mrf.mxu2  ;;  %v10695_v16 = vpack.c.b16 %v1150_v7, %v1149_v0 }
 0x15e   : > { %v938_v17 = vadd.f32 %v937_v15, %v10537_v6  ;;  %v786_v19 = vpop.f32.mrf.mxu1 }
 0x15f   : > { %15068 = vst [vmem:[#allocation43_spill] sm:$0xff] %v10695_v16  ;;  %2126 = vrot.lane.b32.xlu0 %v10695_v16, %s10261_s17  ;;  %3296 = vrot.lane.b32.xlu1 %v10695_v16, %s10262_s19  ;;  %v787_v26 = vadd.f32 %v786_v19, %v10533_v2 }
 0x160   : > { %v1062_v23 = vpack.c.bf16 %v938_v17, %v938_v17  ;;  %2766 = vrot.lane.b32.xlu2 %v10693_v9, %s10261_s17  ;;  %v10711_v27 = vpop.f32.mrf.mxu0 }
 0x161   : > { %v10704_v24 = vpop.permute.xlu2 %2251  ;;  %v1031_v37 = vpack.c.bf16 %v787_v26, %v787_v26 }
 0x162   : > { %v1865_v35 = vunpack.c.l.b16 %v1062_v23  ;;  %979 = vmatmul.bf16.gmra.mxu2 %v10518_v47  ;;  %v1205_v23 = vsel %vm1161_vm0, %v10695_v16, 0 }
 0x163   : > { %671 = vmatmul.bf16.gmra.mxu0 %v10518_v47  ;;  %v1151_v47 = vunpack.c.l.b16 %v1031_v37 }
 0x164   : > { %v10708_v25 = vpack.c.b16 %v1865_v35, %v1864_v22 }
 0x165   : > { %v940_v32 = vpop.f32.mrf.mxu2 }
 0x166   : > { %15069 = vst [vmem:[#allocation44_spill] sm:$0xff] %v10708_v25  ;;  %v788_v34 = vpop.f32.mrf.mxu1  ;;  %v941_v40 = vadd.f32 %v940_v32, %v10537_v6 }
 0x167   : > { %v789_v11 = vadd.f32 %v788_v34, %v10533_v2  ;;  %2768 = vrot.lane.b32.xlu1 %v10708_v25, %s10261_s17 }
 0x168   : > { %v1063_v43 = vpack.c.bf16 %v941_v40, %v941_v40  ;;  %v10719_v29 = vpop.f32.mrf.mxu0 }
 0x169   : > { %v1032_v18 = vpack.c.bf16 %v789_v11, %v789_v11  ;;  %v10717_v42 = vpop.permute.xlu2 %2116 }
 0x16a   : > { %v1866_v59 = vunpack.c.l.b16 %v1063_v43 }
 0x16b   : > { %v1152_v44 = vunpack.c.l.b16 %v1032_v18 }
 0x16d   : > { %v942_v50 = vpop.f32.mrf.mxu2  ;;  %v10721_v51 = vpack.c.b16 %v1152_v44, %v1151_v47 }
 0x16e   : > { %v943_v55 = vadd.f32 %v942_v50, %v10537_v6  ;;  %v791_v56 = vpop.f32.mrf.mxu1 }
 0x16f   : > { %15070 = vst [vmem:[#allocation45_spill] sm:$0xff] %v10721_v51  ;;  %2128 = vrot.lane.b32.xlu0 %v10721_v51, %s10261_s17  ;;  %3298 = vrot.lane.b32.xlu2 %v10721_v51, %s10262_s19  ;;  %v1208_v61 = vsel %vm1161_vm0, %v10721_v51, 0  ;;  %v792_v0 = vadd.f32 %v791_v56, %v10533_v2  ;;  %v1202_v56 = vsel %vm1161_vm0, %v10668_v39, 0 }
 0x170   : > { %v1064_v60 = vpack.c.bf16 %v943_v55, %v943_v55  ;;  %1210 = vmatpush.bf16.xpose.msrb.mxu3 %v1208_v61  ;;  %v637_v7 = vpop.f32.mrf.mxu0 }
 0x171   : > { %v10730_v62 = vpop.permute.xlu2 %2100  ;;  %v1033_v17 = vpack.c.bf16 %v792_v0, %v792_v0  ;;  %v638_v22 = vadd.f32 %v637_v7, %v10531_v1 }
 0x172   : > { %v1867_v41 = vunpack.c.l.b16 %v1064_v60 }
 0x173   : > { %v1315_v32 = vunpack.c.l.b16 %v1033_v17  ;;  %v1001_v37 = vpack.c.bf16 %v638_v22, %v638_v22 }
 0x174   : > { %v10733_v3 = vpack.c.b16 %v1867_v41, %v1866_v59 }
 0x175   : > { %v10735_v15 = vpop.f32.mrf.mxu2  ;;  %v1275_v44 = vunpack.c.l.b16 %v1001_v37 }
 0x176   : > { %15071 = vst [vmem:[#allocation46_spill] sm:$0xff] %v10733_v3  ;;  %1884 = vmatpush.bf16.msrb.mxu1 %v10733_v3  ;;  %v793_v19 = vpop.f32.mrf.mxu1 }
 0x177   : > { %2770 = vrot.lane.b32.xlu2 %v10733_v3, %s10261_s17  ;;  %v794_v35 = vadd.f32 %v793_v19, %v10533_v2 }
 0x178   : > { %1211 = vmatpush.bf16.xpose.msrb.mxu3 %v1205_v23  ;;  %v639_v11 = vpop.f32.mrf.mxu0  ;;  %v1199_v23 = vsel %vm1161_vm0, %v10638_v57, 0 }
 0x179   : > { %v10745_v26 = vpop.permute.xlu2 %2253  ;;  %v1034_v34 = vpack.c.bf16 %v794_v35, %v794_v35  ;;  %v640_v18 = vadd.f32 %v639_v11, %v10531_v1 }
 0x17a   : > { %1885 = vmatpush.bf16.msrb.mxu1 %v10708_v25 }
 0x17b   : > { %v1316_v40 = vunpack.c.l.b16 %v1034_v34  ;;  %v1002_v55 = vpack.c.bf16 %v640_v18, %v640_v18 }
 0x17d   : > { %v10748_v47 = vpop.f32.mrf.mxu2  ;;  %v10751_v43 = vpack.c.b16 %v1316_v40, %v1315_v32  ;;  %v1276_v59 = vunpack.c.l.b16 %v1002_v55 }
 0x17e   : > { %1886 = vmatpush.bf16.msrb.mxu1 %v10693_v9  ;;  %v796_v50 = vpop.f32.mrf.mxu1 }
 0x17f   : > { %15072 = vst [vmem:[#allocation47_spill] sm:$0xff] %v10751_v43  ;;  %2243 = vrot.lane.b32.xlu0 %v10751_v43, %s10261_s17  ;;  %v797_v61 = vadd.f32 %v796_v50, %v10533_v2  ;;  %v10761_v41 = vpack.c.b16 %v1276_v59, %v1275_v44 }
 0x180   : > { %1212 = vmatpush.bf16.xpose.msrb.mxu3 %v1202_v56  ;;  %v642_v0 = vpop.f32.mrf.mxu0 }
 0x181   : > { %v10758_v60 = vpop.permute.xlu2 %2118  ;;  %15073 = vst [vmem:[#allocation48_spill] sm:$0xff] %v10761_v41  ;;  %2227 = vrot.lane.b32.xlu1 %v10761_v41, %s10261_s17  ;;  %v1035_v17 = vpack.c.bf16 %v797_v61, %v797_v61  ;;  %v643_v22 = vadd.f32 %v642_v0, %v10531_v1  ;;  %v1196_v0 = vsel %vm1161_vm0, %v10628_v38, 0 }
 0x182   : > { %1887 = vmatpush.bf16.msrb.mxu1 %v10651_v4 }
 0x183   : > { %v1317_v34 = vunpack.c.l.b16 %v1035_v17  ;;  %v1003_v40 = vpack.c.bf16 %v643_v22, %v643_v22 }
 0x185   : > { %v10763_v7 = vpop.f32.mrf.mxu2  ;;  %v1277_v56 = vunpack.c.l.b16 %v1003_v40 }
 0x186   : > { %1888 = vmatpush.bf16.msrb.mxu1 %v10683_v53  ;;  %v798_v19 = vpop.f32.mrf.mxu1 }
 0x187   : > { %v799_v35 = vadd.f32 %v798_v19, %v10533_v2 }
 0x188   : > { %1213 = vmatpush.bf16.xpose.msrb.mxu3 %v1199_v23  ;;  %v644_v18 = vpop.f32.mrf.mxu0 }
 0x189   : > { %v10773_v32 = vpop.permute.xlu2 %3288  ;;  %v1036_v37 = vpack.c.bf16 %v799_v35, %v799_v35  ;;  %v645_v44 = vadd.f32 %v644_v18, %v10531_v1  ;;  %v1193_v18 = vsel %vm1161_vm0, %v10609_v13, 0 }
 0x18a   : > { %1889 = vmatpush.bf16.msrb.mxu1 %v10603_v10 }
 0x18b   : > { %v1318_v11 = vunpack.c.l.b16 %v1036_v37  ;;  %v1004_v61 = vpack.c.bf16 %v645_v44, %v645_v44 }
 0x18d   : > { %v10776_v50 = vpop.f32.mrf.mxu2  ;;  %v10779_v55 = vpack.c.b16 %v1318_v11, %v1317_v34  ;;  %v1278_v17 = vunpack.c.l.b16 %v1004_v61 }
 0x18e   : > { %1890 = vmatpush.bf16.msrb.mxu1 %v10578_v20  ;;  %v801_v59 = vpop.f32.mrf.mxu1 }
 0x18f   : > { %15074 = vst [vmem:[#allocation49_spill] sm:$0xff] %v10779_v55  ;;  %2245 = vrot.lane.b32.xlu0 %v10779_v55, %s10261_s17  ;;  %v802_v22 = vadd.f32 %v801_v59, %v10533_v2  ;;  %v10789_v23 = vpack.c.b16 %v1278_v17, %v1277_v56 }
 0x190   : > { %1214 = vmatpush.bf16.xpose.msrb.mxu3 %v1196_v0  ;;  %v647_v35 = vpop.f32.mrf.mxu0 }
 0x191   : > { %v10786_v19 = vpop.permute.xlu2 %2120  ;;  %15075 = vst [vmem:[#allocation50_spill] sm:$0xff] %v10789_v23  ;;  %2229 = vrot.lane.b32.xlu2 %v10789_v23, %s10261_s17  ;;  %v1037_v37 = vpack.c.bf16 %v802_v22, %v802_v22  ;;  %v648_v11 = vadd.f32 %v647_v35, %v10531_v1 }
 0x192   : > { %1891 = vmatpush.bf16.msrb.mxu1 %v10556_v46 }
 0x193   : > { %v1319_v61 = vunpack.c.l.b16 %v1037_v37  ;;  %v1005_v0 = vpack.c.bf16 %v648_v11, %v648_v11  ;;  %v10810_v11 = vpop.permute.xlu0 %2758 }
 0x195   : > { %v10791_v34 = vpop.f32.mrf.mxu2  ;;  %v1279_v35 = vunpack.c.l.b16 %v1005_v0  ;;  %v1385_v0 = vsel %vm1161_vm0, %v10664_v30, 0 }
 0x196   : > { %v803_v40 = vpop.f32.mrf.mxu1 }
 0x197   : > { %v804_v44 = vadd.f32 %v803_v40, %v10533_v2  ;;  %v1190_v40 = vsel %vm1161_vm0, %v10570_v5, 0 }
 0x198   : > { %1215 = vmatpush.bf16.xpose.msrb.mxu3 %v1193_v18  ;;  %v649_v46 = vpop.f32.mrf.mxu0 }
 0x199   : > { %v1038_v59 = vpack.c.bf16 %v804_v44, %v804_v44  ;;  %v10799_v56 = vpop.permute.xlu2 %2104  ;;  %v650_v20 = vadd.f32 %v649_v46, %v10531_v1 }
 0x19a   : > { %15076 = vst [vmem:[#allocation51_spill] sm:$0xff] %v10799_v56 }
 0x19b   : > { %v1320_v17 = vunpack.c.l.b16 %v1038_v59  ;;  %v1006_v4 = vpack.c.bf16 %v650_v20, %v650_v20 }
 0x19d   : > { %v10802_v10 = vpop.f32.mrf.mxu2  ;;  %v10804_v22 = vpack.c.b16 %v1320_v17, %v1319_v61  ;;  %v1280_v37 = vunpack.c.l.b16 %v1006_v4 }
 0x19e   : > { %v806_v53 = vpop.f32.mrf.mxu1 }
 0x19f   : > { %15077 = vst [vmem:[#allocation52_spill] sm:$0xff] %v10804_v22  ;;  %2247 = vrot.lane.b32.xlu1 %v10804_v22, %s10261_s17  ;;  %v807_v18 = vadd.f32 %v806_v53, %v10533_v2  ;;  %v10813_v46 = vpack.c.b16 %v1280_v37, %v1279_v35  ;;  %v1187_v53 = vsel %vm1161_vm0, %v10545_v28, 0  ;;  %v10829_v37 = vpop.permute.xlu0 %2102 }
 0x1a0   : > { %1216 = vmatpush.bf16.xpose.msrb.mxu3 %v1190_v40  ;;  %v652_v44 = vpop.f32.mrf.mxu0  ;;  %v10824_v40 = vpop.permute.xlu1 %2098  ;;  %15079 = vst [vmem:[#allocation54_spill] sm:$0xff] %v10829_v37 }
 0x1a1   : > { %15078 = vst [vmem:[#allocation53_spill] sm:$0xff] %v10813_v46  ;;  %v10815_v61 = vpop.permute.xlu2 %3290  ;;  %2231 = vrot.lane.b32.xlu2 %v10813_v46, %s10261_s17  ;;  %v1039_v20 = vpack.c.bf16 %v807_v18, %v807_v18  ;;  %v653_v4 = vadd.f32 %v652_v44, %v10531_v1 }
 0x1a3   : > { %v1321_v9 = vunpack.c.l.b16 %v1039_v20  ;;  %v1007_v18 = vpack.c.bf16 %v653_v4, %v653_v4  ;;  %v1379_v4 = vsel %vm1161_vm0, %v10593_v49, 0  ;;  %v1376_v49 = vsel %vm1161_vm0, %v10558_v48, 0 }
 0x1a5   : > { %v10817_v59 = vpop.f32.mrf.mxu2  ;;  %v1281_v16 = vunpack.c.l.b16 %v1007_v18 }
 0x1a6   : > { %v808_v17 = vpop.f32.mrf.mxu1 }
 0x1a7   : > { %v809_v35 = vadd.f32 %v808_v17, %v10533_v2  ;;  %v1382_v2 = vsel %vm1161_vm0, %v10607_v12, 0 }
 0x1a8   : > { %1217 = vmatpush.bf16.xpose.msrb.mxu3 %v1187_v53  ;;  %v654_v25 = vpop.f32.mrf.mxu0  ;;  %v10844_v20 = vpop.permute.xlu1 %2756 }
 0x1a9   : > { %v1040_v13 = vpack.c.bf16 %v809_v35, %v809_v35  ;;  %v655_v38 = vadd.f32 %v654_v25, %v10531_v1  ;;  %v10836_v39 = vpop.permute.xlu2 %2257 }
 0x1ab   : > { %v1322_v3 = vunpack.c.l.b16 %v1040_v13  ;;  %v1008_v51 = vpack.c.bf16 %v655_v38, %v655_v38 }
 0x1ad   : > { %v10832_v57 = vpop.f32.mrf.mxu2  ;;  %v10834_v44 = vpack.c.b16 %v1322_v3, %v1321_v9  ;;  %v1282_v13 = vunpack.c.l.b16 %v1008_v51  ;;  %v10848_v9 = vpop.permute.xlu0 %2255 }
 0x1af   : > { %15080 = vst [vmem:[#allocation55_spill] sm:$0xff] %v10834_v44  ;;  %8578 = vmatmul.msk.bf16.vlgmr.msrb.gmra.mxu3 %vm1161_vm0, %v10548_v33  ;;  %2249 = vrot.lane.b32.xlu2 %v10834_v44, %s10261_s17  ;;  %v10846_v25 = vpack.c.b16 %v1282_v13, %v1281_v16  ;;  %v1373_v48 = vsel %vm1161_vm0, %v10834_v44, 0 }
 0x1b0   : > { %1387 = vmatpush.bf16.xpose.msra.mxu3 %v1385_v0  ;;  %v657_v3 = vpop.f32.mrf.mxu0  ;;  %v10857_v51 = vpop.permute.xlu1 %2760 }
 0x1b1   : > { %15081 = vst [vmem:[#allocation56_spill] sm:$0xff] %v10846_v25  ;;  %2233 = vrot.lane.b32.xlu1 %v10846_v25, %s10261_s17  ;;  %v658_v38 = vadd.f32 %v657_v3, %v10531_v1  ;;  %v10853_v17 = vpop.permute.xlu2 %2762 }
 0x1b3   : > { %v1009_v53 = vpack.c.bf16 %v658_v38, %v658_v38 }
 0x1b5   : > { %v965_v0 = vpop.f32.mrf.mxu2  ;;  %v10861_v13 = vpop.permute.xlu0 %3292  ;;  %v1283_v12 = vunpack.c.l.b16 %v1009_v53 }
 0x1b6   : > { %v966_v35 = vadd.f32 %v965_v0, %v10537_v6 }
 0x1b8   : > { %1388 = vmatpush.bf16.xpose.msra.mxu3 %v1382_v2  ;;  %v659_v16 = vpop.f32.mrf.mxu0  ;;  %v1073_v3 = vpack.c.bf16 %v966_v35, %v966_v35 }
 0x1b9   : > { %v660_v18 = vadd.f32 %v659_v16, %v10531_v1 }
 0x1ba   : > { %v10867_v28 = vpop.permute.xlu2 %2766  ;;  %v2005_v33 = vunpack.c.l.b16 %v1073_v3 }
 0x1bb   : > { %v1010_v30 = vpack.c.bf16 %v660_v18, %v660_v18 }
 0x1bd   : > { %v967_v2 = vpop.f32.mrf.mxu2  ;;  %v1284_v38 = vunpack.c.l.b16 %v1010_v30 }
 0x1be   : > { %v968_v0 = vadd.f32 %v967_v2, %v10537_v6 }
 0x1bf   : > { %8579 = vmatmul.msk.bf16.gmra.mxu3 %vm1161_vm0, %v10580_v21  ;;  %v10872_v16 = vpack.c.b16 %v1284_v38, %v1283_v12  ;;  %v10879_v21 = vpop.permute.xlu0 %2764 }
 0x1c0   : > { %1389 = vmatpush.bf16.xpose.msra.mxu3 %v1379_v4  ;;  %v10869_v4 = vpop.permute.xlu1 %2122  ;;  %v662_v53 = vpop.f32.mrf.mxu0  ;;  %v1074_v18 = vpack.c.bf16 %v968_v0, %v968_v0 }
 0x1c1   : > { %15082 = vst [vmem:[#allocation57_spill] sm:$0xff] %v10872_v16  ;;  %2235 = vrot.lane.b32.xlu1 %v10872_v16, %s10261_s17  ;;  %v663_v30 = vadd.f32 %v662_v53, %v10531_v1 }
 0x1c2   : > { %v2006_v35 = vunpack.c.l.b16 %v1074_v18 }
 0x1c3   : > { %v1011_v38 = vpack.c.bf16 %v663_v30, %v663_v30 }
 0x1c5   : > { %v970_v5 = vpop.f32.mrf.mxu2 }
 0x1c6   : > { %v971_v12 = vadd.f32 %v970_v5, %v10537_v6 }
 0x1c7   : > { %v10896_v25 = vpop.permute.xlu0 %3294 }
 0x1c8   : > { %1390 = vmatpush.bf16.xpose.msra.mxu3 %v1376_v49  ;;  %v10881_v49 = vpack.c.b16 %v2006_v35, %v2005_v33  ;;  %v10883_v2 = vpop.permute.xlu1 %2124  ;;  %v664_v0 = vpop.f32.mrf.mxu0  ;;  %v1075_v53 = vpack.c.bf16 %v971_v12, %v971_v12  ;;  %v1370_v33 = vsel %vm1161_vm0, %v10804_v22, 0  ;;  %v1285_v35 = vunpack.c.l.b16 %v1011_v38 }
 0x1c9   : > { %v10888_v3 = vpop.permute.xlu2 %3298  ;;  %v665_v18 = vadd.f32 %v664_v0, %v10531_v1 }
 0x1ca   : > { %15083 = vst [vmem:[#allocation58_spill] sm:$0xff] %v10881_v49  ;;  %2885 = vrot.lane.b32.xlu0 %v10881_v49, %s10261_s17  ;;  %v2007_v56 = vunpack.c.l.b16 %v1075_v53 }
 0x1cb   : > { %v1012_v16 = vpack.c.bf16 %v665_v18, %v665_v18 }
 0x1cd   : > { %v972_v44 = vpop.f32.mrf.mxu2  ;;  %v1286_v5 = vunpack.c.l.b16 %v1012_v16  ;;  %v1367_v16 = vsel %vm1161_vm0, %v10779_v55, 0 }
 0x1cf   : > { %8580 = vmatmul.msk.bf16.gmra.mxu3 %vm1161_vm0, %v10596_v58  ;;  %v10902_v12 = vpack.c.b16 %v1286_v5, %v1285_v35 }
 0x1d0   : > { %1391 = vmatpush.bf16.xpose.msra.mxu3 %v1373_v48  ;;  %v973_v48 = vadd.f32 %v972_v44, %v10537_v6  ;;  %v667_v38 = vpop.f32.mrf.mxu0 }
 0x1d1   : > { %v10898_v30 = vpop.permute.xlu1 %3296  ;;  %v10900_v46 = vpop.permute.xlu2 %2770  ;;  %15084 = vst [vmem:[#allocation59_spill] sm:$0xff] %v10902_v12  ;;  %2237 = vrot.lane.b32.xlu2 %v10902_v12, %s10261_s17  ;;  %v668_v53 = vadd.f32 %v667_v38, %v10531_v1 }
 0x1d2   : > { %v1076_v0 = vpack.c.bf16 %v973_v48, %v973_v48  ;;  %2780 = vmatpush.bf16.msrb.mxu0 %v10900_v46 }
 0x1d3   : > { %v1013_v48 = vpack.c.bf16 %v668_v53, %v668_v53  ;;  %v1364_v53 = vsel %vm1161_vm0, %v10751_v43, 0 }
 0x1d4   : > { %v2008_v18 = vunpack.c.l.b16 %v1076_v0 }
 0x1d5   : > { %v975_v22 = vpop.f32.mrf.mxu2 }
 0x1d6   : > { %v10907_v44 = vpack.c.b16 %v2008_v18, %v2007_v56  ;;  %v1287_v18 = vunpack.c.l.b16 %v1013_v48  ;;  %v976_v38 = vadd.f32 %v975_v22, %v10537_v6  ;;  %v620_v48 = vadd.f32 %v10636_v54, %v10531_v1 }
 0x1d8   : > { %1392 = vmatpush.bf16.xpose.msra.mxu3 %v1370_v33  ;;  %15085 = vst [vmem:[#allocation60_spill] sm:$0xff] %v10907_v44  ;;  %2887 = vrot.lane.b32.xlu1 %v10907_v44, %s10261_s17  ;;  %v2127_v33 = vpop.permute.xlu0 %2126  ;;  %v669_v5 = vpop.f32.mrf.mxu0  ;;  %v994_v37 = vpack.c.bf16 %v620_v48, %v620_v48 }
 0x1d9   : > { %v10914_v35 = vpop.permute.xlu1 %2768  ;;  %v670_v0 = vadd.f32 %v669_v5, %v10531_v1  ;;  %v618_v5 = vadd.f32 %v10626_v36, %v10531_v1 }
 0x1da   : > { %2781 = vmatpush.bf16.msrb.mxu0 %v10914_v35 }
 0x1db   : > { %v1014_v55 = vpack.c.bf16 %v670_v0, %v670_v0 }
 0x1dd   : > { %v977_v56 = vpop.f32.mrf.mxu2  ;;  %v1288_v12 = vunpack.c.l.b16 %v1014_v55  ;;  %v993_v55 = vpack.c.bf16 %v618_v5, %v618_v5 }
 0x1de   : > { %2782 = vmatpush.bf16.msrb.mxu0 %v10867_v28  ;;  %v978_v58 = vadd.f32 %v977_v56, %v10537_v6  ;;  %v1077_v56 = vpack.c.bf16 %v976_v38, %v976_v38  ;;  %v2173_v38 = vsel %vm1161_vm0, %v2127_v33, 0 }
 0x1df   : > { %8581 = vmatmul.msk.bf16.gmra.mxu3 %vm1161_vm0, %v10634_v52  ;;  %v10933_v0 = vpack.c.b16 %v1288_v12, %v1287_v18  ;;  %v1105_v12 = vunpack.c.l.b16 %v993_v55  ;;  %v1106_v18 = vunpack.c.l.b16 %v994_v37 }
 0x1e0   : > { %1393 = vmatpush.bf16.xpose.msra.mxu3 %v1367_v16  ;;  %v2305_v16 = vsel %vm1161_vm0, %v10836_v39, 0  ;;  %v1078_v52 = vpack.c.bf16 %v978_v58, %v978_v58  ;;  %v672_v43 = vpop.f32.mrf.mxu0  ;;  %v2009_v54 = vunpack.c.l.b16 %v1077_v56  ;;  %v2302_v58 = vsel %vm1161_vm0, %v10848_v9, 0 }
 0x1e1   : > { %v2129_v22 = vpop.permute.xlu0 %2128  ;;  %15086 = vst [vmem:[#allocation61_spill] sm:$0xff] %v10933_v0  ;;  %2239 = vrot.lane.b32.xlu0 %v10933_v0, %s10261_s17  ;;  %v10949_v37 = vpack.c.b16 %v1106_v18, %v1105_v12  ;;  %v2299_v12 = vsel %vm1161_vm0, %v10745_v26, 0 }
 0x1e2   : > { %2783 = vmatpush.bf16.msrb.mxu0 %v10879_v21  ;;  %v2176_v39 = vsel %vm1161_vm0, %v2129_v22, 0 }
 0x1e3   : > { %2178 = vmatpush.bf16.xpose.msrb.mxu2 %v2176_v39  ;;  %15088 = vst [vmem:[#allocation63_spill] sm:$0xff] %v10949_v37 }
 0x1e5   : > { %v980_v36 = vpop.f32.mrf.mxu2 }
 0x1e6   : > { %2784 = vmatpush.bf16.msrb.mxu0 %v10853_v17  ;;  %v981_v22 = vadd.f32 %v980_v36, %v10537_v6 }
 0x1e8   : > { %1394 = vmatpush.bf16.xpose.msra.mxu3 %v1364_v53  ;;  %v2010_v53 = vunpack.c.l.b16 %v1078_v52  ;;  %v674_v39 = vpop.f32.mrf.mxu0  ;;  %v1079_v56 = vpack.c.bf16 %v981_v22, %v981_v22  ;;  %v625_v22 = vadd.f32 %v10666_v31, %v10531_v1 }
 0x1e9   : > { %v675_v52 = vadd.f32 %v674_v39, %v10531_v1 }
 0x1ea   : > { %2785 = vmatpush.bf16.msrb.mxu0 %v10857_v51  ;;  %v10944_v48 = vpack.c.b16 %v2010_v53, %v2009_v54  ;;  %v2011_v55 = vunpack.c.l.b16 %v1079_v56  ;;  %v623_v53 = vadd.f32 %v10654_v14, %v10531_v1  ;;  %v996_v26 = vpack.c.bf16 %v625_v22, %v625_v22 }
 0x1eb   : > { %2179 = vmatpush.bf16.xpose.msrb.mxu2 %v2173_v38  ;;  %v1016_v33 = vpack.c.bf16 %v675_v52, %v675_v52  ;;  %v2170_v38 = vsel %vm1161_vm0, %v10883_v2, 0  ;;  %v963_v2 = vadd.f32 %v10832_v57, %v10537_v6  ;;  %v2296_v52 = vsel %vm1161_vm0, %v10704_v24, 0 }
 0x1ec   : > { %15087 = vst [vmem:[#allocation62_spill] sm:$0xff] %v10944_v48  ;;  %2889 = vrot.lane.b32.xlu0 %v10944_v48, %s10261_s17  ;;  %v995_v31 = vpack.c.bf16 %v623_v53, %v623_v53  ;;  %v1108_v56 = vunpack.c.l.b16 %v996_v26  ;;  %v958_v57 = vadd.f32 %v10802_v10, %v10537_v6  ;;  %v628_v10 = vadd.f32 %v10681_v45, %v10531_v1 }
 0x1ed   : > { %v630_v53 = vadd.f32 %v10691_v8, %v10531_v1  ;;  %v946_v22 = vadd.f32 %v10735_v15, %v10537_v6 }
 0x1ee   : > { %2786 = vmatpush.bf16.msrb.mxu0 %v10810_v11  ;;  %v1107_v39 = vunpack.c.l.b16 %v995_v31  ;;  %v997_v15 = vpack.c.bf16 %v628_v10, %v628_v10 }
 0x1ef   : > { %8582 = vmatmul.msk.bf16.gmra.mxu3 %vm1161_vm0, %v10949_v37  ;;  %v998_v26 = vpack.c.bf16 %v630_v53, %v630_v53 }
 0x1f0   : > { %2307 = vmatpush.bf16.xpose.msrb.mxu3 %v2305_v16  ;;  %v673_v16 = vadd.f32 %v672_v43, %v10531_v1  ;;  %v982_v43 = vpop.f32.mrf.mxu2  ;;  %v10990_v24 = vpack.c.b16 %v1108_v56, %v1107_v39  ;;  %v2161_v56 = vsel %vm1161_vm0, %v10758_v60, 0  ;;  %v633_v60 = vadd.f32 %v10711_v27, %v10531_v1 }
 0x1f1   : > { %v983_v9 = vadd.f32 %v982_v43, %v10537_v6  ;;  %v956_v43 = vadd.f32 %v10791_v34, %v10537_v6  ;;  %v951_v34 = vadd.f32 %v10763_v7, %v10537_v6  ;;  %v948_v7 = vadd.f32 %v10748_v47, %v10537_v6  ;;  %v2244_v53 = vpop.permute.xlu0 %2243 }
 0x1f2   : > { %v1015_v5 = vpack.c.bf16 %v673_v16, %v673_v16  ;;  %v1290_v16 = vunpack.c.l.b16 %v1016_v33  ;;  %2787 = vmatpush.bf16.msrb.mxu0 %v10844_v20  ;;  %v1072_v33 = vpack.c.bf16 %v963_v2, %v963_v2  ;;  %15091 = vst [vmem:[#allocation66_spill] sm:$0xff] %v10990_v24  ;;  %v1110_v39 = vunpack.c.l.b16 %v998_v26 }
 0x1f3   : > { %v1080_v54 = vpack.c.bf16 %v983_v9, %v983_v9  ;;  %2180 = vmatpush.bf16.xpose.msrb.mxu2 %v2170_v38  ;;  %v2167_v9 = vsel %vm1161_vm0, %v10869_v4, 0  ;;  %v953_v4 = vadd.f32 %v10776_v50, %v10537_v6  ;;  %v1067_v50 = vpack.c.bf16 %v951_v34, %v951_v34 }
 0x1f4   : > { %v1289_v36 = vunpack.c.l.b16 %v1015_v5  ;;  %v1066_v47 = vpack.c.bf16 %v948_v7, %v948_v7  ;;  %v2158_v34 = vsel %vm1161_vm0, %v10717_v42, 0  ;;  %v999_v27 = vpack.c.bf16 %v633_v60, %v633_v60 }
 0x1f5   : > { %v2012_v18 = vunpack.c.l.b16 %v1080_v54  ;;  %v1070_v54 = vpack.c.bf16 %v958_v57, %v958_v57  ;;  %v1068_v45 = vpack.c.bf16 %v953_v4, %v953_v4  ;;  %v3334_v4 = vsel %vm1161_vm0, %v10815_v61, 0 }
 0x1f6   : > { %v10966_v5 = vpack.c.b16 %v1290_v16, %v1289_v36  ;;  %v2004_v16 = vunpack.c.l.b16 %v1072_v33  ;;  %v1111_v10 = vunpack.c.l.b16 %v999_v27  ;;  %v3331_v42 = vsel %vm1161_vm0, %v10773_v32, 0 }
 0x1f7   : > { %v10968_v14 = vpack.c.b16 %v2012_v18, %v2011_v55  ;;  %v1069_v55 = vpack.c.bf16 %v956_v43, %v956_v43  ;;  %v3340_v18 = vsel %vm1161_vm0, %v10896_v25, 0  ;;  %v2002_v8 = vunpack.c.l.b16 %v1070_v54 }
 0x1f8   : > { %2308 = vmatpush.bf16.xpose.msrb.mxu3 %v2302_v58  ;;  %v3346_v58 = vsel %vm1161_vm0, %v10888_v3, 0  ;;  %15089 = vst [vmem:[#allocation64_spill] sm:$0xff] %v10966_v5  ;;  %2241 = vrot.lane.b32.xlu1 %v10966_v5, %s10261_s17  ;;  %v961_v3 = vadd.f32 %v10817_v59, %v10537_v6  ;;  %v3343_v59 = vsel %vm1161_vm0, %v10898_v30, 0  ;;  %v1065_v6 = vpack.c.bf16 %v946_v22, %v946_v22 }
 0x1f9   : > { %3348 = vmatpush.bf16.xpose.msra.mxu0 %v3346_v58  ;;  %15090 = vst [vmem:[#allocation65_spill] sm:$0xff] %v10968_v14  ;;  %2891 = vrot.lane.b32.xlu2 %v10968_v14, %s10261_s17  ;;  %v11012_v58 = vpop.permute.xlu2 %2229  ;;  %v2001_v38 = vunpack.c.l.b16 %v1069_v55  ;;  %v1109_v25 = vunpack.c.l.b16 %v997_v15  ;;  %v11044_v55 = vpop.permute.xlu1 %2227  ;;  %v15097_v15 = vld [vmem:[#allocation56_spill] sm:$0xff] }
 0x1fa   : > { %2029 = vmatpush.bf16.msra.mxu1 %v10968_v14  ;;  %v1071_v36 = vpack.c.bf16 %v961_v3, %v961_v3  ;;  %v1999_v3 = vunpack.c.l.b16 %v1067_v50 }
 0x1fb   : > { %2181 = vmatpush.bf16.xpose.msrb.mxu2 %v2167_v9  ;;  %v11017_v2 = vpack.c.b16 %v2002_v8, %v2001_v38  ;;  %v1997_v9 = vunpack.c.l.b16 %v1065_v6 }
 0x1fc   : > { %v2003_v30 = vunpack.c.l.b16 %v1071_v36  ;;  %v11028_v36 = vpack.c.b16 %v1110_v39, %v1109_v25 }
 0x1fe   : > { %2030 = vmatpush.bf16.msra.mxu1 %v10944_v48  ;;  %v11014_v31 = vpack.c.b16 %v2004_v16, %v2003_v30  ;;  %15092 = vst [vmem:[#allocation67_spill] sm:$0xff] %v11028_v36 }
 0x1ff   : > { %8583 = vmatmul.msk.bf16.gmra.mxu3 %vm1161_vm0, %v10990_v24 }
 0x200   : > { %2309 = vmatpush.bf16.xpose.msrb.mxu3 %v2299_v12  ;;  %v2164_v12 = vsel %vm1161_vm0, %v10786_v19, 0  ;;  %v2000_v19 = vunpack.c.l.b16 %v1068_v45 }
 0x201   : > { %3349 = vmatpush.bf16.xpose.msra.mxu0 %v3343_v59  ;;  %v11024_v43 = vpop.permute.xlu2 %2231  ;;  %v1998_v59 = vunpack.c.l.b16 %v1066_v47 }
 0x202   : > { %2031 = vmatpush.bf16.msra.mxu1 %v10907_v44  ;;  %v11026_v57 = vpack.c.b16 %v2000_v19, %v1999_v3  ;;  %v15098_v19 = vld [vmem:[#allocation57_spill] sm:$0xff] }
 0x203   : > { %2182 = vmatpush.bf16.xpose.msrb.mxu2 %v2164_v12  ;;  %v11031_v33 = vpack.c.b16 %v1998_v59, %v1997_v9  ;;  %v15099_v9 = vld [vmem:[#allocation59_spill] sm:$0xff] }
 0x206   : > { %2032 = vmatpush.bf16.msra.mxu1 %v10881_v49 }
 0x208   : > { %2310 = vmatpush.bf16.xpose.msrb.mxu3 %v2296_v52  ;;  %v3337_v52 = vsel %vm1161_vm0, %v10861_v13, 0  ;;  %v635_v13 = vadd.f32 %v10719_v29, %v10531_v1  ;;  %v2155_v29 = vsel %vm1161_vm0, %v10689_v63, 0  ;;  %v2246_v63 = vpop.permute.xlu0 %2245 }
 0x209   : > { %3350 = vmatpush.bf16.xpose.msra.mxu0 %v3340_v18  ;;  %v2250_v54 = vpop.permute.xlu2 %2249  ;;  %v2287_v32 = vsel %vm1161_vm0, %v2246_v63, 0  ;;  %v15096_v18 = vld [vmem:[#allocation51_spill] sm:$0xff] }
 0x20a   : > { %2033 = vmatpush.bf16.msra.mxu1 %v11014_v31  ;;  %v2293_v30 = vsel %vm1161_vm0, %v2250_v54, 0  ;;  %v1000_v16 = vpack.c.bf16 %v635_v13, %v635_v13 }
 0x20b   : > { %2183 = vmatpush.bf16.xpose.msrb.mxu2 %v2161_v56 }
 0x20c   : > { %v1112_v1 = vunpack.c.l.b16 %v1000_v16 }
 0x20e   : > { %2034 = vmatpush.bf16.msra.mxu1 %v11017_v2  ;;  %v11053_v7 = vpack.c.b16 %v1112_v1, %v1111_v10 }
 0x20f   : > { %8584 = vmatmul.msk.bf16.gmra.mxu3 %vm1161_vm0, %v11028_v36 }
 0x210   : > { %2311 = vmatpush.bf16.xpose.msrb.mxu3 %v2293_v30  ;;  %15093 = vst [vmem:[#allocation68_spill] sm:$0xff] %v11053_v7 }
 0x211   : > { %3351 = vmatpush.bf16.xpose.msra.mxu0 %v3337_v52  ;;  %v2248_v61 = vpop.permute.xlu1 %2247 }
 0x212   : > { %2035 = vmatpush.bf16.msra.mxu1 %v11026_v57  ;;  %v2290_v22 = vsel %vm1161_vm0, %v2248_v61, 0 }
 0x213   : > { %2184 = vmatpush.bf16.xpose.msrb.mxu2 %v2158_v34 }
 0x216   : > { %2036 = vmatpush.bf16.msra.mxu1 %v11031_v33 }
 0x218   : > { %2312 = vmatpush.bf16.xpose.msrb.mxu3 %v2290_v22 }
 0x219   : > { %3352 = vmatpush.bf16.xpose.msra.mxu0 %v3334_v4 }
 0x21b   : > { %2185 = vmatpush.bf16.xpose.msrb.mxu2 %v2155_v29 }
 0x21f   : > { %8585 = vmatmul.msk.bf16.gmra.mxu3 %vm1161_vm0, %v11053_v7 }
 0x220   : > { %2313 = vmatpush.bf16.xpose.msrb.mxu3 %v2287_v32 }
 0x221   : > { %3353 = vmatpush.bf16.xpose.msra.mxu0 %v3331_v42 }
 0x222   : > { %8594 = vmatmul.msk.bf16.vlgmr.msrb.gmra.mxu2 %vm1161_vm0, %v10824_v40 }
 0x223   : > { %9108 = vmatpush.bf16.msra.mxu2 %v10900_v46  ;;  %v2284_v46 = vsel %vm1161_vm0, %v2244_v53, 0  ;;  %v11126_v54 = vpop.permute.xlu1 %2233 }
 0x227   : > { %9109 = vmatpush.bf16.msra.mxu2 %v10914_v35 }
 0x228   : > { %2314 = vmatpush.bf16.xpose.msrb.mxu3 %v2284_v46 }
 0x22b   : > { %9110 = vmatpush.bf16.msra.mxu2 %v10867_v28  ;;  %v11149_v46 = vpop.permute.xlu2 %2237 }
 0x22f   : > { %9111 = vmatpush.bf16.msra.mxu2 %v10879_v21  ;;  %8586 = vmatmul.msk.bf16.vlgmr.msra.gmra.mxu3 %vm1161_vm0, %v10761_v41 }
 0x232   : > { %v1219_v35 = vpop.f32.mrf.mxu3  ;;  %8595 = vmatmul.msk.bf16.gmra.mxu2 %vm1161_vm0, %v10730_v62 }
 0x233   : > { %9112 = vmatpush.bf16.msra.mxu2 %v10853_v17  ;;  %v11070_v40 = vmul.f32 0.17677669, %v1219_v35  ;;  %v11133_v10 = vpop.permute.xlu1 %2235 }
 0x235   : > { %1468 = vmax.xlane.f32.xlu0 %v11070_v40 }
 0x237   : > { %9113 = vmatpush.bf16.msra.mxu2 %v10857_v51  ;;  %v15094_v51 = vld [vmem:[#allocation54_spill] sm:$0xff] }
 0x23a   : > { %v1221_v28 = vpop.f32.mrf.mxu3 }
 0x23b   : > { %9114 = vmatpush.bf16.msra.mxu2 %v10810_v11  ;;  %v11075_v21 = vmul.f32 0.17677669, %v1221_v28 }
 0x23c   : > { %v11124_v4 = vpop.permute.xlu0 %2885 }
 0x23d   : > { %1470 = vmax.xlane.f32.xlu1 %v11075_v21 }
 0x23f   : > { %9115 = vmatpush.bf16.msra.mxu2 %v10844_v20  ;;  %8587 = vmatmul.msk.bf16.gmra.mxu3 %vm1161_vm0, %v10789_v23  ;;  %v15095_v20 = vld [vmem:[#allocation53_spill] sm:$0xff] }
 0x242   : > { %v1224_v17 = vpop.f32.mrf.mxu3  ;;  %8596 = vmatmul.msk.bf16.gmra.mxu2 %vm1161_vm0, %v15094_v51 }
 0x243   : > { %v11082_v62 = vmul.f32 0.17677669, %v1224_v17 }
 0x245   : > { %1472 = vmax.xlane.f32.xlu2 %v11082_v62 }
 0x24a   : > { %v1226_v11 = vpop.f32.mrf.mxu3  ;;  %v11142_v53 = vpop.permute.xlu1 %2887 }
 0x24b   : > { %v11085_v50 = vmul.f32 0.17677669, %v1226_v11 }
 0x24d   : > { %1474 = vmax.xlane.f32.xlu0 %v11085_v50 }
 0x24f   : > { %8588 = vmatmul.msk.bf16.gmra.mxu3 %vm1161_vm0, %v15095_v20 }
 0x252   : > { %v1229_v12 = vpop.f32.mrf.mxu3  ;;  %8597 = vmatmul.msk.bf16.gmra.mxu2 %vm1161_vm0, %v15096_v18 }
 0x253   : > { %v11092_v45 = vmul.f32 0.17677669, %v1229_v12  ;;  %v11131_v16 = vpop.permute.xlu0 %2239 }
 0x255   : > { %1476 = vmax.xlane.f32.xlu1 %v11092_v45 }
 0x25a   : > { %v1231_v38 = vpop.f32.mrf.mxu3 }
 0x25b   : > { %v11095_v8 = vmul.f32 0.17677669, %v1231_v38 }
 0x25d   : > { %1478 = vmax.xlane.f32.xlu0 %v11095_v8 }
 0x25e   : > { %v11140_v42 = vpop.permute.xlu0 %2889 }
 0x25f   : > { %8589 = vmatmul.msk.bf16.gmra.mxu3 %vm1161_vm0, %v15097_v15 }
 0x262   : > { %v1234_v26 = vpop.f32.mrf.mxu3 }
 0x263   : > { %v11100_v6 = vmul.f32 0.17677669, %v1234_v26  ;;  %v11162_v26 = vpop.permute.xlu2 %2891 }
 0x265   : > { %1480 = vmax.xlane.f32.xlu1 %v11100_v6 }
 0x26a   : > { %v1236_v47 = vpop.f32.mrf.mxu3  ;;  %v11151_v35 = vpop.permute.xlu1 %2241 }
 0x26b   : > { %v11103_v3 = vmul.f32 0.17677669, %v1236_v47 }
 0x26d   : > { %1482 = vmax.xlane.f32.xlu0 %v11103_v3 }
 0x26f   : > { %8590 = vmatmul.msk.bf16.gmra.mxu3 %vm1161_vm0, %v15098_v19 }
 0x272   : > { %v1239_v25 = vpop.f32.mrf.mxu3 }
 0x273   : > { %v11108_v39 = vmul.f32 0.17677669, %v1239_v25 }
 0x275   : > { %1484 = vmax.xlane.f32.xlu0 %v11108_v39 }
 0x27a   : > { %v1241_v56 = vpop.f32.mrf.mxu3 }
 0x27b   : > { %v11111_v52 = vmul.f32 0.17677669, %v1241_v56 }
 0x27d   : > { %1486 = vmax.xlane.f32.xlu1 %v11111_v52 }
 0x27f   : > { %8591 = vmatmul.msk.bf16.gmra.mxu3 %vm1161_vm0, %v15099_v9 }
 0x282   : > { %v1244_v59 = vpop.f32.mrf.mxu3 }
 0x283   : > { %v11116_v60 = vmul.f32 0.17677669, %v1244_v59 }
 0x285   : > { %1488 = vmax.xlane.f32.xlu2 %v11116_v60 }
 0x28a   : > { %v1246_v13 = vpop.f32.mrf.mxu3 }
 0x28b   : > { %v11119_v34 = vmul.f32 0.17677669, %v1246_v13 }
 0x28d   : > { %1490 = vmax.xlane.f32.xlu0 %v11119_v34 }
 0x28f   : > { %8592 = vmatmul.msk.bf16.gmra.mxu3 %vm1161_vm0, %v10933_v0 }
 0x292   : > { %v1249_v30 = vpop.f32.mrf.mxu3 }
 0x293   : > { %v11128_v27 = vmul.f32 0.17677669, %v1249_v30 }
 0x295   : > { %1492 = vmax.xlane.f32.xlu0 %v11128_v27 }
 0x29a   : > { %v1251_v1 = vpop.f32.mrf.mxu3 }
 0x29b   : > { %v11135_v29 = vmul.f32 0.17677669, %v1251_v1 }
 0x29d   : > { %1494 = vmax.xlane.f32.xlu1 %v11135_v29 }
 0x29f   : > { %8593 = vmatmul.msk.bf16.gmra.mxu3 %vm1161_vm0, %v10966_v5 }
 0x2a2   : > { %v1254_v61 = vpop.f32.mrf.mxu3 }
 0x2a3   : > { %v11144_v22 = vmul.f32 0.17677669, %v1254_v61 }
 0x2a5   : > { %v2187_v63 = vpop.f32.mrf.mxu2  ;;  %1496 = vmax.xlane.f32.xlu0 %v11144_v22 }
 0x2a6   : > { %v11147_v32 = vmul.f32 0.17677669, %v2187_v63 }
 0x2a8   : > { %v1469_v28 = vpop.xlane.xlu0 %1468  ;;  %2388 = vmax.xlane.f32.xlu2 %v11147_v32 }
 0x2a9   : > { %v1532_v17 = vsub.f32 %v11070_v40, %v1469_v28 }
 0x2aa   : > { %v1256_v51 = vpop.f32.mrf.mxu3 }
 0x2ab   : > { %v1564_v11 = vmul.f32 1.442695, %v1532_v17  ;;  %v11155_v12 = vmul.f32 0.17677669, %v1256_v51 }
 0x2ad   : > { %9246 = vpow2.f32 %v1564_v11  ;;  %v2189_v18 = vpop.f32.mrf.mxu2  ;;  %1498 = vmax.xlane.f32.xlu1 %v11155_v12 }
 0x2ae   : > { %v11158_v38 = vmul.f32 0.17677669, %v2189_v18 }
 0x2af   : > { %8602 = vmatmul.msk.bf16.vlgmr.msrb.gmra.mxu3 %vm1161_vm0, %v11044_v55 }
 0x2b0   : > { %v1471_v47 = vpop.xlane.xlu1 %1470  ;;  %2390 = vmax.xlane.f32.xlu0 %v11158_v38 }
 0x2b1   : > { %v1533_v40 = vsub.f32 %v11075_v21, %v1471_v47 }
 0x2b2   : > { %v1396_v25 = vpop.f32.mrf.mxu3 }
 0x2b3   : > { %v11166_v56 = vpop.eup %9246  ;;  %v1566_v59 = vmul.f32 1.442695, %v1533_v40  ;;  %v11169_v30 = vmul.f32 0.17677669, %v1396_v25 }
 0x2b4   : > { %1628 = vadd.xlane.f32.xlu2 %v11166_v56 }
 0x2b5   : > { %9248 = vpow2.f32 %v1566_v59  ;;  %v2192_v13 = vpop.f32.mrf.mxu2 }
 0x2b6   : > { %v11173_v61 = vmul.f32 0.17677669, %v2192_v13 }
 0x2b8   : > { %v1473_v1 = vpop.xlane.xlu2 %1472  ;;  %1500 = vmax.xlane.f32.xlu0 %v11169_v30 }
 0x2b9   : > { %v1534_v55 = vsub.f32 %v11082_v62, %v1473_v1 }
 0x2ba   : > { %v1398_v63 = vpop.f32.mrf.mxu3 }
 0x2bb   : > { %v11175_v28 = vpop.eup %9248  ;;  %v1568_v21 = vmul.f32 1.442695, %v1534_v55  ;;  %v11179_v51 = vmul.f32 0.17677669, %v1398_v63 }
 0x2bc   : > { %2392 = vmax.xlane.f32.xlu2 %v11173_v61  ;;  %1630 = vadd.xlane.f32.xlu1 %v11175_v28 }
 0x2bd   : > { %9250 = vpow2.f32 %v1568_v21  ;;  %v2194_v17 = vpop.f32.mrf.mxu2 }
 0x2be   : > { %v11190_v13 = vmul.f32 0.17677669, %v2194_v17 }
 0x2bf   : > { %8603 = vmatmul.msk.bf16.gmra.mxu3 %vm1161_vm0, %v11012_v58 }
 0x2c0   : > { %v1475_v11 = vpop.xlane.xlu0 %1474  ;;  %1502 = vmax.xlane.f32.xlu0 %v11179_v51 }
 0x2c1   : > { %v1535_v62 = vsub.f32 %v11085_v50, %v1475_v11 }
 0x2c2   : > { %v1401_v18 = vpop.f32.mrf.mxu3 }
 0x2c3   : > { %v11185_v47 = vpop.eup %9250  ;;  %v1570_v40 = vmul.f32 1.442695, %v1535_v62  ;;  %v11198_v11 = vmul.f32 0.17677669, %v1401_v18 }
 0x2c4   : > { %1632 = vadd.xlane.f32.xlu2 %v11185_v47 }
 0x2c5   : > { %9252 = vpow2.f32 %v1570_v40  ;;  %v2197_v25 = vpop.f32.mrf.mxu2 }
 0x2c6   : > { %v11188_v59 = vmul.f32 0.17677669, %v2197_v25 }
 0x2c8   : > { %v1477_v1 = vpop.xlane.xlu1 %1476  ;;  %2396 = vmax.xlane.f32.xlu1 %v11188_v59  ;;  %2394 = vmax.xlane.f32.xlu0 %v11190_v13 }
 0x2c9   : > { %v1536_v58 = vsub.f32 %v11092_v45, %v1477_v1 }
 0x2ca   : > { %v1403_v50 = vpop.f32.mrf.mxu3 }
 0x2cb   : > { %v11195_v55 = vpop.eup %9252  ;;  %v1572_v63 = vmul.f32 1.442695, %v1536_v58  ;;  %v11200_v62 = vmul.f32 0.17677669, %v1403_v50 }
 0x2cc   : > { %1634 = vadd.xlane.f32.xlu2 %v11195_v55 }
 0x2cd   : > { %v2199_v21 = vpop.f32.mrf.mxu2  ;;  %9254 = vpow2.f32 %v1572_v63 }
 0x2ce   : > { %v11207_v58 = vmul.f32 0.17677669, %v2199_v21 }
 0x2cf   : > { %8604 = vmatmul.msk.bf16.gmra.mxu3 %vm1161_vm0, %v11024_v43 }
 0x2d0   : > { %v1479_v17 = vpop.xlane.xlu0 %1478  ;;  %1504 = vmax.xlane.f32.xlu0 %v11198_v11  ;;  %1506 = vmax.xlane.f32.xlu1 %v11200_v62 }
 0x2d1   : > { %v1537_v45 = vsub.f32 %v11095_v8, %v1479_v17 }
 0x2d2   : > { %v1406_v40 = vpop.f32.mrf.mxu3 }
 0x2d3   : > { %v1574_v25 = vmul.f32 1.442695, %v1537_v45  ;;  %v11209_v18 = vpop.eup %9254  ;;  %v11216_v63 = vmul.f32 0.17677669, %v1406_v40 }
 0x2d5   : > { %9256 = vpow2.f32 %v1574_v25  ;;  %v2202_v1 = vpop.f32.mrf.mxu2 }
 0x2d6   : > { %v11228_v48 = vmul.f32 0.17677669, %v2202_v1 }
 0x2d8   : > { %2398 = vmax.xlane.f32.xlu0 %v11207_v58  ;;  %1636 = vadd.xlane.f32.xlu1 %v11209_v18  ;;  %v1481_v40 = vpop.xlane.xlu1 %1480 }
 0x2d9   : > { %v1538_v14 = vsub.f32 %v11100_v6, %v1481_v40 }
 0x2da   : > { %v1408_v43 = vpop.f32.mrf.mxu3 }
 0x2db   : > { %v11213_v50 = vpop.eup %9256 }
 0x2dc   : > { %1638 = vadd.xlane.f32.xlu2 %v11213_v50 }
 0x2dd   : > { %v2204_v8 = vpop.f32.mrf.mxu2 }
 0x2de   : > { %v11222_v25 = vmul.f32 0.17677669, %v2204_v8 }
 0x2df   : > { %8605 = vmatmul.msk.bf16.gmra.mxu3 %vm1161_vm0, %v11126_v54 }
 0x2e0   : > { %v1483_v17 = vpop.xlane.xlu0 %1482  ;;  %1508 = vmax.xlane.f32.xlu0 %v11216_v63 }
 0x2e1   : > { %v1539_v21 = vsub.f32 %v11103_v3, %v1483_v17 }
 0x2e2   : > { %v1411_v45 = vpop.f32.mrf.mxu3 }
 0x2e3   : > { %v1578_v49 = vmul.f32 1.442695, %v1539_v21  ;;  %v11224_v44 = vmul.f32 0.17677669, %v1411_v45  ;;  %v1576_v45 = vmul.f32 1.442695, %v1538_v14 }
 0x2e4   : > { %2402 = vmax.xlane.f32.xlu2 %v11222_v25 }
 0x2e5   : > { %9258 = vpow2.f32 %v1578_v49  ;;  %1512 = vmax.xlane.f32.xlu1 %v11224_v44  ;;  %v11236_v49 = vmul.f32 0.17677669, %v1408_v43 }
 0x2e8   : > { %v1485_v54 = vpop.xlane.xlu0 %1484  ;;  %2400 = vmax.xlane.f32.xlu0 %v11228_v48 }
 0x2e9   : > { %v1540_v3 = vsub.f32 %v11108_v39, %v1485_v54 }
 0x2ea   : > { %v1413_v8 = vpop.f32.mrf.mxu3 }
 0x2eb   : > { %v11233_v17 = vpop.eup %9258  ;;  %v1580_v21 = vmul.f32 1.442695, %v1540_v3  ;;  %v11244_v54 = vmul.f32 0.17677669, %v1413_v8 }
 0x2ed   : > { %9260 = vpow2.f32 %v1580_v21  ;;  %1642 = vadd.xlane.f32.xlu1 %v11233_v17 }
 0x2ee   : > { %9262 = vpow2.f32 %v1576_v45 }
 0x2ef   : > { %8606 = vmatmul.msk.bf16.gmra.mxu3 %vm1161_vm0, %v11133_v10 }
 0x2f0   : > { %v1487_v1 = vpop.xlane.xlu1 %1486  ;;  %1510 = vmax.xlane.f32.xlu0 %v11236_v49 }
 0x2f1   : > { %v1541_v6 = vsub.f32 %v11111_v52, %v1487_v1 }
 0x2f2   : > { %v1416_v39 = vpop.f32.mrf.mxu3 }
 0x2f3   : > { %v11242_v40 = vpop.eup %9260  ;;  %v1582_v14 = vmul.f32 1.442695, %v1541_v6  ;;  %v11252_v21 = vmul.f32 0.17677669, %v1416_v39 }
 0x2f4   : > { %1644 = vadd.xlane.f32.xlu2 %v11242_v40  ;;  %v11248_v43 = vpop.eup %9262 }
 0x2f5   : > { %1514 = vmax.xlane.f32.xlu1 %v11244_v54  ;;  %9264 = vpow2.f32 %v1582_v14 }
 0x2f8   : > { %v1489_v3 = vpop.xlane.xlu2 %1488  ;;  %1640 = vadd.xlane.f32.xlu0 %v11248_v43 }
 0x2f9   : > { %v1542_v10 = vsub.f32 %v11116_v60, %v1489_v3 }
 0x2fa   : > { %v1418_v52 = vpop.f32.mrf.mxu3 }
 0x2fb   : > { %v1584_v8 = vmul.f32 1.442695, %v1542_v10  ;;  %v11255_v45 = vpop.eup %9264  ;;  %v11261_v5 = vmul.f32 0.17677669, %v1418_v52 }
 0x2fc   : > { %1516 = vmax.xlane.f32.xlu2 %v11252_v21 }
 0x2fd   : > { %9266 = vpow2.f32 %v1584_v8 }
 0x2ff   : > { %8607 = vmatmul.msk.bf16.gmra.mxu3 %vm1161_vm0, %v11149_v46 }
 0x300   : > { %v1491_v1 = vpop.xlane.xlu0 %1490  ;;  %1646 = vadd.xlane.f32.xlu0 %v11255_v45 }
 0x301   : > { %v1543_v6 = vsub.f32 %v11119_v34, %v1491_v1 }
 0x302   : > { %v1421_v14 = vpop.f32.mrf.mxu3 }
 0x303   : > { %v1586_v60 = vmul.f32 1.442695, %v1543_v6  ;;  %v11264_v39 = vpop.eup %9266  ;;  %v11268_v10 = vmul.f32 0.17677669, %v1421_v14 }
 0x304   : > { %1518 = vmax.xlane.f32.xlu2 %v11261_v5 }
 0x305   : > { %9268 = vpow2.f32 %v1586_v60 }
 0x308   : > { %v1493_v3 = vpop.xlane.xlu0 %1492  ;;  %1648 = vadd.xlane.f32.xlu0 %v11264_v39 }
 0x309   : > { %v1544_v46 = vsub.f32 %v11128_v27, %v1493_v3 }
 0x30a   : > { %v1423_v0 = vpop.f32.mrf.mxu3 }
 0x30b   : > { %v1588_v8 = vmul.f32 1.442695, %v1544_v46  ;;  %v11271_v34 = vpop.eup %9268  ;;  %v11280_v14 = vmul.f32 0.17677669, %v1423_v0 }
 0x30c   : > { %1520 = vmax.xlane.f32.xlu2 %v11268_v10 }
 0x30d   : > { %9270 = vpow2.f32 %v1588_v8 }
 0x30f   : > { %8608 = vmatmul.msk.bf16.gmra.mxu3 %vm1161_vm0, %v11131_v16 }
 0x310   : > { %v1495_v52 = vpop.xlane.xlu1 %1494  ;;  %1650 = vadd.xlane.f32.xlu0 %v11271_v34 }
 0x311   : > { %v1545_v1 = vsub.f32 %v11135_v29, %v1495_v52 }
 0x312   : > { %v1426_v6 = vpop.f32.mrf.mxu3 }
 0x313   : > { %v11277_v60 = vpop.eup %9270  ;;  %v1590_v27 = vmul.f32 1.442695, %v1545_v1  ;;  %v11284_v16 = vmul.f32 0.17677669, %v1426_v6 }
 0x314   : > { %1652 = vadd.xlane.f32.xlu2 %v11277_v60 }
 0x315   : > { %9272 = vpow2.f32 %v1590_v27 }
 0x318   : > { %v1497_v3 = vpop.xlane.xlu0 %1496  ;;  %1522 = vmax.xlane.f32.xlu0 %v11280_v14 }
 0x319   : > { %v1546_v46 = vsub.f32 %v11144_v22, %v1497_v3 }
 0x31a   : > { %v1428_v8 = vpop.f32.mrf.mxu3 }
 0x31b   : > { %v2389_v9 = vpop.xlane.xlu2 %2388  ;;  %v11286_v19 = vmul.f32 0.17677669, %v1428_v8  ;;  %v1592_v29 = vmul.f32 1.442695, %v1546_v46  ;;  %v11291_v52 = vpop.eup %9272 }
 0x31c   : > { %1524 = vmax.xlane.f32.xlu2 %v11284_v16  ;;  %v2452_v0 = vsub.f32 %v11147_v32, %v2389_v9 }
 0x31d   : > { %15100 = vst [vmem:[#allocation54_spill] sm:$0xff] %v11286_v19  ;;  %1526 = vmax.xlane.f32.xlu1 %v11286_v19  ;;  %9274 = vpow2.f32 %v1592_v29 }
 0x31e   : > { %v2484_v6 = vmul.f32 1.442695, %v2452_v0 }
 0x31f   : > { %8609 = vmatmul.msk.bf16.gmra.mxu3 %vm1161_vm0, %v11151_v35 }
 0x320   : > { %v1499_v1 = vpop.xlane.xlu1 %1498  ;;  %1654 = vadd.xlane.f32.xlu0 %v11291_v52 }
 0x321   : > { %v1547_v22 = vsub.f32 %v11155_v12, %v1499_v1 }
 0x322   : > { %v1431_v27 = vpop.f32.mrf.mxu3 }
 0x323   : > { %v1594_v3 = vmul.f32 1.442695, %v1547_v22  ;;  %v11297_v8 = vmul.f32 0.17677669, %v1431_v27  ;;  %v2391_v46 = vpop.xlane.xlu0 %2390  ;;  %v11300_v9 = vpop.eup %9274 }
 0x324   : > { %v2453_v32 = vsub.f32 %v11158_v38, %v2391_v46 }
 0x325   : > { %9276 = vpow2.f32 %v1594_v3  ;;  %1528 = vmax.xlane.f32.xlu1 %v11297_v8 }
 0x326   : > { %9278 = vpow2.f32 %v2484_v6  ;;  %v2486_v12 = vmul.f32 1.442695, %v2453_v32 }
 0x327   : > { %v1629_v35 = vpop.xlane.xlu2 %1628 }
 0x328   : > { %1656 = vadd.xlane.f32.xlu0 %v11300_v9  ;;  %9280 = vrcp.f32 %v1629_v35 }
 0x329   : > { %9282 = vpow2.f32 %v2486_v12 }
 0x32a   : > { %v1433_v29 = vpop.f32.mrf.mxu3 }
 0x32b   : > { %v11304_v15 = vpop.eup %9276  ;;  %v1501_v0 = vpop.xlane.xlu0 %1500  ;;  %v11311_v27 = vmul.f32 0.17677669, %v1433_v29 }
 0x32c   : > { %v11306_v1 = vpop.eup %9278  ;;  %v1548_v22 = vsub.f32 %v11169_v30, %v1501_v0  ;;  %1658 = vadd.xlane.f32.xlu2 %v11304_v15 }
 0x32d   : > { %2548 = vadd.xlane.f32.xlu1 %v11306_v1 }
 0x32e   : > { %v1596_v6 = vmul.f32 1.442695, %v1548_v22  ;;  %v9281_v46 = vpop.eup %9280 }
 0x32f   : > { %v2393_v38 = vpop.xlane.xlu2 %2392  ;;  %v1631_v3 = vpop.xlane.xlu1 %1630  ;;  %v1724_v30 = vmul.f32 %v9281_v46, %v11166_v56 }
 0x330   : > { %9284 = vpow2.f32 %v1596_v6  ;;  %1530 = vmax.xlane.f32.xlu0 %v11311_v27  ;;  %v2454_v32 = vsub.f32 %v11173_v61, %v2393_v38  ;;  %v11316_v0 = vpop.eup %9282 }
 0x331   : > { %9286 = vrcp.f32 %v1631_v3  ;;  %v1756_v6 = vpack.c.bf16 %v1724_v30, %v1724_v30 }
 0x332   : > { %v2316_v35 = vpop.f32.mrf.mxu3  ;;  %v2488_v41 = vmul.f32 1.442695, %v2454_v32 }
 0x333   : > { %v1503_v23 = vpop.xlane.xlu0 %1502  ;;  %v1804_v32 = vunpack.c.l.b16 %v1756_v6  ;;  %v11324_v24 = vmul.f32 0.17677669, %v2316_v35 }
 0x334   : > { %9288 = vpow2.f32 %v2488_v41  ;;  %v1549_v61 = vsub.f32 %v11179_v51, %v1503_v23 }
 0x336   : > { %v11318_v22 = vpop.eup %9284  ;;  %v1598_v36 = vmul.f32 1.442695, %v1549_v61 }
 0x337   : > { %v9287_v29 = vpop.eup %9286  ;;  %v1633_v12 = vpop.xlane.xlu2 %1632  ;;  %1660 = vadd.xlane.f32.xlu1 %v11318_v22 }
 0x338   : > { %v1725_v20 = vmul.f32 %v9287_v29, %v11175_v28  ;;  %2550 = vadd.xlane.f32.xlu0 %v11316_v0  ;;  %9290 = vrcp.f32 %v1633_v12 }
 0x339   : > { %9292 = vpow2.f32 %v1598_v36 }
 0x33a   : > { %v1757_v38 = vpack.c.bf16 %v1725_v20, %v1725_v20  ;;  %v2318_v3 = vpop.f32.mrf.mxu3  ;;  %v11326_v19 = vpop.eup %9288 }
 0x33b   : > { %v2397_v56 = vpop.xlane.xlu1 %2396  ;;  %v2395_v46 = vpop.xlane.xlu0 %2394  ;;  %v11335_v12 = vmul.f32 0.17677669, %v2318_v3 }
 0x33c   : > { %v1805_v7 = vunpack.c.l.b16 %v1757_v38  ;;  %v2455_v28 = vsub.f32 %v11190_v13, %v2395_v46  ;;  %v2456_v41 = vsub.f32 %v11188_v59, %v2397_v56 }
 0x33e   : > { %v1820_v37 = vpack.c.b16 %v1805_v7, %v1804_v32  ;;  %v9291_v23 = vpop.eup %9290  ;;  %v2490_v51 = vmul.f32 1.442695, %v2455_v28  ;;  %v2492_v13 = vmul.f32 1.442695, %v2456_v41 }
 0x33f   : > { %v1635_v30 = vpop.xlane.xlu2 %1634  ;;  %2420 = vmax.xlane.f32.xlu1 %v11324_v24  ;;  %v11338_v6 = vpop.eup %9292 }
 0x340   : > { %1892 = vmatmul.bf16.vlgmr.msrb.gmra.mxu1 %v1820_v37  ;;  %2552 = vadd.xlane.f32.xlu0 %v11326_v19  ;;  %9294 = vrcp.f32 %v1635_v30  ;;  %v1726_v37 = vmul.f32 %v9291_v23, %v11185_v47 }
 0x341   : > { %2901 = vmatpush.bf16.msrb.mxu1 %v11162_v26  ;;  %9296 = vpow2.f32 %v2490_v51 }
 0x342   : > { %v2321_v20 = vpop.f32.mrf.mxu3 }
 0x343   : > { %v1505_v7 = vpop.xlane.xlu0 %1504  ;;  %v1507_v35 = vpop.xlane.xlu1 %1506 }
 0x344   : > { %v1550_v29 = vsub.f32 %v11198_v11, %v1505_v7  ;;  %v1551_v59 = vsub.f32 %v11200_v62, %v1507_v35  ;;  %v1758_v11 = vpack.c.bf16 %v1726_v37, %v1726_v37 }
 0x345   : > { %2902 = vmatpush.bf16.msrb.mxu1 %v11140_v42 }
 0x346   : > { %v1600_v36 = vmul.f32 1.442695, %v1550_v29  ;;  %v9295_v26 = vpop.eup %9294  ;;  %v1602_v56 = vmul.f32 1.442695, %v1551_v59  ;;  %v1806_v32 = vunpack.c.l.b16 %v1758_v11  ;;  %v11358_v29 = vmul.f32 0.17677669, %v2321_v20 }
 0x347   : > { %2422 = vmax.xlane.f32.xlu1 %v11335_v12  ;;  %v1727_v42 = vmul.f32 %v9295_v26, %v11195_v55  ;;  %v11345_v46 = vpop.eup %9296 }
 0x348   : > { %9298 = vpow2.f32 %v1600_v36  ;;  %1662 = vadd.xlane.f32.xlu0 %v11338_v6 }
 0x349   : > { %9300 = vpow2.f32 %v2492_v13  ;;  %2903 = vmatpush.bf16.msrb.mxu1 %v11142_v53  ;;  %v1759_v3 = vpack.c.bf16 %v1727_v42, %v1727_v42 }
 0x34a   : > { %v2323_v61 = vpop.f32.mrf.mxu3 }
 0x34b   : > { %v2399_v47 = vpop.xlane.xlu0 %2398  ;;  %v1637_v38 = vpop.xlane.xlu1 %1636  ;;  %v1807_v62 = vunpack.c.l.b16 %v1759_v3  ;;  %v11362_v26 = vmul.f32 0.17677669, %v2323_v61 }
 0x34c   : > { %9302 = vrcp.f32 %v1637_v38  ;;  %v2457_v55 = vsub.f32 %v11207_v58, %v2399_v47 }
 0x34d   : > { %2904 = vmatpush.bf16.msrb.mxu1 %v11124_v4  ;;  %v1821_v41 = vpack.c.b16 %v1807_v62, %v1806_v32  ;;  %9304 = vpow2.f32 %v1602_v56 }
 0x34e   : > { %v11348_v28 = vpop.eup %9298  ;;  %v2494_v13 = vmul.f32 1.442695, %v2457_v55 }
 0x34f   : > { %v11350_v30 = vpop.eup %9300  ;;  %v1639_v53 = vpop.xlane.xlu2 %1638  ;;  %1664 = vadd.xlane.f32.xlu2 %v11348_v28  ;;  %2554 = vadd.xlane.f32.xlu1 %v11345_v46 }
 0x350   : > { %2556 = vadd.xlane.f32.xlu0 %v11350_v30  ;;  %9306 = vrcp.f32 %v1639_v53  ;;  %1897 = vmatmul.bf16.gmra.mxu1 %v1821_v41 }
 0x352   : > { %v9303_v4 = vpop.eup %9302  ;;  %v2326_v23 = vpop.f32.mrf.mxu3 }
 0x353   : > { %v1509_v51 = vpop.xlane.xlu0 %1508  ;;  %v1728_v35 = vmul.f32 %v9303_v4, %v11209_v18  ;;  %v11360_v37 = vpop.eup %9304  ;;  %v11370_v62 = vmul.f32 0.17677669, %v2326_v23 }
 0x354   : > { %v1552_v7 = vsub.f32 %v11216_v63, %v1509_v51 }
 0x355   : > { %v1760_v20 = vpack.c.bf16 %v1728_v35, %v1728_v35 }
 0x356   : > { %v1604_v36 = vmul.f32 1.442695, %v1552_v7  ;;  %v9307_v59 = vpop.eup %9306 }
 0x357   : > { %v2403_v42 = vpop.xlane.xlu2 %2402  ;;  %1666 = vadd.xlane.f32.xlu1 %v11360_v37  ;;  %2424 = vmax.xlane.f32.xlu2 %v11358_v29  ;;  %v1729_v18 = vmul.f32 %v9307_v59, %v11213_v50  ;;  %v1808_v56 = vunpack.c.l.b16 %v1760_v20 }
 0x358   : > { %9308 = vpow2.f32 %v1604_v36  ;;  %v2459_v58 = vsub.f32 %v11222_v25, %v2403_v42  ;;  %v1513_v63 = vpop.xlane.xlu1 %1512  ;;  %2426 = vmax.xlane.f32.xlu0 %v11362_v26 }
 0x359   : > { %9310 = vpow2.f32 %v2494_v13  ;;  %v1761_v47 = vpack.c.bf16 %v1729_v18, %v1729_v18  ;;  %v1554_v42 = vsub.f32 %v11224_v44, %v1513_v63 }
 0x35a   : > { %v2328_v11 = vpop.f32.mrf.mxu3  ;;  %v2498_v61 = vmul.f32 1.442695, %v2459_v58 }
 0x35b   : > { %v2401_v38 = vpop.xlane.xlu0 %2400  ;;  %v1809_v32 = vunpack.c.l.b16 %v1761_v47  ;;  %v11382_v7 = vmul.f32 0.17677669, %v2328_v11  ;;  %v1608_v47 = vmul.f32 1.442695, %v1554_v42 }
 0x35c   : > { %v2458_v3 = vsub.f32 %v11228_v48, %v2401_v38  ;;  %9312 = vpow2.f32 %v2498_v61 }
 0x35d   : > { %v1822_v41 = vpack.c.b16 %v1809_v32, %v1808_v56 }
 0x35e   : > { %v11372_v53 = vpop.eup %9308  ;;  %v2496_v25 = vmul.f32 1.442695, %v2458_v3 }
 0x35f   : > { %v11374_v55 = vpop.eup %9310  ;;  %1668 = vadd.xlane.f32.xlu2 %v11372_v53  ;;  %2428 = vmax.xlane.f32.xlu1 %v11370_v62 }
 0x360   : > { %9314 = vpow2.f32 %v2496_v25  ;;  %v1643_v50 = vpop.xlane.xlu1 %1642  ;;  %2558 = vadd.xlane.f32.xlu0 %v11374_v55  ;;  %1902 = vmatmul.bf16.gmra.mxu1 %v1822_v41 }
 0x361   : > { %9316 = vrcp.f32 %v1643_v50 }
 0x362   : > { %v2331_v48 = vpop.f32.mrf.mxu3  ;;  %v11380_v51 = vpop.eup %9312 }
 0x363   : > { %v1511_v4 = vpop.xlane.xlu0 %1510  ;;  %v11391_v61 = vmul.f32 0.17677669, %v2331_v48 }
 0x364   : > { %v1553_v23 = vsub.f32 %v11236_v49, %v1511_v4 }
 0x366   : > { %v11384_v35 = vpop.eup %9314  ;;  %v1606_v13 = vmul.f32 1.442695, %v1553_v23 }
 0x367   : > { %v1645_v36 = vpop.xlane.xlu2 %1644  ;;  %2562 = vadd.xlane.f32.xlu1 %v11380_v51  ;;  %2430 = vmax.xlane.f32.xlu2 %v11382_v7  ;;  %v9317_v20 = vpop.eup %9316 }
 0x368   : > { %9318 = vpow2.f32 %v1606_v13  ;;  %v1515_v59 = vpop.xlane.xlu1 %1514  ;;  %2560 = vadd.xlane.f32.xlu0 %v11384_v35  ;;  %v1731_v44 = vmul.f32 %v9317_v20, %v11233_v17 }
 0x369   : > { %v1555_v49 = vsub.f32 %v11244_v54, %v1515_v59 }
 0x36a   : > { %v2333_v58 = vpop.f32.mrf.mxu3  ;;  %v1763_v25 = vpack.c.bf16 %v1731_v44, %v1731_v44 }
 0x36b   : > { %v1641_v18 = vpop.xlane.xlu0 %1640  ;;  %v1610_v11 = vmul.f32 1.442695, %v1555_v49  ;;  %v11393_v38 = vmul.f32 0.17677669, %v2333_v58 }
 0x36c   : > { %9320 = vrcp.f32 %v1641_v18  ;;  %v1811_v4 = vunpack.c.l.b16 %v1763_v25 }
 0x36d   : > { %9322 = vpow2.f32 %v1610_v11 }
 0x36e   : > { %v11395_v3 = vpop.eup %9318  ;;  %9324 = vpow2.f32 %v1608_v47 }
 0x36f   : > { %2432 = vmax.xlane.f32.xlu2 %v11391_v61  ;;  %2434 = vmax.xlane.f32.xlu1 %v11393_v38  ;;  %v11401_v54 = vpop.xlane.xlu2 %1516 }
 0x370   : > { %1670 = vadd.xlane.f32.xlu0 %v11395_v3 }
 0x372   : > { %v9321_v63 = vpop.eup %9320 }
 0x373   : > { %v1647_v56 = vpop.xlane.xlu0 %1646  ;;  %v1730_v32 = vmul.f32 %v9321_v63, %v11248_v43  ;;  %v11404_v50 = vpop.eup %9322 }
 0x374   : > { %9326 = vrcp.f32 %v1647_v56  ;;  %v11406_v48 = vpop.eup %9324 }
 0x375   : > { %v1762_v41 = vpack.c.bf16 %v1730_v32, %v1730_v32  ;;  %9328 = vrcp.f32 %v1645_v36 }
 0x377   : > { %1674 = vadd.xlane.f32.xlu2 %v11404_v50  ;;  %v1810_v17 = vunpack.c.l.b16 %v1762_v41  ;;  %v11410_v59 = vpop.xlane.xlu2 %1518 }
 0x378   : > { %1672 = vadd.xlane.f32.xlu0 %v11406_v48 }
 0x379   : > { %v1823_v23 = vpack.c.b16 %v1811_v4, %v1810_v17 }
 0x37a   : > { %v9327_v13 = vpop.eup %9326 }
 0x37b   : > { %v1649_v42 = vpop.xlane.xlu0 %1648  ;;  %1907 = vmatmul.bf16.gmra.mxu1 %v1823_v23  ;;  %v9329_v43 = vpop.eup %9328  ;;  %v1733_v49 = vmul.f32 %v9327_v13, %v11255_v45 }
 0x37c   : > { %v1732_v58 = vmul.f32 %v9329_v43, %v11242_v40  ;;  %v15101_v43 = vld [vmem:[#allocation27_spill] sm:$0xff] }
 0x37d   : > { %v1765_v36 = vpack.c.bf16 %v1733_v49, %v1733_v49 }
 0x37e   : > { %v1764_v20 = vpack.c.bf16 %v1732_v58, %v1732_v58 }
 0x37f   : > { %v11414_v11 = vpop.xlane.xlu2 %1520  ;;  %v1813_v47 = vunpack.c.l.b16 %v1765_v36 }
 0x380   : > { %v1812_v44 = vunpack.c.l.b16 %v1764_v20 }
 0x382   : > { %v1824_v63 = vpack.c.b16 %v1813_v47, %v1812_v44 }
 0x383   : > { %v1651_v18 = vpop.xlane.xlu0 %1650 }
 0x384   : > { %9330 = vrcp.f32 %v1651_v18 }
 0x385   : > { %9332 = vrcp.f32 %v1649_v42 }
 0x387   : > { %v1653_v25 = vpop.xlane.xlu2 %1652 }
 0x388   : > { %2883 = vrot.lane.b32.xlu1 %v11014_v31, %s10261_s17  ;;  %9334 = vrcp.f32 %v1653_v25 }
 0x38a   : > { %v9331_v56 = vpop.eup %9330 }
 0x38b   : > { %1912 = vmatmul.bf16.gmra.mxu1 %v1824_v63  ;;  %v11418_v32 = vpop.xlane.xlu0 %1522  ;;  %v9333_v45 = vpop.eup %9332  ;;  %v1735_v40 = vmul.f32 %v9331_v56, %v11271_v34  ;;  %v9027_v63 = vld [vmem:[#allocation10 + $0x8] sm:$0xff] }
 0x38c   : > { %2879 = vrot.lane.b32.xlu0 %v11026_v57, %s10261_s17  ;;  %v1734_v41 = vmul.f32 %v9333_v45, %v11264_v39  ;;  %3185 = vmatpush.bf16.msra.mxu3 %v9027_v63 }
 0x38d   : > { %v1767_v4 = vpack.c.bf16 %v1735_v40, %v1735_v40 }
 0x38e   : > { %v1766_v13 = vpack.c.bf16 %v1734_v41, %v1734_v41  ;;  %v9335_v18 = vpop.eup %9334 }
 0x38f   : > { %2881 = vrot.lane.b32.xlu2 %v11017_v2, %s10261_s17  ;;  %v1815_v42 = vunpack.c.l.b16 %v1767_v4  ;;  %v1525_v34 = vpop.xlane.xlu2 %1524  ;;  %v1736_v44 = vmul.f32 %v9335_v18, %v11277_v60 }
 0x390   : > { %v11426_v17 = vpop.xlane.xlu1 %1526  ;;  %v1814_v49 = vunpack.c.l.b16 %v1766_v13  ;;  %v1560_v25 = vsub.f32 %v11284_v16, %v1525_v34 }
 0x391   : > { %v1768_v4 = vpack.c.bf16 %v1736_v44, %v1736_v44 }
 0x392   : > { %v1825_v36 = vpack.c.b16 %v1815_v42, %v1814_v49  ;;  %v1620_v60 = vmul.f32 1.442695, %v1560_v25 }
 0x393   : > { %v1655_v23 = vpop.xlane.xlu0 %1654  ;;  %v1816_v42 = vunpack.c.l.b16 %v1768_v4 }
 0x394   : > { %9336 = vrcp.f32 %v1655_v23  ;;  %v9026_v23 = vld [vmem:[#allocation10] sm:$0xff] }
 0x395   : > { %3186 = vmatpush.bf16.msra.mxu3 %v9026_v23 }
 0x397   : > { %3286 = vrot.lane.b32.xlu2 %v15101_v43, %s10262_s19 }
 0x398   : > { %v11430_v58 = vpop.xlane.xlu1 %1528 }
 0x39a   : > { %v9337_v39 = vpop.eup %9336 }
 0x39b   : > { %1917 = vmatmul.bf16.gmra.mxu1 %v1825_v36  ;;  %v1657_v20 = vpop.xlane.xlu0 %1656  ;;  %v1737_v47 = vmul.f32 %v9337_v39, %v11291_v52  ;;  %v1556_v52 = vsub.f32 %v11252_v21, %v11401_v54 }
 0x39d   : > { %v1769_v45 = vpack.c.bf16 %v1737_v47, %v1737_v47  ;;  %v1612_v47 = vmul.f32 1.442695, %v1556_v52 }
 0x39f   : > { %v1659_v56 = vpop.xlane.xlu2 %1658  ;;  %v1817_v13 = vunpack.c.l.b16 %v1769_v45  ;;  %v1558_v45 = vsub.f32 %v11268_v10, %v11414_v11  ;;  %v1559_v10 = vsub.f32 %v11280_v14, %v11418_v32 }
 0x3a0   : > { %v2549_v40 = vpop.xlane.xlu1 %2548  ;;  %9338 = vrcp.f32 %v1659_v56 }
 0x3a1   : > { %9340 = vrcp.f32 %v1657_v20  ;;  %v1826_v49 = vpack.c.b16 %v1817_v13, %v1816_v42  ;;  %v1557_v20 = vsub.f32 %v11261_v5, %v11410_v59  ;;  %v1616_v13 = vmul.f32 1.442695, %v1558_v45 }
 0x3a2   : > { %9342 = vrcp.f32 %v2549_v40 }
 0x3a3   : > { %v11435_v41 = vpop.xlane.xlu0 %1530  ;;  %9344 = vpow2.f32 %v1620_v60  ;;  %v1614_v56 = vmul.f32 1.442695, %v1557_v20 }
 0x3a6   : > { %v9339_v36 = vpop.eup %9338 }
 0x3a7   : > { %v9341_v39 = vpop.eup %9340  ;;  %v1739_v44 = vmul.f32 %v9339_v36, %v11304_v15 }
 0x3a8   : > { %v9343_v34 = vpop.eup %9342  ;;  %v1738_v54 = vmul.f32 %v9341_v39, %v11300_v9  ;;  %v2336_v9 = vpop.f32.mrf.mxu3 }
 0x3a9   : > { %v2644_v21 = vmul.f32 %v9343_v34, %v11306_v1  ;;  %v11444_v63 = vpop.eup %9344  ;;  %v1771_v40 = vpack.c.bf16 %v1739_v44, %v1739_v44  ;;  %v11457_v36 = vmul.f32 0.17677669, %v2336_v9 }
 0x3aa   : > { %v1661_v18 = vpop.xlane.xlu1 %1660  ;;  %v1770_v23 = vpack.c.bf16 %v1738_v54, %v1738_v54 }
 0x3ab   : > { %1922 = vmatmul.bf16.gmra.mxu1 %v1826_v49  ;;  %v2551_v16 = vpop.xlane.xlu0 %2550  ;;  %v2676_v5 = vpack.c.bf16 %v2644_v21, %v2644_v21  ;;  %v1819_v60 = vunpack.c.l.b16 %v1771_v40  ;;  %v1562_v21 = vsub.f32 %v11297_v8, %v11430_v58 }
 0x3ac   : > { %9346 = vrcp.f32 %v2551_v16  ;;  %v1818_v11 = vunpack.c.l.b16 %v1770_v23 }
 0x3ad   : > { %9348 = vpow2.f32 %v1612_v47  ;;  %v2724_v42 = vunpack.c.l.b16 %v2676_v5  ;;  %v1624_v9 = vmul.f32 1.442695, %v1562_v21 }
 0x3ae   : > { %9350 = vpow2.f32 %v1614_v56 }
 0x3af   : > { %9352 = vrcp.f32 %v1661_v18  ;;  %v1618_v18 = vmul.f32 1.442695, %v1559_v10 }
 0x3b0   : > { %9354 = vpow2.f32 %v1616_v13  ;;  %v2338_v40 = vpop.f32.mrf.mxu3 }
 0x3b1   : > { %v11475_v8 = vmul.f32 0.17677669, %v2338_v40 }
 0x3b2   : > { %v9347_v25 = vpop.eup %9346  ;;  %v11448_v4 = vpop.xlane.xlu1 %2420  ;;  %1684 = vadd.xlane.f32.xlu1 %v11444_v63 }
 0x3b3   : > { %v2645_v15 = vmul.f32 %v9347_v25, %v11316_v0  ;;  %v2553_v59 = vpop.xlane.xlu0 %2552  ;;  %v11452_v1 = vpop.eup %9348  ;;  %v1827_v0 = vpack.c.b16 %v1819_v60, %v1818_v11 }
 0x3b4   : > { %v11462_v16 = vpop.eup %9350 }
 0x3b5   : > { %v2677_v52 = vpack.c.bf16 %v2645_v15, %v2645_v15  ;;  %v9353_v20 = vpop.eup %9352 }
 0x3b6   : > { %1676 = vadd.xlane.f32.xlu0 %v11452_v1  ;;  %v11465_v32 = vpop.eup %9354  ;;  %v1740_v44 = vmul.f32 %v9353_v20, %v11318_v22 }
 0x3b7   : > { %v2725_v49 = vunpack.c.l.b16 %v2677_v52 }
 0x3b8   : > { %v1772_v25 = vpack.c.bf16 %v1740_v44, %v1740_v44 }
 0x3b9   : > { %v2740_v39 = vpack.c.b16 %v2725_v49, %v2724_v42 }
 0x3ba   : > { %v11459_v47 = vpop.xlane.xlu1 %2422  ;;  %2436 = vmax.xlane.f32.xlu1 %v11457_v36  ;;  %v1949_v58 = vunpack.c.l.b16 %v1772_v25 }
 0x3bb   : > { %1927 = vmatmul.bf16.gmra.mxu1 %v1827_v0  ;;  %2788 = vmatmul.bf16.vlgmr.msrb.gmra.mxu0 %v2740_v39  ;;  %v1663_v34 = vpop.xlane.xlu0 %1662 }
 0x3bc   : > { %9356 = vrcp.f32 %v1663_v34 }
 0x3bd   : > { %v1893_v14 = vpop.f32.mrf.mxu1  ;;  %9358 = vrcp.f32 %v2553_v59 }
 0x3be   : > { %1678 = vadd.xlane.f32.xlu0 %v11462_v16  ;;  %9360 = vpow2.f32 %v1618_v18 }
 0x3c0   : > { %1680 = vadd.xlane.f32.xlu2 %v11465_v32 }
 0x3c2   : > { %v9357_v54 = vpop.eup %9356  ;;  %v1665_v56 = vpop.xlane.xlu2 %1664 }
 0x3c3   : > { %v2555_v45 = vpop.xlane.xlu1 %2554  ;;  %v1741_v5 = vmul.f32 %v9357_v54, %v11338_v6  ;;  %v2557_v15 = vpop.xlane.xlu0 %2556  ;;  %v1563_v6 = vsub.f32 %v11311_v27, %v11435_v41 }
 0x3c4   : > { %v9359_v59 = vpop.eup %9358  ;;  %9362 = vrcp.f32 %v2555_v45 }
 0x3c5   : > { %v11472_v23 = vpop.eup %9360  ;;  %v1773_v13 = vpack.c.bf16 %v1741_v5, %v1741_v5  ;;  %9364 = vrcp.f32 %v1665_v56  ;;  %v1895_v22 = vpop.f32.mrf.mxu1  ;;  %v2646_v10 = vmul.f32 %v9359_v59, %v11326_v19  ;;  %v1626_v20 = vmul.f32 1.442695, %v1563_v6 }
 0x3c6   : > { %v2078_v52 = vpack.c.bf16 %v1895_v22, %v1893_v14  ;;  %1682 = vadd.xlane.f32.xlu0 %v11472_v23  ;;  %9366 = vpow2.f32 %v1624_v9 }
 0x3c7   : > { %v1950_v60 = vunpack.c.l.b16 %v1773_v13  ;;  %v2678_v34 = vpack.c.bf16 %v2646_v10, %v2646_v10 }
 0x3c8   : > { %8642 = vmatmul.msk.bf16.vlgmr.msra.gmra.mxu3 %vm1161_vm0, %v2078_v52  ;;  %2438 = vmax.xlane.f32.xlu2 %v11475_v8 }
 0x3c9   : > { %v1965_v11 = vpack.c.b16 %v1950_v60, %v1949_v58  ;;  %v2726_v41 = vunpack.c.l.b16 %v2678_v34 }
 0x3ca   : > { %v9363_v42 = vpop.eup %9362  ;;  %v11482_v0 = vpop.xlane.xlu2 %2424 }
 0x3cb   : > { %v1667_v49 = vpop.xlane.xlu1 %1666  ;;  %v9365_v39 = vpop.eup %9364  ;;  %2037 = vmatmul.bf16.vlgmr.msra.gmra.mxu1 %v1965_v11  ;;  %v2647_v19 = vmul.f32 %v9363_v42, %v11345_v46 }
 0x3cc   : > { %9368 = vrcp.f32 %v1667_v49  ;;  %v11484_v18 = vpop.xlane.xlu0 %2426  ;;  %v1742_v21 = vmul.f32 %v9365_v39, %v11348_v28  ;;  %v11488_v27 = vpop.eup %9366 }
 0x3cd   : > { %v2679_v14 = vpack.c.bf16 %v2647_v19, %v2647_v19  ;;  %9370 = vrcp.f32 %v2557_v15  ;;  %v1898_v44 = vpop.f32.mrf.mxu1  ;;  %v15102_v15 = vld [vmem:[#allocation24_spill] sm:$0xff] }
 0x3ce   : > { %9372 = vpow2.f32 %v1626_v20  ;;  %v1774_v5 = vpack.c.bf16 %v1742_v21, %v1742_v21 }
 0x3cf   : > { %v2727_v54 = vunpack.c.l.b16 %v2679_v14 }
 0x3d0   : > { %1688 = vadd.xlane.f32.xlu2 %v11488_v27  ;;  %v1951_v22 = vunpack.c.l.b16 %v1774_v5 }
 0x3d1   : > { %v2741_v45 = vpack.c.b16 %v2727_v54, %v2726_v41 }
 0x3d2   : > { %v9369_v56 = vpop.eup %9368  ;;  %v1669_v40 = vpop.xlane.xlu2 %1668 }
 0x3d3   : > { %v11491_v25 = vpop.xlane.xlu1 %2428  ;;  %v1743_v46 = vmul.f32 %v9369_v56, %v11360_v37  ;;  %2793 = vmatmul.bf16.gmra.mxu0 %v2741_v45  ;;  %3268 = vrot.lane.b32.xlu1 %v15102_v15, %s10262_s19  ;;  %v9371_v59 = vpop.eup %9370 }
 0x3d4   : > { %v2559_v28 = vpop.xlane.xlu0 %2558  ;;  %v11496_v58 = vpop.eup %9372  ;;  %v2648_v10 = vmul.f32 %v9371_v59, %v11350_v30 }
 0x3d5   : > { %9374 = vrcp.f32 %v2559_v28  ;;  %v1775_v9 = vpack.c.bf16 %v1743_v46, %v1743_v46  ;;  %v1900_v13 = vpop.f32.mrf.mxu1 }
 0x3d6   : > { %v2079_v60 = vpack.c.bf16 %v1900_v13, %v1898_v44  ;;  %v2680_v19 = vpack.c.bf16 %v2648_v10, %v2648_v10 }
 0x3d7   : > { %v1952_v52 = vunpack.c.l.b16 %v1775_v9 }
 0x3d8   : > { %1690 = vadd.xlane.f32.xlu2 %v11496_v58  ;;  %8643 = vmatmul.msk.bf16.gmra.mxu3 %vm1161_vm0, %v2079_v60  ;;  %v2728_v20 = vunpack.c.l.b16 %v2680_v19 }
 0x3d9   : > { %v1966_v37 = vpack.c.b16 %v1952_v52, %v1951_v22 }
 0x3da   : > { %v2431_v42 = vpop.xlane.xlu2 %2430  ;;  %2877 = vrot.lane.b32.xlu0 %v11031_v33, %s10261_s17 }
 0x3db   : > { %v9375_v6 = vpop.eup %9374  ;;  %v2563_v11 = vpop.xlane.xlu1 %2562  ;;  %2042 = vmatmul.bf16.gmra.mxu1 %v1966_v37 }
 0x3dc   : > { %9376 = vrcp.f32 %v2563_v11  ;;  %v2561_v49 = vpop.xlane.xlu0 %2560  ;;  %v2649_v39 = vmul.f32 %v9375_v6, %v11374_v55 }
 0x3dd   : > { %9378 = vrcp.f32 %v2561_v49  ;;  %v1903_v30 = vpop.f32.mrf.mxu1  ;;  %v15103_v49 = vld [vmem:[#allocation23_spill] sm:$0xff] }
 0x3de   : > { %v2681_v34 = vpack.c.bf16 %v2649_v39, %v2649_v39  ;;  %9380 = vrcp.f32 %v1669_v40 }
 0x3e0   : > { %v2729_v14 = vunpack.c.l.b16 %v2681_v34 }
 0x3e2   : > { %v9377_v44 = vpop.eup %9376  ;;  %v2742_v21 = vpack.c.b16 %v2729_v14, %v2728_v20  ;;  %v2433_v54 = vpop.xlane.xlu2 %2432 }
 0x3e3   : > { %v9379_v41 = vpop.eup %9378  ;;  %v2651_v5 = vmul.f32 %v9377_v44, %v11380_v51  ;;  %v2471_v51 = vsub.f32 %v11362_v26, %v11484_v18  ;;  %v11513_v14 = vpop.xlane.xlu1 %2434  ;;  %v15104_v44 = vld [vmem:[#allocation54_spill] sm:$0xff] }
 0x3e4   : > { %2798 = vmatmul.bf16.gmra.mxu0 %v2742_v21  ;;  %v1671_v56 = vpop.xlane.xlu0 %1670  ;;  %v9381_v45 = vpop.eup %9380  ;;  %v2650_v46 = vmul.f32 %v9379_v41, %v11384_v35  ;;  %v1561_v21 = vsub.f32 %v15104_v44, %v11426_v17  ;;  %v2473_v41 = vsub.f32 %v11382_v7, %v2431_v42  ;;  %v2474_v7 = vsub.f32 %v11391_v61, %v2433_v54 }
 0x3e5   : > { %9382 = vrcp.f32 %v1671_v56  ;;  %v1905_v55 = vpop.f32.mrf.mxu1  ;;  %v1744_v59 = vmul.f32 %v9381_v45, %v11372_v53  ;;  %v2683_v9 = vpack.c.bf16 %v2651_v5, %v2651_v5  ;;  %v2522_v20 = vmul.f32 1.442695, %v2471_v51  ;;  %v2341_v61 = vpop.f32.mrf.mxu3 }
 0x3e6   : > { %v2080_v28 = vpack.c.bf16 %v1905_v55, %v1903_v30  ;;  %v2682_v40 = vpack.c.bf16 %v2650_v46, %v2650_v46  ;;  %v1622_v45 = vmul.f32 1.442695, %v1561_v21  ;;  %v2526_v55 = vmul.f32 1.442695, %v2473_v41 }
 0x3e7   : > { %v1776_v10 = vpack.c.bf16 %v1744_v59, %v1744_v59  ;;  %v2731_v6 = vunpack.c.l.b16 %v2683_v9  ;;  %v2469_v51 = vsub.f32 %v11335_v12, %v11459_v47  ;;  %v2472_v12 = vsub.f32 %v11370_v62, %v11491_v25 }
 0x3e8   : > { %8644 = vmatmul.msk.bf16.gmra.mxu3 %vm1161_vm0, %v2080_v28  ;;  %v2730_v35 = vunpack.c.l.b16 %v2682_v40  ;;  %v2475_v62 = vsub.f32 %v11393_v38, %v11513_v14 }
 0x3e9   : > { %v1953_v11 = vunpack.c.l.b16 %v1776_v10 }
 0x3ea   : > { %v1675_v22 = vpop.xlane.xlu2 %1674  ;;  %v2743_v34 = vpack.c.b16 %v2731_v6, %v2730_v35  ;;  %v11534_v6 = vmul.f32 0.17677669, %v2341_v61  ;;  %v2530_v41 = vmul.f32 1.442695, %v2475_v62 }
 0x3eb   : > { %v9383_v13 = vpop.eup %9382  ;;  %9384 = vrcp.f32 %v1675_v22  ;;  %v2528_v22 = vmul.f32 1.442695, %v2474_v7 }
 0x3ec   : > { %v1673_v52 = vpop.xlane.xlu0 %1672  ;;  %v1745_v60 = vmul.f32 %v9383_v13, %v11395_v3 }
 0x3ed   : > { %9386 = vrcp.f32 %v1673_v52 }
 0x3ee   : > { %v1777_v37 = vpack.c.bf16 %v1745_v60, %v1745_v60  ;;  %9388 = vpow2.f32 %v2522_v20 }
 0x3ef   : > { %9390 = vpow2.f32 %v1622_v45 }
 0x3f0   : > { %v1954_v53 = vunpack.c.l.b16 %v1777_v37  ;;  %3284 = vrot.lane.b32.xlu2 %v15103_v49, %s10262_s19  ;;  %9392 = vpow2.f32 %v2526_v55  ;;  %v2468_v37 = vsub.f32 %v11324_v24, %v11448_v4  ;;  %v2518_v24 = vmul.f32 1.442695, %v2469_v51  ;;  %v2343_v4 = vpop.f32.mrf.mxu3 }
 0x3f1   : > { %v9385_v39 = vpop.eup %9384  ;;  %9394 = vpow2.f32 %v2528_v22  ;;  %v11558_v44 = vmul.f32 0.17677669, %v2343_v4 }
 0x3f2   : > { %v1967_v19 = vpack.c.b16 %v1954_v53, %v1953_v11  ;;  %v2882_v3 = vpop.permute.xlu2 %2881  ;;  %v1747_v18 = vmul.f32 %v9385_v39, %v11404_v50  ;;  %v2516_v35 = vmul.f32 1.442695, %v2468_v37  ;;  %v2470_v53 = vsub.f32 %v11358_v29, %v11482_v0 }
 0x3f3   : > { %v9387_v30 = vpop.eup %9386  ;;  %v2524_v0 = vmul.f32 1.442695, %v2472_v12 }
 0x3f4   : > { %2047 = vmatmul.bf16.gmra.mxu1 %v1967_v19  ;;  %2803 = vmatmul.bf16.gmra.mxu0 %v2743_v34  ;;  %v1746_v26 = vmul.f32 %v9387_v30, %v11406_v48  ;;  %v1779_v5 = vpack.c.bf16 %v1747_v18, %v1747_v18  ;;  %v11521_v9 = vpop.eup %9388  ;;  %9396 = vpow2.f32 %v2516_v35  ;;  %v2520_v19 = vmul.f32 1.442695, %v2470_v53 }
 0x3f5   : > { %v11525_v52 = vpop.eup %9390  ;;  %9398 = vpow2.f32 %v2518_v24 }
 0x3f6   : > { %v1778_v46 = vpack.c.bf16 %v1746_v26, %v1746_v26  ;;  %v1956_v48 = vunpack.c.l.b16 %v1779_v5  ;;  %v11528_v10 = vpop.eup %9392  ;;  %9400 = vpow2.f32 %v2520_v19 }
 0x3f7   : > { %v11538_v11 = vpop.eup %9394  ;;  %9402 = vpow2.f32 %v2524_v0 }
 0x3f8   : > { %v1908_v56 = vpop.f32.mrf.mxu1  ;;  %v1955_v50 = vunpack.c.l.b16 %v1778_v46  ;;  %v11553_v20 = vpop.f32.mrf.mxu3  ;;  %9404 = vpow2.f32 %v2530_v41 }
 0x3fa   : > { %v3287_v28 = vpop.permute.xlu2 %3286  ;;  %v2884_v59 = vpop.permute.xlu1 %2883  ;;  %v1968_v13 = vpack.c.b16 %v1956_v48, %v1955_v50 }
 0x3fb   : > { %2905 = vmatpush.bf16.msrb.mxu1 %v2884_v59  ;;  %v3328_v40 = vsel %vm1161_vm0, %v3287_v28, 0  ;;  %v11544_v30 = vpop.eup %9396 }
 0x3fc   : > { %3354 = vmatpush.bf16.xpose.msra.mxu0 %v3328_v40  ;;  %v11550_v47 = vpop.eup %9398 }
 0x3fd   : > { %2586 = vadd.xlane.f32.xlu1 %v11521_v9 }
 0x3fe   : > { %v2880_v60 = vpop.permute.xlu0 %2879 }
 0x3ff   : > { %2906 = vmatpush.bf16.msrb.mxu1 %v2882_v3  ;;  %v11555_v3 = vpop.eup %9400 }
 0x400   : > { %v1910_v17 = vpop.f32.mrf.mxu1  ;;  %v11563_v25 = vpop.eup %9402 }
 0x401   : > { %v2081_v42 = vpack.c.bf16 %v1910_v17, %v1908_v56  ;;  %v2348_v18 = vpop.f32.mrf.mxu3  ;;  %v15105_v56 = vld [vmem:[#allocation31_spill] sm:$0xff]  ;;  %v11572_v38 = vpop.eup %9404  ;;  %v15106_v17 = vld [vmem:[#allocation29_spill] sm:$0xff] }
 0x402   : > { %v11569_v45 = vmul.f32 0.17677669, %v2348_v18 }
 0x403   : > { %8645 = vmatmul.msk.bf16.gmra.mxu3 %vm1161_vm0, %v2081_v42  ;;  %2907 = vmatpush.bf16.msrb.mxu1 %v2880_v60 }
 0x404   : > { %2052 = vmatmul.bf16.gmra.mxu1 %v1968_v13  ;;  %1686 = vadd.xlane.f32.xlu0 %v11525_v52 }
 0x405   : > { %2590 = vadd.xlane.f32.xlu1 %v11528_v10 }
 0x408   : > { %v1913_v54 = vpop.f32.mrf.mxu1 }
 0x40c   : > { %2440 = vmax.xlane.f32.xlu0 %v11534_v6 }
 0x40d   : > { %2592 = vadd.xlane.f32.xlu1 %v11538_v11 }
 0x410   : > { %v1915_v39 = vpop.f32.mrf.mxu1 }
 0x411   : > { %v2082_v34 = vpack.c.bf16 %v1915_v39, %v1913_v54 }
 0x413   : > { %8646 = vmatmul.msk.bf16.gmra.mxu3 %vm1161_vm0, %v2082_v34 }
 0x414   : > { %2580 = vadd.xlane.f32.xlu0 %v11544_v30 }
 0x418   : > { %v1918_v29 = vpop.f32.mrf.mxu1 }
 0x419   : > { %2582 = vadd.xlane.f32.xlu2 %v11550_v47 }
 0x41c   : > { %2584 = vadd.xlane.f32.xlu0 %v11555_v3 }
 0x420   : > { %v1920_v21 = vpop.f32.mrf.mxu1 }
 0x421   : > { %v2083_v26 = vpack.c.bf16 %v1920_v21, %v1918_v29  ;;  %2442 = vmax.xlane.f32.xlu2 %v11558_v44 }
 0x423   : > { %8647 = vmatmul.msk.bf16.gmra.mxu3 %vm1161_vm0, %v2083_v26  ;;  %v15107_v26 = vld [vmem:[#allocation63_spill] sm:$0xff] }
 0x424   : > { %2588 = vadd.xlane.f32.xlu0 %v11563_v25 }
 0x425   : > { %v11576_v50 = vpop.xlane.xlu1 %1684 }
 0x426   : > { %3272 = vrot.lane.b32.xlu1 %v15105_v56, %s10262_s19 }
 0x428   : > { %v1923_v46 = vpop.f32.mrf.mxu1 }
 0x429   : > { %2446 = vmax.xlane.f32.xlu2 %v11569_v45  ;;  %v1677_v5 = vpop.xlane.xlu0 %1676 }
 0x42a   : > { %9406 = vrcp.f32 %v1677_v5 }
 0x42d   : > { %v2437_v54 = vpop.xlane.xlu1 %2436 }
 0x430   : > { %v1925_v14 = vpop.f32.mrf.mxu1  ;;  %v9407_v59 = vpop.eup %9406 }
 0x431   : > { %v2084_v55 = vpack.c.bf16 %v1925_v14, %v1923_v46  ;;  %2594 = vadd.xlane.f32.xlu2 %v11572_v38  ;;  %v1679_v28 = vpop.xlane.xlu0 %1678  ;;  %v1748_v48 = vmul.f32 %v9407_v59, %v11452_v1  ;;  %v2476_v1 = vsub.f32 %v11457_v36, %v2437_v54  ;;  %v15108_v54 = vld [vmem:[#allocation39_spill] sm:$0xff] }
 0x432   : > { %9408 = vrcp.f32 %v1679_v28 }
 0x433   : > { %8648 = vmatmul.msk.bf16.gmra.mxu3 %vm1161_vm0, %v2084_v55  ;;  %v1681_v40 = vpop.xlane.xlu2 %1680  ;;  %v1780_v60 = vpack.c.bf16 %v1748_v48, %v1748_v48  ;;  %v2532_v12 = vmul.f32 1.442695, %v2476_v1  ;;  %v11595_v48 = vmul.f32 0.17677669, %v11553_v20 }
 0x435   : > { %v1957_v35 = vunpack.c.l.b16 %v1780_v60 }
 0x438   : > { %v1928_v7 = vpop.f32.mrf.mxu1  ;;  %3270 = vrot.lane.b32.xlu0 %v15106_v17, %s10262_s19  ;;  %v9409_v42 = vpop.eup %9408 }
 0x439   : > { %v1683_v13 = vpop.xlane.xlu0 %1682  ;;  %v1749_v22 = vmul.f32 %v9409_v42, %v11462_v16 }
 0x43a   : > { %9410 = vrcp.f32 %v1683_v13  ;;  %v2351_v13 = vpop.f32.mrf.mxu3 }
 0x43b   : > { %v2439_v37 = vpop.xlane.xlu2 %2438  ;;  %v1781_v61 = vpack.c.bf16 %v1749_v22, %v1749_v22  ;;  %9412 = vrcp.f32 %v1681_v40 }
 0x43c   : > { %9414 = vpow2.f32 %v2532_v12  ;;  %v2477_v22 = vsub.f32 %v11475_v8, %v2439_v37 }
 0x43d   : > { %v1958_v51 = vunpack.c.l.b16 %v1781_v61  ;;  %v11600_v61 = vmul.f32 0.17677669, %v2351_v13 }
 0x43e   : > { %v2534_v60 = vmul.f32 1.442695, %v2477_v22 }
 0x43f   : > { %v1969_v24 = vpack.c.b16 %v1958_v51, %v1957_v35 }
 0x440   : > { %v1930_v53 = vpop.f32.mrf.mxu1  ;;  %v9411_v4 = vpop.eup %9410  ;;  %9416 = vpow2.f32 %v2534_v60 }
 0x441   : > { %v2085_v39 = vpack.c.bf16 %v1930_v53, %v1928_v7  ;;  %2057 = vmatmul.bf16.gmra.mxu1 %v1969_v24  ;;  %v9413_v19 = vpop.eup %9412  ;;  %v1751_v16 = vmul.f32 %v9411_v4, %v11472_v23  ;;  %v15109_v24 = vld [vmem:[#allocation33_spill] sm:$0xff]  ;;  %9418 = vrcp.f32 %v11576_v50 }
 0x442   : > { %v1750_v29 = vmul.f32 %v9413_v19, %v11465_v32  ;;  %v11588_v5 = vpop.eup %9414  ;;  %v2353_v20 = vpop.f32.mrf.mxu3 }
 0x443   : > { %8649 = vmatmul.msk.bf16.gmra.mxu3 %vm1161_vm0, %v2085_v39  ;;  %v1689_v34 = vpop.xlane.xlu2 %1688  ;;  %v1783_v21 = vpack.c.bf16 %v1751_v16, %v1751_v16  ;;  %v11605_v35 = vmul.f32 0.17677669, %v2353_v20 }
 0x444   : > { %v1782_v62 = vpack.c.bf16 %v1750_v29, %v1750_v29 }
 0x445   : > { %v1960_v41 = vunpack.c.l.b16 %v1783_v21  ;;  %v3269_v40 = vpop.permute.xlu1 %3268 }
 0x446   : > { %v1959_v46 = vunpack.c.l.b16 %v1782_v62  ;;  %v11607_v53 = vpop.eup %9416 }
 0x447   : > { %v9419_v37 = vpop.eup %9418 }
 0x448   : > { %v2038_v0 = vpop.f32.mrf.mxu1  ;;  %v1970_v23 = vpack.c.b16 %v1960_v41, %v1959_v46  ;;  %v1752_v39 = vmul.f32 %v9419_v37, %v11444_v63  ;;  %v15110_v46 = vld [vmem:[#allocation36_spill] sm:$0xff] }
 0x449   : > { %2106 = vrot.lane.b32.xlu2 %v15107_v26, %s10261_s17 }
 0x44a   : > { %v1784_v12 = vpack.c.bf16 %v1752_v39, %v1752_v39 }
 0x44b   : > { %v1691_v18 = vpop.xlane.xlu2 %1690 }
 0x44c   : > { %v2878_v36 = vpop.permute.xlu0 %2877 }
 0x44d   : > { %2908 = vmatpush.bf16.msrb.mxu1 %v2878_v36 }
 0x450   : > { %v2040_v14 = vpop.f32.mrf.mxu1  ;;  %2596 = vadd.xlane.f32.xlu1 %v11588_v5 }
 0x451   : > { %v2086_v55 = vpack.c.bf16 %v2040_v14, %v2038_v0  ;;  %2062 = vmatmul.bf16.gmra.mxu1 %v1970_v23  ;;  %v1961_v0 = vunpack.c.l.b16 %v1784_v12 }
 0x453   : > { %v3285_v32 = vpop.permute.xlu2 %3284  ;;  %8650 = vmatmul.msk.bf16.gmra.mxu3 %vm1161_vm0, %v2086_v55 }
 0x454   : > { %v3325_v28 = vsel %vm1161_vm0, %v3285_v32, 0 }
 0x455   : > { %3355 = vmatpush.bf16.xpose.msra.mxu0 %v3325_v28  ;;  %v15111_v28 = vld [vmem:[#allocation66_spill] sm:$0xff] }
 0x458   : > { %v2043_v59 = vpop.f32.mrf.mxu1 }
 0x45c   : > { %8658 = vmatmul.msk.bf16.vlgmr.msra.gmra.mxu0 %vm1161_vm0, %v3269_v40 }
 0x460   : > { %v2045_v7 = vpop.f32.mrf.mxu1 }
 0x461   : > { %v2087_v42 = vpack.c.bf16 %v2045_v7, %v2043_v59 }
 0x462   : > { %2444 = vmax.xlane.f32.xlu0 %v11595_v48 }
 0x463   : > { %8651 = vmatmul.msk.bf16.gmra.mxu3 %vm1161_vm0, %v2087_v42 }
 0x469   : > { %3427 = vrot.lane.b32.xlu1 %v15108_v54, %s10262_s19 }
 0x46a   : > { %2448 = vmax.xlane.f32.xlu0 %v11600_v61 }
 0x471   : > { %v2048_v51 = vpop.f32.mrf.mxu1  ;;  %3425 = vrot.lane.b32.xlu1 %v15109_v24, %s10262_s19 }
 0x472   : > { %2598 = vadd.xlane.f32.xlu0 %v11607_v53  ;;  %2450 = vmax.xlane.f32.xlu2 %v11605_v35 }
 0x477   : > { %v1687_v8 = vpop.xlane.xlu0 %1686 }
 0x478   : > { %9420 = vrcp.f32 %v1687_v8 }
 0x479   : > { %v2050_v4 = vpop.f32.mrf.mxu1  ;;  %9422 = vrcp.f32 %v1691_v18 }
 0x47a   : > { %v2088_v1 = vpack.c.bf16 %v2050_v4, %v2048_v51  ;;  %9424 = vrcp.f32 %v1689_v34 }
 0x47c   : > { %8652 = vmatmul.msk.bf16.gmra.mxu3 %vm1161_vm0, %v2088_v1  ;;  %v2587_v1 = vpop.xlane.xlu1 %2586 }
 0x47e   : > { %v9421_v19 = vpop.eup %9420 }
 0x47f   : > { %v1753_v16 = vmul.f32 %v9421_v19, %v11525_v52  ;;  %v2441_v62 = vpop.xlane.xlu0 %2440  ;;  %v9423_v41 = vpop.eup %9422 }
 0x480   : > { %v9425_v14 = vpop.eup %9424  ;;  %v1755_v55 = vmul.f32 %v9423_v41, %v11496_v58 }
 0x481   : > { %v2053_v29 = vpop.f32.mrf.mxu1  ;;  %v1785_v50 = vpack.c.bf16 %v1753_v16, %v1753_v16  ;;  %v1754_v52 = vmul.f32 %v9425_v14, %v11488_v27 }
 0x482   : > { %v1787_v34 = vpack.c.bf16 %v1755_v55, %v1755_v55 }
 0x483   : > { %v1962_v21 = vunpack.c.l.b16 %v1785_v50  ;;  %v1786_v59 = vpack.c.bf16 %v1754_v52, %v1754_v52 }
 0x484   : > { %v1964_v40 = vunpack.c.l.b16 %v1787_v34 }
 0x485   : > { %v1971_v36 = vpack.c.b16 %v1962_v21, %v1961_v0  ;;  %v1963_v7 = vunpack.c.l.b16 %v1786_v59  ;;  %v2591_v21 = vpop.xlane.xlu1 %2590 }
 0x486   : > { %3274 = vrot.lane.b32.xlu0 %v15110_v46, %s10262_s19 }
 0x487   : > { %2067 = vmatmul.bf16.gmra.mxu1 %v1971_v36  ;;  %v2581_v32 = vpop.xlane.xlu0 %2580  ;;  %v1972_v22 = vpack.c.b16 %v1964_v40, %v1963_v7 }
 0x489   : > { %v2055_v23 = vpop.f32.mrf.mxu1 }
 0x48a   : > { %v2089_v63 = vpack.c.bf16 %v2055_v23, %v2053_v29 }
 0x48c   : > { %8653 = vmatmul.msk.bf16.gmra.mxu3 %vm1161_vm0, %v2089_v63  ;;  %v2583_v18 = vpop.xlane.xlu2 %2582 }
 0x48d   : > { %9426 = vrcp.f32 %v2583_v18 }
 0x48e   : > { %2108 = vrot.lane.b32.xlu0 %v15111_v28, %s10261_s17  ;;  %9428 = vrcp.f32 %v2581_v32 }
 0x48f   : > { %v2585_v27 = vpop.xlane.xlu0 %2584 }
 0x493   : > { %v9427_v58 = vpop.eup %9426 }
 0x494   : > { %v2443_v42 = vpop.xlane.xlu2 %2442  ;;  %v9429_v20 = vpop.eup %9428  ;;  %v2661_v51 = vmul.f32 %v9427_v58, %v11550_v47 }
 0x495   : > { %v2479_v13 = vsub.f32 %v11558_v44, %v2443_v42  ;;  %v2660_v8 = vmul.f32 %v9429_v20, %v11544_v30  ;;  %v2478_v30 = vsub.f32 %v11534_v6, %v2441_v62  ;;  %v2593_v6 = vpop.xlane.xlu1 %2592 }
 0x496   : > { %v2693_v4 = vpack.c.bf16 %v2661_v51, %v2661_v51 }
 0x497   : > { %v2538_v60 = vmul.f32 1.442695, %v2479_v13  ;;  %2072 = vmatmul.bf16.gmra.mxu1 %v1972_v22  ;;  %v2692_v19 = vpack.c.bf16 %v2660_v8, %v2660_v8  ;;  %v2589_v16 = vpop.xlane.xlu0 %2588  ;;  %v2536_v63 = vmul.f32 1.442695, %v2478_v30  ;;  %v11644_v13 = vpop.f32.mrf.mxu3 }
 0x498   : > { %v2846_v44 = vunpack.c.l.b16 %v2693_v4  ;;  %15112 = vst [vmem:[#allocation51_spill] sm:$0xff] %v11644_v13 }
 0x499   : > { %9430 = vpow2.f32 %v2538_v60  ;;  %v2845_v12 = vunpack.c.l.b16 %v2692_v19 }
 0x49a   : > { %9432 = vrcp.f32 %v2585_v27  ;;  %v15113_v27 = vld [vmem:[#allocation67_spill] sm:$0xff] }
 0x49b   : > { %9434 = vrcp.f32 %v2587_v1  ;;  %v2861_v50 = vpack.c.b16 %v2846_v44, %v2845_v12  ;;  %v15115_v44 = vld [vmem:[#allocation30_spill] sm:$0xff] }
 0x49c   : > { %v2447_v37 = vpop.xlane.xlu2 %2446  ;;  %9436 = vrcp.f32 %v2589_v16 }
 0x49d   : > { %9438 = vpow2.f32 %v2536_v63  ;;  %v2481_v18 = vsub.f32 %v11569_v45, %v2447_v37  ;;  %v3273_v45 = vpop.permute.xlu1 %3272 }
 0x49e   : > { %9440 = vrcp.f32 %v2591_v21  ;;  %v15117_v21 = vld [vmem:[#allocation26_spill] sm:$0xff] }
 0x49f   : > { %v11627_v39 = vpop.eup %9430  ;;  %v11651_v4 = vpop.f32.mrf.mxu3 }
 0x4a0   : > { %2602 = vadd.xlane.f32.xlu2 %v11627_v39  ;;  %v9433_v0 = vpop.eup %9432  ;;  %15114 = vst [vmem:[#allocation27_spill] sm:$0xff] %v11651_v4 }
 0x4a1   : > { %v9435_v47 = vpop.eup %9434  ;;  %v2662_v36 = vmul.f32 %v9433_v0, %v11555_v3  ;;  %v2542_v3 = vmul.f32 1.442695, %v2481_v18 }
 0x4a2   : > { %v2663_v14 = vmul.f32 %v9435_v47, %v11521_v9  ;;  %v9437_v59 = vpop.eup %9436 }
 0x4a3   : > { %v2694_v55 = vpack.c.bf16 %v2662_v36, %v2662_v36  ;;  %v11636_v40 = vpop.eup %9438  ;;  %9442 = vpow2.f32 %v2542_v3  ;;  %v2664_v7 = vmul.f32 %v9437_v59, %v11563_v25  ;;  %v11675_v59 = vpop.f32.mrf.mxu0 }
 0x4a4   : > { %v2595_v29 = vpop.xlane.xlu2 %2594  ;;  %v2695_v52 = vpack.c.bf16 %v2663_v14, %v2663_v14  ;;  %v9441_v9 = vpop.eup %9440 }
 0x4a5   : > { %v2847_v34 = vunpack.c.l.b16 %v2694_v55  ;;  %v2665_v42 = vmul.f32 %v9441_v9, %v11528_v10  ;;  %v2696_v22 = vpack.c.bf16 %v2664_v7, %v2664_v7  ;;  %9444 = vrcp.f32 %v2595_v29 }
 0x4a6   : > { %v2848_v62 = vunpack.c.l.b16 %v2695_v52  ;;  %9446 = vrcp.f32 %v2593_v6  ;;  %v15118_v52 = vld [vmem:[#allocation68_spill] sm:$0xff] }
 0x4a7   : > { %2909 = vmatmul.bf16.vlgmr.msrb.gmra.mxu1 %v2861_v50  ;;  %v2697_v20 = vpack.c.bf16 %v2665_v42, %v2665_v42  ;;  %v2849_v51 = vunpack.c.l.b16 %v2696_v22  ;;  %v11658_v47 = vpop.f32.mrf.mxu3 }
 0x4a8   : > { %v2862_v32 = vpack.c.b16 %v2848_v62, %v2847_v34  ;;  %15116 = vst [vmem:[#allocation24_spill] sm:$0xff] %v11658_v47 }
 0x4a9   : > { %v11646_v58 = vpop.eup %9442  ;;  %v2850_v25 = vunpack.c.l.b16 %v2697_v20 }
 0x4aa   : > { %v3271_v41 = vpop.permute.xlu0 %3270 }
 0x4ab   : > { %8659 = vmatmul.msk.bf16.gmra.mxu0 %vm1161_vm0, %v3271_v41  ;;  %v2863_v8 = vpack.c.b16 %v2850_v25, %v2849_v51  ;;  %v9445_v37 = vpop.eup %9444  ;;  %v11679_v51 = vpop.f32.mrf.mxu0 }
 0x4ac   : > { %v2107_v23 = vpop.permute.xlu2 %2106  ;;  %v9447_v1 = vpop.eup %9446  ;;  %v2667_v16 = vmul.f32 %v9445_v37, %v11572_v38 }
 0x4ad   : > { %8598 = vmatmul.msk.bf16.gmra.mxu2 %vm1161_vm0, %v2107_v23  ;;  %v2666_v12 = vmul.f32 %v9447_v1, %v11538_v11 }
 0x4ae   : > { %v2699_v29 = vpack.c.bf16 %v2667_v16, %v2667_v16 }
 0x4af   : > { %v2698_v0 = vpack.c.bf16 %v2666_v12, %v2666_v12  ;;  %v11667_v18 = vpop.f32.mrf.mxu3 }
 0x4b0   : > { %v2852_v30 = vunpack.c.l.b16 %v2699_v29  ;;  %15119 = vst [vmem:[#allocation23_spill] sm:$0xff] %v11667_v18  ;;  %v15143_v18 = vld [vmem:[#allocation46_spill] sm:$0xff] }
 0x4b1   : > { %v2851_v41 = vunpack.c.l.b16 %v2698_v0 }
 0x4b3   : > { %v2864_v38 = vpack.c.b16 %v2852_v30, %v2851_v41  ;;  %v11683_v29 = vpop.f32.mrf.mxu0 }
 0x4b7   : > { %2914 = vmatmul.bf16.gmra.mxu1 %v2862_v32  ;;  %v11699_v30 = vpop.f32.mrf.mxu3 }
 0x4b8   : > { %3276 = vrot.lane.b32.xlu2 %v15107_v26, %s10262_s19  ;;  %2600 = vadd.xlane.f32.xlu0 %v11636_v40  ;;  %15121 = vst [vmem:[#allocation54_spill] sm:$0xff] %v11699_v30  ;;  %v15147_v30 = vld [vmem:[#allocation38_spill] sm:$0xff] }
 0x4bb   : > { %8660 = vmatmul.msk.bf16.gmra.mxu0 %vm1161_vm0, %v3273_v45  ;;  %v11693_v0 = vpop.f32.mrf.mxu0 }
 0x4be   : > { %v2058_v60 = vpop.f32.mrf.mxu1 }
 0x4c0   : > { %2110 = vrot.lane.b32.xlu2 %v15113_v27, %s10261_s17  ;;  %2606 = vadd.xlane.f32.xlu0 %v11646_v58 }
 0x4c3   : > { %v2597_v36 = vpop.xlane.xlu1 %2596  ;;  %v11703_v41 = vpop.f32.mrf.mxu0 }
 0x4c6   : > { %v2060_v10 = vpop.f32.mrf.mxu1 }
 0x4c7   : > { %2919 = vmatmul.bf16.gmra.mxu1 %v2863_v8  ;;  %v2090_v19 = vpack.c.bf16 %v2060_v10, %v2058_v60 }
 0x4c8   : > { %3423 = vrot.lane.b32.xlu2 %v15115_v44, %s10262_s19 }
 0x4c9   : > { %8654 = vmatmul.msk.bf16.gmra.mxu3 %vm1161_vm0, %v2090_v19 }
 0x4ce   : > { %v2063_v50 = vpop.f32.mrf.mxu1 }
 0x4d0   : > { %3421 = vrot.lane.b32.xlu2 %v15117_v21, %s10262_s19 }
 0x4d4   : > { %3278 = vrot.lane.b32.xlu0 %v15111_v28, %s10262_s19 }
 0x4d5   : > { %v2445_v14 = vpop.xlane.xlu0 %2444 }
 0x4d6   : > { %v2480_v23 = vsub.f32 %v11595_v48, %v2445_v14  ;;  %v2065_v63 = vpop.f32.mrf.mxu1 }
 0x4d7   : > { %2924 = vmatmul.bf16.gmra.mxu1 %v2864_v38  ;;  %v2091_v55 = vpack.c.bf16 %v2065_v63, %v2063_v50  ;;  %v11705_v38 = vpop.f32.mrf.mxu3  ;;  %v15123_v63 = vld [vmem:[#allocation49_spill] sm:$0xff] }
 0x4d8   : > { %v2540_v11 = vmul.f32 1.442695, %v2480_v23  ;;  %2112 = vrot.lane.b32.xlu2 %v15118_v52, %s10261_s17  ;;  %15122 = vst [vmem:[#allocation31_spill] sm:$0xff] %v11705_v38 }
 0x4d9   : > { %8655 = vmatmul.msk.bf16.gmra.mxu3 %vm1161_vm0, %v2091_v55 }
 0x4da   : > { %9448 = vpow2.f32 %v2540_v11  ;;  %v15124_v11 = vld [vmem:[#allocation47_spill] sm:$0xff] }
 0x4db   : > { %v3428_v34 = vpop.permute.xlu1 %3427  ;;  %9450 = vrcp.f32 %v2597_v36 }
 0x4dc   : > { %v3475_v6 = vsel %vm1161_vm0, %v3428_v34, 0 }
 0x4dd   : > { %3477 = vmatpush.bf16.xpose.msra.mxu1 %v3475_v6  ;;  %v2449_v62 = vpop.xlane.xlu0 %2448  ;;  %v11712_v6 = vpop.f32.mrf.mxu0 }
 0x4de   : > { %v2482_v1 = vsub.f32 %v11600_v61, %v2449_v62 }
 0x4df   : > { %v11714_v62 = vpop.f32.mrf.mxu3 }
 0x4e0   : > { %v11671_v3 = vpop.eup %9448  ;;  %v2544_v12 = vmul.f32 1.442695, %v2482_v1  ;;  %15125 = vst [vmem:[#allocation29_spill] sm:$0xff] %v11714_v62 }
 0x4e1   : > { %2604 = vadd.xlane.f32.xlu1 %v11671_v3  ;;  %v9451_v7 = vpop.eup %9450 }
 0x4e2   : > { %v2668_v45 = vmul.f32 %v9451_v7, %v11588_v5 }
 0x4e3   : > { %v3426_v48 = vpop.permute.xlu1 %3425 }
 0x4e4   : > { %v3472_v32 = vsel %vm1161_vm0, %v3426_v48, 0  ;;  %v2700_v20 = vpack.c.bf16 %v2668_v45, %v2668_v45  ;;  %v15126_v48 = vld [vmem:[#allocation52_spill] sm:$0xff] }
 0x4e5   : > { %3478 = vmatpush.bf16.xpose.msra.mxu1 %v3472_v32  ;;  %v2599_v9 = vpop.xlane.xlu0 %2598  ;;  %v2451_v22 = vpop.xlane.xlu2 %2450  ;;  %v15127_v32 = vld [vmem:[#allocation53_spill] sm:$0xff] }
 0x4e6   : > { %9452 = vrcp.f32 %v2599_v9  ;;  %v2483_v25 = vsub.f32 %v11605_v35, %v2451_v22  ;;  %v2853_v37 = vunpack.c.l.b16 %v2700_v20  ;;  %v15128_v9 = vld [vmem:[#allocation48_spill] sm:$0xff]  ;;  %v11723_v22 = vpop.f32.mrf.mxu0  ;;  %v15131_v20 = vld [vmem:[#allocation50_spill] sm:$0xff] }
 0x4e7   : > { %15129 = vst [vmem:[#allocation63_spill] sm:$0xff] %v11723_v22 }
 0x4e8   : > { %v2546_v19 = vmul.f32 1.442695, %v2483_v25  ;;  %v15132_v25 = vld [vmem:[#allocation56_spill] sm:$0xff] }
 0x4ea   : > { %9454 = vpow2.f32 %v2546_v19 }
 0x4eb   : > { %9456 = vpow2.f32 %v2544_v12 }
 0x4ec   : > { %v9453_v42 = vpop.eup %9452 }
 0x4ed   : > { %v2669_v60 = vmul.f32 %v9453_v42, %v11607_v53  ;;  %v15120_v53 = vld [vmem:[#allocation55_spill] sm:$0xff] }
 0x4ef   : > { %v2701_v8 = vpack.c.bf16 %v2669_v60, %v2669_v60  ;;  %v11725_v60 = vpop.f32.mrf.mxu3 }
 0x4f0   : > { %v11688_v35 = vpop.eup %9454  ;;  %15130 = vst [vmem:[#allocation39_spill] sm:$0xff] %v11725_v60 }
 0x4f1   : > { %v2854_v10 = vunpack.c.l.b16 %v2701_v8  ;;  %v11691_v50 = vpop.eup %9456 }
 0x4f3   : > { %v2865_v16 = vpack.c.b16 %v2854_v10, %v2853_v37  ;;  %v11733_v37 = vpop.f32.mrf.mxu0  ;;  %v15134_v10 = vld [vmem:[#allocation45_spill] sm:$0xff] }
 0x4f4   : > { %15133 = vst [vmem:[#allocation33_spill] sm:$0xff] %v11733_v37 }
 0x4f5   : > { %2929 = vmatmul.bf16.gmra.mxu1 %v2865_v16 }
 0x4f8   : > { %v3275_v5 = vpop.permute.xlu0 %3274 }
 0x4f9   : > { %8661 = vmatmul.msk.bf16.gmra.mxu0 %vm1161_vm0, %v3275_v5 }
 0x4fa   : > { %3419 = vrot.lane.b32.xlu1 %v15120_v53, %s10262_s19 }
 0x4fe   : > { %2610 = vadd.xlane.f32.xlu0 %v11688_v35 }
 0x500   : > { %v2109_v61 = vpop.permute.xlu0 %2108 }
 0x501   : > { %2608 = vadd.xlane.f32.xlu2 %v11691_v50  ;;  %8599 = vmatmul.msk.bf16.gmra.mxu2 %vm1161_vm0, %v2109_v61  ;;  %v3357_v61 = vpop.f32.mrf.mxu0 }
 0x502   : > { %3280 = vrot.lane.b32.xlu1 %v15113_v27, %s10262_s19 }
 0x504   : > { %v2068_v36 = vpop.f32.mrf.mxu1 }
 0x50a   : > { %3282 = vrot.lane.b32.xlu1 %v15118_v52, %s10262_s19 }
 0x50c   : > { %v2070_v14 = vpop.f32.mrf.mxu1 }
 0x50d   : > { %v2092_v23 = vpack.c.bf16 %v2070_v14, %v2068_v36  ;;  %v15135_v14 = vld [vmem:[#allocation57_spill] sm:$0xff] }
 0x50f   : > { %8656 = vmatmul.msk.bf16.gmra.mxu3 %vm1161_vm0, %v2092_v23 }
 0x512   : > { %3415 = vrot.lane.b32.xlu0 %v15123_v63, %s10262_s19  ;;  %3413 = vrot.lane.b32.xlu1 %v15124_v11, %s10262_s19 }
 0x513   : > { %v2603_v55 = vpop.xlane.xlu2 %2602 }
 0x514   : > { %v2073_v34 = vpop.f32.mrf.mxu1  ;;  %9458 = vrcp.f32 %v2603_v55 }
 0x519   : > { %3417 = vrot.lane.b32.xlu2 %v15126_v48, %s10262_s19 }
 0x51a   : > { %3401 = vrot.lane.b32.xlu0 %v15127_v32, %s10262_s19  ;;  %3397 = vrot.lane.b32.xlu1 %v15128_v9, %s10262_s19  ;;  %v9459_v16 = vpop.eup %9458 }
 0x51b   : > { %v3277_v7 = vpop.permute.xlu2 %3276  ;;  %v2671_v5 = vmul.f32 %v9459_v16, %v11627_v39  ;;  %v3359_v39 = vpop.f32.mrf.mxu0 }
 0x51c   : > { %v2075_v45 = vpop.f32.mrf.mxu1  ;;  %8662 = vmatmul.msk.bf16.gmra.mxu0 %vm1161_vm0, %v3277_v7 }
 0x51d   : > { %v2093_v42 = vpack.c.bf16 %v2075_v45, %v2073_v34  ;;  %v2703_v34 = vpack.c.bf16 %v2671_v5, %v2671_v5 }
 0x51f   : > { %8657 = vmatmul.msk.bf16.gmra.mxu3 %vm1161_vm0, %v2093_v42 }
 0x521   : > { %3399 = vrot.lane.b32.xlu2 %v15131_v20, %s10262_s19 }
 0x522   : > { %3403 = vrot.lane.b32.xlu1 %v15132_v25, %s10262_s19 }
 0x523   : > { %v2111_v8 = vpop.permute.xlu2 %2110 }
 0x524   : > { %8600 = vmatmul.msk.bf16.gmra.mxu2 %vm1161_vm0, %v2111_v8  ;;  %v2856_v8 = vunpack.c.l.b16 %v2703_v34 }
 0x52a   : > { %4351 = vrot.lane.b32.xlu1 %v15134_v10, %s10263_s23 }
 0x52b   : > { %v3424_v1 = vpop.permute.xlu2 %3423  ;;  %v2601_v19 = vpop.xlane.xlu0 %2600 }
 0x52c   : > { %9460 = vrcp.f32 %v2601_v19  ;;  %v3469_v12 = vsel %vm1161_vm0, %v3424_v1, 0  ;;  %v15136_v1 = vld [vmem:[#allocation43_spill] sm:$0xff] }
 0x52d   : > { %3479 = vmatpush.bf16.xpose.msra.mxu1 %v3469_v12  ;;  %v11746_v12 = vmul.f32 0.17677669, %v3359_v39 }
 0x532   : > { %v9461_v36 = vpop.eup %9460  ;;  %3405 = vrot.lane.b32.xlu1 %v15135_v14, %s10262_s19 }
 0x533   : > { %v3422_v23 = vpop.permute.xlu2 %3421  ;;  %v2670_v55 = vmul.f32 %v9461_v36, %v11636_v40  ;;  %v2607_v16 = vpop.xlane.xlu0 %2606  ;;  %v11750_v36 = vmul.f32 0.17677669, %v3357_v61 }
 0x534   : > { %v3466_v7 = vsel %vm1161_vm0, %v3422_v23, 0  ;;  %v3362_v40 = vpop.f32.mrf.mxu0  ;;  %9462 = vrcp.f32 %v2607_v16 }
 0x535   : > { %3480 = vmatpush.bf16.xpose.msra.mxu1 %v3466_v7  ;;  %v2702_v45 = vpack.c.bf16 %v2670_v55, %v2670_v55 }
 0x537   : > { %v2855_v42 = vunpack.c.l.b16 %v2702_v45  ;;  %v15137_v45 = vld [vmem:[#allocation40_spill] sm:$0xff] }
 0x539   : > { %v2866_v10 = vpack.c.b16 %v2856_v8, %v2855_v42 }
 0x53a   : > { %4349 = vrot.lane.b32.xlu1 %v15136_v1, %s10263_s23  ;;  %v9463_v7 = vpop.eup %9462 }
 0x53b   : > { %v2113_v19 = vpop.permute.xlu2 %2112  ;;  %2934 = vmatmul.bf16.gmra.mxu1 %v2866_v10  ;;  %v2673_v42 = vmul.f32 %v9463_v7, %v11646_v58  ;;  %v15139_v58 = vld [vmem:[#allocation59_spill] sm:$0xff] }
 0x53c   : > { %8601 = vmatmul.msk.bf16.gmra.mxu2 %vm1161_vm0, %v2113_v19  ;;  %v3364_v23 = vpop.f32.mrf.mxu0  ;;  %v15138_v19 = vld [vmem:[#allocation37_spill] sm:$0xff] }
 0x53d   : > { %v11753_v55 = vmul.f32 0.17677669, %v3364_v23  ;;  %v2705_v10 = vpack.c.bf16 %v2673_v42, %v2673_v42  ;;  %v11762_v23 = vmul.f32 0.17677669, %v3362_v40  ;;  %v15140_v40 = vld [vmem:[#allocation35_spill] sm:$0xff] }
 0x544   : > { %3560 = vmax.xlane.f32.xlu0 %v11746_v12  ;;  %v3367_v1 = vpop.f32.mrf.mxu0 }
 0x546   : > { %v3279_v5 = vpop.permute.xlu0 %3278 }
 0x547   : > { %8663 = vmatmul.msk.bf16.gmra.mxu0 %vm1161_vm0, %v3279_v5  ;;  %v2858_v5 = vunpack.c.l.b16 %v2705_v10 }
 0x54a   : > { %3558 = vmax.xlane.f32.xlu2 %v11750_v36 }
 0x552   : > { %3564 = vmax.xlane.f32.xlu2 %v11753_v55 }
 0x554   : > { %v2605_v34 = vpop.xlane.xlu1 %2604 }
 0x555   : > { %9464 = vrcp.f32 %v2605_v34  ;;  %v3369_v34 = vpop.f32.mrf.mxu0 }
 0x558   : > { %4347 = vrot.lane.b32.xlu0 %v15137_v45, %s10263_s23  ;;  %v11765_v45 = vmul.f32 0.17677669, %v3369_v34 }
 0x55b   : > { %v9465_v8 = vpop.eup %9464 }
 0x55c   : > { %v2672_v61 = vmul.f32 %v9465_v8, %v11671_v3 }
 0x55e   : > { %v2704_v39 = vpack.c.bf16 %v2672_v61, %v2672_v61 }
 0x560   : > { %4345 = vrot.lane.b32.xlu0 %v15138_v19, %s10263_s23  ;;  %v2857_v16 = vunpack.c.l.b16 %v2704_v39  ;;  %v15141_v39 = vld [vmem:[#allocation44_spill] sm:$0xff] }
 0x562   : > { %v2867_v60 = vpack.c.b16 %v2858_v5, %v2857_v16 }
 0x564   : > { %3562 = vmax.xlane.f32.xlu1 %v11762_v23  ;;  %2939 = vmatmul.bf16.gmra.mxu1 %v2867_v60 }
 0x56a   : > { %3407 = vrot.lane.b32.xlu2 %v15139_v58, %s10262_s19 }
 0x56c   : > { %3568 = vmax.xlane.f32.xlu1 %v11765_v45  ;;  %v3420_v3 = vpop.permute.xlu1 %3419 }
 0x56d   : > { %v3463_v7 = vsel %vm1161_vm0, %v3420_v3, 0 }
 0x56e   : > { %3481 = vmatpush.bf16.xpose.msra.mxu1 %v3463_v7 }
 0x571   : > { %v2611_v42 = vpop.xlane.xlu0 %2610 }
 0x572   : > { %9466 = vrcp.f32 %v2611_v42  ;;  %4343 = vrot.lane.b32.xlu2 %v15140_v40, %s10263_s23 }
 0x574   : > { %v3281_v8 = vpop.permute.xlu1 %3280  ;;  %v2609_v61 = vpop.xlane.xlu2 %2608 }
 0x575   : > { %9468 = vrcp.f32 %v2609_v61  ;;  %8664 = vmatmul.msk.bf16.gmra.mxu0 %vm1161_vm0, %v3281_v8  ;;  %v15142_v8 = vld [vmem:[#allocation61_spill] sm:$0xff] }
 0x578   : > { %v9467_v60 = vpop.eup %9466 }
 0x579   : > { %v2675_v10 = vmul.f32 %v9467_v60, %v11688_v35 }
 0x57a   : > { %3938 = vrot.lane.b32.xlu2 %v15141_v39, %s10262_s19 }
 0x57b   : > { %v9469_v19 = vpop.eup %9468  ;;  %v2707_v3 = vpack.c.bf16 %v2675_v10, %v2675_v10  ;;  %v11785_v10 = vmul.f32 0.17677669, %v3367_v1 }
 0x57c   : > { %v3283_v16 = vpop.permute.xlu1 %3282  ;;  %v3418_v5 = vpop.permute.xlu2 %3417  ;;  %v2674_v34 = vmul.f32 %v9469_v19, %v11691_v50 }
 0x57d   : > { %v3460_v7 = vsel %vm1161_vm0, %v3418_v5, 0  ;;  %v2860_v61 = vunpack.c.l.b16 %v2707_v3 }
 0x57e   : > { %3482 = vmatpush.bf16.xpose.msra.mxu1 %v3460_v7  ;;  %v2706_v42 = vpack.c.bf16 %v2674_v34, %v2674_v34  ;;  %v15144_v7 = vld [vmem:[#allocation34_spill] sm:$0xff] }
 0x580   : > { %v2859_v40 = vunpack.c.l.b16 %v2706_v42 }
 0x582   : > { %3409 = vrot.lane.b32.xlu2 %v15142_v8, %s10262_s19  ;;  %v2868_v38 = vpack.c.b16 %v2860_v61, %v2859_v40  ;;  %v15145_v40 = vld [vmem:[#allocation42_spill] sm:$0xff] }
 0x584   : > { %v3414_v35 = vpop.permute.xlu1 %3413  ;;  %2944 = vmatmul.bf16.gmra.mxu1 %v2868_v38  ;;  %v3416_v60 = vpop.permute.xlu0 %3415 }
 0x585   : > { %3940 = vrot.lane.b32.xlu1 %v15143_v18, %s10262_s19  ;;  %8665 = vmatmul.msk.bf16.gmra.mxu0 %vm1161_vm0, %v3283_v16  ;;  %v3457_v50 = vsel %vm1161_vm0, %v3416_v60, 0  ;;  %v3454_v5 = vsel %vm1161_vm0, %v3414_v35, 0  ;;  %v2207_v16 = vpop.f32.mrf.mxu2  ;;  %v3400_v1 = vpop.permute.xlu2 %3399 }
 0x586   : > { %3483 = vmatpush.bf16.xpose.msra.mxu1 %v3457_v50  ;;  %v11796_v61 = vmul.f32 0.17677669, %v2207_v16 }
 0x58a   : > { %3566 = vmax.xlane.f32.xlu0 %v11785_v10 }
 0x58c   : > { %v3398_v19 = vpop.permute.xlu1 %3397 }
 0x58d   : > { %v2209_v35 = vpop.f32.mrf.mxu2 }
 0x58e   : > { %3484 = vmatpush.bf16.xpose.msra.mxu1 %v3454_v5  ;;  %v11799_v50 = vmul.f32 0.17677669, %v2209_v35  ;;  %v3372_v5 = vpop.f32.mrf.mxu0 }
 0x594   : > { %v3404_v34 = vpop.permute.xlu1 %3403 }
 0x595   : > { %8666 = vmatmul.msk.bf16.vlgmr.msra.gmra.mxu1 %vm1161_vm0, %v3398_v19 }
 0x59c   : > { %v4352_v38 = vpop.permute.xlu1 %4351 }
 0x59d   : > { %v4399_v3 = vsel %vm1161_vm0, %v4352_v38, 0  ;;  %v11803_v38 = vmul.f32 0.17677669, %v3372_v5 }
 0x59e   : > { %4341 = vrot.lane.b32.xlu0 %v15144_v7, %s10263_s23  ;;  %4401 = vmatpush.bf16.xpose.msrb.mxu3 %v4399_v3  ;;  %v3402_v3 = vpop.permute.xlu0 %3401 }
 0x5a4   : > { %v3406_v42 = vpop.permute.xlu1 %3405 }
 0x5a5   : > { %8667 = vmatmul.msk.bf16.gmra.mxu1 %vm1161_vm0, %v3400_v1 }
 0x5a6   : > { %3936 = vrot.lane.b32.xlu0 %v15145_v40, %s10262_s19 }
 0x5ab   : > { %2404 = vmax.xlane.f32.xlu2 %v11796_v61 }
 0x5ac   : > { %v4350_v60 = vpop.permute.xlu1 %4349 }
 0x5ad   : > { %v4396_v19 = vsel %vm1161_vm0, %v4350_v60, 0  ;;  %v11809_v60 = vpop.f32.mrf.mxu1 }
 0x5ae   : > { %4402 = vmatpush.bf16.xpose.msrb.mxu3 %v4396_v19  ;;  %15146 = vst [vmem:[#allocation36_spill] sm:$0xff] %v11809_v60 }
 0x5af   : > { %2406 = vmax.xlane.f32.xlu1 %v11799_v50 }
 0x5b3   : > { %3570 = vmax.xlane.f32.xlu2 %v11803_v38 }
 0x5b5   : > { %8668 = vmatmul.msk.bf16.gmra.mxu1 %vm1161_vm0, %v3402_v3  ;;  %v3374_v3 = vpop.f32.mrf.mxu0 }
 0x5b7   : > { %v3561_v1 = vpop.xlane.xlu0 %3560 }
 0x5b8   : > { %v3623_v35 = vsub.f32 %v11746_v12, %v3561_v1 }
 0x5ba   : > { %v3656_v62 = vmul.f32 1.442695, %v3623_v35 }
 0x5bd   : > { %v3559_v7 = vpop.xlane.xlu2 %3558 }
 0x5be   : > { %v3622_v16 = vsub.f32 %v11750_v36, %v3559_v7  ;;  %v11822_v7 = vmul.f32 0.17677669, %v3374_v3 }
 0x5c0   : > { %v3654_v4 = vmul.f32 1.442695, %v3622_v16 }
 0x5c2   : > { %9470 = vpow2.f32 %v3654_v4  ;;  %v11820_v4 = vpop.f32.mrf.mxu1 }
 0x5c3   : > { %9472 = vpow2.f32 %v3656_v62  ;;  %15148 = vst [vmem:[#allocation66_spill] sm:$0xff] %v11820_v4 }
 0x5c5   : > { %v11811_v19 = vpop.xlane.xlu2 %3564  ;;  %8669 = vmatmul.msk.bf16.gmra.mxu1 %vm1161_vm0, %v3404_v34  ;;  %v15149_v34 = vld [vmem:[#allocation41_spill] sm:$0xff] }
 0x5c8   : > { %v11814_v5 = vpop.eup %9470  ;;  %3934 = vrot.lane.b32.xlu1 %v15147_v30, %s10262_s19 }
 0x5c9   : > { %3718 = vadd.xlane.f32.xlu2 %v11814_v5  ;;  %v11824_v1 = vpop.eup %9472 }
 0x5ca   : > { %v4348_v36 = vpop.permute.xlu0 %4347 }
 0x5cb   : > { %v4393_v12 = vsel %vm1161_vm0, %v4348_v36, 0  ;;  %v11832_v36 = vpop.f32.mrf.mxu1 }
 0x5cc   : > { %4403 = vmatpush.bf16.xpose.msrb.mxu3 %v4393_v12  ;;  %15150 = vst [vmem:[#allocation67_spill] sm:$0xff] %v11832_v36  ;;  %v15151_v12 = vld [vmem:[#allocation32_spill] sm:$0xff] }
 0x5cd   : > { %v3408_v16 = vpop.permute.xlu2 %3407 }
 0x5d0   : > { %3932 = vrot.lane.b32.xlu1 %v15149_v34, %s10262_s19  ;;  %3572 = vmax.xlane.f32.xlu0 %v11822_v7  ;;  %v15153_v34 = vld [vmem:[#allocation64_spill] sm:$0xff] }
 0x5d1   : > { %3720 = vadd.xlane.f32.xlu2 %v11824_v1 }
 0x5d2   : > { %v4346_v62 = vpop.permute.xlu0 %4345 }
 0x5d3   : > { %v4390_v35 = vsel %vm1161_vm0, %v4346_v62, 0  ;;  %v11837_v13 = vpop.f32.mrf.mxu1 }
 0x5d4   : > { %4404 = vmatpush.bf16.xpose.msrb.mxu3 %v4390_v35  ;;  %15152 = vst [vmem:[#allocation30_spill] sm:$0xff] %v11837_v13 }
 0x5d5   : > { %8670 = vmatmul.msk.bf16.gmra.mxu1 %vm1161_vm0, %v3406_v42  ;;  %v4344_v3 = vpop.permute.xlu2 %4343 }
 0x5d6   : > { %v4387_v47 = vsel %vm1161_vm0, %v4344_v3, 0  ;;  %v2212_v3 = vpop.f32.mrf.mxu2 }
 0x5d7   : > { %v3563_v30 = vpop.xlane.xlu1 %3562  ;;  %v11856_v58 = vmul.f32 0.17677669, %v2212_v3  ;;  %v3625_v3 = vsub.f32 %v11753_v55, %v11811_v19 }
 0x5d8   : > { %3930 = vrot.lane.b32.xlu1 %v15151_v12, %s10262_s19 }
 0x5db   : > { %v11844_v62 = vpop.f32.mrf.mxu1 }
 0x5dc   : > { %4405 = vmatpush.bf16.xpose.msrb.mxu3 %v4387_v47  ;;  %15154 = vst [vmem:[#allocation26_spill] sm:$0xff] %v11844_v62  ;;  %v15155_v47 = vld [vmem:[#allocation28_spill] sm:$0xff] }
 0x5dd   : > { %v3939_v42 = vpop.permute.xlu2 %3938 }
 0x5df   : > { %v3569_v35 = vpop.xlane.xlu1 %3568 }
 0x5e3   : > { %v11850_v40 = vpop.f32.mrf.mxu1 }
 0x5e4   : > { %3411 = vrot.lane.b32.xlu0 %v15153_v34, %s10262_s19  ;;  %15156 = vst [vmem:[#allocation68_spill] sm:$0xff] %v11850_v40 }
 0x5e5   : > { %8671 = vmatmul.msk.bf16.gmra.mxu1 %vm1161_vm0, %v3408_v16  ;;  %v3410_v12 = vpop.permute.xlu2 %3409 }
 0x5e9   : > { %4339 = vrot.lane.b32.xlu2 %v15101_v43, %s10263_s23  ;;  %v2214_v43 = vpop.f32.mrf.mxu2 }
 0x5ea   : > { %v11853_v34 = vmul.f32 0.17677669, %v2214_v43 }
 0x5eb   : > { %v11900_v13 = vpop.f32.mrf.mxu1 }
 0x5ec   : > { %4337 = vrot.lane.b32.xlu0 %v15103_v49, %s10263_s23  ;;  %v3377_v49 = vpop.f32.mrf.mxu0  ;;  %15158 = vst [vmem:[#allocation55_spill] sm:$0xff] %v11900_v13 }
 0x5ed   : > { %v11868_v40 = vmul.f32 0.17677669, %v3377_v49 }
 0x5f3   : > { %v11910_v25 = vpop.f32.mrf.mxu1 }
 0x5f4   : > { %3928 = vrot.lane.b32.xlu0 %v15155_v47, %s10262_s19  ;;  %v3379_v18 = vpop.f32.mrf.mxu0  ;;  %15159 = vst [vmem:[#allocation49_spill] sm:$0xff] %v11910_v25 }
 0x5f5   : > { %8672 = vmatmul.msk.bf16.gmra.mxu1 %vm1161_vm0, %v3410_v12  ;;  %v3624_v12 = vsub.f32 %v11762_v23, %v3563_v30  ;;  %v11861_v14 = vmul.f32 0.17677669, %v3379_v18  ;;  %v3660_v30 = vmul.f32 1.442695, %v3625_v3  ;;  %v3627_v3 = vsub.f32 %v11765_v45, %v3569_v35 }
 0x5f7   : > { %v3941_v16 = vpop.permute.xlu1 %3940 }
 0x5f8   : > { %3950 = vmatpush.bf16.msrb.mxu0 %v3941_v16  ;;  %v2217_v16 = vpop.f32.mrf.mxu2 }
 0x5f9   : > { %v11895_v45 = vmul.f32 0.17677669, %v2217_v16 }
 0x5fc   : > { %3951 = vmatpush.bf16.msrb.mxu0 %v3939_v42  ;;  %v3658_v42 = vmul.f32 1.442695, %v3624_v12  ;;  %v3382_v12 = vpop.f32.mrf.mxu0 }
 0x5fd   : > { %v3567_v39 = vpop.xlane.xlu0 %3566 }
 0x5fe   : > { %9474 = vpow2.f32 %v3658_v42  ;;  %v3626_v55 = vsub.f32 %v11785_v10, %v3567_v39 }
 0x5ff   : > { %9476 = vpow2.f32 %v3660_v30 }
 0x600   : > { %v2219_v18 = vpop.f32.mrf.mxu2  ;;  %v3662_v42 = vmul.f32 1.442695, %v3626_v55 }
 0x602   : > { %2410 = vmax.xlane.f32.xlu1 %v11853_v34  ;;  %9478 = vpow2.f32 %v3662_v42 }
 0x604   : > { %v11871_v23 = vpop.eup %9474  ;;  %v3384_v4 = vpop.f32.mrf.mxu0 }
 0x605   : > { %v11878_v19 = vpop.eup %9476  ;;  %v11923_v25 = vmul.f32 0.17677669, %v3384_v4 }
 0x608   : > { %v11885_v62 = vpop.eup %9478  ;;  %v2222_v42 = vpop.f32.mrf.mxu2 }
 0x610   : > { %v4342_v8 = vpop.permute.xlu0 %4341 }
 0x611   : > { %v4384_v47 = vsel %vm1161_vm0, %v4342_v8, 0  ;;  %v15157_v8 = vld [vmem:[#allocation25_spill] sm:$0xff] }
 0x612   : > { %2408 = vmax.xlane.f32.xlu2 %v11856_v58  ;;  %4406 = vmatpush.bf16.xpose.msrb.mxu3 %v4384_v47  ;;  %v11874_v47 = vmul.f32 0.17677669, %v2219_v18  ;;  %v3664_v18 = vmul.f32 1.442695, %v3627_v3 }
 0x614   : > { %9480 = vpow2.f32 %v3664_v18  ;;  %v11898_v18 = vmul.f32 0.17677669, %v2222_v42 }
 0x618   : > { %v3937_v43 = vpop.permute.xlu0 %3936 }
 0x619   : > { %3952 = vmatpush.bf16.msrb.mxu0 %v3937_v43  ;;  %v11881_v43 = vmul.f32 0.17677669, %v3382_v12 }
 0x61a   : > { %3576 = vmax.xlane.f32.xlu2 %v11861_v14  ;;  %v11890_v55 = vpop.eup %9480 }
 0x61b   : > { %3926 = vrot.lane.b32.xlu1 %v15157_v8, %s10262_s19 }
 0x61e   : > { %3574 = vmax.xlane.f32.xlu0 %v11868_v40  ;;  %v2405_v49 = vpop.xlane.xlu2 %2404 }
 0x622   : > { %3722 = vadd.xlane.f32.xlu2 %v11871_v23  ;;  %v2407_v30 = vpop.xlane.xlu1 %2406 }
 0x626   : > { %2414 = vmax.xlane.f32.xlu0 %v11874_v47  ;;  %v3571_v8 = vpop.xlane.xlu2 %3570 }
 0x62a   : > { %3724 = vadd.xlane.f32.xlu2 %v11878_v19 }
 0x62e   : > { %3578 = vmax.xlane.f32.xlu0 %v11881_v43 }
 0x636   : > { %3726 = vadd.xlane.f32.xlu0 %v11885_v62 }
 0x63a   : > { %v3935_v39 = vpop.permute.xlu1 %3934 }
 0x63b   : > { %3953 = vmatpush.bf16.msrb.mxu0 %v3935_v39 }
 0x63c   : > { %v11888_v10 = vpop.xlane.xlu2 %3718 }
 0x63e   : > { %3728 = vadd.xlane.f32.xlu0 %v11890_v55 }
 0x642   : > { %v3933_v12 = vpop.permute.xlu1 %3932  ;;  %4321 = vrot.lane.b32.xlu2 %v15102_v15, %s10263_s23  ;;  %v2460_v15 = vsub.f32 %v11796_v61, %v2405_v49  ;;  %v11918_v49 = vpop.f32.mrf.mxu1 }
 0x643   : > { %3954 = vmatpush.bf16.msrb.mxu0 %v3933_v12  ;;  %v3573_v16 = vpop.xlane.xlu0 %3572  ;;  %v2224_v12 = vpop.f32.mrf.mxu2  ;;  %15160 = vst [vmem:[#allocation47_spill] sm:$0xff] %v11918_v49 }
 0x644   : > { %v3721_v35 = vpop.xlane.xlu2 %3720  ;;  %v2500_v60 = vmul.f32 1.442695, %v2460_v15  ;;  %v11907_v42 = vmul.f32 0.17677669, %v2224_v12  ;;  %v3629_v61 = vsub.f32 %v11822_v7, %v3573_v16  ;;  %v3628_v16 = vsub.f32 %v11803_v38, %v3571_v8 }
 0x645   : > { %2412 = vmax.xlane.f32.xlu1 %v11895_v45 }
 0x646   : > { %9482 = vpow2.f32 %v2500_v60  ;;  %v3668_v12 = vmul.f32 1.442695, %v3629_v61  ;;  %v3666_v61 = vmul.f32 1.442695, %v3628_v16 }
 0x648   : > { %9484 = vpow2.f32 %v3668_v12 }
 0x649   : > { %9486 = vpow2.f32 %v3666_v61 }
 0x64a   : > { %v3931_v3 = vpop.permute.xlu1 %3930  ;;  %v11925_v32 = vpop.f32.mrf.mxu1 }
 0x64b   : > { %3955 = vmatpush.bf16.msrb.mxu0 %v3931_v3  ;;  %v3387_v3 = vpop.f32.mrf.mxu0  ;;  %15161 = vst [vmem:[#allocation52_spill] sm:$0xff] %v11925_v32 }
 0x64c   : > { %v4340_v39 = vpop.permute.xlu2 %4339 }
 0x64d   : > { %2416 = vmax.xlane.f32.xlu1 %v11898_v18  ;;  %v4381_v36 = vsel %vm1161_vm0, %v4340_v39, 0  ;;  %v11913_v39 = vpop.eup %9482 }
 0x64e   : > { %4407 = vmatpush.bf16.xpose.msrb.mxu3 %v4381_v36  ;;  %v11928_v7 = vpop.eup %9484 }
 0x652   : > { %4323 = vrot.lane.b32.xlu0 %v15106_v17, %s10263_s23  ;;  %v11935_v12 = vpop.f32.mrf.mxu1 }
 0x653   : > { %v3389_v15 = vpop.f32.mrf.mxu0  ;;  %15162 = vst [vmem:[#allocation45_spill] sm:$0xff] %v11935_v12 }
 0x654   : > { %v11920_v60 = vmul.f32 0.17677669, %v3389_v15 }
 0x655   : > { %2418 = vmax.xlane.f32.xlu1 %v11907_v42 }
 0x656   : > { %v3412_v13 = vpop.permute.xlu0 %3411 }
 0x657   : > { %8673 = vmatmul.msk.bf16.gmra.mxu1 %vm1161_vm0, %v3412_v13 }
 0x65b   : > { %v3392_v4 = vpop.f32.mrf.mxu0 }
 0x65d   : > { %2564 = vadd.xlane.f32.xlu1 %v11913_v39 }
 0x65e   : > { %v4338_v36 = vpop.permute.xlu0 %4337 }
 0x65f   : > { %v4378_v17 = vsel %vm1161_vm0, %v4338_v36, 0  ;;  %v2461_v36 = vsub.f32 %v11799_v50, %v2407_v30  ;;  %v11943_v50 = vpop.f32.mrf.mxu1 }
 0x660   : > { %4408 = vmatpush.bf16.xpose.msrb.mxu3 %v4378_v17  ;;  %v11933_v17 = vmul.f32 0.17677669, %v3387_v3  ;;  %15163 = vst [vmem:[#allocation43_spill] sm:$0xff] %v11943_v50 }
 0x661   : > { %v2502_v15 = vmul.f32 1.442695, %v2461_v36 }
 0x663   : > { %9488 = vpow2.f32 %v2502_v15  ;;  %v3394_v38 = vpop.f32.mrf.mxu0 }
 0x664   : > { %9490 = vrcp.f32 %v3721_v35  ;;  %v11947_v3 = vmul.f32 0.17677669, %v3394_v38 }
 0x665   : > { %3584 = vmax.xlane.f32.xlu1 %v11920_v60  ;;  %9492 = vrcp.f32 %v11888_v10 }
 0x666   : > { %v3929_v13 = vpop.permute.xlu0 %3928 }
 0x667   : > { %3956 = vmatpush.bf16.msrb.mxu0 %v3929_v13  ;;  %v11938_v13 = vpop.eup %9486  ;;  %v11950_v36 = vpop.f32.mrf.mxu1 }
 0x668   : > { %15164 = vst [vmem:[#allocation40_spill] sm:$0xff] %v11950_v36 }
 0x669   : > { %v11940_v32 = vpop.eup %9488 }
 0x66a   : > { %v9491_v8 = vpop.eup %9490 }
 0x66b   : > { %3580 = vmax.xlane.f32.xlu2 %v11923_v25  ;;  %v9493_v30 = vpop.eup %9492  ;;  %v3815_v16 = vmul.f32 %v9491_v8, %v11824_v1 }
 0x66c   : > { %v3814_v35 = vmul.f32 %v9493_v30, %v11814_v5 }
 0x66d   : > { %3732 = vadd.xlane.f32.xlu1 %v11928_v7  ;;  %v3847_v10 = vpack.c.bf16 %v3815_v16, %v3815_v16 }
 0x66e   : > { %v3846_v49 = vpack.c.bf16 %v3814_v35, %v3814_v35 }
 0x66f   : > { %v3895_v38 = vunpack.c.l.b16 %v3847_v10  ;;  %v11956_v8 = vpop.f32.mrf.mxu1 }
 0x670   : > { %v3894_v37 = vunpack.c.l.b16 %v3846_v49 }
 0x672   : > { %v3910_v9 = vpack.c.b16 %v3895_v38, %v3894_v37 }
 0x673   : > { %3582 = vmax.xlane.f32.xlu2 %v11933_v17 }
 0x675   : > { %v2411_v61 = vpop.xlane.xlu1 %2410 }
 0x676   : > { %v2463_v20 = vsub.f32 %v11853_v34, %v2411_v61 }
 0x678   : > { %v2506_v36 = vmul.f32 1.442695, %v2463_v20 }
 0x67b   : > { %3730 = vadd.xlane.f32.xlu2 %v11938_v13 }
 0x67c   : > { %2566 = vadd.xlane.f32.xlu0 %v11940_v32 }
 0x684   : > { %3588 = vmax.xlane.f32.xlu0 %v11947_v3 }
 0x685   : > { %v2409_v15 = vpop.xlane.xlu2 %2408 }
 0x686   : > { %v2462_v50 = vsub.f32 %v11856_v58, %v2409_v15 }
 0x688   : > { %v2504_v12 = vmul.f32 1.442695, %v2462_v50 }
 0x68a   : > { %9494 = vpow2.f32 %v2504_v12  ;;  %v11963_v12 = vpop.f32.mrf.mxu1 }
 0x68b   : > { %9496 = vpow2.f32 %v2506_v36 }
 0x68d   : > { %v3927_v22 = vpop.permute.xlu1 %3926  ;;  %v3577_v1 = vpop.xlane.xlu2 %3576 }
 0x68e   : > { %3957 = vmatpush.bf16.msrb.mxu0 %v3927_v22  ;;  %v3631_v20 = vsub.f32 %v11861_v14, %v3577_v1 }
 0x690   : > { %v11958_v5 = vpop.eup %9494  ;;  %v3672_v50 = vmul.f32 1.442695, %v3631_v20 }
 0x691   : > { %2568 = vadd.xlane.f32.xlu1 %v11958_v5  ;;  %3958 = vmatmul.bf16.vlgmr.msrb.gmra.mxu0 %v3910_v9  ;;  %v3575_v58 = vpop.xlane.xlu0 %3574  ;;  %v11965_v49 = vpop.eup %9496 }
 0x692   : > { %v11971_v9 = vpop.f32.mrf.mxu3  ;;  %v11975_v16 = vpop.f32.mrf.mxu1 }
 0x693   : > { %4325 = vrot.lane.b32.xlu2 %v15105_v56, %s10263_s23  ;;  %v11973_v56 = vmul.f32 0.17677669, %v3392_v4 }
 0x695   : > { %v3723_v34 = vpop.xlane.xlu2 %3722 }
 0x696   : > { %9498 = vrcp.f32 %v3723_v34 }
 0x698   : > { %4327 = vrot.lane.b32.xlu0 %v15110_v46, %s10263_s23 }
 0x699   : > { %2570 = vadd.xlane.f32.xlu1 %v11965_v49  ;;  %v2415_v22 = vpop.xlane.xlu0 %2414 }
 0x69a   : > { %v11979_v15 = vpop.f32.mrf.mxu3  ;;  %v3486_v34 = vpop.f32.mrf.mxu1 }
 0x69c   : > { %v9499_v30 = vpop.eup %9498 }
 0x69d   : > { %v3725_v37 = vpop.xlane.xlu2 %3724  ;;  %v3816_v46 = vmul.f32 %v9499_v30, %v11871_v23  ;;  %v11987_v30 = vmul.f32 0.17677669, %v3486_v34 }
 0x69e   : > { %9500 = vrcp.f32 %v3725_v37 }
 0x69f   : > { %9502 = vpow2.f32 %v3672_v50  ;;  %v3848_v10 = vpack.c.bf16 %v3816_v46, %v3816_v46  ;;  %v3630_v50 = vsub.f32 %v11868_v40, %v3575_v58 }
 0x6a1   : > { %3586 = vmax.xlane.f32.xlu1 %v11973_v56  ;;  %v3579_v36 = vpop.xlane.xlu0 %3578  ;;  %v3896_v20 = vunpack.c.l.b16 %v3848_v10 }
 0x6a4   : > { %v9501_v35 = vpop.eup %9500 }
 0x6a5   : > { %v4322_v61 = vpop.permute.xlu2 %4321  ;;  %v3817_v14 = vmul.f32 %v9501_v35, %v11878_v19  ;;  %v11983_v4 = vpop.eup %9502  ;;  %v2465_v35 = vsub.f32 %v11874_v47, %v2415_v22  ;;  %v3632_v47 = vsub.f32 %v11881_v43, %v3579_v36 }
 0x6a6   : > { %8698 = vmatmul.msk.bf16.vlgmr.msrb.gmra.mxu3 %vm1161_vm0, %v4322_v61  ;;  %v3670_v61 = vmul.f32 1.442695, %v3630_v50 }
 0x6a7   : > { %v3849_v38 = vpack.c.bf16 %v3817_v14, %v3817_v14  ;;  %v3488_v14 = vpop.f32.mrf.mxu1 }
 0x6a9   : > { %3736 = vadd.xlane.f32.xlu1 %v11983_v4  ;;  %v3727_v1 = vpop.xlane.xlu0 %3726  ;;  %v3897_v37 = vunpack.c.l.b16 %v3849_v38  ;;  %v2510_v38 = vmul.f32 1.442695, %v2465_v35 }
 0x6aa   : > { %9504 = vrcp.f32 %v3727_v1  ;;  %v11992_v1 = vmul.f32 0.17677669, %v3488_v14 }
 0x6ab   : > { %v3911_v23 = vpack.c.b16 %v3897_v37, %v3896_v20 }
 0x6ad   : > { %3963 = vmatmul.bf16.gmra.mxu0 %v3911_v23  ;;  %v12000_v23 = vpop.f32.mrf.mxu3 }
 0x6ae   : > { %15165 = vst [vmem:[#allocation37_spill] sm:$0xff] %v12000_v23 }
 0x6b0   : > { %v9505_v46 = vpop.eup %9504 }
 0x6b1   : > { %3590 = vmax.xlane.f32.xlu1 %v11987_v30  ;;  %v3729_v19 = vpop.xlane.xlu0 %3728  ;;  %v3818_v10 = vmul.f32 %v9505_v46, %v11885_v62 }
 0x6b2   : > { %9506 = vrcp.f32 %v3729_v19 }
 0x6b3   : > { %9508 = vpow2.f32 %v3670_v61  ;;  %v3850_v37 = vpack.c.bf16 %v3818_v10, %v3818_v10 }
 0x6b4   : > { %9510 = vpow2.f32 %v2510_v38  ;;  %v3491_v38 = vpop.f32.mrf.mxu1 }
 0x6b5   : > { %v3898_v61 = vunpack.c.l.b16 %v3850_v37  ;;  %v12009_v14 = vpop.f32.mrf.mxu3 }
 0x6b8   : > { %v9507_v20 = vpop.eup %9506  ;;  %v2413_v40 = vpop.xlane.xlu1 %2412 }
 0x6b9   : > { %v2464_v58 = vsub.f32 %v11895_v45, %v2413_v40  ;;  %3592 = vmax.xlane.f32.xlu1 %v11992_v1  ;;  %v3819_v34 = vmul.f32 %v9507_v20, %v11890_v55  ;;  %v11998_v22 = vpop.eup %9508  ;;  %v3674_v45 = vmul.f32 1.442695, %v3632_v47 }
 0x6ba   : > { %v12003_v35 = vpop.eup %9510 }
 0x6bb   : > { %v2508_v62 = vmul.f32 1.442695, %v2464_v58  ;;  %v3851_v50 = vpack.c.bf16 %v3819_v34, %v3819_v34  ;;  %v12018_v34 = vmul.f32 0.17677669, %v3491_v38 }
 0x6bc   : > { %3734 = vadd.xlane.f32.xlu2 %v11998_v22 }
 0x6bd   : > { %9512 = vpow2.f32 %v2508_v62  ;;  %v3899_v19 = vunpack.c.l.b16 %v3851_v50 }
 0x6be   : > { %9514 = vpow2.f32 %v3674_v45 }
 0x6bf   : > { %v3912_v46 = vpack.c.b16 %v3899_v19, %v3898_v61 }
 0x6c0   : > { %v2417_v55 = vpop.xlane.xlu1 %2416 }
 0x6c1   : > { %2574 = vadd.xlane.f32.xlu1 %v12003_v35  ;;  %3968 = vmatmul.bf16.gmra.mxu0 %v3912_v46  ;;  %v2466_v10 = vsub.f32 %v11898_v18, %v2417_v55 }
 0x6c3   : > { %v12006_v43 = vpop.eup %9512  ;;  %v2512_v58 = vmul.f32 1.442695, %v2466_v10 }
 0x6c4   : > { %2572 = vadd.xlane.f32.xlu0 %v12006_v43  ;;  %v4324_v36 = vpop.permute.xlu0 %4323  ;;  %v12013_v20 = vpop.eup %9514 }
 0x6c5   : > { %8699 = vmatmul.msk.bf16.gmra.mxu3 %vm1161_vm0, %v4324_v36  ;;  %9516 = vpow2.f32 %v2512_v58 }
 0x6c8   : > { %v12015_v40 = vpop.xlane.xlu1 %2418 }
 0x6c9   : > { %3738 = vadd.xlane.f32.xlu1 %v12013_v20 }
 0x6cb   : > { %v12021_v47 = vpop.eup %9516 }
 0x6cc   : > { %3594 = vmax.xlane.f32.xlu0 %v12018_v34 }
 0x6d0   : > { %v2565_v37 = vpop.xlane.xlu1 %2564 }
 0x6d4   : > { %2576 = vadd.xlane.f32.xlu0 %v12021_v47 }
 0x6d8   : > { %v3585_v18 = vpop.xlane.xlu1 %3584 }
 0x6d9   : > { %v3635_v10 = vsub.f32 %v11920_v60, %v3585_v18 }
 0x6de   : > { %v3581_v62 = vpop.xlane.xlu2 %3580 }
 0x6df   : > { %v3633_v50 = vsub.f32 %v11923_v25, %v3581_v62  ;;  %v12032_v25 = vpop.f32.mrf.mxu3 }
 0x6e0   : > { %v3733_v19 = vpop.xlane.xlu1 %3732  ;;  %15166 = vst [vmem:[#allocation35_spill] sm:$0xff] %v12032_v25 }
 0x6e1   : > { %v3676_v61 = vmul.f32 1.442695, %v3633_v50 }
 0x6e2   : > { %4329 = vrot.lane.b32.xlu1 %v15107_v26, %s10263_s23  ;;  %v3680_v26 = vmul.f32 1.442695, %v3635_v10 }
 0x6e3   : > { %9518 = vpow2.f32 %v3676_v61 }
 0x6e4   : > { %9520 = vrcp.f32 %v3733_v19 }
 0x6e5   : > { %9522 = vrcp.f32 %v2565_v37 }
 0x6e6   : > { %v3583_v45 = vpop.xlane.xlu2 %3582 }
 0x6e7   : > { %v3634_v46 = vsub.f32 %v11933_v17, %v3583_v45 }
 0x6e9   : > { %v12028_v55 = vpop.eup %9518  ;;  %v3678_v36 = vmul.f32 1.442695, %v3634_v46 }
 0x6ea   : > { %3740 = vadd.xlane.f32.xlu2 %v12028_v55  ;;  %v9521_v58 = vpop.eup %9520 }
 0x6eb   : > { %9524 = vpow2.f32 %v3678_v36  ;;  %v9523_v50 = vpop.eup %9522  ;;  %v3821_v37 = vmul.f32 %v9521_v58, %v11928_v7  ;;  %v12040_v36 = vpop.f32.mrf.mxu3 }
 0x6ec   : > { %v2652_v61 = vmul.f32 %v9523_v50, %v11913_v39 }
 0x6ed   : > { %v3853_v46 = vpack.c.bf16 %v3821_v37, %v3821_v37 }
 0x6ee   : > { %v3731_v38 = vpop.xlane.xlu2 %3730  ;;  %v2684_v10 = vpack.c.bf16 %v2652_v61, %v2652_v61 }
 0x6ef   : > { %9526 = vrcp.f32 %v3731_v38  ;;  %v2567_v62 = vpop.xlane.xlu0 %2566  ;;  %v3901_v58 = vunpack.c.l.b16 %v3853_v46 }
 0x6f0   : > { %9528 = vrcp.f32 %v2567_v62 }
 0x6f1   : > { %v12034_v17 = vpop.eup %9524  ;;  %9530 = vpow2.f32 %v3680_v26  ;;  %v2732_v26 = vunpack.c.l.b16 %v2684_v10 }
 0x6f2   : > { %3742 = vadd.xlane.f32.xlu0 %v12034_v17 }
 0x6f3   : > { %v12047_v37 = vpop.f32.mrf.mxu3 }
 0x6f4   : > { %15167 = vst [vmem:[#allocation34_spill] sm:$0xff] %v12047_v37 }
 0x6f5   : > { %v9527_v60 = vpop.eup %9526 }
 0x6f6   : > { %v9529_v18 = vpop.eup %9528  ;;  %v4326_v19 = vpop.permute.xlu2 %4325  ;;  %v3820_v45 = vmul.f32 %v9527_v60, %v11938_v13 }
 0x6f7   : > { %v2653_v38 = vmul.f32 %v9529_v18, %v11940_v32  ;;  %8700 = vmatmul.msk.bf16.gmra.mxu3 %vm1161_vm0, %v4326_v19  ;;  %v12044_v25 = vpop.eup %9530  ;;  %v12049_v61 = vpop.xlane.xlu0 %3588 }
 0x6f8   : > { %v3852_v62 = vpack.c.bf16 %v3820_v45, %v3820_v45  ;;  %v3493_v60 = vpop.f32.mrf.mxu1 }
 0x6f9   : > { %v2685_v7 = vpack.c.bf16 %v2653_v38, %v2653_v38  ;;  %v12053_v18 = vmul.f32 0.17677669, %v3493_v60  ;;  %v15169_v60 = vld [vmem:[#allocation65_spill] sm:$0xff] }
 0x6fa   : > { %3744 = vadd.xlane.f32.xlu0 %v12044_v25  ;;  %v3900_v39 = vunpack.c.l.b16 %v3852_v62 }
 0x6fb   : > { %v2733_v50 = vunpack.c.l.b16 %v2685_v7  ;;  %v12057_v45 = vpop.f32.mrf.mxu3 }
 0x6fc   : > { %v3913_v23 = vpack.c.b16 %v3901_v58, %v3900_v39  ;;  %15168 = vst [vmem:[#allocation69_spill] sm:$0xff] %v12057_v45 }
 0x6fd   : > { %v2744_v13 = vpack.c.b16 %v2733_v50, %v2732_v26 }
 0x6fe   : > { %3973 = vmatmul.bf16.gmra.mxu0 %v3913_v23 }
 0x6ff   : > { %2808 = vmatmul.bf16.vlgmr.msra.gmra.mxu2 %v2744_v13  ;;  %v2467_v13 = vsub.f32 %v11907_v42, %v12015_v40 }
 0x702   : > { %4480 = vrot.lane.b32.xlu2 %v15108_v54, %s10263_s23 }
 0x704   : > { %v2569_v32 = vpop.xlane.xlu1 %2568 }
 0x705   : > { %9532 = vrcp.f32 %v2569_v32 }
 0x70a   : > { %4478 = vrot.lane.b32.xlu2 %v15109_v24, %s10263_s23  ;;  %v4328_v19 = vpop.permute.xlu0 %4327 }
 0x70b   : > { %8701 = vmatmul.msk.bf16.gmra.mxu3 %vm1161_vm0, %v4328_v19  ;;  %v9533_v46 = vpop.eup %9532 }
 0x70c   : > { %v2571_v23 = vpop.xlane.xlu1 %2570  ;;  %3596 = vmax.xlane.f32.xlu1 %v12053_v18  ;;  %v2654_v54 = vmul.f32 %v9533_v46, %v11958_v5  ;;  %v3496_v5 = vpop.f32.mrf.mxu1 }
 0x70d   : > { %9534 = vrcp.f32 %v2571_v23 }
 0x70e   : > { %4331 = vrot.lane.b32.xlu0 %v15111_v28, %s10263_s23  ;;  %v2686_v24 = vpack.c.bf16 %v2654_v54, %v2654_v54  ;;  %v2514_v28 = vmul.f32 1.442695, %v2467_v13 }
 0x710   : > { %v2734_v39 = vunpack.c.l.b16 %v2686_v24 }
 0x713   : > { %v9535_v10 = vpop.eup %9534 }
 0x714   : > { %v3587_v38 = vpop.xlane.xlu1 %3586  ;;  %v2655_v62 = vmul.f32 %v9535_v10, %v11965_v49  ;;  %v12081_v10 = vmul.f32 0.17677669, %v3496_v5 }
 0x716   : > { %v2687_v7 = vpack.c.bf16 %v2655_v62, %v2655_v62  ;;  %v3498_v62 = vpop.f32.mrf.mxu1 }
 0x718   : > { %v2735_v58 = vunpack.c.l.b16 %v2687_v7 }
 0x71a   : > { %v2745_v26 = vpack.c.b16 %v2735_v58, %v2734_v39  ;;  %v12085_v58 = vmul.f32 0.17677669, %v3498_v62  ;;  %v12090_v62 = vpop.f32.mrf.mxu3 }
 0x71b   : > { %15171 = vst [vmem:[#allocation65_spill] sm:$0xff] %v12090_v62 }
 0x71c   : > { %v3737_v50 = vpop.xlane.xlu1 %3736  ;;  %2813 = vmatmul.bf16.gmra.mxu2 %v2745_v26 }
 0x71d   : > { %9536 = vrcp.f32 %v3737_v50 }
 0x71e   : > { %9538 = vpow2.f32 %v2514_v28 }
 0x723   : > { %v9537_v23 = vpop.eup %9536 }
 0x724   : > { %v12067_v32 = vpop.xlane.xlu1 %3590  ;;  %v12075_v46 = vpop.eup %9538  ;;  %v3823_v42 = vmul.f32 %v9537_v23, %v11983_v4 }
 0x725   : > { %4476 = vrot.lane.b32.xlu1 %v15115_v44, %s10263_s23  ;;  %v15170_v44 = vld [vmem:[#allocation62_spill] sm:$0xff] }
 0x726   : > { %v3855_v39 = vpack.c.bf16 %v3823_v42, %v3823_v42 }
 0x728   : > { %v3903_v13 = vunpack.c.l.b16 %v3855_v39  ;;  %v3636_v39 = vsub.f32 %v11973_v56, %v3587_v38 }
 0x72c   : > { %v12071_v49 = vpop.xlane.xlu1 %3592 }
 0x72d   : > { %4061 = vrot.lane.b32.xlu1 %v15169_v60, %s10262_s19 }
 0x72f   : > { %v3735_v19 = vpop.xlane.xlu2 %3734 }
 0x730   : > { %9540 = vrcp.f32 %v3735_v19 }
 0x733   : > { %2578 = vadd.xlane.f32.xlu2 %v12075_v46 }
 0x734   : > { %v2575_v40 = vpop.xlane.xlu1 %2574 }
 0x735   : > { %9542 = vrcp.f32 %v2575_v40  ;;  %4059 = vrot.lane.b32.xlu1 %v15170_v44, %s10262_s19 }
 0x736   : > { %v9541_v54 = vpop.eup %9540 }
 0x737   : > { %v2573_v24 = vpop.xlane.xlu0 %2572  ;;  %v3822_v7 = vmul.f32 %v9541_v54, %v11998_v22 }
 0x738   : > { %9544 = vrcp.f32 %v2573_v24  ;;  %3598 = vmax.xlane.f32.xlu0 %v12081_v10 }
 0x739   : > { %v3854_v26 = vpack.c.bf16 %v3822_v7, %v3822_v7 }
 0x73b   : > { %v9543_v4 = vpop.eup %9542  ;;  %3600 = vmax.xlane.f32.xlu2 %v12085_v58  ;;  %v3902_v50 = vunpack.c.l.b16 %v3854_v26 }
 0x73c   : > { %v2657_v28 = vmul.f32 %v9543_v4, %v12003_v35  ;;  %v3739_v7 = vpop.xlane.xlu1 %3738  ;;  %v3682_v35 = vmul.f32 1.442695, %v3636_v39  ;;  %v12101_v4 = vpop.f32.mrf.mxu3 }
 0x73d   : > { %v3914_v5 = vpack.c.b16 %v3903_v13, %v3902_v50  ;;  %15172 = vst [vmem:[#allocation62_spill] sm:$0xff] %v12101_v4 }
 0x73e   : > { %v9545_v19 = vpop.eup %9544  ;;  %v2689_v22 = vpack.c.bf16 %v2657_v28, %v2657_v28  ;;  %9546 = vpow2.f32 %v3682_v35  ;;  %v3501_v28 = vpop.f32.mrf.mxu1 }
 0x73f   : > { %3978 = vmatmul.bf16.gmra.mxu0 %v3914_v5  ;;  %v2656_v23 = vmul.f32 %v9545_v19, %v12006_v43  ;;  %v12095_v26 = vpop.xlane.xlu0 %3594  ;;  %9548 = vrcp.f32 %v3739_v7 }
 0x740   : > { %v2737_v54 = vunpack.c.l.b16 %v2689_v22  ;;  %v12116_v22 = vmul.f32 0.17677669, %v3501_v28 }
 0x741   : > { %v2688_v42 = vpack.c.bf16 %v2656_v23, %v2656_v23  ;;  %v15174_v23 = vld [vmem:[#allocation58_spill] sm:$0xff] }
 0x743   : > { %v2736_v40 = vunpack.c.l.b16 %v2688_v42 }
 0x744   : > { %v12106_v56 = vpop.eup %9546 }
 0x745   : > { %v2746_v24 = vpack.c.b16 %v2737_v54, %v2736_v40  ;;  %v9549_v13 = vpop.eup %9548 }
 0x747   : > { %2818 = vmatmul.bf16.gmra.mxu2 %v2746_v24  ;;  %v12108_v38 = vpop.xlane.xlu0 %2576 }
 0x74c   : > { %4333 = vrot.lane.b32.xlu0 %v15113_v27, %s10263_s23  ;;  %v15173_v27 = vld [vmem:[#allocation60_spill] sm:$0xff] }
 0x753   : > { %4474 = vrot.lane.b32.xlu2 %v15117_v21, %s10263_s23  ;;  %v3638_v21 = vsub.f32 %v11987_v30, %v12067_v32 }
 0x754   : > { %4472 = vrot.lane.b32.xlu0 %v15120_v53, %s10263_s23  ;;  %v4330_v43 = vpop.permute.xlu1 %4329  ;;  %v3824_v53 = vmul.f32 %v9549_v13, %v12013_v20 }
 0x755   : > { %8702 = vmatmul.msk.bf16.gmra.mxu3 %vm1161_vm0, %v4330_v43  ;;  %v3686_v5 = vmul.f32 1.442695, %v3638_v21 }
 0x756   : > { %v3856_v24 = vpack.c.bf16 %v3824_v53, %v3824_v53 }
 0x758   : > { %v3904_v20 = vunpack.c.l.b16 %v3856_v24 }
 0x75c   : > { %4057 = vrot.lane.b32.xlu0 %v15173_v27, %s10262_s19 }
 0x75d   : > { %v3741_v50 = vpop.xlane.xlu2 %3740 }
 0x75e   : > { %9550 = vrcp.f32 %v3741_v50 }
 0x75f   : > { %3746 = vadd.xlane.f32.xlu1 %v12106_v56  ;;  %9552 = vpow2.f32 %v3686_v5 }
 0x764   : > { %v9551_v19 = vpop.eup %9550  ;;  %4055 = vrot.lane.b32.xlu0 %v15174_v23, %s10262_s19 }
 0x765   : > { %v4481_v42 = vpop.permute.xlu2 %4480  ;;  %v3743_v40 = vpop.xlane.xlu0 %3742  ;;  %v3825_v54 = vmul.f32 %v9551_v19, %v12028_v55  ;;  %v3637_v55 = vsub.f32 %v11947_v3, %v12049_v61 }
 0x766   : > { %v4528_v7 = vsel %vm1161_vm0, %v4481_v42, 0  ;;  %9554 = vrcp.f32 %v3743_v40  ;;  %v12123_v35 = vpop.eup %9552  ;;  %v12133_v61 = vpop.f32.mrf.mxu3 }
 0x767   : > { %4530 = vmatpush.bf16.xpose.msra.mxu0 %v4528_v7  ;;  %3602 = vmax.xlane.f32.xlu1 %v12116_v22  ;;  %v3857_v30 = vpack.c.bf16 %v3825_v54, %v3825_v54  ;;  %v3684_v53 = vmul.f32 1.442695, %v3637_v55  ;;  %15175 = vst [vmem:[#allocation60_spill] sm:$0xff] %v12133_v61 }
 0x769   : > { %v3905_v32 = vunpack.c.l.b16 %v3857_v30 }
 0x76b   : > { %v3915_v39 = vpack.c.b16 %v3905_v32, %v3904_v20 }
 0x76c   : > { %4470 = vrot.lane.b32.xlu0 %v15126_v48, %s10263_s23  ;;  %v9555_v13 = vpop.eup %9554 }
 0x76d   : > { %v4479_v43 = vpop.permute.xlu2 %4478  ;;  %3983 = vmatmul.bf16.gmra.mxu0 %v3915_v39  ;;  %v3745_v50 = vpop.xlane.xlu0 %3744  ;;  %v3826_v28 = vmul.f32 %v9555_v13, %v12034_v17  ;;  %v9029_v39 = vld [vmem:[#allocation10 + $0x18] sm:$0xff] }
 0x76e   : > { %9556 = vrcp.f32 %v3745_v50  ;;  %v4525_v21 = vsel %vm1161_vm0, %v4479_v43, 0  ;;  %v3503_v17 = vpop.f32.mrf.mxu1  ;;  %v12142_v7 = vpop.f32.mrf.mxu3  ;;  %3036 = vmatpush.bf16.msrb.mxu2 %v9029_v39  ;;  %v9028_v43 = vld [vmem:[#allocation10 + $0x10] sm:$0xff] }
 0x76f   : > { %4531 = vmatpush.bf16.xpose.msra.mxu0 %v4525_v21  ;;  %3750 = vadd.xlane.f32.xlu1 %v12123_v35  ;;  %9558 = vpow2.f32 %v3684_v53  ;;  %v3858_v3 = vpack.c.bf16 %v3826_v28, %v3826_v28  ;;  %15176 = vst [vmem:[#allocation58_spill] sm:$0xff] %v12142_v7  ;;  %v12145_v20 = vmul.f32 0.17677669, %v3503_v17  ;;  %v3640_v53 = vsub.f32 %v12018_v34, %v12095_v26 }
 0x771   : > { %v3906_v42 = vunpack.c.l.b16 %v3858_v3 }
 0x772   : > { %3037 = vmatpush.bf16.msrb.mxu2 %v9028_v43 }
 0x774   : > { %v9557_v5 = vpop.eup %9556  ;;  %4335 = vrot.lane.b32.xlu0 %v15118_v52, %s10263_s23  ;;  %v3639_v52 = vsub.f32 %v11992_v1, %v12071_v49 }
 0x775   : > { %v3827_v48 = vmul.f32 %v9557_v5, %v12044_v25  ;;  %v12135_v54 = vpop.eup %9558 }
 0x776   : > { %v3688_v30 = vmul.f32 1.442695, %v3639_v52  ;;  %v3506_v50 = vpop.f32.mrf.mxu1  ;;  %v12168_v26 = vpop.f32.mrf.mxu3 }
 0x777   : > { %v3859_v19 = vpack.c.bf16 %v3827_v48, %v3827_v48  ;;  %v3690_v48 = vmul.f32 1.442695, %v3640_v53  ;;  %15177 = vst [vmem:[#allocation70_spill] sm:$0xff] %v12168_v26  ;;  %v2950_v53 = vpack.c.bf16 %v11679_v51, %v11675_v59 }
 0x778   : > { %9560 = vpow2.f32 %v3688_v30 }
 0x779   : > { %v3907_v40 = vunpack.c.l.b16 %v3859_v19  ;;  %9562 = vrcp.f32 %v12108_v38 }
 0x77b   : > { %v3916_v24 = vpack.c.b16 %v3907_v40, %v3906_v42 }
 0x77c   : > { %4468 = vrot.lane.b32.xlu0 %v15123_v63, %s10263_s23  ;;  %3748 = vadd.xlane.f32.xlu2 %v12135_v54 }
 0x77d   : > { %3988 = vmatmul.bf16.gmra.mxu0 %v3916_v24  ;;  %v12165_v24 = vmul.f32 0.17677669, %v3506_v50 }
 0x77e   : > { %v12152_v63 = vpop.eup %9560  ;;  %v3508_v19 = vpop.f32.mrf.mxu1 }
 0x77f   : > { %v3597_v1 = vpop.xlane.xlu1 %3596  ;;  %v9563_v21 = vpop.eup %9562 }
 0x780   : > { %v4332_v25 = vpop.permute.xlu0 %4331  ;;  %v2658_v5 = vmul.f32 %v9563_v21, %v12021_v47 }
 0x781   : > { %8703 = vmatmul.msk.bf16.gmra.mxu3 %vm1161_vm0, %v4332_v25 }
 0x782   : > { %v2690_v40 = vpack.c.bf16 %v2658_v5, %v2658_v5  ;;  %v3641_v5 = vsub.f32 %v12053_v18, %v3597_v1 }
 0x784   : > { %4049 = vrot.lane.b32.xlu0 %v11026_v57, %s10262_s19  ;;  %3604 = vmax.xlane.f32.xlu2 %v12145_v20  ;;  %v2738_v17 = vunpack.c.l.b16 %v2690_v40 }
 0x788   : > { %4053 = vrot.lane.b32.xlu1 %v11014_v31, %s10262_s19 }
 0x78c   : > { %4047 = vrot.lane.b32.xlu0 %v11031_v33, %s10262_s19  ;;  %3752 = vadd.xlane.f32.xlu2 %v12152_v63 }
 0x797   : > { %v4477_v49 = vpop.permute.xlu1 %4476 }
 0x798   : > { %v4522_v32 = vsel %vm1161_vm0, %v4477_v49, 0 }
 0x799   : > { %4532 = vmatpush.bf16.xpose.msra.mxu0 %v4522_v32 }
 0x79f   : > { %v4062_v55 = vpop.permute.xlu1 %4061 }
 0x7a0   : > { %4071 = vmatpush.bf16.msrb.mxu1 %v4062_v55  ;;  %v12176_v55 = vpop.f32.mrf.mxu3 }
 0x7a1   : > { %15178 = vst [vmem:[#allocation71_spill] sm:$0xff] %v12176_v55 }
 0x7a4   : > { %4051 = vrot.lane.b32.xlu2 %v11017_v2, %s10262_s19 }
 0x7a6   : > { %v2579_v13 = vpop.xlane.xlu2 %2578 }
 0x7a7   : > { %9564 = vrcp.f32 %v2579_v13  ;;  %v4060_v28 = vpop.permute.xlu1 %4059 }
 0x7a8   : > { %4072 = vmatpush.bf16.msrb.mxu1 %v4060_v28  ;;  %9566 = vpow2.f32 %v3690_v48 }
 0x7ab   : > { %v3599_v47 = vpop.xlane.xlu0 %3598 }
 0x7ad   : > { %v9565_v3 = vpop.eup %9564 }
 0x7ae   : > { %v3601_v42 = vpop.xlane.xlu2 %3600  ;;  %v2659_v38 = vmul.f32 %v9565_v3, %v12075_v46  ;;  %v12170_v30 = vpop.eup %9566 }
 0x7af   : > { %v3511_v46 = vpop.f32.mrf.mxu1  ;;  %v3643_v50 = vsub.f32 %v12085_v58, %v3601_v42  ;;  %v12188_v3 = vpop.f32.mrf.mxu3  ;;  %v3692_v42 = vmul.f32 1.442695, %v3641_v5  ;;  %v15184_v5 = vld [vmem:[#allocation48_spill] sm:$0xff] }
 0x7b0   : > { %v2691_v52 = vpack.c.bf16 %v2659_v38, %v2659_v38  ;;  %v12174_v39 = vmul.f32 0.17677669, %v3511_v46  ;;  %15179 = vst [vmem:[#allocation72_spill] sm:$0xff] %v12188_v3  ;;  %v12191_v38 = vmul.f32 0.17677669, %v3508_v19  ;;  %v2951_v19 = vpack.c.bf16 %v11693_v0, %v11683_v29  ;;  %v15201_v3 = vld [vmem:[#allocation57_spill] sm:$0xff] }
 0x7b1   : > { %v3696_v21 = vmul.f32 1.442695, %v3643_v50 }
 0x7b2   : > { %3606 = vmax.xlane.f32.xlu1 %v12165_v24  ;;  %v2739_v34 = vunpack.c.l.b16 %v2691_v52 }
 0x7b3   : > { %9568 = vpow2.f32 %v3696_v21 }
 0x7b4   : > { %v2747_v25 = vpack.c.b16 %v2739_v34, %v2738_v17  ;;  %9570 = vpow2.f32 %v3692_v42  ;;  %v2809_v42 = vpop.f32.mrf.mxu2 }
 0x7b6   : > { %v4475_v49 = vpop.permute.xlu2 %4474  ;;  %3754 = vadd.xlane.f32.xlu0 %v12170_v30  ;;  %2823 = vmatmul.bf16.gmra.mxu2 %v2747_v25 }
 0x7b7   : > { %v4519_v32 = vsel %vm1161_vm0, %v4475_v49, 0  ;;  %v3513_v13 = vpop.f32.mrf.mxu1  ;;  %v12199_v18 = vpop.f32.mrf.mxu3 }
 0x7b8   : > { %4533 = vmatpush.bf16.xpose.msra.mxu0 %v4519_v32  ;;  %v12183_v28 = vmul.f32 0.17677669, %v3513_v13  ;;  %15180 = vst [vmem:[#allocation73_spill] sm:$0xff] %v12199_v18  ;;  %v3642_v13 = vsub.f32 %v12081_v10, %v3599_v47 }
 0x7b9   : > { %v12195_v59 = vpop.eup %9568 }
 0x7ba   : > { %v12201_v52 = vpop.eup %9570  ;;  %v3694_v21 = vmul.f32 1.442695, %v3642_v13 }
 0x7be   : > { %3610 = vmax.xlane.f32.xlu0 %v12174_v39  ;;  %v4334_v43 = vpop.permute.xlu0 %4333 }
 0x7bf   : > { %8704 = vmatmul.msk.bf16.gmra.mxu3 %vm1161_vm0, %v4334_v43  ;;  %v3516_v1 = vpop.f32.mrf.mxu1  ;;  %v12210_v34 = vpop.f32.mrf.mxu3  ;;  %v2952_v43 = vpack.c.bf16 %v11712_v6, %v11703_v41 }
 0x7c0   : > { %v12205_v17 = vmul.f32 0.17677669, %v3516_v1  ;;  %15181 = vst [vmem:[#allocation74_spill] sm:$0xff] %v12210_v34 }
 0x7c6   : > { %3612 = vmax.xlane.f32.xlu0 %v12183_v28  ;;  %8618 = vmatmul.msk.bf16.vlgmr.msrb.gmra.mxu2 %vm1161_vm0, %v2950_v53  ;;  %v4473_v48 = vpop.permute.xlu0 %4472 }
 0x7c7   : > { %v4516_v58 = vsel %vm1161_vm0, %v4473_v48, 0  ;;  %v12214_v0 = vpop.f32.mrf.mxu3  ;;  %v12228_v48 = vpop.f32.mrf.mxu1 }
 0x7c8   : > { %4534 = vmatpush.bf16.xpose.msra.mxu0 %v4516_v58  ;;  %15182 = vst [vmem:[#allocation75_spill] sm:$0xff] %v12214_v0 }
 0x7cb   : > { %4466 = vrot.lane.b32.xlu1 %v15124_v11, %s10263_s23 }
 0x7cd   : > { %3608 = vmax.xlane.f32.xlu2 %v12191_v38 }
 0x7ce   : > { %3760 = vadd.xlane.f32.xlu0 %v12195_v59  ;;  %v4058_v51 = vpop.permute.xlu0 %4057 }
 0x7cf   : > { %4073 = vmatpush.bf16.msrb.mxu1 %v4058_v51  ;;  %v12224_v53 = vpop.f32.mrf.mxu3 }
 0x7d0   : > { %15183 = vst [vmem:[#allocation76_spill] sm:$0xff] %v12224_v53  ;;  %v15200_v53 = vld [vmem:[#allocation68_spill] sm:$0xff] }
 0x7d2   : > { %v3747_v40 = vpop.xlane.xlu1 %3746 }
 0x7d5   : > { %3756 = vadd.xlane.f32.xlu2 %v12201_v52 }
 0x7d6   : > { %3614 = vmax.xlane.f32.xlu0 %v12205_v17  ;;  %8619 = vmatmul.msk.bf16.gmra.mxu2 %vm1161_vm0, %v2951_v19  ;;  %v4056_v11 = vpop.permute.xlu0 %4055  ;;  %v15186_v19 = vld [vmem:[#allocation33_spill] sm:$0xff] }
 0x7d7   : > { %4074 = vmatpush.bf16.msrb.mxu1 %v4056_v11 }
 0x7da   : > { %v3603_v25 = vpop.xlane.xlu1 %3602 }
 0x7db   : > { %v3644_v49 = vsub.f32 %v12116_v22, %v3603_v25  ;;  %v15187_v25 = vld [vmem:[#allocation50_spill] sm:$0xff] }
 0x7dd   : > { %v3698_v46 = vmul.f32 1.442695, %v3644_v49 }
 0x7de   : > { %v4471_v32 = vpop.permute.xlu0 %4470 }
 0x7df   : > { %9572 = vpow2.f32 %v3698_v46  ;;  %v4513_v29 = vsel %vm1161_vm0, %v4471_v32, 0  ;;  %v3521_v46 = vpop.f32.mrf.mxu1  ;;  %v12240_v32 = vpop.f32.mrf.mxu3 }
 0x7e0   : > { %4535 = vmatpush.bf16.xpose.msra.mxu0 %v4513_v29  ;;  %9574 = vrcp.f32 %v3747_v40  ;;  %v15185_v40 = vld [vmem:[#allocation63_spill] sm:$0xff]  ;;  %15188 = vst [vmem:[#allocation48_spill] sm:$0xff] %v12240_v32 }
 0x7e1   : > { %9576 = vpow2.f32 %v3694_v21  ;;  %v2953_v11 = vpack.c.bf16 %v15186_v19, %v15185_v40 }
 0x7e2   : > { %v3751_v58 = vpop.xlane.xlu1 %3750 }
 0x7e5   : > { %v12218_v50 = vpop.eup %9572 }
 0x7e6   : > { %3762 = vadd.xlane.f32.xlu0 %v12218_v50  ;;  %8620 = vmatmul.msk.bf16.gmra.mxu2 %vm1161_vm0, %v2952_v43  ;;  %v4336_v22 = vpop.permute.xlu0 %4335  ;;  %v9575_v47 = vpop.eup %9574 }
 0x7e7   : > { %8705 = vmatmul.msk.bf16.gmra.mxu3 %vm1161_vm0, %v4336_v22  ;;  %v3828_v51 = vmul.f32 %v9575_v47, %v12106_v56  ;;  %v12232_v1 = vpop.eup %9576  ;;  %v2811_v47 = vpop.f32.mrf.mxu2 }
 0x7e8   : > { %v12247_v19 = vpop.f32.mrf.mxu3 }
 0x7e9   : > { %v3860_v56 = vpack.c.bf16 %v3828_v51, %v3828_v51  ;;  %15189 = vst [vmem:[#allocation63_spill] sm:$0xff] %v12247_v19  ;;  %v3523_v51 = vpop.f32.mrf.mxu1 }
 0x7ed   : > { %4450 = vrot.lane.b32.xlu2 %v15184_v5, %s10263_s23 }
 0x7ee   : > { %v4469_v41 = vpop.permute.xlu0 %4468 }
 0x7ef   : > { %v3749_v6 = vpop.xlane.xlu2 %3748  ;;  %v4510_v10 = vsel %vm1161_vm0, %v4469_v41, 0  ;;  %v12244_v41 = vmul.f32 0.17677669, %v3521_v46  ;;  %v2814_v46 = vpop.f32.mrf.mxu2 }
 0x7f0   : > { %9578 = vrcp.f32 %v3749_v6  ;;  %4536 = vmatpush.bf16.xpose.msra.mxu0 %v4510_v10  ;;  %v3908_v6 = vunpack.c.l.b16 %v3860_v56 }
 0x7f5   : > { %4452 = vrot.lane.b32.xlu2 %v15187_v25, %s10263_s23  ;;  %3758 = vadd.xlane.f32.xlu1 %v12232_v1 }
 0x7f6   : > { %v9579_v49 = vpop.eup %9578  ;;  %8621 = vmatmul.msk.bf16.gmra.mxu2 %vm1161_vm0, %v2953_v11  ;;  %v12251_v11 = vmul.f32 0.17677669, %v3523_v51 }
 0x7f7   : > { %v3605_v29 = vpop.xlane.xlu2 %3604  ;;  %v3829_v43 = vmul.f32 %v9579_v49, %v12135_v54  ;;  %v2954_v49 = vpack.c.bf16 %v2811_v47, %v2809_v42  ;;  %v2816_v42 = vpop.f32.mrf.mxu2 }
 0x7f8   : > { %v3645_v13 = vsub.f32 %v12145_v20, %v3605_v29  ;;  %v4050_v29 = vpop.permute.xlu0 %4049  ;;  %v2955_v51 = vpack.c.bf16 %v2816_v42, %v2814_v46 }
 0x7f9   : > { %v3861_v22 = vpack.c.bf16 %v3829_v43, %v3829_v43 }
 0x7fa   : > { %v3700_v21 = vmul.f32 1.442695, %v3645_v13  ;;  %v4054_v5 = vpop.permute.xlu1 %4053 }
 0x7fb   : > { %4075 = vmatpush.bf16.msrb.mxu1 %v4054_v5  ;;  %v3909_v10 = vunpack.c.l.b16 %v3861_v22  ;;  %v12258_v22 = vpop.f32.mrf.mxu3 }
 0x7fc   : > { %9580 = vpow2.f32 %v3700_v21  ;;  %15190 = vst [vmem:[#allocation33_spill] sm:$0xff] %v12258_v22 }
 0x7fd   : > { %3618 = vmax.xlane.f32.xlu1 %v12244_v41  ;;  %v3917_v40 = vpack.c.b16 %v3909_v10, %v3908_v6  ;;  %9582 = vrcp.f32 %v3751_v58 }
 0x7ff   : > { %v3753_v54 = vpop.xlane.xlu2 %3752  ;;  %3993 = vmatmul.bf16.gmra.mxu0 %v3917_v40 }
 0x800   : > { %9584 = vrcp.f32 %v3753_v54  ;;  %v4048_v47 = vpop.permute.xlu0 %4047 }
 0x802   : > { %v12249_v20 = vpop.eup %9580 }
 0x803   : > { %3764 = vadd.xlane.f32.xlu0 %v12249_v20  ;;  %v9583_v25 = vpop.eup %9582  ;;  %v12260_v54 = vpop.f32.mrf.mxu3 }
 0x804   : > { %v3830_v58 = vmul.f32 %v9583_v25, %v12123_v35  ;;  %15191 = vst [vmem:[#allocation50_spill] sm:$0xff] %v12260_v54  ;;  %v2819_v35 = vpop.f32.mrf.mxu2  ;;  %v12266_v25 = vmul.f32 0.17677669, %v12228_v48 }
 0x805   : > { %3620 = vmax.xlane.f32.xlu1 %v12251_v11 }
 0x806   : > { %v9585_v43 = vpop.eup %9584  ;;  %8622 = vmatmul.msk.bf16.gmra.mxu2 %vm1161_vm0, %v2954_v49  ;;  %v3862_v5 = vpack.c.bf16 %v3830_v58, %v3830_v58 }
 0x807   : > { %v3831_v56 = vmul.f32 %v9585_v43, %v12152_v63  ;;  %v4052_v13 = vpop.permute.xlu2 %4051  ;;  %v15192_v63 = vld [vmem:[#allocation53_spill] sm:$0xff] }
 0x808   : > { %4076 = vmatpush.bf16.msrb.mxu1 %v4052_v13  ;;  %v4015_v10 = vunpack.c.l.b16 %v3862_v5 }
 0x809   : > { %v3863_v21 = vpack.c.bf16 %v3831_v56, %v3831_v56 }
 0x80b   : > { %v4016_v6 = vunpack.c.l.b16 %v3863_v21  ;;  %v12268_v49 = vpop.f32.mrf.mxu3 }
 0x80c   : > { %4077 = vmatpush.bf16.msrb.mxu1 %v4050_v29  ;;  %15193 = vst [vmem:[#allocation53_spill] sm:$0xff] %v12268_v49  ;;  %v15194_v29 = vld [vmem:[#allocation56_spill] sm:$0xff]  ;;  %v2821_v43 = vpop.f32.mrf.mxu2 }
 0x80d   : > { %v4031_v40 = vpack.c.b16 %v4016_v6, %v4015_v10  ;;  %v2956_v58 = vpack.c.bf16 %v2821_v43, %v2819_v35 }
 0x810   : > { %4078 = vmatpush.bf16.msrb.mxu1 %v4048_v47 }
 0x813   : > { %4079 = vmatmul.bf16.vlgmr.msrb.gmra.mxu1 %v4031_v40  ;;  %v4410_v56 = vpop.f32.mrf.mxu3 }
 0x816   : > { %8623 = vmatmul.msk.bf16.gmra.mxu2 %vm1161_vm0, %v2955_v51 }
 0x817   : > { %4454 = vrot.lane.b32.xlu0 %v15192_v63, %s10263_s23 }
 0x81b   : > { %v4412_v13 = vpop.f32.mrf.mxu3 }
 0x81e   : > { %3616 = vmax.xlane.f32.xlu2 %v12266_v25  ;;  %4456 = vrot.lane.b32.xlu1 %v15194_v29, %s10263_s23 }
 0x823   : > { %v4415_v42 = vpop.f32.mrf.mxu3 }
 0x825   : > { %v3607_v21 = vpop.xlane.xlu1 %3606 }
 0x826   : > { %8624 = vmatmul.msk.bf16.gmra.mxu2 %vm1161_vm0, %v2956_v58  ;;  %v3646_v6 = vsub.f32 %v12165_v24, %v3607_v21 }
 0x828   : > { %v3702_v48 = vmul.f32 1.442695, %v3646_v6 }
 0x829   : > { %v3755_v46 = vpop.xlane.xlu0 %3754 }
 0x82a   : > { %9586 = vpow2.f32 %v3702_v48  ;;  %v12284_v48 = vmul.f32 0.17677669, %v4415_v42 }
 0x82b   : > { %v4417_v58 = vpop.f32.mrf.mxu3 }
 0x830   : > { %v12277_v29 = vpop.eup %9586 }
 0x831   : > { %v3611_v5 = vpop.xlane.xlu0 %3610 }
 0x839   : > { %v2824_v10 = vpop.f32.mrf.mxu2  ;;  %v3613_v47 = vpop.xlane.xlu0 %3612 }
 0x83a   : > { %v3649_v40 = vsub.f32 %v12183_v28, %v3613_v47 }
 0x83c   : > { %v3708_v51 = vmul.f32 1.442695, %v3649_v40 }
 0x83d   : > { %v4467_v63 = vpop.permute.xlu1 %4466 }
 0x83e   : > { %v4507_v35 = vsel %vm1161_vm0, %v4467_v63, 0  ;;  %9588 = vpow2.f32 %v3708_v51  ;;  %v4420_v51 = vpop.f32.mrf.mxu3  ;;  %v12296_v63 = vmul.f32 0.17677669, %v4417_v58 }
 0x83f   : > { %4537 = vmatpush.bf16.xpose.msra.mxu0 %v4507_v35  ;;  %9590 = vrcp.f32 %v3755_v46  ;;  %v12294_v46 = vmul.f32 0.17677669, %v4420_v51 }
 0x840   : > { %v3609_v43 = vpop.xlane.xlu2 %3608 }
 0x841   : > { %v3647_v49 = vsub.f32 %v12191_v38, %v3609_v43  ;;  %3766 = vadd.xlane.f32.xlu0 %v12277_v29  ;;  %v2826_v24 = vpop.f32.mrf.mxu2 }
 0x842   : > { %v2957_v21 = vpack.c.bf16 %v2826_v24, %v2824_v10 }
 0x843   : > { %v3704_v6 = vmul.f32 1.442695, %v3647_v49 }
 0x844   : > { %8625 = vmatmul.msk.bf16.gmra.mxu2 %vm1161_vm0, %v2957_v21  ;;  %v12282_v28 = vpop.eup %9588 }
 0x845   : > { %9592 = vpow2.f32 %v3704_v6  ;;  %v9591_v40 = vpop.eup %9590  ;;  %v15195_v6 = vld [vmem:[#allocation36_spill] sm:$0xff] }
 0x846   : > { %v3832_v49 = vmul.f32 %v9591_v40, %v12170_v30  ;;  %v12306_v40 = vmul.f32 0.17677669, %v4410_v56  ;;  %v4422_v58 = vpop.f32.mrf.mxu3  ;;  %v12316_v56 = vmul.f32 0.17677669, %v4412_v13 }
 0x848   : > { %v3757_v47 = vpop.xlane.xlu2 %3756  ;;  %3772 = vadd.xlane.f32.xlu1 %v12282_v28  ;;  %v3864_v24 = vpack.c.bf16 %v3832_v49, %v3832_v49  ;;  %v3648_v49 = vsub.f32 %v12174_v39, %v3611_v5  ;;  %v15197_v39 = vld [vmem:[#allocation67_spill] sm:$0xff]  ;;  %v15198_v5 = vld [vmem:[#allocation30_spill] sm:$0xff] }
 0x849   : > { %9594 = vrcp.f32 %v3757_v47  ;;  %4615 = vmax.xlane.f32.xlu0 %v12284_v48  ;;  %v12288_v38 = vpop.f32.mrf.mxu2  ;;  %v15196_v47 = vld [vmem:[#allocation66_spill] sm:$0xff] }
 0x84a   : > { %v2958_v30 = vpack.c.bf16 %v15196_v47, %v15195_v6  ;;  %v4017_v54 = vunpack.c.l.b16 %v3864_v24 }
 0x84b   : > { %v12290_v10 = vpop.eup %9592 }
 0x84c   : > { %3768 = vadd.xlane.f32.xlu2 %v12290_v10 }
 0x84f   : > { %v9595_v42 = vpop.eup %9594 }
 0x850   : > { %v4451_v35 = vpop.permute.xlu2 %4450  ;;  %4619 = vmax.xlane.f32.xlu1 %v12294_v46  ;;  %v3833_v43 = vmul.f32 %v9595_v42, %v12201_v52  ;;  %v12311_v42 = vmul.f32 0.17677669, %v4422_v58 }
 0x851   : > { %4617 = vmax.xlane.f32.xlu0 %v12296_v63  ;;  %v12301_v21 = vpop.f32.mrf.mxu2  ;;  %8706 = vmatmul.msk.bf16.vlgmr.msra.gmra.mxu0 %vm1161_vm0, %v4451_v35  ;;  %v3706_v35 = vmul.f32 1.442695, %v3648_v49 }
 0x852   : > { %v3865_v51 = vpack.c.bf16 %v3833_v43, %v3833_v43  ;;  %v3761_v43 = vpop.xlane.xlu0 %3760 }
 0x853   : > { %9596 = vpow2.f32 %v3706_v35 }
 0x854   : > { %4611 = vmax.xlane.f32.xlu2 %v12306_v40  ;;  %8626 = vmatmul.msk.bf16.gmra.mxu2 %vm1161_vm0, %v2958_v30  ;;  %v4018_v52 = vunpack.c.l.b16 %v3865_v51  ;;  %9598 = vrcp.f32 %v3761_v43 }
 0x856   : > { %v4032_v22 = vpack.c.b16 %v4018_v52, %v4017_v54  ;;  %v2959_v54 = vpack.c.bf16 %v15198_v5, %v15197_v39 }
 0x858   : > { %4084 = vmatmul.bf16.gmra.mxu1 %v4032_v22  ;;  %4621 = vmax.xlane.f32.xlu1 %v12311_v42  ;;  %v4453_v47 = vpop.permute.xlu2 %4452 }
 0x859   : > { %v12314_v6 = vpop.f32.mrf.mxu2  ;;  %v12324_v22 = vpop.eup %9596 }
 0x85a   : > { %v3615_v13 = vpop.xlane.xlu0 %3614  ;;  %v9599_v51 = vpop.eup %9598 }
 0x85b   : > { %v3835_v52 = vmul.f32 %v9599_v51, %v12195_v59 }
 0x85c   : > { %4613 = vmax.xlane.f32.xlu2 %v12316_v56 }
 0x85d   : > { %v3867_v5 = vpack.c.bf16 %v3835_v52, %v3835_v52 }
 0x85f   : > { %v4020_v32 = vunpack.c.l.b16 %v3867_v5 }
 0x861   : > { %v12319_v24 = vpop.f32.mrf.mxu2  ;;  %8707 = vmatmul.msk.bf16.gmra.mxu0 %vm1161_vm0, %v4453_v47 }
 0x862   : > { %v3763_v49 = vpop.xlane.xlu0 %3762 }
 0x864   : > { %8627 = vmatmul.msk.bf16.gmra.mxu2 %vm1161_vm0, %v2959_v54  ;;  %3770 = vadd.xlane.f32.xlu2 %v12324_v22  ;;  %v15199_v54 = vld [vmem:[#allocation26_spill] sm:$0xff] }
 0x865   : > { %v2960_v19 = vpack.c.bf16 %v15200_v53, %v15199_v54 }
 0x868   : > { %v3759_v30 = vpop.xlane.xlu1 %3758 }
 0x869   : > { %9600 = vrcp.f32 %v3759_v30  ;;  %v12328_v58 = vpop.f32.mrf.mxu2 }
 0x86a   : > { %9602 = vrcp.f32 %v3763_v49 }
 0x86f   : > { %v9601_v35 = vpop.eup %9600 }
 0x870   : > { %v12331_v47 = vpop.xlane.xlu1 %3618  ;;  %v3834_v39 = vmul.f32 %v9601_v35, %v12232_v1  ;;  %v9603_v18 = vpop.eup %9602 }
 0x871   : > { %v12334_v43 = vpop.f32.mrf.mxu2  ;;  %v3836_v53 = vmul.f32 %v9603_v18, %v12218_v50 }
 0x872   : > { %v3866_v0 = vpack.c.bf16 %v3834_v39, %v3834_v39  ;;  %v15203_v39 = vld [vmem:[#allocation49_spill] sm:$0xff] }
 0x874   : > { %8628 = vmatmul.msk.bf16.gmra.mxu2 %vm1161_vm0, %v2960_v19  ;;  %v4019_v30 = vunpack.c.l.b16 %v3866_v0  ;;  %v3868_v19 = vpack.c.bf16 %v3836_v53, %v3836_v53 }
 0x876   : > { %v3765_v34 = vpop.xlane.xlu0 %3764  ;;  %v4033_v59 = vpack.c.b16 %v4020_v32, %v4019_v30 }
 0x877   : > { %9604 = vrcp.f32 %v3765_v34  ;;  %v15202_v34 = vld [vmem:[#allocation55_spill] sm:$0xff] }
 0x878   : > { %v3621_v51 = vpop.xlane.xlu1 %3620  ;;  %4089 = vmatmul.bf16.gmra.mxu1 %v4033_v59  ;;  %v2961_v5 = vpack.c.bf16 %v15203_v39, %v15202_v34 }
 0x879   : > { %v3653_v1 = vsub.f32 %v12251_v11, %v3621_v51  ;;  %v12340_v52 = vpop.f32.mrf.mxu2  ;;  %v15204_v51 = vld [vmem:[#allocation47_spill] sm:$0xff] }
 0x87b   : > { %v3716_v35 = vmul.f32 1.442695, %v3653_v1  ;;  %v15205_v1 = vld [vmem:[#allocation52_spill] sm:$0xff] }
 0x87c   : > { %4458 = vrot.lane.b32.xlu2 %v15201_v3, %s10263_s23  ;;  %v4021_v3 = vunpack.c.l.b16 %v3868_v19 }
 0x87d   : > { %v9605_v49 = vpop.eup %9604  ;;  %9606 = vpow2.f32 %v3716_v35  ;;  %v2962_v35 = vpack.c.bf16 %v15205_v1, %v15204_v51  ;;  %v15210_v51 = vld [vmem:[#allocation59_spill] sm:$0xff]  ;;  %v9030_v1 = vld [vmem:[#allocation10 + $0x20] sm:$0xff] }
 0x87e   : > { %v3837_v0 = vmul.f32 %v9605_v49, %v12249_v20 }
 0x880   : > { %v3869_v32 = vpack.c.bf16 %v3837_v0, %v3837_v0  ;;  %v3650_v0 = vsub.f32 %v12205_v17, %v3615_v13 }
 0x881   : > { %v12350_v11 = vpop.f32.mrf.mxu2 }
 0x882   : > { %v4022_v54 = vunpack.c.l.b16 %v3869_v32  ;;  %v3710_v34 = vmul.f32 1.442695, %v3650_v0 }
 0x883   : > { %v12348_v30 = vpop.eup %9606 }
 0x884   : > { %8629 = vmatmul.msk.bf16.gmra.mxu2 %vm1161_vm0, %v2961_v5  ;;  %3780 = vadd.xlane.f32.xlu1 %v12348_v30  ;;  %v4034_v18 = vpack.c.b16 %v4022_v54, %v4021_v3  ;;  %v15206_v5 = vld [vmem:[#allocation46_spill] sm:$0xff]  ;;  %v15207_v54 = vld [vmem:[#allocation45_spill] sm:$0xff]  ;;  %v15208_v3 = vld [vmem:[#allocation43_spill] sm:$0xff] }
 0x885   : > { %v2963_v17 = vpack.c.bf16 %v15208_v3, %v15207_v54 }
 0x888   : > { %4094 = vmatmul.bf16.gmra.mxu1 %v4034_v18  ;;  %v15209_v18 = vld [vmem:[#allocation61_spill] sm:$0xff] }
 0x889   : > { %v4455_v50 = vpop.permute.xlu0 %4454  ;;  %v12355_v20 = vpop.f32.mrf.mxu2 }
 0x88a   : > { %8708 = vmatmul.msk.bf16.gmra.mxu0 %vm1161_vm0, %v4455_v50 }
 0x890   : > { %v4457_v32 = vpop.permute.xlu1 %4456 }
 0x891   : > { %v3617_v59 = vpop.xlane.xlu2 %3616  ;;  %v12362_v19 = vpop.f32.mrf.mxu2 }
 0x892   : > { %v3651_v53 = vsub.f32 %v12266_v25, %v3617_v59  ;;  %v9031_v59 = vld [vmem:[#allocation10 + $0x28] sm:$0xff] }
 0x893   : > { %4206 = vmatpush.bf16.msra.mxu2 %v9031_v59  ;;  %v15213_v59 = vld [vmem:[#allocation42_spill] sm:$0xff] }
 0x894   : > { %v3712_v49 = vmul.f32 1.442695, %v3651_v53  ;;  %8630 = vmatmul.msk.bf16.gmra.mxu2 %vm1161_vm0, %v2962_v35  ;;  %v15211_v35 = vld [vmem:[#allocation40_spill] sm:$0xff] }
 0x895   : > { %v2964_v53 = vpack.c.bf16 %v11956_v8, %v15211_v35  ;;  %v2965_v8 = vpack.c.bf16 %v11975_v16, %v11963_v12  ;;  %v3652_v12 = vsub.f32 %v12244_v41, %v12331_v47 }
 0x896   : > { %9608 = vpow2.f32 %v3712_v49  ;;  %v3959_v49 = vpop.f32.mrf.mxu0 }
 0x897   : > { %9610 = vpow2.f32 %v3710_v34  ;;  %4207 = vmatpush.bf16.msra.mxu2 %v9030_v1  ;;  %v15212_v34 = vld [vmem:[#allocation44_spill] sm:$0xff] }
 0x899   : > { %v12370_v25 = vpop.f32.mrf.mxu2 }
 0x89a   : > { %8709 = vmatmul.msk.bf16.gmra.mxu0 %vm1161_vm0, %v4457_v32 }
 0x89c   : > { %v12365_v39 = vpop.eup %9608 }
 0x89d   : > { %3776 = vadd.xlane.f32.xlu0 %v12365_v39  ;;  %4993 = vrot.lane.b32.xlu1 %v15206_v5, %s10263_s23  ;;  %v12374_v13 = vpop.eup %9610 }
 0x89e   : > { %v3961_v5 = vpop.f32.mrf.mxu0 }
 0x8a1   : > { %v12380_v50 = vpop.f32.mrf.mxu2 }
 0x8a4   : > { %8631 = vmatmul.msk.bf16.gmra.mxu2 %vm1161_vm0, %v2963_v17 }
 0x8a5   : > { %4462 = vrot.lane.b32.xlu1 %v15209_v18, %s10263_s23  ;;  %3774 = vadd.xlane.f32.xlu2 %v12374_v13 }
 0x8a6   : > { %v3964_v1 = vpop.f32.mrf.mxu0 }
 0x8a9   : > { %v12387_v0 = vpop.f32.mrf.mxu2 }
 0x8b1   : > { %4460 = vrot.lane.b32.xlu0 %v15210_v51, %s10263_s23  ;;  %v12391_v54 = vpop.f32.mrf.mxu2 }
 0x8b4   : > { %8632 = vmatmul.msk.bf16.gmra.mxu2 %vm1161_vm0, %v2964_v53  ;;  %v3767_v32 = vpop.xlane.xlu0 %3766 }
 0x8b5   : > { %9612 = vrcp.f32 %v3767_v32 }
 0x8bb   : > { %v9613_v17 = vpop.eup %9612 }
 0x8bc   : > { %v3838_v18 = vmul.f32 %v9613_v17, %v12277_v29  ;;  %v15214_v29 = vld [vmem:[#allocation38_spill] sm:$0xff] }
 0x8bd   : > { %4991 = vrot.lane.b32.xlu2 %v15212_v34, %s10263_s23 }
 0x8be   : > { %v3870_v34 = vpack.c.bf16 %v3838_v18, %v3838_v18  ;;  %v3714_v18 = vmul.f32 1.442695, %v3652_v12 }
 0x8bf   : > { %v3769_v3 = vpop.xlane.xlu2 %3768 }
 0x8c0   : > { %9614 = vrcp.f32 %v3769_v3  ;;  %v4425_v3 = vpop.f32.mrf.mxu3  ;;  %v4023_v61 = vunpack.c.l.b16 %v3870_v34 }
 0x8c1   : > { %v12404_v16 = vmul.f32 0.17677669, %v4425_v3 }
 0x8c4   : > { %8633 = vmatmul.msk.bf16.gmra.mxu2 %vm1161_vm0, %v2965_v8  ;;  %v3773_v8 = vpop.xlane.xlu1 %3772 }
 0x8c5   : > { %4989 = vrot.lane.b32.xlu2 %v15213_v59, %s10263_s23  ;;  %9616 = vrcp.f32 %v3773_v8 }
 0x8c6   : > { %v9615_v51 = vpop.eup %9614  ;;  %9618 = vpow2.f32 %v3714_v18 }
 0x8c7   : > { %v4612_v35 = vpop.xlane.xlu2 %4611  ;;  %v12399_v53 = vpop.f32.mrf.mxu2  ;;  %v3839_v32 = vmul.f32 %v9615_v51, %v12290_v10  ;;  %v4120_v51 = vpack.c.bf16 %v3961_v5, %v3959_v49 }
 0x8c8   : > { %v3966_v10 = vpop.f32.mrf.mxu0  ;;  %v4675_v34 = vsub.f32 %v12306_v40, %v4612_v35  ;;  %v4427_v49 = vpop.f32.mrf.mxu3 }
 0x8c9   : > { %v3871_v55 = vpack.c.bf16 %v3839_v32, %v3839_v32  ;;  %v12423_v18 = vmul.f32 0.17677669, %v4427_v49 }
 0x8ca   : > { %v4707_v8 = vmul.f32 1.442695, %v4675_v34 }
 0x8cb   : > { %v4024_v26 = vunpack.c.l.b16 %v3871_v55  ;;  %v9617_v47 = vpop.eup %9616 }
 0x8cd   : > { %4987 = vrot.lane.b32.xlu2 %v15214_v29, %s10263_s23  ;;  %v4035_v17 = vpack.c.b16 %v4024_v26, %v4023_v61  ;;  %v12414_v61 = vpop.eup %9618  ;;  %v3841_v26 = vmul.f32 %v9617_v47, %v12282_v28 }
 0x8cf   : > { %v4614_v59 = vpop.xlane.xlu2 %4613  ;;  %v12408_v7 = vpop.f32.mrf.mxu2  ;;  %4623 = vmax.xlane.f32.xlu1 %v12404_v16  ;;  %4099 = vmatmul.bf16.gmra.mxu1 %v4035_v17  ;;  %v3873_v17 = vpack.c.bf16 %v3841_v26, %v3841_v26  ;;  %v15219_v26 = vld [vmem:[#allocation64_spill] sm:$0xff] }
 0x8d0   : > { %15215 = vst [vmem:[#allocation56_spill] sm:$0xff] %v12408_v7  ;;  %v3969_v32 = vpop.f32.mrf.mxu0  ;;  %v4676_v47 = vsub.f32 %v12316_v56, %v4614_v59  ;;  %v4620_v59 = vpop.xlane.xlu1 %4619 }
 0x8d1   : > { %v4026_v40 = vunpack.c.l.b16 %v3873_v17  ;;  %v4430_v17 = vpop.f32.mrf.mxu3 }
 0x8d4   : > { %8682 = vmatmul.msk.bf16.vlgmr.msra.gmra.mxu2 %vm1161_vm0, %v4120_v51 }
 0x8d7   : > { %v12412_v55 = vpop.f32.mrf.mxu2  ;;  %v3771_v41 = vpop.xlane.xlu2 %3770 }
 0x8d8   : > { %15216 = vst [vmem:[#allocation36_spill] sm:$0xff] %v12412_v55  ;;  %9620 = vrcp.f32 %v3771_v41  ;;  %v4121_v41 = vpack.c.bf16 %v3966_v10, %v3964_v1  ;;  %v3971_v4 = vpop.f32.mrf.mxu0  ;;  %v4709_v10 = vmul.f32 1.442695, %v4676_v47 }
 0x8d9   : > { %9622 = vpow2.f32 %v4707_v8  ;;  %v4122_v49 = vpack.c.bf16 %v3971_v4, %v3969_v32  ;;  %v15223_v32 = vld [vmem:[#allocation41_spill] sm:$0xff] }
 0x8da   : > { %9624 = vpow2.f32 %v4709_v10 }
 0x8db   : > { %3778 = vadd.xlane.f32.xlu0 %v12414_v61 }
 0x8de   : > { %v9621_v3 = vpop.eup %9620 }
 0x8df   : > { %v12419_v5 = vpop.f32.mrf.mxu2  ;;  %v4459_v12 = vpop.permute.xlu2 %4458  ;;  %v3840_v29 = vmul.f32 %v9621_v3, %v12324_v22 }
 0x8e0   : > { %15217 = vst [vmem:[#allocation66_spill] sm:$0xff] %v12419_v5  ;;  %8710 = vmatmul.msk.bf16.gmra.mxu0 %vm1161_vm0, %v4459_v12  ;;  %v12432_v34 = vpop.eup %9622  ;;  %v3974_v1 = vpop.f32.mrf.mxu0 }
 0x8e1   : > { %v3872_v51 = vpack.c.bf16 %v3840_v29, %v3840_v29  ;;  %v12438_v56 = vpop.eup %9624 }
 0x8e3   : > { %4625 = vmax.xlane.f32.xlu0 %v12423_v18  ;;  %v4025_v28 = vunpack.c.l.b16 %v3872_v51  ;;  %v12443_v51 = vmul.f32 0.17677669, %v4430_v17 }
 0x8e4   : > { %8683 = vmatmul.msk.bf16.gmra.mxu2 %vm1161_vm0, %v4121_v41  ;;  %v4616_v41 = vpop.xlane.xlu0 %4615 }
 0x8e5   : > { %v4036_v35 = vpack.c.b16 %v4026_v40, %v4025_v28  ;;  %v12446_v28 = vpop.xlane.xlu1 %4621  ;;  %v4677_v47 = vsub.f32 %v12284_v48, %v4616_v41  ;;  %v15227_v41 = vld [vmem:[#allocation28_spill] sm:$0xff] }
 0x8e7   : > { %v12428_v22 = vpop.f32.mrf.mxu2  ;;  %4104 = vmatmul.bf16.gmra.mxu1 %v4036_v35  ;;  %v12452_v35 = vpop.f32.mrf.mxu3  ;;  %v4711_v10 = vmul.f32 1.442695, %v4677_v47 }
 0x8e8   : > { %15218 = vst [vmem:[#allocation67_spill] sm:$0xff] %v12428_v22  ;;  %4464 = vrot.lane.b32.xlu1 %v15219_v26, %s10263_s23  ;;  %v3976_v12 = vpop.f32.mrf.mxu0  ;;  %v15225_v22 = vld [vmem:[#allocation32_spill] sm:$0xff] }
 0x8e9   : > { %v4123_v40 = vpack.c.bf16 %v3976_v12, %v3974_v1  ;;  %9626 = vpow2.f32 %v4711_v10 }
 0x8eb   : > { %4771 = vadd.xlane.f32.xlu0 %v12432_v34 }
 0x8ef   : > { %v12435_v3 = vpop.f32.mrf.mxu2 }
 0x8f0   : > { %15220 = vst [vmem:[#allocation30_spill] sm:$0xff] %v12435_v3  ;;  %v3979_v8 = vpop.f32.mrf.mxu0 }
 0x8f4   : > { %8684 = vmatmul.msk.bf16.gmra.mxu2 %vm1161_vm0, %v4122_v49 }
 0x8f6   : > { %4773 = vadd.xlane.f32.xlu2 %v12438_v56 }
 0x8f7   : > { %v12441_v29 = vpop.f32.mrf.mxu2  ;;  %v12456_v49 = vpop.xlane.xlu1 %3780 }
 0x8f8   : > { %15221 = vst [vmem:[#allocation26_spill] sm:$0xff] %v12441_v29  ;;  %v3981_v26 = vpop.f32.mrf.mxu0  ;;  %v4679_v29 = vsub.f32 %v12294_v46, %v4620_v59 }
 0x8f9   : > { %v4124_v3 = vpack.c.bf16 %v3981_v26, %v3979_v8 }
 0x8fa   : > { %v4715_v12 = vmul.f32 1.442695, %v4679_v29 }
 0x8fc   : > { %9628 = vpow2.f32 %v4715_v12 }
 0x8fe   : > { %4627 = vmax.xlane.f32.xlu2 %v12443_v51 }
 0x8ff   : > { %v12448_v4 = vpop.f32.mrf.mxu2  ;;  %4985 = vrot.lane.b32.xlu0 %v15223_v32, %s10263_s23  ;;  %v12463_v32 = vpop.f32.mrf.mxu3 }
 0x900   : > { %15222 = vst [vmem:[#allocation68_spill] sm:$0xff] %v12448_v4  ;;  %v4618_v4 = vpop.xlane.xlu0 %4617  ;;  %v3984_v1 = vpop.f32.mrf.mxu0 }
 0x904   : > { %8685 = vmatmul.msk.bf16.gmra.mxu2 %vm1161_vm0, %v4123_v40 }
 0x907   : > { %v12458_v17 = vpop.f32.mrf.mxu2  ;;  %4983 = vrot.lane.b32.xlu0 %v15225_v22, %s10263_s23  ;;  %v4437_v46 = vpop.f32.mrf.mxu3  ;;  %v15228_v22 = vld [vmem:[#allocation25_spill] sm:$0xff] }
 0x908   : > { %15224 = vst [vmem:[#allocation57_spill] sm:$0xff] %v12458_v17  ;;  %v12469_v17 = vpop.eup %9626 }
 0x909   : > { %v12477_v29 = vpop.eup %9628 }
 0x90f   : > { %v12465_v48 = vpop.f32.mrf.mxu2  ;;  %4981 = vrot.lane.b32.xlu0 %v15227_v41, %s10263_s23  ;;  %v4994_v40 = vpop.permute.xlu1 %4993 }
 0x910   : > { %15226 = vst [vmem:[#allocation55_spill] sm:$0xff] %v12465_v48  ;;  %5003 = vmatpush.bf16.msra.mxu1 %v4994_v40  ;;  %v3777_v47 = vpop.xlane.xlu0 %3776  ;;  %v3986_v40 = vpop.f32.mrf.mxu0 }
 0x911   : > { %9630 = vrcp.f32 %v3777_v47  ;;  %v4440_v26 = vpop.f32.mrf.mxu3  ;;  %v4125_v5 = vpack.c.bf16 %v3986_v40, %v3984_v1  ;;  %v4678_v1 = vsub.f32 %v12296_v63, %v4618_v4 }
 0x912   : > { %4775 = vadd.xlane.f32.xlu1 %v12469_v17 }
 0x914   : > { %8686 = vmatmul.msk.bf16.gmra.mxu2 %vm1161_vm0, %v4124_v3  ;;  %v12483_v3 = vmul.f32 0.17677669, %v4440_v26 }
 0x916   : > { %4979 = vrot.lane.b32.xlu2 %v15228_v22, %s10263_s23 }
 0x917   : > { %v12475_v59 = vpop.f32.mrf.mxu2  ;;  %v9631_v41 = vpop.eup %9630 }
 0x918   : > { %15229 = vst [vmem:[#allocation49_spill] sm:$0xff] %v12475_v59  ;;  %v3775_v10 = vpop.xlane.xlu2 %3774  ;;  %v3843_v8 = vmul.f32 %v9631_v41, %v12365_v39 }
 0x919   : > { %9632 = vrcp.f32 %v3775_v10  ;;  %v3989_v10 = vpop.f32.mrf.mxu0  ;;  %v4442_v4 = vpop.f32.mrf.mxu3 }
 0x91a   : > { %4779 = vadd.xlane.f32.xlu1 %v12477_v29  ;;  %v3875_v59 = vpack.c.bf16 %v3843_v8, %v3843_v8 }
 0x91c   : > { %v4028_v41 = vunpack.c.l.b16 %v3875_v59  ;;  %v4080_v59 = vpop.f32.mrf.mxu1 }
 0x91f   : > { %v9633_v12 = vpop.eup %9632  ;;  %v12481_v47 = vpop.f32.mrf.mxu2 }
 0x920   : > { %15230 = vst [vmem:[#allocation47_spill] sm:$0xff] %v12481_v47  ;;  %v4992_v48 = vpop.permute.xlu2 %4991  ;;  %v3842_v22 = vmul.f32 %v9633_v12, %v12374_v13  ;;  %v4463_v12 = vpop.permute.xlu1 %4462 }
 0x921   : > { %5004 = vmatpush.bf16.msra.mxu1 %v4992_v48  ;;  %v3991_v13 = vpop.f32.mrf.mxu0 }
 0x922   : > { %4635 = vmax.xlane.f32.xlu1 %v12483_v3  ;;  %v3874_v62 = vpack.c.bf16 %v3842_v22, %v3842_v22  ;;  %v4126_v8 = vpack.c.bf16 %v3991_v13, %v3989_v10 }
 0x923   : > { %v4461_v55 = vpop.permute.xlu0 %4460 }
 0x924   : > { %8687 = vmatmul.msk.bf16.gmra.mxu2 %vm1161_vm0, %v4125_v5  ;;  %8711 = vmatmul.msk.bf16.gmra.mxu0 %vm1161_vm0, %v4461_v55  ;;  %v4027_v39 = vunpack.c.l.b16 %v3874_v62  ;;  %v4713_v5 = vmul.f32 1.442695, %v4678_v1  ;;  %v12497_v55 = vmul.f32 0.17677669, %v12452_v35 }
 0x926   : > { %v4037_v47 = vpack.c.b16 %v4028_v41, %v4027_v39  ;;  %9634 = vpow2.f32 %v4713_v5  ;;  %v4082_v39 = vpop.f32.mrf.mxu1  ;;  %v4680_v41 = vsub.f32 %v12311_v42, %v12446_v28 }
 0x927   : > { %v12489_v26 = vpop.f32.mrf.mxu2 }
 0x928   : > { %15231 = vst [vmem:[#allocation52_spill] sm:$0xff] %v12489_v26  ;;  %v4990_v45 = vpop.permute.xlu2 %4989  ;;  %4109 = vmatmul.bf16.gmra.mxu1 %v4037_v47  ;;  %v12505_v47 = vmul.f32 0.17677669, %v12463_v32  ;;  %v4717_v32 = vmul.f32 1.442695, %v4680_v41 }
 0x929   : > { %5005 = vmatpush.bf16.msra.mxu1 %v4990_v45  ;;  %v3994_v62 = vpop.f32.mrf.mxu0  ;;  %v12537_v26 = vmul.f32 0.17677669, %v4442_v4 }
 0x92c   : > { %v12502_v63 = vpop.eup %9634 }
 0x92f   : > { %v12491_v48 = vpop.f32.mrf.mxu2 }
 0x930   : > { %15232 = vst [vmem:[#allocation46_spill] sm:$0xff] %v12491_v48  ;;  %v4988_v40 = vpop.permute.xlu2 %4987 }
 0x931   : > { %5006 = vmatpush.bf16.msra.mxu1 %v4988_v40  ;;  %v3996_v22 = vpop.f32.mrf.mxu0 }
 0x932   : > { %v4127_v35 = vpack.c.bf16 %v3996_v22, %v3994_v62 }
 0x934   : > { %8688 = vmatmul.msk.bf16.gmra.mxu2 %vm1161_vm0, %v4126_v8  ;;  %8712 = vmatmul.msk.bf16.gmra.mxu0 %vm1161_vm0, %v4463_v12  ;;  %v12515_v8 = vmul.f32 0.17677669, %v4437_v46  ;;  %v4445_v12 = vpop.f32.mrf.mxu3 }
 0x937   : > { %v12499_v45 = vpop.f32.mrf.mxu2 }
 0x938   : > { %15233 = vst [vmem:[#allocation45_spill] sm:$0xff] %v12499_v45 }
 0x939   : > { %4629 = vmax.xlane.f32.xlu0 %v12497_v55 }
 0x93c   : > { %v4447_v22 = vpop.f32.mrf.mxu3 }
 0x93f   : > { %v12507_v10 = vpop.f32.mrf.mxu2  ;;  %4777 = vadd.xlane.f32.xlu2 %v12502_v63 }
 0x940   : > { %15234 = vst [vmem:[#allocation43_spill] sm:$0xff] %v12507_v10  ;;  %v4085_v10 = vpop.f32.mrf.mxu1 }
 0x941   : > { %4631 = vmax.xlane.f32.xlu0 %v12505_v47 }
 0x942   : > { %v4624_v13 = vpop.xlane.xlu1 %4623 }
 0x943   : > { %v4681_v1 = vsub.f32 %v12404_v16, %v4624_v13  ;;  %v12530_v13 = vmul.f32 0.17677669, %v4447_v22  ;;  %v4539_v22 = vpop.f32.mrf.mxu0 }
 0x944   : > { %8689 = vmatmul.msk.bf16.gmra.mxu2 %vm1161_vm0, %v4127_v35  ;;  %v4128_v35 = vpack.c.bf16 %v4082_v39, %v4080_v59 }
 0x945   : > { %v4719_v40 = vmul.f32 1.442695, %v4681_v1 }
 0x947   : > { %9636 = vpow2.f32 %v4719_v40  ;;  %v12517_v5 = vpop.f32.mrf.mxu2  ;;  %v15237_v40 = vld [vmem:[#allocation51_spill] sm:$0xff] }
 0x948   : > { %15235 = vst [vmem:[#allocation61_spill] sm:$0xff] %v12517_v5  ;;  %9638 = vrcp.f32 %v12456_v49  ;;  %v4087_v41 = vpop.f32.mrf.mxu1 }
 0x949   : > { %4633 = vmax.xlane.f32.xlu0 %v12515_v8  ;;  %9640 = vpow2.f32 %v4717_v32  ;;  %v3189_v32 = vadd.f32 %v15237_v40, %v12288_v38 }
 0x94d   : > { %v12521_v42 = vpop.eup %9636 }
 0x94e   : > { %4783 = vadd.xlane.f32.xlu2 %v12521_v42  ;;  %v3779_v16 = vpop.xlane.xlu0 %3778  ;;  %v9639_v28 = vpop.eup %9638 }
 0x94f   : > { %9642 = vrcp.f32 %v3779_v16  ;;  %v12524_v62 = vpop.f32.mrf.mxu2  ;;  %v12526_v46 = vpop.eup %9640  ;;  %v3845_v49 = vmul.f32 %v9639_v28, %v12348_v30 }
 0x950   : > { %15236 = vst [vmem:[#allocation59_spill] sm:$0xff] %v12524_v62  ;;  %v4090_v48 = vpop.f32.mrf.mxu1 }
 0x951   : > { %4781 = vadd.xlane.f32.xlu0 %v12526_v46  ;;  %v3877_v5 = vpack.c.bf16 %v3845_v49, %v3845_v49 }
 0x953   : > { %v4030_v40 = vunpack.c.l.b16 %v3877_v5  ;;  %v15238_v5 = vld [vmem:[#allocation24_spill] sm:$0xff] }
 0x954   : > { %8690 = vmatmul.msk.bf16.gmra.mxu2 %vm1161_vm0, %v4128_v35 }
 0x955   : > { %v9643_v1 = vpop.eup %9642 }
 0x956   : > { %4641 = vmax.xlane.f32.xlu2 %v12530_v13  ;;  %v4626_v16 = vpop.xlane.xlu0 %4625  ;;  %v3844_v62 = vmul.f32 %v9643_v1, %v12414_v61  ;;  %v12544_v61 = vmul.f32 0.17677669, %v4539_v22  ;;  %v4129_v1 = vpack.c.bf16 %v4087_v41, %v4085_v10 }
 0x957   : > { %v4682_v59 = vsub.f32 %v12423_v18, %v4626_v16  ;;  %v4209_v30 = vpop.f32.mrf.mxu2  ;;  %v12547_v18 = vmul.f32 0.17677669, %v4445_v12 }
 0x958   : > { %v12540_v39 = vadd.f32 %v4209_v30, %v3189_v32  ;;  %v3876_v28 = vpack.c.bf16 %v3844_v62, %v3844_v62  ;;  %v3194_v32 = vadd.f32 %v15238_v5, %v12314_v6  ;;  %v15239_v6 = vld [vmem:[#allocation54_spill] sm:$0xff] }
 0x959   : > { %v4721_v35 = vmul.f32 1.442695, %v4682_v59  ;;  %4637 = vmax.xlane.f32.xlu0 %v12537_v26 }
 0x95a   : > { %v4465_v45 = vpop.permute.xlu1 %4464  ;;  %v4029_v38 = vunpack.c.l.b16 %v3876_v28 }
 0x95b   : > { %9644 = vpow2.f32 %v4721_v35  ;;  %8713 = vmatmul.msk.bf16.gmra.mxu0 %vm1161_vm0, %v4465_v45  ;;  %v4092_v45 = vpop.f32.mrf.mxu1 }
 0x95c   : > { %v4038_v4 = vpack.c.b16 %v4030_v40, %v4029_v38  ;;  %v4130_v40 = vpack.c.bf16 %v4092_v45, %v4090_v48 }
 0x95e   : > { %4643 = vmax.xlane.f32.xlu2 %v12544_v61  ;;  %4114 = vmatmul.bf16.gmra.mxu1 %v4038_v4  ;;  %v4772_v12 = vpop.xlane.xlu0 %4771  ;;  %v3199_v4 = vadd.f32 %v15239_v6, %v12328_v58 }
 0x95f   : > { %v12549_v62 = vpop.f32.mrf.mxu2 }
 0x961   : > { %v12551_v49 = vpop.eup %9644  ;;  %4639 = vmax.xlane.f32.xlu0 %v12547_v18 }
 0x962   : > { %4785 = vadd.xlane.f32.xlu1 %v12551_v49 }
 0x963   : > { %v4095_v28 = vpop.f32.mrf.mxu1 }
 0x964   : > { %8691 = vmatmul.msk.bf16.gmra.mxu2 %vm1161_vm0, %v4129_v1 }
 0x967   : > { %v4214_v16 = vpop.f32.mrf.mxu2 }
 0x968   : > { %v12558_v59 = vadd.f32 %v4214_v16, %v3194_v32 }
 0x969   : > { %v4774_v30 = vpop.xlane.xlu2 %4773 }
 0x96a   : > { %9646 = vrcp.f32 %v4774_v30 }
 0x96b   : > { %9648 = vrcp.f32 %v4772_v12  ;;  %v4097_v16 = vpop.f32.mrf.mxu1  ;;  %v4541_v12 = vpop.f32.mrf.mxu0 }
 0x96f   : > { %v12560_v22 = vpop.f32.mrf.mxu2 }
 0x970   : > { %v9647_v5 = vpop.eup %9646 }
 0x971   : > { %v4628_v35 = vpop.xlane.xlu2 %4627  ;;  %v4986_v38 = vpop.permute.xlu0 %4985  ;;  %v4868_v48 = vmul.f32 %v9647_v5, %v12438_v56 }
 0x972   : > { %v4683_v10 = vsub.f32 %v12443_v51, %v4628_v35  ;;  %5007 = vmatpush.bf16.msra.mxu1 %v4986_v38  ;;  %v9649_v37 = vpop.eup %9648 }
 0x973   : > { %v4867_v45 = vmul.f32 %v9649_v37, %v12432_v34  ;;  %v4900_v30 = vpack.c.bf16 %v4868_v48, %v4868_v48  ;;  %v4100_v35 = vpop.f32.mrf.mxu1  ;;  %v15240_v37 = vld [vmem:[#allocation29_spill] sm:$0xff]  ;;  %v4544_v5 = vpop.f32.mrf.mxu0 }
 0x974   : > { %v4723_v41 = vmul.f32 1.442695, %v4683_v10  ;;  %8692 = vmatmul.msk.bf16.gmra.mxu2 %vm1161_vm0, %v4130_v40  ;;  %v4131_v10 = vpack.c.bf16 %v4097_v16, %v4095_v28  ;;  %v3204_v34 = vadd.f32 %v15240_v37, %v12340_v52  ;;  %v12583_v28 = vmul.f32 0.17677669, %v4544_v5 }
 0x975   : > { %v4899_v38 = vpack.c.bf16 %v4867_v45, %v4867_v45 }
 0x976   : > { %9650 = vpow2.f32 %v4723_v41  ;;  %v12575_v41 = vmul.f32 0.17677669, %v4541_v12 }
 0x977   : > { %v4219_v1 = vpop.f32.mrf.mxu2  ;;  %v4947_v56 = vunpack.c.l.b16 %v4899_v38 }
 0x978   : > { %v12566_v32 = vadd.f32 %v4219_v1, %v3199_v4 }
 0x979   : > { %v4984_v7 = vpop.permute.xlu0 %4983  ;;  %v4980_v6 = vpop.permute.xlu2 %4979 }
 0x97a   : > { %5008 = vmatpush.bf16.msra.mxu1 %v4984_v7  ;;  %v4948_v7 = vunpack.c.l.b16 %v4900_v30 }
 0x97b   : > { %v4102_v16 = vpop.f32.mrf.mxu1 }
 0x97c   : > { %v12569_v51 = vpop.eup %9650  ;;  %v4963_v4 = vpack.c.b16 %v4948_v7, %v4947_v56  ;;  %v4132_v45 = vpack.c.bf16 %v4102_v16, %v4100_v35 }
 0x97d   : > { %4787 = vadd.xlane.f32.xlu1 %v12569_v51 }
 0x97f   : > { %v12573_v58 = vpop.f32.mrf.mxu2 }
 0x981   : > { %v4982_v40 = vpop.permute.xlu0 %4981 }
 0x982   : > { %5009 = vmatpush.bf16.msra.mxu1 %v4982_v40 }
 0x983   : > { %v4105_v12 = vpop.f32.mrf.mxu1 }
 0x984   : > { %8693 = vmatmul.msk.bf16.gmra.mxu2 %vm1161_vm0, %v4131_v10 }
 0x985   : > { %4645 = vmax.xlane.f32.xlu1 %v12575_v41  ;;  %v4776_v40 = vpop.xlane.xlu1 %4775 }
 0x986   : > { %5010 = vmatpush.bf16.msra.mxu1 %v4980_v6  ;;  %9652 = vrcp.f32 %v4776_v40 }
 0x987   : > { %v4224_v1 = vpop.f32.mrf.mxu2 }
 0x988   : > { %v12581_v48 = vadd.f32 %v4224_v1, %v3204_v34 }
 0x989   : > { %5011 = vmatmul.bf16.vlgmr.msra.gmra.mxu1 %v4963_v4 }
 0x98b   : > { %v4107_v30 = vpop.f32.mrf.mxu1 }
 0x98c   : > { %v4133_v38 = vpack.c.bf16 %v4107_v30, %v4105_v12  ;;  %v9653_v4 = vpop.eup %9652 }
 0x98d   : > { %4647 = vmax.xlane.f32.xlu1 %v12583_v28  ;;  %v4780_v35 = vpop.xlane.xlu1 %4779  ;;  %v4869_v16 = vmul.f32 %v9653_v4, %v12469_v17 }
 0x994   : > { %8694 = vmatmul.msk.bf16.gmra.mxu2 %vm1161_vm0, %v4132_v45 }
 0x9a4   : > { %8695 = vmatmul.msk.bf16.gmra.mxu2 %vm1161_vm0, %v4133_v38  ;;  %v4901_v38 = vpack.c.bf16 %v4869_v16, %v4869_v16 }
 0x9a5   : > { %v4110_v52 = vpop.f32.mrf.mxu1 }
 0x9ac   : > { %v4630_v10 = vpop.xlane.xlu0 %4629 }
 0x9ad   : > { %v4684_v7 = vsub.f32 %v12497_v55, %v4630_v10  ;;  %v4112_v6 = vpop.f32.mrf.mxu1 }
 0x9ae   : > { %v4134_v37 = vpack.c.bf16 %v4112_v6, %v4110_v52 }
 0x9af   : > { %v4725_v56 = vmul.f32 1.442695, %v4684_v7  ;;  %v4636_v7 = vpop.xlane.xlu1 %4635 }
 0x9b0   : > { %v4687_v4 = vsub.f32 %v12483_v3, %v4636_v7 }
 0x9b1   : > { %9654 = vpow2.f32 %v4725_v56  ;;  %v4949_v56 = vunpack.c.l.b16 %v4901_v38 }
 0x9b2   : > { %v4778_v34 = vpop.xlane.xlu2 %4777 }
 0x9b3   : > { %9656 = vrcp.f32 %v4778_v34  ;;  %v4546_v34 = vpop.f32.mrf.mxu0 }
 0x9b4   : > { %8696 = vmatmul.msk.bf16.gmra.mxu2 %vm1161_vm0, %v4134_v37  ;;  %v4632_v1 = vpop.xlane.xlu0 %4631 }
 0x9b5   : > { %v4685_v5 = vsub.f32 %v12505_v47, %v4632_v1 }
 0x9b7   : > { %v12592_v45 = vpop.eup %9654  ;;  %v4727_v12 = vmul.f32 1.442695, %v4685_v5  ;;  %v4731_v5 = vmul.f32 1.442695, %v4687_v4 }
 0x9b8   : > { %4789 = vadd.xlane.f32.xlu0 %v12592_v45 }
 0x9b9   : > { %v9657_v55 = vpop.eup %9656  ;;  %9658 = vpow2.f32 %v4727_v12 }
 0x9ba   : > { %v4870_v30 = vmul.f32 %v9657_v55, %v12502_v63  ;;  %9660 = vrcp.f32 %v4780_v35 }
 0x9bb   : > { %v4549_v12 = vpop.f32.mrf.mxu0 }
 0x9bc   : > { %v4634_v52 = vpop.xlane.xlu0 %4633  ;;  %v4902_v40 = vpack.c.bf16 %v4870_v30, %v4870_v30 }
 0x9bd   : > { %v4686_v10 = vsub.f32 %v12515_v8, %v4634_v52  ;;  %v12601_v8 = vmul.f32 0.17677669, %v4546_v34 }
 0x9be   : > { %v4950_v6 = vunpack.c.l.b16 %v4902_v40 }
 0x9bf   : > { %v12597_v47 = vpop.eup %9658  ;;  %v4729_v17 = vmul.f32 1.442695, %v4686_v10  ;;  %v12610_v10 = vmul.f32 0.17677669, %v4549_v12 }
 0x9c0   : > { %4791 = vadd.xlane.f32.xlu0 %v12597_v47  ;;  %v4964_v37 = vpack.c.b16 %v4950_v6, %v4949_v56  ;;  %v9661_v1 = vpop.eup %9660 }
 0x9c1   : > { %9662 = vpow2.f32 %v4729_v17  ;;  %v4871_v35 = vmul.f32 %v9661_v1, %v12477_v29  ;;  %v4784_v3 = vpop.xlane.xlu2 %4783 }
 0x9c2   : > { %5016 = vmatmul.bf16.gmra.mxu1 %v4964_v37 }
 0x9c3   : > { %v4903_v52 = vpack.c.bf16 %v4871_v35, %v4871_v35  ;;  %v4551_v34 = vpop.f32.mrf.mxu0 }
 0x9c4   : > { %v4782_v63 = vpop.xlane.xlu0 %4781  ;;  %v12617_v1 = vmul.f32 0.17677669, %v4551_v34 }
 0x9c5   : > { %9664 = vrcp.f32 %v4782_v63  ;;  %v4951_v29 = vunpack.c.l.b16 %v4903_v52 }
 0x9c6   : > { %9666 = vpow2.f32 %v4731_v5 }
 0x9c7   : > { %v12603_v16 = vpop.eup %9662  ;;  %9668 = vrcp.f32 %v4784_v3 }
 0x9c8   : > { %4649 = vmax.xlane.f32.xlu0 %v12601_v8  ;;  %4793 = vadd.xlane.f32.xlu2 %v12603_v16 }
 0x9c9   : > { %v4642_v5 = vpop.xlane.xlu2 %4641 }
 0x9cb   : > { %v9665_v55 = vpop.eup %9664 }
 0x9cc   : > { %v4638_v30 = vpop.xlane.xlu0 %4637  ;;  %v4872_v38 = vmul.f32 %v9665_v55, %v12526_v46  ;;  %v12612_v56 = vpop.eup %9666  ;;  %v4690_v55 = vsub.f32 %v12530_v13, %v4642_v5 }
 0x9cd   : > { %v4688_v40 = vsub.f32 %v12537_v26, %v4638_v30  ;;  %v9669_v63 = vpop.eup %9668  ;;  %v12631_v13 = vpop.f32.mrf.mxu2 }
 0x9ce   : > { %v4904_v7 = vpack.c.bf16 %v4872_v38, %v4872_v38  ;;  %v4873_v3 = vmul.f32 %v9669_v63, %v12521_v42  ;;  %v4737_v38 = vmul.f32 1.442695, %v4690_v55  ;;  %v4554_v63 = vpop.f32.mrf.mxu0 }
 0x9cf   : > { %v4733_v6 = vmul.f32 1.442695, %v4688_v40  ;;  %v12640_v5 = vmul.f32 0.17677669, %v4554_v63 }
 0x9d0   : > { %4651 = vmax.xlane.f32.xlu0 %v12610_v10  ;;  %4795 = vadd.xlane.f32.xlu2 %v12612_v56  ;;  %v4952_v17 = vunpack.c.l.b16 %v4904_v7  ;;  %v4905_v40 = vpack.c.bf16 %v4873_v3, %v4873_v3 }
 0x9d1   : > { %9670 = vpow2.f32 %v4733_v6 }
 0x9d2   : > { %v4965_v37 = vpack.c.b16 %v4952_v17, %v4951_v29  ;;  %v4953_v29 = vunpack.c.l.b16 %v4905_v40 }
 0x9d4   : > { %5021 = vmatmul.bf16.gmra.mxu1 %v4965_v37  ;;  %v4640_v46 = vpop.xlane.xlu0 %4639 }
 0x9d5   : > { %v4689_v26 = vsub.f32 %v12547_v18, %v4640_v46  ;;  %v4786_v4 = vpop.xlane.xlu1 %4785  ;;  %v4644_v46 = vpop.xlane.xlu2 %4643 }
 0x9d6   : > { %9672 = vrcp.f32 %v4786_v4  ;;  %v4691_v4 = vsub.f32 %v12544_v61, %v4644_v46 }
 0x9d7   : > { %v12619_v35 = vpop.eup %9670  ;;  %v4735_v12 = vmul.f32 1.442695, %v4689_v26  ;;  %v9033_v26 = vld [vmem:[#allocation10 + $0x38] sm:$0xff] }
 0x9d8   : > { %4653 = vmax.xlane.f32.xlu2 %v12617_v1  ;;  %4797 = vadd.xlane.f32.xlu1 %v12619_v35 }
 0x9d9   : > { %9674 = vpow2.f32 %v4735_v12  ;;  %5259 = vmatpush.bf16.msrb.mxu0 %v9033_v26  ;;  %v9032_v12 = vld [vmem:[#allocation10 + $0x30] sm:$0xff] }
 0x9da   : > { %9676 = vpow2.f32 %v4737_v38 }
 0x9db   : > { %v4115_v30 = vpop.f32.mrf.mxu1 }
 0x9dc   : > { %v9673_v18 = vpop.eup %9672 }
 0x9dd   : > { %v4874_v52 = vmul.f32 %v9673_v18, %v12551_v49  ;;  %5260 = vmatpush.bf16.msrb.mxu0 %v9032_v12  ;;  %v4556_v18 = vpop.f32.mrf.mxu0 }
 0x9df   : > { %v12626_v7 = vpop.eup %9674  ;;  %v4906_v6 = vpack.c.bf16 %v4874_v52, %v4874_v52 }
 0x9e0   : > { %4799 = vadd.xlane.f32.xlu2 %v12626_v7  ;;  %v12634_v49 = vpop.eup %9676 }
 0x9e1   : > { %v4954_v17 = vunpack.c.l.b16 %v4906_v6 }
 0x9e3   : > { %v4117_v37 = vpop.f32.mrf.mxu1  ;;  %v4966_v42 = vpack.c.b16 %v4954_v17, %v4953_v29 }
 0x9e4   : > { %v4135_v34 = vpack.c.bf16 %v4117_v37, %v4115_v30  ;;  %5112 = vrot.lane.b32.xlu0 %v15170_v44, %s10263_s23  ;;  %v4739_v44 = vmul.f32 1.442695, %v4691_v4 }
 0x9e5   : > { %5026 = vmatmul.bf16.gmra.mxu1 %v4966_v42  ;;  %v4559_v40 = vpop.f32.mrf.mxu0 }
 0x9e6   : > { %8697 = vmatmul.msk.bf16.gmra.mxu2 %vm1161_vm0, %v4135_v34  ;;  %9678 = vpow2.f32 %v4739_v44 }
 0x9e8   : > { %4801 = vadd.xlane.f32.xlu2 %v12634_v49 }
 0x9ec   : > { %5110 = vrot.lane.b32.xlu0 %v15173_v27, %s10263_s23  ;;  %v12647_v61 = vpop.eup %9678 }
 0x9f0   : > { %4655 = vmax.xlane.f32.xlu2 %v12640_v5  ;;  %v4788_v55 = vpop.xlane.xlu1 %4787 }
 0x9f1   : > { %5114 = vrot.lane.b32.xlu1 %v15169_v60, %s10263_s23 }
 0x9f4   : > { %5108 = vrot.lane.b32.xlu0 %v15174_v23, %s10263_s23  ;;  %v12656_v23 = vmul.f32 0.17677669, %v4556_v18 }
 0x9f8   : > { %4803 = vadd.xlane.f32.xlu2 %v12647_v61  ;;  %v4646_v3 = vpop.xlane.xlu1 %4645 }
 0x9f9   : > { %v4692_v38 = vsub.f32 %v12575_v41, %v4646_v3  ;;  %v4561_v41 = vpop.f32.mrf.mxu0 }
 0x9fa   : > { %v12662_v29 = vmul.f32 0.17677669, %v4561_v41 }
 0x9fb   : > { %v4741_v60 = vmul.f32 1.442695, %v4692_v38 }
 0x9fd   : > { %9680 = vpow2.f32 %v4741_v60 }
 0x9fe   : > { %9682 = vrcp.f32 %v4788_v55 }
 0xa00   : > { %v4648_v18 = vpop.xlane.xlu1 %4647 }
 0xa03   : > { %v12659_v6 = vpop.eup %9680 }
 0xa04   : > { %v9683_v17 = vpop.eup %9682 }
 0xa05   : > { %v4875_v37 = vmul.f32 %v9683_v17, %v12569_v51 }
 0xa06   : > { %v5012_v27 = vpop.f32.mrf.mxu1 }
 0xa07   : > { %v4907_v46 = vpack.c.bf16 %v4875_v37, %v4875_v37 }
 0xa09   : > { %v4955_v4 = vunpack.c.l.b16 %v4907_v46 }
 0xa0e   : > { %v5014_v30 = vpop.f32.mrf.mxu1 }
 0xa0f   : > { %v5173_v52 = vpack.c.bf16 %v5014_v30, %v5012_v27  ;;  %v12671_v27 = vmul.f32 0.17677669, %v4559_v40  ;;  %v4564_v30 = vpop.f32.mrf.mxu0 }
 0xa10   : > { %5106 = vrot.lane.b32.xlu2 %v11014_v31, %s10263_s23  ;;  %v12676_v41 = vmul.f32 0.17677669, %v4564_v30 }
 0xa11   : > { %8722 = vmatmul.msk.bf16.vlgmr.msrb.gmra.mxu0 %vm1161_vm0, %v5173_v52 }
 0xa18   : > { %5104 = vrot.lane.b32.xlu2 %v11017_v2, %s10263_s23 }
 0xa1b   : > { %4657 = vmax.xlane.f32.xlu1 %v12656_v23 }
 0xa1e   : > { %4805 = vadd.xlane.f32.xlu0 %v12659_v6 }
 0xa26   : > { %4661 = vmax.xlane.f32.xlu0 %v12662_v29 }
 0xa2b   : > { %v4790_v31 = vpop.xlane.xlu0 %4789 }
 0xa2c   : > { %9684 = vrcp.f32 %v4790_v31 }
 0xa32   : > { %v9685_v2 = vpop.eup %9684 }
 0xa33   : > { %v4792_v34 = vpop.xlane.xlu0 %4791  ;;  %v4876_v42 = vmul.f32 %v9685_v2, %v12592_v45 }
 0xa34   : > { %5102 = vrot.lane.b32.xlu1 %v11026_v57, %s10263_s23  ;;  %9686 = vrcp.f32 %v4792_v34 }
 0xa35   : > { %v4908_v26 = vpack.c.bf16 %v4876_v42, %v4876_v42 }
 0xa37   : > { %v4956_v63 = vunpack.c.l.b16 %v4908_v26  ;;  %v4566_v26 = vpop.f32.mrf.mxu0 }
 0xa39   : > { %v4967_v44 = vpack.c.b16 %v4956_v63, %v4955_v4  ;;  %v12681_v63 = vmul.f32 0.17677669, %v4566_v26 }
 0xa3a   : > { %5100 = vrot.lane.b32.xlu0 %v11031_v33, %s10263_s23  ;;  %v9687_v55 = vpop.eup %9686  ;;  %s10184_s23 = scalar_lea.hbm %s14914_s9, 512 }
 0xa3b   : > { %v4794_v12 = vpop.xlane.xlu2 %4793  ;;  %5031 = vmatmul.bf16.gmra.mxu1 %v4967_v44  ;;  %v4650_v51 = vpop.xlane.xlu0 %4649  ;;  %v4877_v3 = vmul.f32 %v9687_v55, %v12597_v47  ;;  %v4693_v44 = vsub.f32 %v12583_v28, %v4648_v18 }
 0xa3c   : > { %9688 = vrcp.f32 %v4794_v12 }
 0xa3d   : > { %v4909_v60 = vpack.c.bf16 %v4877_v3, %v4877_v3 }
 0xa3f   : > { %v5017_v45 = vpop.f32.mrf.mxu1  ;;  %v4957_v40 = vunpack.c.l.b16 %v4909_v60  ;;  %v4569_v60 = vpop.f32.mrf.mxu0 }
 0xa41   : > { %4659 = vmax.xlane.f32.xlu2 %v12671_v27 }
 0xa42   : > { %v9689_v57 = vpop.eup %9688 }
 0xa43   : > { %v4796_v38 = vpop.xlane.xlu2 %4795  ;;  %v4878_v52 = vmul.f32 %v9689_v57, %v12603_v16  ;;  %v4652_v31 = vpop.xlane.xlu0 %4651 }
 0xa44   : > { %9690 = vrcp.f32 %v4796_v38  ;;  %v4695_v34 = vsub.f32 %v12610_v10, %v4652_v31  ;;  %v4743_v10 = vmul.f32 1.442695, %v4693_v44  ;;  %v4694_v38 = vsub.f32 %v12601_v8, %v4650_v51 }
 0xa45   : > { %v4910_v33 = vpack.c.bf16 %v4878_v52, %v4878_v52 }
 0xa46   : > { %v4747_v4 = vmul.f32 1.442695, %v4695_v34  ;;  %v4745_v31 = vmul.f32 1.442695, %v4694_v38 }
 0xa47   : > { %v5019_v17 = vpop.f32.mrf.mxu1  ;;  %v4958_v37 = vunpack.c.l.b16 %v4910_v33 }
 0xa48   : > { %v5174_v2 = vpack.c.bf16 %v5019_v17, %v5017_v45 }
 0xa49   : > { %4663 = vmax.xlane.f32.xlu2 %v12676_v41  ;;  %v4968_v47 = vpack.c.b16 %v4958_v37, %v4957_v40 }
 0xa4a   : > { %8723 = vmatmul.msk.bf16.gmra.mxu0 %vm1161_vm0, %v5174_v2  ;;  %v9691_v16 = vpop.eup %9690 }
 0xa4b   : > { %v4654_v42 = vpop.xlane.xlu2 %4653  ;;  %v4798_v46 = vpop.xlane.xlu1 %4797  ;;  %5036 = vmatmul.bf16.gmra.mxu1 %v4968_v47  ;;  %v4879_v12 = vmul.f32 %v9691_v16, %v12612_v56 }
 0xa4c   : > { %9692 = vrcp.f32 %v4798_v46  ;;  %v4696_v28 = vsub.f32 %v12617_v1, %v4654_v42  ;;  %v12696_v1 = vmul.f32 0.17677669, %v4569_v60  ;;  %v4571_v42 = vpop.f32.mrf.mxu0 }
 0xa4d   : > { %9694 = vpow2.f32 %v4747_v4  ;;  %v4911_v30 = vpack.c.bf16 %v4879_v12, %v4879_v12 }
 0xa4f   : > { %v4959_v18 = vunpack.c.l.b16 %v4911_v30 }
 0xa51   : > { %v5022_v55 = vpop.f32.mrf.mxu1  ;;  %4665 = vmax.xlane.f32.xlu2 %v12681_v63 }
 0xa52   : > { %v9693_v45 = vpop.eup %9692 }
 0xa53   : > { %v4800_v3 = vpop.xlane.xlu2 %4799  ;;  %v4880_v57 = vmul.f32 %v9693_v45, %v12619_v35  ;;  %v12689_v33 = vpop.eup %9694  ;;  %v4749_v35 = vmul.f32 1.442695, %v4696_v28  ;;  %v12708_v28 = vmul.f32 0.17677669, %v4571_v42 }
 0xa54   : > { %9696 = vrcp.f32 %v4800_v3 }
 0xa55   : > { %v4912_v52 = vpack.c.bf16 %v4880_v57, %v4880_v57  ;;  %9698 = vpow2.f32 %v4743_v10 }
 0xa56   : > { %v5113_v2 = vpop.permute.xlu0 %5112 }
 0xa57   : > { %v4960_v56 = vunpack.c.l.b16 %v4912_v52  ;;  %v4574_v52 = vpop.f32.mrf.mxu0 }
 0xa59   : > { %v5024_v17 = vpop.f32.mrf.mxu1  ;;  %4811 = vadd.xlane.f32.xlu2 %v12689_v33  ;;  %v4969_v40 = vpack.c.b16 %v4960_v56, %v4959_v18 }
 0xa5a   : > { %v5175_v37 = vpack.c.bf16 %v5024_v17, %v5022_v55  ;;  %v9697_v8 = vpop.eup %9696 }
 0xa5b   : > { %v4802_v47 = vpop.xlane.xlu2 %4801  ;;  %5041 = vmatmul.bf16.gmra.mxu1 %v4969_v40  ;;  %v12693_v51 = vpop.eup %9698  ;;  %v4881_v34 = vmul.f32 %v9697_v8, %v12626_v7  ;;  %v12715_v40 = vmul.f32 0.17677669, %v4574_v52 }
 0xa5c   : > { %9700 = vrcp.f32 %v4802_v47  ;;  %8724 = vmatmul.msk.bf16.gmra.mxu0 %vm1161_vm0, %v5175_v37 }
 0xa5d   : > { %9702 = vpow2.f32 %v4745_v31  ;;  %v4913_v12 = vpack.c.bf16 %v4881_v34, %v4881_v34 }
 0xa5e   : > { %4807 = vadd.xlane.f32.xlu1 %v12693_v51  ;;  %9704 = vpow2.f32 %v4749_v35  ;;  %v5111_v10 = vpop.permute.xlu0 %5110 }
 0xa5f   : > { %v4961_v30 = vunpack.c.l.b16 %v4913_v12  ;;  %v4576_v17 = vpop.f32.mrf.mxu0 }
 0xa60   : > { %v12717_v35 = vmul.f32 0.17677669, %v4576_v17 }
 0xa61   : > { %4667 = vmax.xlane.f32.xlu2 %v12696_v1 }
 0xa62   : > { %v9701_v46 = vpop.eup %9700  ;;  %v5027_v26 = vpop.f32.mrf.mxu1 }
 0xa63   : > { %v12700_v16 = vpop.eup %9702  ;;  %v5115_v4 = vpop.permute.xlu1 %5114  ;;  %v4882_v44 = vmul.f32 %v9701_v46, %v12634_v49 }
 0xa64   : > { %v4656_v55 = vpop.xlane.xlu2 %4655  ;;  %5124 = vmatpush.bf16.msra.mxu3 %v5115_v4  ;;  %4809 = vadd.xlane.f32.xlu0 %v12700_v16  ;;  %v12704_v45 = vpop.eup %9704 }
 0xa65   : > { %v4697_v7 = vsub.f32 %v12640_v5, %v4656_v55  ;;  %v4914_v3 = vpack.c.bf16 %v4882_v44, %v4882_v44 }
 0xa66   : > { %4813 = vadd.xlane.f32.xlu1 %v12704_v45  ;;  %v5109_v31 = vpop.permute.xlu0 %5108 }
 0xa67   : > { %v4751_v57 = vmul.f32 1.442695, %v4697_v7  ;;  %v4962_v38 = vunpack.c.l.b16 %v4914_v3 }
 0xa68   : > { %5125 = vmatpush.bf16.msra.mxu3 %v5113_v2 }
 0xa69   : > { %9706 = vpow2.f32 %v4751_v57  ;;  %v4970_v49 = vpack.c.b16 %v4962_v38, %v4961_v30 }
 0xa6a   : > { %v5029_v60 = vpop.f32.mrf.mxu1 }
 0xa6b   : > { %5046 = vmatmul.bf16.gmra.mxu1 %v4970_v49  ;;  %v5176_v18 = vpack.c.bf16 %v5029_v60, %v5027_v26 }
 0xa6c   : > { %v4804_v56 = vpop.xlane.xlu2 %4803  ;;  %5126 = vmatpush.bf16.msra.mxu3 %v5111_v10 }
 0xa6d   : > { %8725 = vmatmul.msk.bf16.gmra.mxu0 %vm1161_vm0, %v5176_v18 }
 0xa6e   : > { %4669 = vmax.xlane.f32.xlu1 %v12708_v28 }
 0xa6f   : > { %v12712_v5 = vpop.eup %9706 }
 0xa70   : > { %4815 = vadd.xlane.f32.xlu2 %v12712_v5  ;;  %5127 = vmatpush.bf16.msra.mxu3 %v5109_v31 }
 0xa74   : > { %v5107_v37 = vpop.permute.xlu2 %5106 }
 0xa75   : > { %5128 = vmatpush.bf16.msra.mxu3 %v5107_v37 }
 0xa76   : > { %4671 = vmax.xlane.f32.xlu1 %v12715_v40 }
 0xa78   : > { %4673 = vmax.xlane.f32.xlu2 %v12717_v35 }
 0xa7c   : > { %v5105_v2 = vpop.permute.xlu2 %5104 }
 0xa7d   : > { %5129 = vmatpush.bf16.msra.mxu3 %v5105_v2 }
 0xa8e   : > { %v4658_v47 = vpop.xlane.xlu1 %4657 }
 0xa8f   : > { %v4698_v8 = vsub.f32 %v12656_v23, %v4658_v47 }
 0xa91   : > { %v4753_v34 = vmul.f32 1.442695, %v4698_v8  ;;  %v4806_v42 = vpop.xlane.xlu0 %4805 }
 0xa93   : > { %9708 = vpow2.f32 %v4753_v34 }
 0xa94   : > { %9710 = vrcp.f32 %v4806_v42 }
 0xa95   : > { %9712 = vrcp.f32 %v4804_v56 }
 0xa99   : > { %v12722_v46 = vpop.eup %9708  ;;  %v4662_v26 = vpop.xlane.xlu0 %4661 }
 0xa9a   : > { %v4700_v4 = vsub.f32 %v12662_v29, %v4662_v26  ;;  %4817 = vadd.xlane.f32.xlu0 %v12722_v46  ;;  %v9711_v12 = vpop.eup %9710 }
 0xa9b   : > { %v9713_v55 = vpop.eup %9712  ;;  %v4884_v10 = vmul.f32 %v9711_v12, %v12659_v6 }
 0xa9c   : > { %v4757_v44 = vmul.f32 1.442695, %v4700_v4  ;;  %v4883_v23 = vmul.f32 %v9713_v55, %v12647_v61 }
 0xa9d   : > { %v4916_v3 = vpack.c.bf16 %v4884_v10, %v4884_v10 }
 0xa9e   : > { %9714 = vpow2.f32 %v4757_v44  ;;  %v4915_v30 = vpack.c.bf16 %v4883_v23, %v4883_v23 }
 0xa9f   : > { %v5069_v29 = vunpack.c.l.b16 %v4916_v3 }
 0xaa0   : > { %v5068_v38 = vunpack.c.l.b16 %v4915_v30 }
 0xaa2   : > { %v5084_v49 = vpack.c.b16 %v5069_v29, %v5068_v38 }
 0xaa4   : > { %v12727_v7 = vpop.eup %9714 }
 0xaa5   : > { %4821 = vadd.xlane.f32.xlu1 %v12727_v7 }
 0xaa6   : > { %v5103_v57 = vpop.permute.xlu1 %5102 }
 0xaa7   : > { %5130 = vmatpush.bf16.msra.mxu3 %v5103_v57 }
 0xaac   : > { %v5101_v52 = vpop.permute.xlu0 %5100 }
 0xaad   : > { %5131 = vmatpush.bf16.msra.mxu3 %v5101_v52 }
 0xab0   : > { %5132 = vmatmul.bf16.vlgmr.msra.gmra.mxu3 %v5084_v49 }
 0xab4   : > { %v4660_v60 = vpop.xlane.xlu2 %4659 }
 0xab5   : > { %v4699_v18 = vsub.f32 %v12671_v27, %v4660_v60 }
 0xab7   : > { %v4755_v6 = vmul.f32 1.442695, %v4699_v18 }
 0xab8   : > { %v5032_v56 = vpop.f32.mrf.mxu1 }
 0xab9   : > { %9716 = vpow2.f32 %v4755_v6 }
 0xabc   : > { %v4664_v31 = vpop.xlane.xlu2 %4663 }
 0xabd   : > { %v4701_v61 = vsub.f32 %v12676_v41, %v4664_v31  ;;  %v5262_v41 = vpop.f32.mrf.mxu0 }
 0xabf   : > { %v12733_v17 = vpop.eup %9716  ;;  %v4759_v37 = vmul.f32 1.442695, %v4701_v61 }
 0xac0   : > { %v5034_v2 = vpop.f32.mrf.mxu1  ;;  %4819 = vadd.xlane.f32.xlu0 %v12733_v17 }
 0xac1   : > { %9718 = vpow2.f32 %v4759_v37  ;;  %v5177_v47 = vpack.c.bf16 %v5034_v2, %v5032_v56 }
 0xac3   : > { %8726 = vmatmul.msk.bf16.gmra.mxu0 %vm1161_vm0, %v5177_v47 }
 0xac4   : > { %v4666_v8 = vpop.xlane.xlu2 %4665 }
 0xac5   : > { %v4702_v34 = vsub.f32 %v12681_v63, %v4666_v8  ;;  %v5264_v63 = vpop.f32.mrf.mxu0 }
 0xac7   : > { %v12738_v27 = vpop.eup %9718  ;;  %v4761_v42 = vmul.f32 1.442695, %v4702_v34 }
 0xac8   : > { %v5037_v26 = vpop.f32.mrf.mxu1  ;;  %4823 = vadd.xlane.f32.xlu2 %v12738_v27 }
 0xac9   : > { %9720 = vpow2.f32 %v4761_v42 }
 0xacc   : > { %v4812_v4 = vpop.xlane.xlu2 %4811 }
 0xacd   : > { %v5267_v60 = vpop.f32.mrf.mxu0 }
 0xacf   : > { %v12741_v44 = vpop.eup %9720 }
 0xad0   : > { %v5039_v12 = vpop.f32.mrf.mxu1  ;;  %4825 = vadd.xlane.f32.xlu0 %v12741_v44 }
 0xad1   : > { %v5178_v55 = vpack.c.bf16 %v5039_v12, %v5037_v26  ;;  %v4808_v10 = vpop.xlane.xlu1 %4807 }
 0xad2   : > { %9722 = vrcp.f32 %v4808_v10 }
 0xad3   : > { %8727 = vmatmul.msk.bf16.gmra.mxu0 %vm1161_vm0, %v5178_v55 }
 0xad4   : > { %v4668_v23 = vpop.xlane.xlu2 %4667 }
 0xad5   : > { %v4703_v3 = vsub.f32 %v12696_v1, %v4668_v23  ;;  %v5269_v12 = vpop.f32.mrf.mxu0 }
 0xad7   : > { %v4763_v57 = vmul.f32 1.442695, %v4703_v3  ;;  %v4810_v30 = vpop.xlane.xlu0 %4809 }
 0xad8   : > { %v9723_v29 = vpop.eup %9722  ;;  %9724 = vrcp.f32 %v4810_v30  ;;  %v5042_v38 = vpop.f32.mrf.mxu1 }
 0xad9   : > { %9726 = vpow2.f32 %v4763_v57  ;;  %v4814_v52 = vpop.xlane.xlu1 %4813  ;;  %v4885_v49 = vmul.f32 %v9723_v29, %v12693_v51  ;;  %v12758_v57 = vld [vmem:[#allocation14] sm:$0xff] }
 0xada   : > { %9728 = vrcp.f32 %v4814_v52  ;;  %v12761_v30 = vperm.slane %v12758_v57, 3 }
 0xadb   : > { %v4917_v31 = vpack.c.bf16 %v4885_v49, %v4885_v49  ;;  %9730 = vrcp.f32 %v4812_v4 }
 0xadd   : > { %v5070_v51 = vunpack.c.l.b16 %v4917_v31  ;;  %v15242_v31 = vld [vmem:[#allocation23_spill] sm:$0xff] }
 0xade   : > { %v9725_v18 = vpop.eup %9724 }
 0xadf   : > { %v12747_v6 = vpop.eup %9726  ;;  %v4886_v56 = vmul.f32 %v9725_v18, %v12700_v16 }
 0xae0   : > { %v5044_v61 = vpop.f32.mrf.mxu1  ;;  %4827 = vadd.xlane.f32.xlu1 %v12747_v6  ;;  %v9729_v16 = vpop.eup %9728 }
 0xae1   : > { %v5179_v1 = vpack.c.bf16 %v5044_v61, %v5042_v38  ;;  %v4670_v37 = vpop.xlane.xlu1 %4669  ;;  %v4918_v2 = vpack.c.bf16 %v4886_v56, %v4886_v56  ;;  %v9731_v55 = vpop.eup %9730  ;;  %v4888_v3 = vmul.f32 %v9729_v16, %v12704_v45  ;;  %v3196_v61 = vadd.f32 %v15242_v31, %v12319_v24  ;;  %v9894_v31 = vld [vmem:[%s10471_s24 + $0x28] sm:$0xff] }
 0xae2   : > { %v4704_v47 = vsub.f32 %v12708_v28, %v4670_v37  ;;  %v5342_v28 = vadd.f32 %v5262_v41, %v12540_v39  ;;  %v4887_v38 = vmul.f32 %v9731_v55, %v12689_v33  ;;  %v5272_v56 = vpop.f32.mrf.mxu0  ;;  %v5344_v55 = vadd.f32 %v5267_v60, %v12558_v59 }
 0xae3   : > { %v12752_v8 = vpop.xlane.xlu2 %4815  ;;  %8728 = vmatmul.msk.bf16.gmra.mxu0 %vm1161_vm0, %v5179_v1  ;;  %v5071_v34 = vunpack.c.l.b16 %v4918_v2  ;;  %v4920_v45 = vpack.c.bf16 %v4888_v3, %v4888_v3  ;;  %v4292_v2 = vadd.f32 %v12560_v22, %v3196_v61 }
 0xae4   : > { %v4765_v42 = vmul.f32 1.442695, %v4704_v47  ;;  %v5375_v33 = vadd.f32 %v12761_v30, %v5342_v28  ;;  %v4919_v1 = vpack.c.bf16 %v4887_v38, %v4887_v38  ;;  %v5377_v60 = vadd.f32 %v12761_v30, %v5344_v55  ;;  %v9890_v28 = vld [vmem:[%s10471_s24 + $0x8] sm:$0xff]  ;;  %v9891_v38 = vld [vmem:[%s10471_s24 + $0x18] sm:$0xff] }
 0xae5   : > { %v5085_v26 = vpack.c.b16 %v5071_v34, %v5070_v51  ;;  %v5073_v51 = vunpack.c.l.b16 %v4920_v45 }
 0xae6   : > { %9732 = vpow2.f32 %v4765_v42  ;;  %v5345_v42 = vadd.f32 %v5269_v12, %v4292_v2  ;;  %v5072_v16 = vunpack.c.l.b16 %v4919_v1 }
 0xae7   : > { %5137 = vmatmul.bf16.gmra.mxu3 %v5085_v26  ;;  %v9889_v26 = vld [vmem:[%s10471_s24] sm:$0xff] }
 0xae8   : > { %v5047_v10 = vpop.f32.mrf.mxu1  ;;  %v5378_v12 = vadd.f32 %v12761_v30, %v5345_v42 }
 0xae9   : > { %v4672_v23 = vpop.xlane.xlu1 %4671 }
 0xaea   : > { %v4705_v4 = vsub.f32 %v12715_v40, %v4672_v23  ;;  %v15241_v40 = vld [vmem:[#allocation27_spill] sm:$0xff] }
 0xaeb   : > { %v4674_v29 = vpop.xlane.xlu2 %4673  ;;  %v3191_v41 = vadd.f32 %v15241_v40, %v12301_v21  ;;  %v12777_v21 = vadd.f32 %v9889_v26, %v5375_v33  ;;  %v15243_v23 = vld [vmem:[#allocation31_spill] sm:$0xff] }
 0xaec   : > { %v12764_v52 = vpop.eup %9732  ;;  %v4767_v49 = vmul.f32 1.442695, %v4705_v4  ;;  %v4706_v18 = vsub.f32 %v12717_v35, %v4674_v29  ;;  %v3201_v59 = vadd.f32 %v15243_v23, %v12334_v43  ;;  %v5346_v4 = vadd.f32 %v5272_v56, %v12566_v32  ;;  %v9892_v43 = vld [vmem:[%s10471_s24 + $0x10] sm:$0xff] }
 0xaed   : > { %4829 = vadd.xlane.f32.xlu2 %v12764_v52  ;;  %v4290_v35 = vadd.f32 %v12549_v62, %v3191_v41  ;;  %v5086_v62 = vpack.c.b16 %v5073_v51, %v5072_v16  ;;  %v12803_v45 = vadd.f32 %v9892_v43, %v5377_v60 }
 0xaee   : > { %9734 = vpow2.f32 %v4767_v49  ;;  %v4769_v39 = vmul.f32 1.442695, %v4706_v18  ;;  %v4294_v3 = vadd.f32 %v12573_v58, %v3201_v59  ;;  %v12798_v49 = vadd.f32 %v9891_v38, %v5378_v12 }
 0xaef   : > { %v5343_v34 = vadd.f32 %v5264_v63, %v4290_v35  ;;  %v5379_v58 = vadd.f32 %v12761_v30, %v5346_v4 }
 0xaf0   : > { %9736 = vpow2.f32 %v4769_v39  ;;  %v5049_v37 = vpop.f32.mrf.mxu1  ;;  %v9893_v39 = vld [vmem:[%s10471_s24 + $0x20] sm:$0xff] }
 0xaf1   : > { %v5180_v47 = vpack.c.bf16 %v5049_v37, %v5047_v10  ;;  %v5376_v63 = vadd.f32 %v12761_v30, %v5343_v34  ;;  %v5274_v10 = vpop.f32.mrf.mxu0  ;;  %v12809_v40 = vadd.f32 %v9893_v39, %v5379_v58  ;;  %9738 = vrcp.f32 %v12752_v8  ;;  %v9895_v37 = vld [vmem:[%s10471_s24 + $0x30] sm:$0xff] }
 0xaf2   : > { %v5347_v18 = vadd.f32 %v5274_v10, %v4294_v3 }
 0xaf3   : > { %8729 = vmatmul.msk.bf16.gmra.mxu0 %vm1161_vm0, %v5180_v47  ;;  %v12795_v29 = vadd.f32 %v9890_v28, %v5376_v63 }
 0xaf4   : > { %v12779_v24 = vpop.eup %9734  ;;  %v5380_v32 = vadd.f32 %v12761_v30, %v5347_v18 }
 0xaf5   : > { %4831 = vadd.xlane.f32.xlu0 %v12779_v24  ;;  %5439 = vadd.xlane.f32.xlu2 %v12777_v21 }
 0xaf6   : > { %v12784_v22 = vpop.eup %9736  ;;  %v12814_v61 = vadd.f32 %v9894_v31, %v5380_v32  ;;  %v10264_v31 = vmov 128.0  }
 0xaf7   : > { %4833 = vadd.xlane.f32.xlu1 %v12784_v22  ;;  %5142 = vmatmul.bf16.gmra.mxu3 %v5086_v62  ;;  %v9739_v2 = vpop.eup %9738 }
 0xaf9   : > { %v5277_v56 = vpop.f32.mrf.mxu0 }
 0xafa   : > { %v5348_v41 = vadd.f32 %v5277_v56, %v12581_v48  ;;  %v4889_v48 = vmul.f32 %v9739_v2, %v12712_v5 }
 0xafc   : > { %v5381_v33 = vadd.f32 %v12761_v30, %v5348_v41  ;;  %v4921_v34 = vpack.c.bf16 %v4889_v48, %v4889_v48  ;;  %v4229_v48 = vpop.f32.mrf.mxu2 }
 0xafd   : > { %5441 = vadd.xlane.f32.xlu0 %v12795_v29  ;;  %5445 = vadd.xlane.f32.xlu2 %v12798_v49 }
 0xafe   : > { %v12820_v35 = vadd.f32 %v9895_v37, %v5381_v33  ;;  %v5074_v26 = vunpack.c.l.b16 %v4921_v34 }
 0xaff   : > { %5443 = vadd.xlane.f32.xlu1 %v12803_v45 }
 0xb05   : > { %5447 = vadd.xlane.f32.xlu0 %v12809_v40 }
 0xb07   : > { %5449 = vadd.xlane.f32.xlu1 %v12814_v61 }
 0xb0d   : > { %v4818_v1 = vpop.xlane.xlu0 %4817 }
 0xb0e   : > { %9740 = vrcp.f32 %v4818_v1 }
 0xb0f   : > { %5451 = vadd.xlane.f32.xlu1 %v12820_v35 }
 0xb14   : > { %v9741_v47 = vpop.eup %9740 }
 0xb15   : > { %v4890_v51 = vmul.f32 %v9741_v47, %v12722_v46 }
 0xb17   : > { %v4922_v42 = vpack.c.bf16 %v4890_v51, %v4890_v51 }
 0xb18   : > { %v4822_v55 = vpop.xlane.xlu1 %4821 }
 0xb19   : > { %v5075_v16 = vunpack.c.l.b16 %v4922_v42  ;;  %9742 = vrcp.f32 %v4822_v55 }
 0xb1b   : > { %v5087_v8 = vpack.c.b16 %v5075_v16, %v5074_v26 }
 0xb1d   : > { %5147 = vmatmul.bf16.gmra.mxu3 %v5087_v8 }
 0xb1f   : > { %v9743_v12 = vpop.eup %9742 }
 0xb20   : > { %v4892_v10 = vmul.f32 %v9743_v12, %v12727_v7 }
 0xb22   : > { %v4924_v46 = vpack.c.bf16 %v4892_v10, %v4892_v10 }
 0xb24   : > { %v5077_v38 = vunpack.c.l.b16 %v4924_v46 }
 0xb33   : > { %v5133_v62 = vpop.f32.mrf.mxu3  ;;  %v4820_v63 = vpop.xlane.xlu0 %4819 }
 0xb34   : > { %9744 = vrcp.f32 %v4820_v63 }
 0xb3a   : > { %v9745_v23 = vpop.eup %9744 }
 0xb3b   : > { %v4824_v59 = vpop.xlane.xlu2 %4823  ;;  %v5135_v5 = vpop.f32.mrf.mxu3  ;;  %v4891_v60 = vmul.f32 %v9745_v23, %v12733_v17 }
 0xb3c   : > { %v5181_v3 = vpack.c.bf16 %v5135_v5, %v5133_v62  ;;  %9746 = vrcp.f32 %v4824_v59  ;;  %v5279_v17 = vpop.f32.mrf.mxu0 }
 0xb3d   : > { %v4923_v4 = vpack.c.bf16 %v4891_v60, %v4891_v60  ;;  %v15245_v60 = vld [vmem:[#allocation39_spill] sm:$0xff] }
 0xb3e   : > { %8730 = vmatmul.msk.bf16.gmra.mxu0 %vm1161_vm0, %v5181_v3  ;;  %v3206_v46 = vadd.f32 %v15245_v60, %v12350_v11 }
 0xb3f   : > { %v5076_v28 = vunpack.c.l.b16 %v4923_v4 }
 0xb41   : > { %v5088_v18 = vpack.c.b16 %v5077_v38, %v5076_v28 }
 0xb42   : > { %v9747_v58 = vpop.eup %9746 }
 0xb43   : > { %5152 = vmatmul.bf16.gmra.mxu3 %v5088_v18  ;;  %v4826_v43 = vpop.xlane.xlu0 %4825  ;;  %v4893_v7 = vmul.f32 %v9747_v58, %v12738_v27  ;;  %v12830_v27 = vpop.f32.mrf.mxu2 }
 0xb44   : > { %9748 = vrcp.f32 %v4826_v43  ;;  %v5282_v47 = vpop.f32.mrf.mxu0  ;;  %v4296_v43 = vadd.f32 %v12631_v13, %v3206_v46 }
 0xb45   : > { %v4925_v39 = vpack.c.bf16 %v4893_v7, %v4893_v7  ;;  %9750 = vrcp.f32 %v10264_v31 }
 0xb47   : > { %v5078_v33 = vunpack.c.l.b16 %v4925_v39 }
 0xb4a   : > { %v9749_v32 = vpop.eup %9748 }
 0xb4b   : > { %v4894_v56 = vmul.f32 %v9749_v32, %v12741_v44  ;;  %v9751_v2 = vpop.eup %9750  ;;  %v12837_v10 = vpop.f32.mrf.mxu2  ;;  %v5349_v32 = vadd.f32 %v5279_v17, %v4296_v43 }
 0xb4c   : > { %v5504_v51 = vmul.f32 128.0, %v9751_v2  ;;  %v12832_v44 = vpop.f32.mrf.mxu0  ;;  %vm5508_vm1 = vweird.f32 %v9751_v2 }
 0xb4d   : > { %v4926_v41 = vpack.c.bf16 %v4894_v56, %v4894_v56 }
 0xb4e   : > { %v5505_v42 = vsub.f32 1.0, %v5504_v51 }
 0xb4f   : > { %v5079_v1 = vunpack.c.l.b16 %v4926_v41  ;;  %v3209_v41 = vadd.f32 %v11971_v9, %v12355_v20 }
 0xb50   : > { %v5506_v26 = vmul.f32 %v9751_v2, %v5505_v42 }
 0xb51   : > { %v5089_v37 = vpack.c.b16 %v5079_v1, %v5078_v33  ;;  %v4297_v17 = vadd.f32 %v4229_v48, %v3209_v41  ;;  %v9896_v48 = vld [vmem:[%s10471_s24 + $0x38] sm:$0xff]  ;;  %v15247_v41 = vld [vmem:[#allocation35_spill] sm:$0xff] }
 0xb52   : > { %v5507_v55 = vadd.f32 %v9751_v2, %v5506_v26 }
 0xb53   : > { %5157 = vmatmul.bf16.gmra.mxu3 %v5089_v37  ;;  %v4828_v34 = vpop.xlane.xlu1 %4827  ;;  %v4236_v13 = vpop.f32.mrf.mxu2 }
 0xb54   : > { %9752 = vrcp.f32 %v4828_v34  ;;  %v12835_v63 = vsel %vm5508_vm1, %v9751_v2, %v5507_v55  ;;  %v12842_v3 = vpop.f32.mrf.mxu0  ;;  %v5350_v55 = vadd.f32 %v5282_v47, %v4297_v17 }
 0xb55   : > { %15244 = vst [vmem:[#allocation40_spill] sm:$0xff] %v12835_v63 }
 0xb56   : > { %v5383_v47 = vadd.f32 %v12761_v30, %v5350_v55  ;;  %v3221_v55 = vadd.f32 %v12040_v36, %v12391_v54  ;;  %v15248_v54 = vld [vmem:[#allocation34_spill] sm:$0xff] }
 0xb5a   : > { %v9753_v8 = vpop.eup %9752 }
 0xb5b   : > { %v4895_v62 = vmul.f32 %v9753_v8, %v12747_v6 }
 0xb5d   : > { %v4927_v5 = vpack.c.bf16 %v4895_v62, %v4895_v62 }
 0xb60   : > { %v4830_v16 = vpop.xlane.xlu2 %4829 }
 0xb61   : > { %9754 = vrcp.f32 %v4830_v16  ;;  %v5289_v16 = vpop.f32.mrf.mxu0 }
 0xb67   : > { %v9755_v12 = vpop.eup %9754 }
 0xb68   : > { %v5440_v23 = vpop.xlane.xlu2 %5439  ;;  %v4896_v59 = vmul.f32 %v9755_v12, %v12764_v52  ;;  %v4832_v28 = vpop.xlane.xlu0 %4831  ;;  %v5080_v52 = vunpack.c.l.b16 %v4927_v5  ;;  %v3216_v5 = vadd.f32 %v12009_v14, %v12380_v50 }
 0xb69   : > { %v5510_v4 = vmul.f32 %v12835_v63, %v5440_v23  ;;  %9756 = vrcp.f32 %v4832_v28 }
 0xb6a   : > { %v4834_v38 = vpop.xlane.xlu1 %4833  ;;  %v5138_v6 = vpop.f32.mrf.mxu3  ;;  %v4928_v18 = vpack.c.bf16 %v4896_v59, %v4896_v59  ;;  %v3211_v59 = vadd.f32 %v11979_v15, %v12362_v19  ;;  %v4300_v43 = vadd.f32 %v4236_v13, %v3216_v5  ;;  %v9897_v19 = vld [vmem:[%s10471_s24 + $0x40] sm:$0xff] }
 0xb6b   : > { %v12847_v58 = vsub.f32 %v12777_v21, %v5510_v4  ;;  %9758 = vrcp.f32 %v4834_v38  ;;  %v5382_v21 = vadd.f32 %v12761_v30, %v5349_v32  ;;  %v12889_v14 = vadd.f32 %v9897_v19, %v5383_v47  ;;  %v5292_v32 = vpop.f32.mrf.mxu0 }
 0xb6c   : > { %v5081_v7 = vunpack.c.l.b16 %v4928_v18  ;;  %v4298_v18 = vadd.f32 %v12830_v27, %v3211_v59 }
 0xb6d   : > { %v5574_v11 = vmul.f32 %v12847_v58, %v12847_v58  ;;  %v12866_v62 = vadd.f32 %v9896_v48, %v5382_v21 }
 0xb6e   : > { %v5090_v56 = vpack.c.b16 %v5081_v7, %v5080_v52  ;;  %v4239_v52 = vpop.f32.mrf.mxu2  ;;  %v5351_v50 = vadd.f32 %v12832_v44, %v4298_v18 }
 0xb6f   : > { %5606 = vadd.xlane.f32.xlu2 %v5574_v11  ;;  %v9757_v39 = vpop.eup %9756 }
 0xb70   : > { %v5446_v31 = vpop.xlane.xlu2 %5445  ;;  %5162 = vmatmul.bf16.gmra.mxu3 %v5090_v56  ;;  %v5442_v37 = vpop.xlane.xlu0 %5441  ;;  %v4897_v9 = vmul.f32 %v9757_v39, %v12779_v24  ;;  %v15246_v39 = vld [vmem:[#allocation37_spill] sm:$0xff] }
 0xb71   : > { %v9759_v33 = vpop.eup %9758  ;;  %v5513_v1 = vmul.f32 %v12835_v63, %v5446_v31  ;;  %v5511_v2 = vmul.f32 %v12835_v63, %v5442_v37  ;;  %v3214_v44 = vadd.f32 %v15246_v39, %v12370_v25  ;;  %v3219_v31 = vadd.f32 %v15247_v41, %v12387_v0  ;;  %v8860_v39 = vld [vmem:[#allocation11 + $0xe8] sm:$0xf] }
 0xb72   : > { %v5444_v51 = vpop.xlane.xlu1 %5443  ;;  %v5140_v34 = vpop.f32.mrf.mxu3  ;;  %v4898_v20 = vmul.f32 %v9759_v33, %v12784_v22  ;;  %v4929_v22 = vpack.c.bf16 %v4897_v9, %v4897_v9  ;;  %v5384_v33 = vadd.f32 %v12761_v30, %v5351_v50 }
 0xb73   : > { %v12857_v42 = vsub.f32 %v12798_v49, %v5513_v1  ;;  %v5182_v26 = vpack.c.bf16 %v5140_v34, %v5138_v6  ;;  %v12862_v8 = vsub.f32 %v12795_v29, %v5511_v2  ;;  %v5512_v49 = vmul.f32 %v12835_v63, %v5444_v51 }
 0xb74   : > { %v4930_v29 = vpack.c.bf16 %v4898_v20, %v4898_v20  ;;  %v5082_v38 = vunpack.c.l.b16 %v4929_v22  ;;  %v4299_v17 = vadd.f32 %v12837_v10, %v3214_v44  ;;  %v9899_v20 = vld [vmem:[%s10471_s24 + $0x58] sm:$0xff]  ;;  %v5294_v10 = vpop.f32.mrf.mxu0 }
 0xb75   : > { %8731 = vmatmul.msk.bf16.gmra.mxu0 %vm1161_vm0, %v5182_v26  ;;  %v5577_v12 = vmul.f32 %v12857_v42, %v12857_v42  ;;  %v5575_v24 = vmul.f32 %v12862_v8, %v12862_v8  ;;  %v12880_v60 = vsub.f32 %v12803_v45, %v5512_v49  ;;  %v5353_v45 = vadd.f32 %v5289_v16, %v4300_v43  ;;  %v9898_v26 = vld [vmem:[%s10471_s24 + $0x48] sm:$0xff]  ;;  %v9903_v43 = vld [vmem:[%s10471_s24 + $0x70] sm:$0xff]  ;;  %v9065_v44 = vld [vmem:[#allocation11 + $0xf4] sm:$0xf0] }
 0xb76   : > { %v5083_v6 = vunpack.c.l.b16 %v4930_v29  ;;  %v4241_v51 = vpop.f32.mrf.mxu2  ;;  %v5352_v0 = vadd.f32 %v12842_v3, %v4299_v17  ;;  %v12913_v9 = vadd.f32 %v9898_v26, %v5384_v33  ;;  %v9900_v29 = vld [vmem:[%s10471_s24 + $0x50] sm:$0xff]  ;;  %v8836_v33 = vld [vmem:[#allocation11 + $0xc0] sm:$0xf] }
 0xb77   : > { %5453 = vadd.xlane.f32.xlu2 %v12866_v62  ;;  %5612 = vadd.xlane.f32.xlu1 %v5577_v12  ;;  %v5576_v11 = vmul.f32 %v12880_v60, %v12880_v60  ;;  %v5386_v13 = vadd.f32 %v12761_v30, %v5353_v45  ;;  %v4302_v49 = vadd.f32 %v4241_v51, %v3221_v55  ;;  %v8852_v45 = vld [vmem:[#allocation11 + $0xe0] sm:$0xf]  ;;  %v8838_v17 = vld [vmem:[#allocation11 + $0xd0] sm:$0xf0]  ;;  %v9056_v26 = vld [vmem:[#allocation11 + $0xac] sm:$0xf0] }
 0xb78   : > { %5608 = vadd.xlane.f32.xlu0 %v5575_v24  ;;  %v5448_v23 = vpop.xlane.xlu0 %5447  ;;  %v5091_v56 = vpack.c.b16 %v5083_v6, %v5082_v38  ;;  %v5385_v48 = vadd.f32 %v12761_v30, %v5352_v0  ;;  %v9902_v38 = vld [vmem:[%s10471_s24 + $0x68] sm:$0xff]  ;;  %v8822_v55 = vld [vmem:[#allocation11 + $0xb0] sm:$0xf0] }
 0xb79   : > { %v5514_v46 = vmul.f32 %v12835_v63, %v5448_v23  ;;  %v12916_v16 = vadd.f32 %v9899_v20, %v5386_v13  ;;  %v5355_v24 = vadd.f32 %v5294_v10, %v4302_v49  ;;  %v9901_v23 = vld [vmem:[%s10471_s24 + $0x60] sm:$0xff]  ;;  %v9060_v13 = vld [vmem:[#allocation11 + $0xcc] sm:$0xf0] }
 0xb7a   : > { %v5450_v4 = vpop.xlane.xlu1 %5449  ;;  %v5143_v28 = vpop.f32.mrf.mxu3  ;;  %v12930_v47 = vadd.f32 %v9900_v29, %v5385_v48  ;;  %v9054_v20 = vld [vmem:[#allocation11 + $0xa4] sm:$0xf]  ;;  %v8828_v48 = vld [vmem:[#allocation11 + $0xa8] sm:$0xf]  ;;  %v8804_v29 = vld [vmem:[#allocation11 + $0x80] sm:$0xf] }
 0xb7b   : > { %v12885_v7 = vsub.f32 %v12809_v40, %v5514_v46  ;;  %v5515_v15 = vmul.f32 %v12835_v63, %v5450_v4  ;;  %v5388_v5 = vadd.f32 %v12761_v30, %v5355_v24  ;;  %v8825_v49 = vor.u32 %v9054_v20, %v8822_v55  ;;  %v9038_v20 = vld [vmem:[#allocation11 + $0x24] sm:$0xf] }
 0xb7c   : > { %v5297_v46 = vpop.f32.mrf.mxu0 }
 0xb7d   : > { %v5578_v27 = vmul.f32 %v12885_v7, %v12885_v7  ;;  %v12898_v40 = vsub.f32 %v12814_v61, %v5515_v15  ;;  %v4301_v61 = vadd.f32 %v4239_v52, %v3219_v31  ;;  %v12941_v6 = vadd.f32 %v9902_v38, %v5388_v5  ;;  %v8806_v5 = vld [vmem:[#allocation11 + $0x90] sm:$0xf0] }
 0xb7e   : > { %v4244_v36 = vpop.f32.mrf.mxu2  ;;  %v8861_v31 = vor.u32 %v9065_v44, %v8860_v39  ;;  %v9044_v39 = vld [vmem:[#allocation11 + $0x4c] sm:$0xf0]  ;;  %v9042_v44 = vld [vmem:[#allocation11 + $0x44] sm:$0xf] }
 0xb7f   : > { %5455 = vadd.xlane.f32.xlu2 %v12889_v14  ;;  %5614 = vadd.xlane.f32.xlu1 %v5578_v27  ;;  %v5579_v25 = vmul.f32 %v12898_v40, %v12898_v40  ;;  %v5354_v34 = vadd.f32 %v5292_v32, %v4301_v61  ;;  %v9064_v32 = vld [vmem:[#allocation11 + $0xec] sm:$0xf0]  ;;  %v8844_v61 = vld [vmem:[#allocation11 + $0xc8] sm:$0xf] }
 0xb80   : > { %5610 = vadd.xlane.f32.xlu0 %v5576_v11  ;;  %5167 = vmatmul.bf16.gmra.mxu3 %v5091_v56  ;;  %v9062_v11 = vld [vmem:[#allocation11 + $0xe4] sm:$0xf]  ;;  %v8853_v27 = vor.u32 %v9064_v32, %v8852_v45  ;;  %v8854_v56 = vld [vmem:[#allocation11 + $0xf0] sm:$0xf0]  ;;  %v9049_v45 = vld [vmem:[#allocation11 + $0x74] sm:$0xf0] }
 0xb81   : > { %v5387_v12 = vadd.f32 %v12761_v30, %v5354_v34  ;;  %v8857_v41 = vor.u32 %v9062_v11, %v8854_v56  ;;  %6548 = vmatpush.bf16.msrb.mxu3 %v8861_v31  ;;  %v8820_v34 = vld [vmem:[#allocation11 + $0xa0] sm:$0xf] }
 0xb82   : > { %v5452_v21 = vpop.xlane.xlu1 %5451  ;;  %v5145_v1 = vpop.f32.mrf.mxu3  ;;  %6370 = vmatpush.bf16.msrb.mxu1 %v8853_v27  ;;  %v8821_v10 = vor.u32 %v9056_v26, %v8820_v34  ;;  %v8772_v56 = vld [vmem:[#allocation11 + $0x40] sm:$0xf]  ;;  %v9040_v26 = vld [vmem:[#allocation11 + $0x2c] sm:$0xf0] }
 0xb83   : > { %v5183_v37 = vpack.c.bf16 %v5145_v1, %v5143_v28  ;;  %v5516_v2 = vmul.f32 %v12835_v63, %v5452_v21  ;;  %v12933_v59 = vadd.f32 %v9901_v23, %v5387_v12  ;;  %6459 = vmatpush.bf16.msrb.mxu2 %v8857_v41  ;;  %v9058_v21 = vld [vmem:[#allocation11 + $0xc4] sm:$0xf]  ;;  %v9057_v12 = vld [vmem:[#allocation11 + $0xb4] sm:$0xf0]  ;;  %v9052_v23 = vld [vmem:[#allocation11 + $0x8c] sm:$0xf0] }
 0xb84   : > { %v8841_v51 = vor.u32 %v9058_v21, %v8838_v17  ;;  %v8829_v24 = vor.u32 %v9057_v12, %v8828_v48  ;;  %v12953_v27 = vpop.f32.mrf.mxu0  ;;  %v8780_v21 = vld [vmem:[#allocation11 + $0x48] sm:$0xf]  ;;  %v8756_v34 = vld [vmem:[#allocation11 + $0x20] sm:$0xf]  ;;  %v8758_v48 = vld [vmem:[#allocation11 + $0x30] sm:$0xf0] }
 0xb85   : > { %8732 = vmatmul.msk.bf16.gmra.mxu0 %vm1161_vm0, %v5183_v37  ;;  %v12923_v3 = vsub.f32 %v12820_v35, %v5516_v2  ;;  %v3224_v35 = vadd.f32 %v15248_v54, %v12399_v53  ;;  %v8837_v37 = vor.u32 %v9060_v13, %v8836_v33  ;;  %v9061_v2 = vld [vmem:[#allocation11 + $0xd4] sm:$0xf0]  ;;  %v8773_v33 = vor.u32 %v9044_v39, %v8772_v56  ;;  %v8774_v13 = vld [vmem:[#allocation11 + $0x50] sm:$0xf0]  ;;  %v8764_v12 = vld [vmem:[#allocation11 + $0x28] sm:$0xf] }
 0xb86   : > { %v8845_v0 = vor.u32 %v9061_v2, %v8844_v61  ;;  %v8777_v17 = vor.u32 %v9042_v44, %v8774_v13  ;;  %v9063_v2 = vld [vmem:[#allocation11 + $0xec] sm:$0xf]  ;;  %v8757_v55 = vor.u32 %v9040_v26, %v8756_v34 }
 0xb87   : > { %5616 = vadd.xlane.f32.xlu2 %v5579_v25  ;;  %5461 = vadd.xlane.f32.xlu1 %v12916_v16  ;;  %v5580_v22 = vmul.f32 %v12923_v3, %v12923_v3  ;;  %v4303_v4 = vadd.f32 %v4244_v36, %v3224_v35  ;;  %v9050_v36 = vld [vmem:[#allocation11 + $0x84] sm:$0xf]  ;;  %v8805_v35 = vor.u32 %v9052_v23, %v8804_v29  ;;  %v9051_v13 = vld [vmem:[#allocation11 + $0x8c] sm:$0xf] }
 0xb88   : > { %5457 = vadd.xlane.f32.xlu0 %v12913_v9  ;;  %6371 = vmatpush.bf16.msrb.mxu1 %v8837_v37  ;;  %v8761_v29 = vor.u32 %v9038_v20, %v8758_v48 }
 0xb89   : > { %v5356_v28 = vadd.f32 %v5297_v46, %v4303_v4  ;;  %6460 = vmatpush.bf16.msrb.mxu2 %v8841_v51  ;;  %6549 = vmatpush.bf16.msrb.mxu3 %v8845_v0  ;;  %v8812_v46 = vld [vmem:[#allocation11 + $0x88] sm:$0xf]  ;;  %v9053_v4 = vld [vmem:[#allocation11 + $0x94] sm:$0xf0] }
 0xb8a   : > { %v8813_v38 = vor.u32 %v9053_v4, %v8812_v46  ;;  %v8740_v46 = vld [vmem:[#allocation11] sm:$0xf]  ;;  %v9036_v4 = vld [vmem:[#allocation11 + $0xc] sm:$0xf0] }
 0xb8b   : > { %v5389_v18 = vadd.f32 %v12761_v30, %v5356_v28  ;;  %v8809_v28 = vor.u32 %v9050_v36, %v8806_v5  ;;  %v9059_v36 = vld [vmem:[#allocation11 + $0xcc] sm:$0xf] }
 0xb8c   : > { %6372 = vmatpush.bf16.msrb.mxu1 %v8821_v10 }
 0xb8d   : > { %v12946_v52 = vadd.f32 %v9903_v43, %v5389_v18  ;;  %6461 = vmatpush.bf16.msrb.mxu2 %v8825_v49  ;;  %6550 = vmatpush.bf16.msrb.mxu3 %v8829_v24  ;;  %v8788_v18 = vld [vmem:[#allocation11 + $0x60] sm:$0xf]  ;;  %v9048_v43 = vld [vmem:[#allocation11 + $0x6c] sm:$0xf0]  ;;  %v9041_v49 = vld [vmem:[#allocation11 + $0x34] sm:$0xf0] }
 0xb8e   : > { %v8765_v23 = vor.u32 %v9041_v49, %v8764_v12 }
 0xb8f   : > { %5618 = vadd.xlane.f32.xlu2 %v5580_v22  ;;  %5463 = vadd.xlane.f32.xlu1 %v12933_v59  ;;  %v12951_v22 = vpop.f32.mrf.mxu2 }
 0xb90   : > { %5459 = vadd.xlane.f32.xlu0 %v12930_v47  ;;  %6373 = vmatpush.bf16.msrb.mxu1 %v8805_v35 }
 0xb91   : > { %6462 = vmatpush.bf16.msrb.mxu2 %v8809_v28  ;;  %6551 = vmatpush.bf16.msrb.mxu3 %v8813_v38  ;;  %v9034_v28 = vld [vmem:[#allocation11 + $0x4] sm:$0xf]  ;;  %v8741_v38 = vor.u32 %v9036_v4, %v8740_v46 }
 0xb97   : > { %5465 = vadd.xlane.f32.xlu2 %v12941_v6  ;;  %v12955_v41 = vpop.f32.mrf.mxu2 }
 0xb9f   : > { %5467 = vadd.xlane.f32.xlu2 %v12946_v52 }
 0xba0   : > { %v5148_v15 = vpop.f32.mrf.mxu3 }
 0xba8   : > { %v5150_v19 = vpop.f32.mrf.mxu3 }
 0xba9   : > { %v5184_v53 = vpack.c.bf16 %v5150_v19, %v5148_v15  ;;  %v9046_v15 = vld [vmem:[#allocation11 + $0x64] sm:$0xf]  ;;  %v8789_v19 = vor.u32 %v9048_v43, %v8788_v18  ;;  %v8742_v18 = vld [vmem:[#allocation11 + $0x10] sm:$0xf0]  ;;  %v8748_v43 = vld [vmem:[#allocation11 + $0x8] sm:$0xf] }
 0xbab   : > { %8733 = vmatmul.msk.bf16.gmra.mxu0 %vm1161_vm0, %v5184_v53  ;;  %v8790_v53 = vld [vmem:[#allocation11 + $0x70] sm:$0xf0]  ;;  %6374 = vmatpush.bf16.msrb.mxu1 %v8789_v19  ;;  %v12964_v19 = vpop.f32.mrf.mxu2 }
 0xbac   : > { %v8793_v32 = vor.u32 %v9046_v15, %v8790_v53  ;;  %v9037_v15 = vld [vmem:[#allocation11 + $0x14] sm:$0xf0]  ;;  %v8745_v53 = vor.u32 %v9034_v28, %v8742_v18  ;;  %v9043_v28 = vld [vmem:[#allocation11 + $0x4c] sm:$0xf] }
 0xbae   : > { %6463 = vmatpush.bf16.msrb.mxu2 %v8793_v32  ;;  %v8830_v32 = vld [vmem:[#allocation11 + $0xb8] sm:$0xf0] }
 0xbaf   : > { %6375 = vmatpush.bf16.msrb.mxu1 %v8773_v33 }
 0xbb2   : > { %6464 = vmatpush.bf16.msrb.mxu2 %v8777_v17 }
 0xbb3   : > { %6376 = vmatpush.bf16.msrb.mxu1 %v8757_v55  ;;  %v8798_v55 = vld [vmem:[#allocation11 + $0x78] sm:$0xf0] }
 0xbb6   : > { %6465 = vmatpush.bf16.msrb.mxu2 %v8761_v29  ;;  %v12990_v29 = vpop.f32.mrf.mxu2 }
 0xbb7   : > { %6377 = vmatpush.bf16.msrb.mxu1 %v8741_v38  ;;  %v8782_v38 = vld [vmem:[#allocation11 + $0x58] sm:$0xf0] }
 0xbba   : > { %6466 = vmatpush.bf16.msrb.mxu2 %v8745_v53 }
 0xbbb   : > { %v12959_v24 = vpop.f32.mrf.mxu0 }
 0xbc3   : > { %v12978_v34 = vpop.f32.mrf.mxu0 }
 0xbc6   : > { %v5153_v50 = vpop.f32.mrf.mxu3 }
 0xbce   : > { %v5155_v1 = vpop.f32.mrf.mxu3 }
 0xbcf   : > { %v5185_v25 = vpack.c.bf16 %v5155_v1, %v5153_v50  ;;  %v8796_v50 = vld [vmem:[#allocation11 + $0x68] sm:$0xf]  ;;  %v9045_v1 = vld [vmem:[#allocation11 + $0x54] sm:$0xf0] }
 0xbd0   : > { %v8797_v11 = vor.u32 %v9049_v45, %v8796_v50  ;;  %v8781_v61 = vor.u32 %v9045_v1, %v8780_v21  ;;  %v8749_v50 = vor.u32 %v9037_v15, %v8748_v43  ;;  %v9055_v45 = vld [vmem:[#allocation11 + $0xac] sm:$0xf]  ;;  %v8814_v21 = vld [vmem:[#allocation11 + $0x98] sm:$0xf0]  ;;  %v8785_v15 = vor.u32 %v9043_v28, %v8782_v38 }
 0xbd1   : > { %8734 = vmatmul.msk.bf16.gmra.mxu0 %vm1161_vm0, %v5185_v25  ;;  %v8862_v25 = vld [vmem:[#allocation11 + $0xf8] sm:$0xf0] }
 0xbd2   : > { %6552 = vmatpush.bf16.msrb.mxu3 %v8797_v11  ;;  %v8865_v51 = vor.u32 %v9063_v2, %v8862_v25  ;;  %v8833_v11 = vor.u32 %v9055_v45, %v8830_v32  ;;  %v15249_v25 = vld [vmem:[#allocation56_spill] sm:$0xff] }
 0xbd3   : > { %v15251_v32 = vld [vmem:[#allocation36_spill] sm:$0xff] }
 0xbd4   : > { %6637 = vmatpush.bf16.msra.mxu0 %v8865_v51  ;;  %v15250_v51 = vld [vmem:[#allocation69_spill] sm:$0xff] }
 0xbd6   : > { %v5158_v54 = vpop.f32.mrf.mxu3  ;;  %6553 = vmatpush.bf16.msrb.mxu3 %v8781_v61 }
 0xbda   : > { %6554 = vmatpush.bf16.msrb.mxu3 %v8765_v23 }
 0xbde   : > { %v5160_v31 = vpop.f32.mrf.mxu3  ;;  %6555 = vmatpush.bf16.msrb.mxu3 %v8749_v50 }
 0xbdf   : > { %v5186_v37 = vpack.c.bf16 %v5160_v31, %v5158_v54  ;;  %v8846_v54 = vld [vmem:[#allocation11 + $0xd8] sm:$0xf0] }
 0xbe0   : > { %v8849_v5 = vor.u32 %v9059_v36, %v8846_v54 }
 0xbe1   : > { %8735 = vmatmul.msk.bf16.gmra.mxu0 %vm1161_vm0, %v5186_v37  ;;  %v8817_v37 = vor.u32 %v9051_v13, %v8814_v21 }
 0xbe2   : > { %v5607_v0 = vpop.xlane.xlu2 %5606  ;;  %6638 = vmatpush.bf16.msra.mxu0 %v8849_v5 }
 0xbe3   : > { %v5670_v10 = vmul.f32 %v5607_v0, %v12835_v63  ;;  %v3226_v0 = vadd.f32 %v15250_v51, %v15249_v25 }
 0xbe5   : > { %v12961_v35 = vadd.f32 1e-05, %v5670_v10  ;;  %v4304_v48 = vadd.f32 %v12951_v22, %v3226_v0 }
 0xbe6   : > { %6639 = vmatpush.bf16.msra.mxu0 %v8833_v11  ;;  %v15252_v11 = vld [vmem:[#allocation65_spill] sm:$0xff] }
 0xbe7   : > { %9760 = vrsqrt.f32 %v12961_v35  ;;  %v5357_v23 = vadd.f32 %v12953_v27, %v4304_v48  ;;  %vm5740_vm3 = vweird.f32 %v12961_v35 }
 0xbea   : > { %v5454_v56 = vpop.xlane.xlu2 %5453  ;;  %v5613_v39 = vpop.xlane.xlu1 %5612  ;;  %6640 = vmatpush.bf16.msra.mxu0 %v8817_v37  ;;  %v8766_v37 = vld [vmem:[#allocation11 + $0x38] sm:$0xf0] }
 0xbeb   : > { %v5517_v44 = vmul.f32 %v12835_v63, %v5454_v56  ;;  %v5673_v31 = vmul.f32 %v5613_v39, %v12835_v63  ;;  %v5609_v33 = vpop.xlane.xlu0 %5608  ;;  %v3229_v56 = vadd.f32 %v15252_v11, %v15251_v32  ;;  %v5390_v39 = vadd.f32 %v12761_v30, %v5357_v23 }
 0xbec   : > { %v5671_v1 = vmul.f32 %v5609_v33, %v12835_v63 }
 0xbed   : > { %v12969_v17 = vpop.eup %9760  ;;  %v12972_v61 = vsub.f32 %v12866_v62, %v5517_v44  ;;  %v12974_v2 = vadd.f32 1e-05, %v5673_v31  ;;  %v9047_v62 = vld [vmem:[#allocation11 + $0x6c] sm:$0xf]  ;;  %v4305_v25 = vadd.f32 %v12955_v41, %v3229_v56 }
 0xbee   : > { %v5735_v26 = vmul.f32 %v12969_v17, %v12961_v35  ;;  %v12982_v20 = vadd.f32 1e-05, %v5671_v1  ;;  %v8801_v49 = vor.u32 %v9047_v62, %v8798_v55  ;;  %vm5741_vm2 = vweird.f32 %v12969_v17  ;;  %v9039_v1 = vld [vmem:[#allocation11 + $0x2c] sm:$0xf]  ;;  %v9904_v55 = vld [vmem:[%s10471_s24 + $0x78] sm:$0xff] }
 0xbef   : > { %9762 = vrsqrt.f32 %v12974_v2  ;;  %v5581_v10 = vmul.f32 %v12972_v61, %v12972_v61  ;;  %vm13022_vm4 = vmor %vm5740_vm3, %vm5741_vm2  ;;  %v13034_v35 = vadd.f32 %v9904_v55, %v5390_v39  ;;  %v8769_v41 = vor.u32 %v9039_v1, %v8766_v37  ;;  %v15258_v55 = vld [vmem:[#allocation58_spill] sm:$0xff] }
 0xbf0   : > { %v5736_v12 = vmul.f32 %v12969_v17, %v5735_v26  ;;  %9764 = vrsqrt.f32 %v12982_v20  ;;  %6641 = vmatpush.bf16.msra.mxu0 %v8801_v49  ;;  %v5358_v48 = vadd.f32 %v12959_v24, %v4305_v25  ;;  %v4256_v24 = vpop.f32.mrf.mxu2  ;;  %vm5750_vm6 = vweird.f32 %v12982_v20 }
 0xbf1   : > { %5620 = vadd.xlane.f32.xlu0 %v5581_v10  ;;  %vm5770_vm11 = vweird.f32 %v12974_v2 }
 0xbf2   : > { %v5737_v36 = vmul.f32 0.5, %v5736_v12  ;;  %v5456_v54 = vpop.xlane.xlu2 %5455  ;;  %v5615_v46 = vpop.xlane.xlu1 %5614 }
 0xbf3   : > { %v5518_v5 = vmul.f32 %v12835_v63, %v5456_v54  ;;  %v5611_v4 = vpop.xlane.xlu0 %5610  ;;  %v12995_v43 = vpop.f32.mrf.mxu3  ;;  %v5674_v27 = vmul.f32 %v5615_v46, %v12835_v63  ;;  %v8750_v46 = vld [vmem:[#allocation11 + $0x18] sm:$0xf0] }
 0xbf4   : > { %v5738_v22 = vsub.f32 1.5, %v5737_v36  ;;  %v5672_v18 = vmul.f32 %v5611_v4, %v12835_v63  ;;  %v13010_v31 = vpop.f32.mrf.mxu0  ;;  %6642 = vmatpush.bf16.msra.mxu0 %v8785_v15  ;;  %v13040_v4 = vperm.slane %v12758_v57, 5 }
 0xbf5   : > { %v12997_v53 = vpop.eup %9762  ;;  %v13000_v50 = vsub.f32 %v12889_v14, %v5518_v5  ;;  %v13027_v26 = vadd.f32 1e-05, %v5674_v27  ;;  %v9035_v5 = vld [vmem:[#allocation11 + $0xc] sm:$0xf] }
 0xbf6   : > { %v13003_v45 = vpop.eup %9764  ;;  %v5739_v44 = vmul.f32 %v12969_v17, %v5738_v22  ;;  %v5765_v33 = vmul.f32 %v12997_v53, %v12974_v2  ;;  %v13016_v13 = vadd.f32 1e-05, %v5672_v18  ;;  %v8753_v56 = vor.u32 %v9035_v5, %v8750_v46 }
 0xbf7   : > { %v5745_v14 = vmul.f32 %v13003_v45, %v12982_v20  ;;  %v5582_v21 = vmul.f32 %v13000_v50, %v13000_v50  ;;  %vm5751_vm5 = vweird.f32 %v13003_v45  ;;  %vm5771_vm9 = vweird.f32 %v12997_v53 }
 0xbf8   : > { %9766 = vrsqrt.f32 %v13016_v13  ;;  %v5743_v10 = vsel %vm13022_vm4, %v12969_v17, %v5739_v44  ;;  %v5766_v12 = vmul.f32 %v12997_v53, %v5765_v33  ;;  %6643 = vmatpush.bf16.msra.mxu0 %v8769_v41  ;;  %vm5752_vm7 = vmor %vm5750_vm6, %vm5751_vm5  ;;  %vm5760_vm10 = vweird.f32 %v13016_v13 }
 0xbf9   : > { %v5746_v0 = vmul.f32 %v13003_v45, %v5745_v14  ;;  %5622 = vadd.xlane.f32.xlu0 %v5582_v21  ;;  %v6054_v22 = vmul.f32 %v5743_v10, %v12847_v58  ;;  %9768 = vrsqrt.f32 %v13027_v26  ;;  %v5391_v58 = vadd.f32 %v12761_v30, %v5358_v48  ;;  %v15256_v10 = vld [vmem:[#allocation62_spill] sm:$0xff]  ;;  %vm13131_vm13 = vmor %vm5770_vm11, %vm5771_vm9 }
 0xbfa   : > { %v5617_v62 = vpop.xlane.xlu2 %5616  ;;  %v5462_v36 = vpop.xlane.xlu1 %5461  ;;  %v5767_v44 = vmul.f32 0.5, %v5766_v12  ;;  %vm5780_vm2 = vweird.f32 %v13027_v26 }
 0xbfb   : > { %v5747_v49 = vmul.f32 0.5, %v5746_v0  ;;  %v5675_v23 = vmul.f32 %v5617_v62, %v12835_v63  ;;  %v5458_v54 = vpop.xlane.xlu0 %5457  ;;  %v5521_v17 = vmul.f32 %v12835_v63, %v5462_v36  ;;  %v5165_v38 = vpop.f32.mrf.mxu3  ;;  %v6087_v14 = vmul.f32 %v13040_v4, %v6054_v22  ;;  %v15255_v0 = vld [vmem:[#allocation66_spill] sm:$0xff]  ;;  %v9905_v22 = vld [vmem:[%s10471_s24 + $0x80] sm:$0xff] }
 0xbfc   : > { %v5519_v28 = vmul.f32 %v12835_v63, %v5458_v54  ;;  %v5187_v11 = vpack.c.bf16 %v5165_v38, %v12995_v43  ;;  %v13068_v43 = vperm.slane %v12758_v57, 6  ;;  %6644 = vmatpush.bf16.msra.mxu0 %v8753_v56  ;;  %v15257_v62 = vld [vmem:[#allocation30_spill] sm:$0xff]  ;;  %v5768_v48 = vsub.f32 1.5, %v5767_v44 }
 0xbfd   : > { %v5748_v18 = vsub.f32 1.5, %v5747_v49  ;;  %v13047_v15 = vadd.f32 1e-05, %v5675_v23  ;;  %v13050_v27 = vsub.f32 %v12916_v16, %v5521_v17  ;;  %v5309_v16 = vpop.f32.mrf.mxu0  ;;  %v3236_v41 = vadd.f32 %v15258_v55, %v15257_v62  ;;  %v15266_v62 = vld [vmem:[#allocation70_spill] sm:$0xff] }
 0xbfe   : > { %v13053_v32 = vsub.f32 %v12913_v9, %v5519_v28  ;;  %v13056_v39 = vpop.eup %9766  ;;  %8736 = vmatmul.msk.bf16.gmra.mxu0 %vm1161_vm0, %v5187_v11  ;;  %v13094_v38 = vadd.f32 %v13068_v43, %v6087_v14 }
 0xbff   : > { %v5749_v33 = vmul.f32 %v13003_v45, %v5748_v18  ;;  %9770 = vrsqrt.f32 %v13047_v15  ;;  %v5755_v9 = vmul.f32 %v13056_v39, %v13016_v13  ;;  %v5585_v21 = vmul.f32 %v13050_v27, %v13050_v27  ;;  %v13081_v57 = vpop.eup %9768 }
 0xc00   : > { %v5583_v25 = vmul.f32 %v13053_v32, %v13053_v32  ;;  %v4308_v28 = vadd.f32 %v4256_v24, %v3236_v41  ;;  %15259 = vst [vmem:[#allocation44_spill] sm:$0xff] %v13094_v38  ;;  %v13097_v18 = vadd.f32 %v9905_v22, %v5391_v58  ;;  %vm5761_vm8 = vweird.f32 %v13056_v39 }
 0xc01   : > { %v5753_v20 = vsel %vm5752_vm7, %v13003_v45, %v5749_v33  ;;  %5469 = vadd.xlane.f32.xlu0 %v13034_v35  ;;  %v5756_v37 = vmul.f32 %v13056_v39, %v5755_v9  ;;  %v3231_v45 = vadd.f32 %v15256_v10, %v15255_v0  ;;  %5628 = vadd.xlane.f32.xlu2 %v5585_v21  ;;  %v4259_v33 = vpop.f32.mrf.mxu2  ;;  %vm13122_vm12 = vmor %vm5760_vm10, %vm5761_vm8  ;;  %vm5781_vm15 = vweird.f32 %v13081_v57 }
 0xc02   : > { %v6055_v1 = vmul.f32 %v5753_v20, %v12862_v8  ;;  %v13079_v51 = vpop.xlane.xlu2 %5618  ;;  %v5464_v8 = vpop.xlane.xlu1 %5463  ;;  %5624 = vadd.xlane.f32.xlu1 %v5583_v25  ;;  %v5769_v9 = vmul.f32 %v12997_v53, %v5768_v48  ;;  %vm5782_vm3 = vmor %vm5780_vm2, %vm5781_vm15 }
 0xc03   : > { %v5460_v12 = vpop.xlane.xlu0 %5459  ;;  %v5757_v23 = vmul.f32 0.5, %v5756_v37  ;;  %v5522_v36 = vmul.f32 %v12835_v63, %v5464_v8  ;;  %v5168_v5 = vpop.f32.mrf.mxu3  ;;  %v4306_v17 = vadd.f32 %v12964_v19, %v3231_v45  ;;  %v5775_v19 = vmul.f32 %v13081_v57, %v13027_v26  ;;  %v15265_v45 = vld [vmem:[#allocation26_spill] sm:$0xff] }
 0xc04   : > { %v6088_v49 = vmul.f32 %v13040_v4, %v6055_v1  ;;  %v5520_v54 = vmul.f32 %v12835_v63, %v5460_v12  ;;  %v5361_v1 = vadd.f32 %v5309_v16, %v4308_v28  ;;  %v3239_v55 = vadd.f32 %v15266_v62, %v15265_v45 }
 0xc05   : > { %v13090_v46 = vpop.eup %9770  ;;  %v5758_v56 = vsub.f32 1.5, %v5757_v23  ;;  %v13110_v24 = vsub.f32 %v12933_v59, %v5522_v36  ;;  %v5312_v25 = vpop.f32.mrf.mxu0  ;;  %v5776_v10 = vmul.f32 %v13081_v57, %v5775_v19  ;;  %v15267_v23 = vld [vmem:[#allocation67_spill] sm:$0xff]  ;;  %v15268_v36 = vld [vmem:[#allocation60_spill] sm:$0xff] }
 0xc06   : > { %v13100_v11 = vadd.f32 %v13068_v43, %v6088_v49  ;;  %v5785_v44 = vmul.f32 %v13090_v46, %v13047_v15  ;;  %v13115_v14 = vsub.f32 %v12930_v47, %v5520_v54  ;;  %v5359_v47 = vadd.f32 %v12978_v34, %v4306_v17 }
 0xc07   : > { %v5759_v58 = vmul.f32 %v13056_v39, %v5758_v56  ;;  %v5586_v13 = vmul.f32 %v13110_v24, %v13110_v24  ;;  %v5773_v34 = vsel %vm13131_vm13, %v12997_v53, %v5769_v9  ;;  %v5394_v12 = vadd.f32 %v12761_v30, %v5361_v1 }
 0xc08   : > { %15260 = vst [vmem:[#allocation42_spill] sm:$0xff] %v13100_v11  ;;  %v13119_v20 = vpack.c.bf16 %v13100_v11, %v13094_v38  ;;  %v5786_v59 = vmul.f32 %v13090_v46, %v5785_v44  ;;  %v5584_v16 = vmul.f32 %v13115_v14, %v13115_v14  ;;  %v3234_v54 = vadd.f32 %v15268_v36, %v15267_v23  ;;  %v9909_v23 = vld [vmem:[%s10471_s24 + $0x90] sm:$0xff] }
 0xc09   : > { %5471 = vadd.xlane.f32.xlu0 %v13097_v18  ;;  %v5763_v2 = vsel %vm13122_vm12, %v13056_v39, %v5759_v58  ;;  %5630 = vadd.xlane.f32.xlu2 %v5586_v13  ;;  %v5392_v17 = vadd.f32 %v12761_v30, %v5359_v47  ;;  %v6057_v28 = vmul.f32 %v5773_v34, %v12857_v42  ;;  %v9906_v58 = vld [vmem:[%s10471_s24 + $0x98] sm:$0xff]  ;;  %v15270_v42 = vld [vmem:[#allocation71_spill] sm:$0xff]  ;;  %v9907_v13 = vld [vmem:[%s10471_s24 + $0x88] sm:$0xff]  ;;  %vm5791_vm14 = vweird.f32 %v13090_v46 }
 0xc0a   : > { %6378 = vmatmul.bf16.vlgmr.msrb.gmra.mxu1 %v13119_v20  ;;  %6467 = vmatmul.bf16.vlgmr.msrb.gmra.mxu2 %v13119_v20  ;;  %v5466_v0 = vpop.xlane.xlu2 %5465  ;;  %v6056_v41 = vmul.f32 %v5763_v2, %v12880_v60  ;;  %v5787_v8 = vmul.f32 0.5, %v5786_v59  ;;  %v4309_v22 = vadd.f32 %v4259_v33, %v3239_v55  ;;  %v5777_v60 = vmul.f32 0.5, %v5776_v10  ;;  %v15269_v59 = vld [vmem:[#allocation68_spill] sm:$0xff]  ;;  %v9072_v11 = vld [vmem:[#allocation13 + $0x30] sm:$0xff] }
 0xc0b   : > { %6556 = vmatmul.bf16.vlgmr.msrb.gmra.mxu3 %v13119_v20  ;;  %v5523_v39 = vmul.f32 %v12835_v63, %v5466_v0  ;;  %5626 = vadd.xlane.f32.xlu1 %v5584_v16  ;;  %v5170_v48 = vpop.f32.mrf.mxu3  ;;  %v4307_v44 = vadd.f32 %v12990_v29, %v3234_v54  ;;  %v13165_v21 = vadd.f32 %v9906_v58, %v5394_v12 }
 0xc0c   : > { %v5188_v49 = vpack.c.bf16 %v5170_v48, %v5168_v5  ;;  %v4261_v5 = vpop.f32.mrf.mxu2  ;;  %v5788_v9 = vsub.f32 1.5, %v5787_v8  ;;  %v5362_v19 = vadd.f32 %v5312_v25, %v4309_v22  ;;  %v3241_v33 = vadd.f32 %v15270_v42, %v15269_v59  ;;  %v9911_v42 = vld [vmem:[%s10471_s24 + $0xb0] sm:$0xff] }
 0xc0d   : > { %v13153_v53 = vsub.f32 %v12941_v6, %v5523_v39  ;;  %v6089_v6 = vmul.f32 %v13040_v4, %v6056_v41  ;;  %v5360_v1 = vadd.f32 %v13010_v31, %v4307_v44  ;;  %v13171_v47 = vadd.f32 %v9907_v13, %v5392_v17  ;;  %v5314_v0 = vpop.f32.mrf.mxu0 }
 0xc0e   : > { %8737 = vmatmul.msk.bf16.gmra.mxu0 %vm1161_vm0, %v5188_v49  ;;  %v6090_v37 = vmul.f32 %v13040_v4, %v6057_v28  ;;  %v5778_v2 = vsub.f32 1.5, %v5777_v60  ;;  %v4310_v16 = vadd.f32 %v4261_v5, %v3241_v33  ;;  %v5789_v31 = vmul.f32 %v13090_v46, %v5788_v9  ;;  %v9910_v28 = vld [vmem:[%s10471_s24 + $0xa8] sm:$0xff] }
 0xc0f   : > { %v5587_v56 = vmul.f32 %v13153_v53, %v13153_v53  ;;  %v13178_v34 = vadd.f32 %v13068_v43, %v6089_v6  ;;  %v5395_v10 = vadd.f32 %v12761_v30, %v5362_v19  ;;  %v5393_v45 = vadd.f32 %v12761_v30, %v5360_v1  ;;  %v15277_v6 = vld [vmem:[#allocation72_spill] sm:$0xff] }
 0xc10   : > { %v13189_v62 = vadd.f32 %v13068_v43, %v6090_v37  ;;  %v5779_v55 = vmul.f32 %v13081_v57, %v5778_v2  ;;  %vm5790_vm0 = vweird.f32 %v13047_v15  ;;  %v5363_v41 = vadd.f32 %v5314_v0, %v4310_v16  ;;  %v9908_v15 = vld [vmem:[%s10471_s24 + $0xa0] sm:$0xff] }
 0xc11   : > { %5632 = vadd.xlane.f32.xlu0 %v5587_v56  ;;  %5477 = vadd.xlane.f32.xlu2 %v13165_v21  ;;  %15271 = vst [vmem:[#allocation38_spill] sm:$0xff] %v13178_v34  ;;  %vm13195_vm1 = vmor %vm5790_vm0, %vm5791_vm14  ;;  %v13206_v49 = vadd.f32 %v9908_v15, %v5395_v10  ;;  %v13209_v36 = vadd.f32 %v9909_v23, %v5393_v45 }
 0xc12   : > { %v5468_v29 = vpop.xlane.xlu2 %5467  ;;  %15272 = vst [vmem:[#allocation64_spill] sm:$0xff] %v13189_v62  ;;  %v5793_v12 = vsel %vm13195_vm1, %v13090_v46, %v5789_v31  ;;  %v5783_v54 = vsel %vm5782_vm3, %v13081_v57, %v5779_v55  ;;  %v5396_v17 = vadd.f32 %v12761_v30, %v5363_v41  ;;  %v5676_v1 = vmul.f32 %v13079_v51, %v12835_v63 }
 0xc13   : > { %v5524_v25 = vmul.f32 %v12835_v63, %v5468_v29  ;;  %5473 = vadd.xlane.f32.xlu1 %v13171_v47  ;;  %v6059_v26 = vmul.f32 %v5793_v12, %v12898_v40  ;;  %v6058_v46 = vmul.f32 %v5783_v54, %v12885_v7  ;;  %v15276_v40 = vld [vmem:[#allocation57_spill] sm:$0xff] }
 0xc14   : > { %v13218_v22 = vadd.f32 %v9910_v28, %v5396_v17  ;;  %v4264_v56 = vpop.f32.mrf.mxu2  ;;  %v3244_v5 = vadd.f32 %v15277_v6, %v15276_v40  ;;  %v5708_v13 = vadd.f32 1e-05, %v5676_v1 }
 0xc15   : > { %v13184_v39 = vsub.f32 %v12946_v52, %v5524_v25  ;;  %v6153_v52 = vpack.c.bf16 %v13189_v62, %v13178_v34  ;;  %v6092_v60 = vmul.f32 %v13040_v4, %v6059_v26  ;;  %v6091_v57 = vmul.f32 %v13040_v4, %v6058_v46  ;;  %v9080_v62 = vld [vmem:[#allocation13 + $0x70] sm:$0xff] }
 0xc16   : > { %v4311_v9 = vadd.f32 %v4264_v56, %v3244_v5  ;;  %9772 = vrsqrt.f32 %v5708_v13  ;;  %vm5800_vm5 = vweird.f32 %v5708_v13  ;;  %v9088_v34 = vld [vmem:[#allocation13 + $0xb0] sm:$0xff] }
 0xc17   : > { %v5588_v48 = vmul.f32 %v13184_v39, %v13184_v39  ;;  %v13225_v44 = vadd.f32 %v13068_v43, %v6092_v60  ;;  %v13230_v7 = vadd.f32 %v13068_v43, %v6091_v57 }
 0xc19   : > { %5634 = vadd.xlane.f32.xlu0 %v5588_v48  ;;  %5479 = vadd.xlane.f32.xlu2 %v13206_v49  ;;  %15275 = vst [vmem:[#allocation41_spill] sm:$0xff] %v13225_v44 }
 0xc1a   : > { %6383 = vmatmul.bf16.gmra.mxu1 %v6153_v52  ;;  %6472 = vmatmul.bf16.gmra.mxu2 %v6153_v52  ;;  %15278 = vst [vmem:[#allocation32_spill] sm:$0xff] %v13230_v7 }
 0xc1b   : > { %6561 = vmatmul.bf16.gmra.mxu3 %v6153_v52  ;;  %5475 = vadd.xlane.f32.xlu1 %v13209_v36 }
 0xc1c   : > { %v9773_v29 = vpop.eup %9772  ;;  %v4266_v2 = vpop.f32.mrf.mxu2 }
 0xc1d   : > { %v5795_v37 = vmul.f32 %v9773_v29, %v5708_v13  ;;  %vm5801_vm4 = vweird.f32 %v9773_v29 }
 0xc1e   : > { %6645 = vmatmul.bf16.vlgmr.msra.gmra.mxu0 %v13119_v20  ;;  %v6154_v20 = vpack.c.bf16 %v13225_v44, %v13230_v7  ;;  %vm5802_vm6 = vmor %vm5800_vm5, %vm5801_vm4 }
 0xc1f   : > { %v5796_v25 = vmul.f32 %v9773_v29, %v5795_v37 }
 0xc21   : > { %5481 = vadd.xlane.f32.xlu0 %v13218_v22  ;;  %v5797_v10 = vmul.f32 0.5, %v5796_v25 }
 0xc23   : > { %v5798_v55 = vsub.f32 1.5, %v5797_v10  ;;  %v15279_v10 = vld [vmem:[#allocation55_spill] sm:$0xff] }
 0xc24   : > { %v13243_v8 = vpop.f32.mrf.mxu2 }
 0xc25   : > { %v5799_v12 = vmul.f32 %v9773_v29, %v5798_v55  ;;  %v15280_v55 = vld [vmem:[#allocation73_spill] sm:$0xff] }
 0xc27   : > { %v5803_v17 = vsel %vm5802_vm6, %v9773_v29, %v5799_v12 }
 0xc28   : > { %v5317_v19 = vpop.f32.mrf.mxu0  ;;  %v6060_v40 = vmul.f32 %v5803_v17, %v12923_v3 }
 0xc29   : > { %v5364_v58 = vadd.f32 %v5317_v19, %v4311_v9 }
 0xc2a   : > { %6388 = vmatmul.bf16.gmra.mxu1 %v6154_v20  ;;  %6477 = vmatmul.bf16.gmra.mxu2 %v6154_v20  ;;  %v6093_v29 = vmul.f32 %v13040_v4, %v6060_v40 }
 0xc2b   : > { %v5397_v59 = vadd.f32 %v12761_v30, %v5364_v58  ;;  %6566 = vmatmul.bf16.gmra.mxu3 %v6154_v20 }
 0xc2c   : > { %v13258_v19 = vpop.f32.mrf.mxu2  ;;  %v13284_v12 = vadd.f32 %v13068_v43, %v6093_v29 }
 0xc2d   : > { %v13236_v33 = vadd.f32 %v9911_v42, %v5397_v59 }
 0xc2e   : > { %6650 = vmatmul.bf16.gmra.mxu0 %v6153_v52  ;;  %15281 = vst [vmem:[#allocation28_spill] sm:$0xff] %v13284_v12 }
 0xc2f   : > { %5483 = vadd.xlane.f32.xlu0 %v13236_v33 }
 0xc30   : > { %v5319_v45 = vpop.f32.mrf.mxu0 }
 0xc3e   : > { %6655 = vmatmul.bf16.gmra.mxu0 %v6154_v20 }
 0xc4e   : > { %v13248_v23 = vpop.f32.mrf.mxu0 }
 0xc56   : > { %v13271_v37 = vpop.f32.mrf.mxu0 }
 0xc5e   : > { %v13310_v29 = vpop.f32.mrf.mxu0 }
 0xc64   : > { %v5621_v16 = vpop.xlane.xlu0 %5620 }
 0xc65   : > { %v5677_v0 = vmul.f32 %v5621_v16, %v12835_v63 }
 0xc67   : > { %v5709_v31 = vadd.f32 1e-05, %v5677_v0 }
 0xc69   : > { %9774 = vrsqrt.f32 %v5709_v31  ;;  %vm5810_vm8 = vweird.f32 %v5709_v31 }
 0xc6c   : > { %v5623_v41 = vpop.xlane.xlu0 %5622 }
 0xc6d   : > { %v5678_v48 = vmul.f32 %v5623_v41, %v12835_v63  ;;  %v3246_v41 = vadd.f32 %v15280_v55, %v15279_v10 }
 0xc6f   : > { %v9775_v51 = vpop.eup %9774  ;;  %v13245_v52 = vadd.f32 1e-05, %v5678_v48 }
 0xc70   : > { %v5805_v15 = vmul.f32 %v9775_v51, %v5709_v31  ;;  %vm5811_vm7 = vweird.f32 %v9775_v51 }
 0xc71   : > { %9776 = vrsqrt.f32 %v13245_v52  ;;  %vm5812_vm9 = vmor %vm5810_vm8, %vm5811_vm7  ;;  %vm5820_vm12 = vweird.f32 %v13245_v52 }
 0xc72   : > { %v5806_v54 = vmul.f32 %v9775_v51, %v5805_v15 }
 0xc74   : > { %v5807_v26 = vmul.f32 0.5, %v5806_v54  ;;  %v5470_v46 = vpop.xlane.xlu0 %5469  ;;  %v5629_v57 = vpop.xlane.xlu2 %5628  ;;  %v4312_v54 = vadd.f32 %v4266_v2, %v3246_v41 }
 0xc75   : > { %v5525_v28 = vmul.f32 %v12835_v63, %v5470_v46  ;;  %v5681_v6 = vmul.f32 %v5629_v57, %v12835_v63  ;;  %v5625_v5 = vpop.xlane.xlu1 %5624 }
 0xc76   : > { %v5808_v60 = vsub.f32 1.5, %v5807_v26  ;;  %v5679_v59 = vmul.f32 %v5625_v5, %v12835_v63  ;;  %v5365_v57 = vadd.f32 %v5319_v45, %v4312_v54 }
 0xc77   : > { %v13251_v56 = vpop.eup %9776  ;;  %v13256_v9 = vsub.f32 %v13034_v35, %v5525_v28  ;;  %v13268_v35 = vadd.f32 1e-05, %v5681_v6 }
 0xc78   : > { %v5809_v20 = vmul.f32 %v9775_v51, %v5808_v60  ;;  %v5815_v58 = vmul.f32 %v13251_v56, %v13245_v52  ;;  %v13265_v1 = vadd.f32 1e-05, %v5679_v59  ;;  %v15284_v59 = vld [vmem:[#allocation74_spill] sm:$0xff]  ;;  %vm5821_vm10 = vweird.f32 %v13251_v56 }
 0xc79   : > { %v5589_v42 = vmul.f32 %v13256_v9, %v13256_v9  ;;  %vm13336_vm13 = vmor %vm5820_vm12, %vm5821_vm10  ;;  %vm5850_vm4 = vweird.f32 %v13268_v35 }
 0xc7a   : > { %v5813_v3 = vsel %vm5812_vm9, %v9775_v51, %v5809_v20  ;;  %v5816_v25 = vmul.f32 %v13251_v56, %v5815_v58  ;;  %9778 = vrsqrt.f32 %v13265_v1  ;;  %v15283_v58 = vld [vmem:[#allocation49_spill] sm:$0xff]  ;;  %vm5830_vm14 = vweird.f32 %v13265_v1 }
 0xc7b   : > { %v6061_v13 = vmul.f32 %v5813_v3, %v12972_v61  ;;  %5636 = vadd.xlane.f32.xlu1 %v5589_v42  ;;  %9780 = vrsqrt.f32 %v13268_v35  ;;  %v3249_v42 = vadd.f32 %v15284_v59, %v15283_v58 }
 0xc7c   : > { %v5472_v16 = vpop.xlane.xlu0 %5471  ;;  %v5631_v61 = vpop.xlane.xlu2 %5630  ;;  %v5817_v17 = vmul.f32 0.5, %v5816_v25 }
 0xc7d   : > { %v5526_v0 = vmul.f32 %v12835_v63, %v5472_v16  ;;  %v6094_v31 = vmul.f32 %v13040_v4, %v6061_v13  ;;  %v5398_v13 = vadd.f32 %v12761_v30, %v5365_v57  ;;  %v4313_v16 = vadd.f32 %v13243_v8, %v3249_v42  ;;  %v9912_v57 = vld [vmem:[%s10471_s24 + $0xb8] sm:$0xff] }
 0xc7e   : > { %v5627_v48 = vpop.xlane.xlu1 %5626  ;;  %v5818_v2 = vsub.f32 1.5, %v5817_v17 }
 0xc7f   : > { %v13281_v51 = vsub.f32 %v13097_v18, %v5526_v0  ;;  %v13287_v15 = vadd.f32 %v13068_v43, %v6094_v31  ;;  %v5680_v26 = vmul.f32 %v5627_v48, %v12835_v63  ;;  %v13296_v18 = vpop.f32.mrf.mxu2  ;;  %v5682_v31 = vmul.f32 %v5631_v61, %v12835_v63 }
 0xc80   : > { %v13294_v60 = vpop.eup %9778  ;;  %v5819_v41 = vmul.f32 %v13251_v56, %v5818_v2 }
 0xc81   : > { %15282 = vst [vmem:[#allocation25_spill] sm:$0xff] %v13287_v15  ;;  %v6155_v46 = vpack.c.bf16 %v13287_v15, %v13284_v12  ;;  %v5590_v28 = vmul.f32 %v13281_v51, %v13281_v51  ;;  %v13298_v40 = vadd.f32 1e-05, %v5680_v26  ;;  %v5825_v6 = vmul.f32 %v13294_v60, %v13265_v1  ;;  %v13303_v20 = vpop.eup %9780 }
 0xc82   : > { %v5845_v48 = vmul.f32 %v13303_v20, %v13268_v35  ;;  %vm5831_vm11 = vweird.f32 %v13294_v60  ;;  %vm5851_vm1 = vweird.f32 %v13303_v20  ;;  %v9914_v35 = vld [vmem:[%s10471_s24 + $0xd8] sm:$0xff] }
 0xc83   : > { %6393 = vmatmul.bf16.gmra.mxu1 %v6155_v46  ;;  %6482 = vmatmul.bf16.gmra.mxu2 %v6155_v46  ;;  %9782 = vrsqrt.f32 %v13298_v40  ;;  %v5826_v45 = vmul.f32 %v13294_v60, %v5825_v6  ;;  %v13334_v6 = vadd.f32 %v9912_v57, %v5398_v13  ;;  %vm13352_vm15 = vmor %vm5830_vm14, %vm5831_vm11  ;;  %v15289_v13 = vld [vmem:[#allocation46_spill] sm:$0xff]  ;;  %v5329_v57 = vpop.f32.mrf.mxu0  ;;  %vm5840_vm2 = vweird.f32 %v13298_v40 }
 0xc84   : > { %6571 = vmatmul.bf16.gmra.mxu3 %v6155_v46  ;;  %6660 = vmatmul.bf16.gmra.mxu0 %v6155_v46  ;;  %v5633_v5 = vpop.xlane.xlu0 %5632  ;;  %v5478_v25 = vpop.xlane.xlu2 %5477  ;;  %v5366_v46 = vadd.f32 %v13248_v23, %v4313_v16  ;;  %v5846_v58 = vmul.f32 %v13303_v20, %v5845_v48  ;;  %v15291_v48 = vld [vmem:[#allocation47_spill] sm:$0xff]  ;;  %vm13443_vm5 = vmor %vm5850_vm4, %vm5851_vm1 }
 0xc85   : > { %5638 = vadd.xlane.f32.xlu1 %v5590_v28  ;;  %v5683_v3 = vmul.f32 %v5633_v5, %v12835_v63  ;;  %v5827_v0 = vmul.f32 0.5, %v5826_v45  ;;  %v5529_v10 = vmul.f32 %v12835_v63, %v5478_v25  ;;  %v13342_v5 = vadd.f32 1e-05, %v5682_v31  ;;  %v15290_v25 = vld [vmem:[#allocation48_spill] sm:$0xff] }
 0xc86   : > { %v5474_v55 = vpop.xlane.xlu1 %5473  ;;  %v3256_v16 = vadd.f32 %v15290_v25, %v15289_v13  ;;  %v5847_v2 = vmul.f32 0.5, %v5846_v58  ;;  %v9913_v58 = vld [vmem:[%s10471_s24 + $0xc0] sm:$0xff] }
 0xc87   : > { %v5527_v54 = vmul.f32 %v12835_v63, %v5474_v55  ;;  %v5828_v17 = vsub.f32 1.5, %v5827_v0  ;;  %v13322_v8 = vsub.f32 %v13165_v21, %v5529_v10  ;;  %v13324_v26 = vadd.f32 1e-05, %v5683_v3  ;;  %v4276_v52 = vpop.f32.mrf.mxu2 }
 0xc88   : > { %v5399_v0 = vadd.f32 %v12761_v30, %v5366_v46  ;;  %v4316_v46 = vadd.f32 %v4276_v52, %v3256_v16  ;;  %v15293_v16 = vld [vmem:[#allocation45_spill] sm:$0xff]  ;;  %vm5860_vm10 = vweird.f32 %v13342_v5 }
 0xc89   : > { %v13326_v61 = vpop.eup %9782  ;;  %v13331_v28 = vsub.f32 %v13171_v47, %v5527_v54  ;;  %v5829_v21 = vmul.f32 %v13294_v60, %v5828_v17  ;;  %v5823_v47 = vsel %vm13336_vm13, %v13251_v56, %v5819_v41  ;;  %v5593_v1 = vmul.f32 %v13322_v8, %v13322_v8  ;;  %v15292_v54 = vld [vmem:[#allocation75_spill] sm:$0xff] }
 0xc8a   : > { %v5835_v23 = vmul.f32 %v13326_v61, %v13298_v40  ;;  %9784 = vrsqrt.f32 %v13324_v26  ;;  %v6062_v10 = vmul.f32 %v5823_v47, %v13000_v50  ;;  %v3251_v17 = vadd.f32 %v15292_v54, %v15291_v48 }
 0xc8b   : > { %v5591_v42 = vmul.f32 %v13331_v28, %v13331_v28  ;;  %v5833_v56 = vsel %vm13352_vm15, %v13294_v60, %v5829_v21  ;;  %5644 = vadd.xlane.f32.xlu0 %v5593_v1  ;;  %9786 = vrsqrt.f32 %v13342_v5  ;;  %v13388_v25 = vadd.f32 %v9913_v58, %v5399_v0 }
 0xc8c   : > { %v13360_v45 = vpop.xlane.xlu0 %5634  ;;  %v5836_v3 = vmul.f32 %v13326_v61, %v5835_v23  ;;  %v5480_v31 = vpop.xlane.xlu2 %5479  ;;  %v6063_v21 = vmul.f32 %v5833_v56, %v13053_v32  ;;  %v4314_v50 = vadd.f32 %v13258_v19, %v3251_v17  ;;  %v6095_v13 = vmul.f32 %v13040_v4, %v6062_v10 }
 0xc8d   : > { %5485 = vadd.xlane.f32.xlu1 %v13334_v6  ;;  %5640 = vadd.xlane.f32.xlu2 %v5591_v42  ;;  %v5530_v60 = vmul.f32 %v12835_v63, %v5480_v31  ;;  %v5369_v42 = vadd.f32 %v5329_v57, %v4316_v46  ;;  %v5848_v32 = vsub.f32 1.5, %v5847_v2  ;;  %v15294_v31 = vld [vmem:[#allocation63_spill] sm:$0xff]  ;;  %vm5841_vm0 = vweird.f32 %v13326_v61  ;;  %v5332_v2 = vpop.f32.mrf.mxu0 }
 0xc8e   : > { %v5837_v55 = vmul.f32 0.5, %v5836_v3  ;;  %v5476_v41 = vpop.xlane.xlu1 %5475  ;;  %v6096_v19 = vmul.f32 %v13040_v4, %v6063_v21  ;;  %vm13427_vm3 = vmor %vm5840_vm2, %vm5841_vm0  ;;  %vm5870_vm8 = vweird.f32 %v13324_v26 }
 0xc8f   : > { %v13378_v23 = vsub.f32 %v13206_v49, %v5530_v60  ;;  %v5528_v59 = vmul.f32 %v12835_v63, %v5476_v41  ;;  %v5367_v60 = vadd.f32 %v13271_v37, %v4314_v50  ;;  %v4279_v0 = vpop.f32.mrf.mxu2  ;;  %v5402_v54 = vadd.f32 %v12761_v30, %v5369_v42  ;;  %v15297_v50 = vld [vmem:[#allocation52_spill] sm:$0xff] }
 0xc90   : > { %v5838_v47 = vsub.f32 1.5, %v5837_v55  ;;  %v13382_v1 = vpop.eup %9784  ;;  %v3259_v55 = vadd.f32 %v15294_v31, %v15293_v16  ;;  %v13410_v37 = vadd.f32 %v13068_v43, %v6095_v13  ;;  %v13413_v17 = vadd.f32 %v13068_v43, %v6096_v19  ;;  %v9916_v13 = vld [vmem:[%s10471_s24 + $0xe0] sm:$0xff] }
 0xc91   : > { %v5594_v3 = vmul.f32 %v13378_v23, %v13378_v23  ;;  %v13391_v49 = vsub.f32 %v13209_v36, %v5528_v59  ;;  %v13394_v56 = vpop.eup %9786  ;;  %v5865_v36 = vmul.f32 %v13382_v1, %v13324_v26  ;;  %v5849_v57 = vmul.f32 %v13303_v20, %v5848_v32  ;;  %v15310_v26 = vld [vmem:[#allocation50_spill] sm:$0xff] }
 0xc92   : > { %v5839_v41 = vmul.f32 %v13326_v61, %v5838_v47  ;;  %15295 = vst [vmem:[#allocation51_spill] sm:$0xff] %v13410_v37  ;;  %v5855_v21 = vmul.f32 %v13394_v56, %v13342_v5  ;;  %v15298_v47 = vld [vmem:[#allocation76_spill] sm:$0xff]  ;;  %v4317_v42 = vadd.f32 %v4279_v0, %v3259_v55  ;;  %v6156_v40 = vpack.c.bf16 %v13413_v17, %v13410_v37  ;;  %v9915_v0 = vld [vmem:[%s10471_s24 + $0xc8] sm:$0xff] }
 0xc93   : > { %5646 = vadd.xlane.f32.xlu0 %v5594_v3  ;;  %v5592_v48 = vmul.f32 %v13391_v49, %v13391_v49  ;;  %15296 = vst [vmem:[#allocation24_spill] sm:$0xff] %v13413_v17  ;;  %v3254_v59 = vadd.f32 %v15298_v47, %v15297_v50  ;;  %v5400_v3 = vadd.f32 %v12761_v30, %v5367_v60  ;;  %v15303_v50 = vld [vmem:[#allocation43_spill] sm:$0xff]  ;;  %v15304_v47 = vld [vmem:[#allocation33_spill] sm:$0xff]  ;;  %vm5871_vm6 = vweird.f32 %v13382_v1 }
 0xc94   : > { %v5482_v52 = vpop.xlane.xlu0 %5481  ;;  %v5866_v58 = vmul.f32 %v13382_v1, %v5865_v36  ;;  %6398 = vmatmul.bf16.gmra.mxu1 %v6156_v40  ;;  %6487 = vmatmul.bf16.gmra.mxu2 %v6156_v40  ;;  %v13448_v16 = vadd.f32 %v9914_v35, %v5402_v54  ;;  %v5370_v31 = vadd.f32 %v5332_v2, %v4317_v42  ;;  %vm5861_vm7 = vweird.f32 %v13394_v56  ;;  %vm13493_vm9 = vmor %vm5870_vm8, %vm5871_vm6 }
 0xc95   : > { %5487 = vadd.xlane.f32.xlu1 %v13388_v25  ;;  %v5531_v10 = vmul.f32 %v12835_v63, %v5482_v52  ;;  %5642 = vadd.xlane.f32.xlu2 %v5592_v48  ;;  %v4315_v19 = vadd.f32 %v13296_v18, %v3254_v59  ;;  %v5856_v55 = vmul.f32 %v13394_v56, %v5855_v21  ;;  %v9917_v52 = vld [vmem:[%s10471_s24 + $0xd0] sm:$0xff]  ;;  %vm5862_vm11 = vmor %vm5860_vm10, %vm5861_vm7 }
 0xc96   : > { %6576 = vmatmul.bf16.gmra.mxu3 %v6156_v40  ;;  %6665 = vmatmul.bf16.gmra.mxu0 %v6156_v40  ;;  %v3261_v59 = vadd.f32 %v15304_v47, %v15303_v50 }
 0xc97   : > { %v13420_v46 = vsub.f32 %v13218_v22, %v5531_v10  ;;  %v5843_v22 = vsel %vm13427_vm3, %v13326_v61, %v5839_v41  ;;  %v5853_v61 = vsel %vm13443_vm5, %v13303_v20, %v5849_v57  ;;  %v5368_v60 = vadd.f32 %v13310_v29, %v4315_v19  ;;  %v4281_v54 = vpop.f32.mrf.mxu2  ;;  %v5334_v29 = vpop.f32.mrf.mxu0 }
 0xc98   : > { %v6064_v18 = vmul.f32 %v5843_v22, %v13115_v14  ;;  %v5867_v10 = vmul.f32 0.5, %v5866_v58  ;;  %v13458_v41 = vadd.f32 %v9915_v0, %v5400_v3  ;;  %v6065_v36 = vmul.f32 %v5853_v61, %v13050_v27 }
 0xc99   : > { %v5595_v32 = vmul.f32 %v13420_v46, %v13420_v46  ;;  %v5403_v20 = vadd.f32 %v12761_v30, %v5370_v31  ;;  %v5857_v48 = vmul.f32 0.5, %v5856_v55  ;;  %v5401_v57 = vadd.f32 %v12761_v30, %v5368_v60 }
 0xc9a   : > { %v6097_v14 = vmul.f32 %v13040_v4, %v6064_v18  ;;  %v5868_v2 = vsub.f32 1.5, %v5867_v10  ;;  %v6098_v27 = vmul.f32 %v13040_v4, %v6065_v36  ;;  %v4318_v22 = vadd.f32 %v4281_v54, %v3261_v59  ;;  %v15309_v36 = vld [vmem:[#allocation61_spill] sm:$0xff] }
 0xc9b   : > { %5493 = vadd.xlane.f32.xlu0 %v13448_v16  ;;  %v5858_v3 = vsub.f32 1.5, %v5857_v48  ;;  %v13470_v40 = vadd.f32 %v9916_v13, %v5403_v20  ;;  %v13482_v35 = vadd.f32 %v9917_v52, %v5401_v57  ;;  %v3264_v20 = vadd.f32 %v15310_v26, %v15309_v36 }
 0xc9c   : > { %v5869_v19 = vmul.f32 %v13382_v1, %v5868_v2  ;;  %v5371_v61 = vadd.f32 %v5334_v29, %v4318_v22  ;;  %v13485_v31 = vadd.f32 %v13068_v43, %v6098_v27  ;;  %v9918_v2 = vld [vmem:[%s10471_s24 + $0xe8] sm:$0xff] }
 0xc9d   : > { %5648 = vadd.xlane.f32.xlu1 %v5595_v32  ;;  %5489 = vadd.xlane.f32.xlu2 %v13458_v41  ;;  %v13476_v32 = vadd.f32 %v13068_v43, %v6097_v14  ;;  %v5859_v55 = vmul.f32 %v13394_v56, %v5858_v3  ;;  %v5684_v3 = vmul.f32 %v13360_v45, %v12835_v63 }
 0xc9e   : > { %15306 = vst [vmem:[#allocation29_spill] sm:$0xff] %v13485_v31  ;;  %v5873_v0 = vsel %vm13493_vm9, %v13382_v1, %v5869_v19  ;;  %v5404_v48 = vadd.f32 %v12761_v30, %v5371_v61 }
 0xc9f   : > { %15305 = vst [vmem:[#allocation54_spill] sm:$0xff] %v13476_v32  ;;  %v6157_v60 = vpack.c.bf16 %v13485_v31, %v13476_v32  ;;  %v4284_v10 = vpop.f32.mrf.mxu2  ;;  %v5863_v54 = vsel %vm5862_vm11, %v13394_v56, %v5859_v55  ;;  %v5337_v14 = vpop.f32.mrf.mxu0  ;;  %v6067_v5 = vmul.f32 %v5873_v0, %v13153_v53  ;;  %v9919_v53 = vld [vmem:[%s10471_s24 + $0xf0] sm:$0xff]  ;;  %v5716_v13 = vadd.f32 1e-05, %v5684_v3 }
 0xca0   : > { %v4319_v57 = vadd.f32 %v4284_v10, %v3264_v20  ;;  %v6066_v29 = vmul.f32 %v5863_v54, %v13110_v24 }
 0xca1   : > { %v6100_v50 = vmul.f32 %v13040_v4, %v6067_v5  ;;  %9788 = vrsqrt.f32 %v5716_v13  ;;  %vm5880_vm13 = vweird.f32 %v5716_v13 }
 0xca2   : > { %v5484_v21 = vpop.xlane.xlu0 %5483  ;;  %v5372_v1 = vadd.f32 %v5337_v14, %v4319_v57  ;;  %v6099_v56 = vmul.f32 %v13040_v4, %v6066_v29 }
 0xca3   : > { %v5532_v42 = vmul.f32 %v12835_v63, %v5484_v21  ;;  %5495 = vadd.xlane.f32.xlu0 %v13470_v40  ;;  %v13510_v21 = vadd.f32 %v9918_v2, %v5404_v48  ;;  %v13517_v59 = vadd.f32 %v13068_v43, %v6100_v50 }
 0xca4   : > { %6403 = vmatmul.bf16.gmra.mxu1 %v6157_v60  ;;  %6492 = vmatmul.bf16.gmra.mxu2 %v6157_v60  ;;  %v5405_v47 = vadd.f32 %v12761_v30, %v5372_v1 }
 0xca5   : > { %v13473_v58 = vsub.f32 %v13236_v33, %v5532_v42  ;;  %5491 = vadd.xlane.f32.xlu2 %v13482_v35  ;;  %15311 = vst [vmem:[#allocation27_spill] sm:$0xff] %v13517_v59  ;;  %v13520_v42 = vadd.f32 %v13068_v43, %v6099_v56 }
 0xca6   : > { %6581 = vmatmul.bf16.gmra.mxu3 %v6157_v60  ;;  %6670 = vmatmul.bf16.gmra.mxu0 %v6157_v60  ;;  %v13523_v24 = vadd.f32 %v9919_v53, %v5405_v47 }
 0xca7   : > { %v5596_v33 = vmul.f32 %v13473_v58, %v13473_v58  ;;  %15312 = vst [vmem:[#allocation23_spill] sm:$0xff] %v13520_v42  ;;  %v6158_v27 = vpack.c.bf16 %v13517_v59, %v13520_v42  ;;  %v9789_v22 = vpop.eup %9788  ;;  %v9097_v42 = vld [vmem:[#allocation13 + $0xf8] sm:$0xff] }
 0xca8   : > { %v5875_v19 = vmul.f32 %v9789_v22, %v5716_v13  ;;  %vm5881_vm12 = vweird.f32 %v9789_v22  ;;  %7442 = vmatpush.bf16.msrb.mxu0 %v9097_v42 }
 0xca9   : > { %5650 = vadd.xlane.f32.xlu1 %v5596_v33  ;;  %vm5882_vm14 = vmor %vm5880_vm13, %vm5881_vm12 }
 0xcaa   : > { %v5876_v52 = vmul.f32 %v9789_v22, %v5875_v19 }
 0xcac   : > { %v5877_v18 = vmul.f32 0.5, %v5876_v52 }
 0xcae   : > { %v5878_v60 = vsub.f32 1.5, %v5877_v18  ;;  %v4286_v18 = vpop.f32.mrf.mxu2 }
 0xcb0   : > { %v5879_v26 = vmul.f32 %v9789_v22, %v5878_v60 }
 0xcb1   : > { %5497 = vadd.xlane.f32.xlu1 %v13510_v21 }
 0xcb2   : > { %v5883_v54 = vsel %vm5882_vm14, %v9789_v22, %v5879_v26 }
 0xcb3   : > { %v6068_v29 = vmul.f32 %v5883_v54, %v13184_v39 }
 0xcb4   : > { %6408 = vmatmul.bf16.gmra.mxu1 %v6158_v27  ;;  %6497 = vmatmul.bf16.gmra.mxu2 %v6158_v27 }
 0xcb6   : > { %6586 = vmatmul.bf16.gmra.mxu3 %v6158_v27  ;;  %6675 = vmatmul.bf16.gmra.mxu0 %v6158_v27 }
 0xcb9   : > { %5499 = vadd.xlane.f32.xlu1 %v13523_v24 }
 0xcee   : > { %v5637_v61 = vpop.xlane.xlu1 %5636 }
 0xcef   : > { %v5685_v33 = vmul.f32 %v5637_v61, %v12835_v63 }
 0xcf1   : > { %v5717_v55 = vadd.f32 1e-05, %v5685_v33  ;;  %v6101_v33 = vmul.f32 %v13040_v4, %v6068_v29 }
 0xcf3   : > { %9790 = vrsqrt.f32 %v5717_v55  ;;  %vm5890_vm0 = vweird.f32 %v5717_v55 }
 0xcf8   : > { %v5639_v10 = vpop.xlane.xlu1 %5638 }
 0xcf9   : > { %v9791_v0 = vpop.eup %9790  ;;  %v5686_v36 = vmul.f32 %v5639_v10, %v12835_v63 }
 0xcfa   : > { %v5885_v20 = vmul.f32 %v9791_v0, %v5717_v55  ;;  %vm5891_vm15 = vweird.f32 %v9791_v0 }
 0xcfb   : > { %v13532_v45 = vadd.f32 1e-05, %v5686_v36  ;;  %vm5892_vm1 = vmor %vm5890_vm0, %vm5891_vm15 }
 0xcfc   : > { %v5886_v48 = vmul.f32 %v9791_v0, %v5885_v20 }
 0xcfd   : > { %9792 = vrsqrt.f32 %v13532_v45  ;;  %vm5900_vm3 = vweird.f32 %v13532_v45 }
 0xcfe   : > { %v5887_v14 = vmul.f32 0.5, %v5886_v48  ;;  %v5645_v50 = vpop.xlane.xlu0 %5644  ;;  %v13562_v48 = vadd.f32 %v13068_v43, %v6101_v33 }
 0xcff   : > { %v5689_v53 = vmul.f32 %v5645_v50, %v12835_v63 }
 0xd00   : > { %v5888_v57 = vsub.f32 1.5, %v5887_v14  ;;  %v5486_v5 = vpop.xlane.xlu1 %5485  ;;  %v5641_v1 = vpop.xlane.xlu2 %5640  ;;  %15315 = vst [vmem:[#allocation31_spill] sm:$0xff] %v13562_v48 }
 0xd01   : > { %v5533_v2 = vmul.f32 %v12835_v63, %v5486_v5  ;;  %v5687_v56 = vmul.f32 %v5641_v1, %v12835_v63  ;;  %v13549_v52 = vadd.f32 1e-05, %v5689_v53  ;;  %v5339_v14 = vpop.f32.mrf.mxu0 }
 0xd02   : > { %v5889_v47 = vmul.f32 %v9791_v0, %v5888_v57 }
 0xd03   : > { %v13539_v27 = vpop.eup %9792  ;;  %v13542_v3 = vsub.f32 %v13334_v6, %v5533_v2  ;;  %v13546_v22 = vadd.f32 1e-05, %v5687_v56  ;;  %vm5930_vm12 = vweird.f32 %v13549_v52 }
 0xd04   : > { %v5893_v13 = vsel %vm5892_vm1, %v9791_v0, %v5889_v47  ;;  %v5895_v39 = vmul.f32 %v13539_v27, %v13532_v45  ;;  %v15314_v0 = vld [vmem:[#allocation53_spill] sm:$0xff]  ;;  %vm5901_vm2 = vweird.f32 %v13539_v27 }
 0xd05   : > { %v6069_v19 = vmul.f32 %v5893_v13, %v13256_v9  ;;  %v5597_v61 = vmul.f32 %v13542_v3, %v13542_v3  ;;  %9794 = vrsqrt.f32 %v13546_v22  ;;  %v15313_v9 = vld [vmem:[#allocation59_spill] sm:$0xff]  ;;  %vm13589_vm4 = vmor %vm5900_vm3, %vm5901_vm2  ;;  %vm5910_vm6 = vweird.f32 %v13546_v22 }
 0xd06   : > { %v5896_v55 = vmul.f32 %v13539_v27, %v5895_v39  ;;  %9796 = vrsqrt.f32 %v13549_v52  ;;  %v3266_v36 = vadd.f32 %v15314_v0, %v15313_v9  ;;  %v5647_v20 = vpop.xlane.xlu0 %5646 }
 0xd07   : > { %5652 = vadd.xlane.f32.xlu2 %v5597_v61  ;;  %v6102_v6 = vmul.f32 %v13040_v4, %v6069_v19 }
 0xd08   : > { %v5897_v60 = vmul.f32 0.5, %v5896_v55  ;;  %v5488_v10 = vpop.xlane.xlu1 %5487  ;;  %v4320_v57 = vadd.f32 %v4286_v18, %v3266_v36  ;;  %v5643_v29 = vpop.xlane.xlu2 %5642 }
 0xd09   : > { %v5534_v26 = vmul.f32 %v12835_v63, %v5488_v10  ;;  %v13565_v54 = vadd.f32 %v13068_v43, %v6102_v6  ;;  %v5688_v47 = vmul.f32 %v5643_v29, %v12835_v63 }
 0xd0a   : > { %v5898_v5 = vsub.f32 1.5, %v5897_v60  ;;  %v5373_v53 = vadd.f32 %v5339_v14, %v4320_v57 }
 0xd0b   : > { %15316 = vst [vmem:[#allocation39_spill] sm:$0xff] %v13565_v54  ;;  %v13568_v1 = vsub.f32 %v13388_v25, %v5534_v26  ;;  %v6159_v2 = vpack.c.bf16 %v13565_v54, %v13562_v48  ;;  %v9795_v50 = vpop.eup %9794  ;;  %v13578_v19 = vadd.f32 1e-05, %v5688_v47  ;;  %v5690_v25 = vmul.f32 %v5647_v20, %v12835_v63  ;;  %v9920_v47 = vld [vmem:[%s10471_s24 + $0xf8] sm:$0xff]  ;;  %s10180_s24 = scalar_lea.hbm %s10179_s22, 256 }
 0xd0c   : > { %v13573_v56 = vpop.eup %9796  ;;  %v5905_v13 = vmul.f32 %v9795_v50, %v13546_v22  ;;  %v5899_v61 = vmul.f32 %v13539_v27, %v5898_v5  ;;  %v5406_v18 = vadd.f32 %v12761_v30, %v5373_v53  ;;  %vm5911_vm5 = vweird.f32 %v9795_v50  ;;  %p10181_p1 = scmp.ne.s32.totalorder %s10179_s22, %s10180_s24  ;;  %p10186_p8 = scmp.lt.s32.totalorder %s10184_s23, %s10180_s24 }
 0xd0d   : > { %v5598_v39 = vmul.f32 %v13568_v1, %v13568_v1  ;;  %6413 = vmatmul.bf16.gmra.mxu1 %v6159_v2  ;;  %6502 = vmatmul.bf16.gmra.mxu2 %v6159_v2  ;;  %v5925_v55 = vmul.f32 %v13573_v56, %v13549_v52  ;;  %9798 = vrsqrt.f32 %v13578_v19  ;;  %v13593_v36 = vadd.f32 1e-05, %v5690_v25  ;;  %vm5912_vm7 = vmor %vm5910_vm6, %vm5911_vm5 }
 0xd0e   : > { %6591 = vmatmul.bf16.gmra.mxu3 %v6159_v2  ;;  %6680 = vmatmul.bf16.gmra.mxu0 %v6159_v2  ;;  %v5906_v33 = vmul.f32 %v9795_v50, %v5905_v13  ;;  %v5494_v9 = vpop.xlane.xlu0 %5493  ;;  %v5903_v30 = vsel %vm13589_vm4, %v13539_v27, %v5899_v61  ;;  %v13609_v53 = vadd.f32 %v9920_v47, %v5406_v18  ;;  %vm5931_vm9 = vweird.f32 %v13573_v56  ;;  %p10182_p3 = pnand %p10181_p1, %p10431_p13  ;;  %p10187_p7 = por %p10186_p8, %p10185_p12 }
 0xd0f   : > { %5654 = vadd.xlane.f32.xlu2 %v5598_v39  ;;  %v5537_v26 = vmul.f32 %v12835_v63, %v5494_v9  ;;  %v5926_v45 = vmul.f32 %v13573_v56, %v5925_v55  ;;  %v6070_v13 = vmul.f32 %v5903_v30, %v13281_v51  ;;  %vm5920_vm10 = vweird.f32 %v13578_v19  ;;  %vm5932_vm13 = vmor %vm5930_vm12, %vm5931_vm9 }
 0xd10   : > { %v5649_v6 = vpop.xlane.xlu1 %5648  ;;  %v5907_v60 = vmul.f32 0.5, %v5906_v33  ;;  %v5490_v14 = vpop.xlane.xlu2 %5489  ;;  %vm5940_vm2 = vweird.f32 %v13593_v36  ;;  %p10183_p5 = pneg %p10182_p3 }
 0xd11   : > { %v5691_v10 = vmul.f32 %v5649_v6, %v12835_v63  ;;  %v5535_v5 = vmul.f32 %v12835_v63, %v5490_v14  ;;  %v13604_v29 = vsub.f32 %v13448_v16, %v5537_v26  ;;  %v5927_v25 = vmul.f32 0.5, %v5926_v45 }
 0xd12   : > { %v5908_v20 = vsub.f32 1.5, %v5907_v60  ;;  %p10188_p9 = pnand %p10187_p7, %p10183_p5 }
 0xd13   : > { %v13600_v57 = vadd.f32 1e-05, %v5691_v10  ;;  %v9799_v27 = vpop.eup %9798  ;;  %v13615_v39 = vsub.f32 %v13458_v41, %v5535_v5  ;;  %v5601_v22 = vmul.f32 %v13604_v29, %v13604_v29  ;;  %v6103_v41 = vmul.f32 %v13040_v4, %v6070_v13 }
 0xd14   : > { %v5909_v2 = vmul.f32 %v9795_v50, %v5908_v20  ;;  %v5915_v61 = vmul.f32 %v9799_v27, %v13578_v19  ;;  %v5928_v60 = vsub.f32 1.5, %v5927_v25  ;;  %vm5921_vm8 = vweird.f32 %v9799_v27 }
 0xd15   : > { %9800 = vrsqrt.f32 %v13600_v57  ;;  %v5599_v51 = vmul.f32 %v13615_v39, %v13615_v39  ;;  %5660 = vadd.xlane.f32.xlu1 %v5601_v22  ;;  %v13639_v14 = vadd.f32 %v13068_v43, %v6103_v41  ;;  %vm5922_vm11 = vmor %vm5920_vm10, %vm5921_vm8  ;;  %vm5950_vm0 = vweird.f32 %v13600_v57 }
 0xd16   : > { %9802 = vrsqrt.f32 %v13593_v36  ;;  %v5913_v16 = vsel %vm5912_vm7, %v9795_v50, %v5909_v2  ;;  %v5916_v55 = vmul.f32 %v9799_v27, %v5915_v61  ;;  %v5496_v6 = vpop.xlane.xlu0 %5495  ;;  %v5929_v2 = vmul.f32 %v13573_v56, %v5928_v60 }
 0xd17   : > { %5501 = vadd.xlane.f32.xlu2 %v13609_v53  ;;  %v6071_v33 = vmul.f32 %v5913_v16, %v13331_v28  ;;  %5656 = vadd.xlane.f32.xlu0 %v5599_v51  ;;  %v5538_v28 = vmul.f32 %v12835_v63, %v5496_v6  ;;  %15319 = vst [vmem:[#allocation37_spill] sm:$0xff] %v13639_v14 }
 0xd18   : > { %v5917_v10 = vmul.f32 0.5, %v5916_v55  ;;  %v5492_v9 = vpop.xlane.xlu2 %5491 }
 0xd19   : > { %v6104_v50 = vmul.f32 %v13040_v4, %v6071_v33  ;;  %v5536_v45 = vmul.f32 %v12835_v63, %v5492_v9  ;;  %v13651_v25 = vsub.f32 %v13470_v40, %v5538_v28  ;;  %v5933_v33 = vsel %vm5932_vm13, %v13573_v56, %v5929_v2 }
 0xd1a   : > { %v5918_v30 = vsub.f32 1.5, %v5917_v10  ;;  %v6073_v41 = vmul.f32 %v5933_v33, %v13322_v8 }
 0xd1b   : > { %v13626_v18 = vpop.eup %9800  ;;  %v13642_v5 = vadd.f32 %v13068_v43, %v6104_v50  ;;  %v13648_v16 = vsub.f32 %v13482_v35, %v5536_v45  ;;  %v5602_v52 = vmul.f32 %v13651_v25, %v13651_v25 }
 0xd1c   : > { %v13628_v0 = vpop.eup %9802  ;;  %v13631_v26 = vpop.xlane.xlu1 %5650  ;;  %v5945_v20 = vmul.f32 %v13626_v18, %v13600_v57  ;;  %v5919_v47 = vmul.f32 %v9799_v27, %v5918_v30  ;;  %v6106_v9 = vmul.f32 %v13040_v4, %v6073_v41  ;;  %vm5951_vm14 = vweird.f32 %v13626_v18 }
 0xd1d   : > { %15320 = vst [vmem:[#allocation35_spill] sm:$0xff] %v13642_v5  ;;  %v5935_v13 = vmul.f32 %v13628_v0, %v13593_v36  ;;  %v6160_v19 = vpack.c.bf16 %v13642_v5, %v13639_v14  ;;  %v5600_v51 = vmul.f32 %v13648_v16, %v13648_v16  ;;  %vm5941_vm15 = vweird.f32 %v13628_v0  ;;  %vm5952_vm1 = vmor %vm5950_vm0, %vm5951_vm14  ;;  %v13712_v41 = vpop.f32.mrf.mxu0 }
 0xd1e   : > { %v5923_v61 = vsel %vm5922_vm11, %v9799_v27, %v5919_v47  ;;  %v5946_v22 = vmul.f32 %v13626_v18, %v5945_v20  ;;  %v13680_v45 = vadd.f32 %v13068_v43, %v6106_v9  ;;  %vm5942_vm3 = vmor %vm5940_vm2, %vm5941_vm15 }
 0xd1f   : > { %6418 = vmatmul.bf16.gmra.mxu1 %v6160_v19  ;;  %6507 = vmatmul.bf16.gmra.mxu2 %v6160_v19  ;;  %v5936_v35 = vmul.f32 %v13628_v0, %v5935_v13  ;;  %v6072_v40 = vmul.f32 %v5923_v61, %v13391_v49 }
 0xd20   : > { %6596 = vmatmul.bf16.gmra.mxu3 %v6160_v19  ;;  %6685 = vmatmul.bf16.gmra.mxu0 %v6160_v19  ;;  %v5947_v55 = vmul.f32 0.5, %v5946_v22  ;;  %15322 = vst [vmem:[#allocation56_spill] sm:$0xff] %v13680_v45 }
 0xd21   : > { %5658 = vadd.xlane.f32.xlu0 %v5600_v51  ;;  %5662 = vadd.xlane.f32.xlu2 %v5602_v52  ;;  %v5937_v56 = vmul.f32 0.5, %v5936_v35  ;;  %v6105_v60 = vmul.f32 %v13040_v4, %v6072_v40 }
 0xd22   : > { %v5948_v10 = vsub.f32 1.5, %v5947_v55 }
 0xd23   : > { %v5938_v28 = vsub.f32 1.5, %v5937_v56  ;;  %v13674_v20 = vadd.f32 %v13068_v43, %v6105_v60 }
 0xd24   : > { %v5498_v27 = vpop.xlane.xlu1 %5497  ;;  %v5949_v8 = vmul.f32 %v13626_v18, %v5948_v10  ;;  %v13714_v10 = vpop.f32.mrf.mxu2 }
 0xd25   : > { %v5539_v6 = vmul.f32 %v12835_v63, %v5498_v27  ;;  %15321 = vst [vmem:[#allocation34_spill] sm:$0xff] %v13674_v20  ;;  %v5939_v2 = vmul.f32 %v13628_v0, %v5938_v28  ;;  %v6161_v13 = vpack.c.bf16 %v13680_v45, %v13674_v20 }
 0xd26   : > { %v5953_v19 = vsel %vm5952_vm1, %v13626_v18, %v5949_v8 }
 0xd27   : > { %v13667_v50 = vsub.f32 %v13510_v21, %v5539_v6  ;;  %v5943_v22 = vsel %vm5942_vm3, %v13628_v0, %v5939_v2  ;;  %v13710_v6 = vpop.f32.mrf.mxu1 }
 0xd28   : > { %v6074_v57 = vmul.f32 %v5943_v22, %v13378_v23  ;;  %v5692_v23 = vmul.f32 %v13631_v26, %v12835_v63  ;;  %v13716_v26 = vpop.f32.mrf.mxu3 }
 0xd29   : > { %v5603_v49 = vmul.f32 %v13667_v50, %v13667_v50 }
 0xd2a   : > { %v6107_v36 = vmul.f32 %v13040_v4, %v6074_v57 }
 0xd2b   : > { %5664 = vadd.xlane.f32.xlu0 %v5603_v49 }
 0xd2c   : > { %v5500_v30 = vpop.xlane.xlu1 %5499  ;;  %v13703_v35 = vadd.f32 %v13068_v43, %v6107_v36  ;;  %v13727_v36 = vpop.f32.mrf.mxu2 }
 0xd2d   : > { %v5540_v21 = vmul.f32 %v12835_v63, %v5500_v30 }
 0xd2e   : > { %15324 = vst [vmem:[#allocation36_spill] sm:$0xff] %v13703_v35 }
 0xd2f   : > { %v13686_v47 = vsub.f32 %v13523_v24, %v5540_v21  ;;  %6423 = vmatmul.bf16.gmra.mxu1 %v6161_v13  ;;  %6512 = vmatmul.bf16.gmra.mxu2 %v6161_v13  ;;  %v6075_v24 = vmul.f32 %v5953_v19, %v13420_v46  ;;  %v5724_v46 = vadd.f32 1e-05, %v5692_v23  ;;  %v13721_v21 = vpop.f32.mrf.mxu1  ;;  %v13723_v19 = vpop.f32.mrf.mxu0 }
 0xd30   : > { %6601 = vmatmul.bf16.gmra.mxu3 %v6161_v13  ;;  %6690 = vmatmul.bf16.gmra.mxu0 %v6161_v13 }
 0xd31   : > { %v5604_v61 = vmul.f32 %v13686_v47, %v13686_v47  ;;  %v6108_v33 = vmul.f32 %v13040_v4, %v6075_v24  ;;  %9804 = vrsqrt.f32 %v5724_v46  ;;  %vm5960_vm5 = vweird.f32 %v5724_v46 }
 0xd33   : > { %5666 = vadd.xlane.f32.xlu1 %v5604_v61  ;;  %v13700_v18 = vadd.f32 %v13068_v43, %v6108_v33 }
 0xd35   : > { %15323 = vst [vmem:[#allocation69_spill] sm:$0xff] %v13700_v18  ;;  %v6162_v0 = vpack.c.bf16 %v13700_v18, %v13703_v35 }
 0xd37   : > { %v9805_v51 = vpop.eup %9804 }
 0xd38   : > { %v5955_v40 = vmul.f32 %v9805_v51, %v5724_v46  ;;  %vm5961_vm4 = vweird.f32 %v9805_v51 }
 0xd39   : > { %vm5962_vm6 = vmor %vm5960_vm5, %vm5961_vm4 }
 0xd3a   : > { %v5956_v52 = vmul.f32 %v9805_v51, %v5955_v40 }
 0xd3c   : > { %v5957_v60 = vmul.f32 0.5, %v5956_v52  ;;  %v13729_v52 = vpop.f32.mrf.mxu3 }
 0xd3e   : > { %v5958_v49 = vsub.f32 1.5, %v5957_v60 }
 0xd3f   : > { %6428 = vmatmul.bf16.gmra.mxu1 %v6162_v0  ;;  %6517 = vmatmul.bf16.gmra.mxu2 %v6162_v0 }
 0xd40   : > { %6606 = vmatmul.bf16.gmra.mxu3 %v6162_v0  ;;  %6695 = vmatmul.bf16.gmra.mxu0 %v6162_v0  ;;  %v5959_v2 = vmul.f32 %v9805_v51, %v5958_v49 }
 0xd42   : > { %v5963_v22 = vsel %vm5962_vm6, %v9805_v51, %v5959_v2 }
 0xd7a   : > { %v5653_v27 = vpop.xlane.xlu2 %5652 }
 0xd7b   : > { %v5693_v55 = vmul.f32 %v5653_v27, %v12835_v63  ;;  %v6076_v27 = vmul.f32 %v5963_v22, %v13473_v58  ;;  %v13744_v22 = vpop.f32.mrf.mxu0 }
 0xd7d   : > { %v5725_v56 = vadd.f32 1e-05, %v5693_v55 }
 0xd7f   : > { %9806 = vrsqrt.f32 %v5725_v56  ;;  %vm5970_vm8 = vweird.f32 %v5725_v56 }
 0xd82   : > { %v5655_v9 = vpop.xlane.xlu2 %5654 }
 0xd83   : > { %v5694_v28 = vmul.f32 %v5655_v9, %v12835_v63 }
 0xd85   : > { %v9807_v30 = vpop.eup %9806  ;;  %v13719_v8 = vadd.f32 1e-05, %v5694_v28 }
 0xd86   : > { %v5965_v13 = vmul.f32 %v9807_v30, %v5725_v56  ;;  %vm5971_vm7 = vweird.f32 %v9807_v30  ;;  %v6109_v56 = vmul.f32 %v13040_v4, %v6076_v27 }
 0xd87   : > { %9808 = vrsqrt.f32 %v13719_v8  ;;  %vm5972_vm9 = vmor %vm5970_vm8, %vm5971_vm7  ;;  %vm5980_vm11 = vweird.f32 %v13719_v8 }
 0xd88   : > { %v5966_v61 = vmul.f32 %v9807_v30, %v5965_v13  ;;  %v5661_v23 = vpop.xlane.xlu1 %5660  ;;  %v13742_v13 = vpop.f32.mrf.mxu1 }
 0xd89   : > { %v5697_v46 = vmul.f32 %v5661_v23, %v12835_v63  ;;  %v13751_v23 = vadd.f32 %v13068_v43, %v6109_v56 }
 0xd8a   : > { %v5967_v24 = vmul.f32 0.5, %v5966_v61  ;;  %v5502_v57 = vpop.xlane.xlu2 %5501  ;;  %v5657_v51 = vpop.xlane.xlu0 %5656 }
 0xd8b   : > { %v5541_v33 = vmul.f32 %v12835_v63, %v5502_v57  ;;  %v5695_v9 = vmul.f32 %v5657_v51, %v12835_v63  ;;  %v13738_v28 = vadd.f32 1e-05, %v5697_v46  ;;  %15325 = vst [vmem:[#allocation65_spill] sm:$0xff] %v13751_v23  ;;  %v13756_v46 = vpop.f32.mrf.mxu2 }
 0xd8c   : > { %v5968_v0 = vsub.f32 1.5, %v5967_v24 }
 0xd8d   : > { %v9809_v40 = vpop.eup %9808  ;;  %v13733_v55 = vsub.f32 %v13609_v53, %v5541_v33  ;;  %v5727_v61 = vadd.f32 1e-05, %v5695_v9  ;;  %9810 = vrsqrt.f32 %v13738_v28  ;;  %vm6010_vm2 = vweird.f32 %v13738_v28 }
 0xd8e   : > { %v5969_v60 = vmul.f32 %v9807_v30, %v5968_v0  ;;  %v5975_v49 = vmul.f32 %v9809_v40, %v13719_v8  ;;  %vm5981_vm10 = vweird.f32 %v9809_v40 }
 0xd8f   : > { %v5605_v2 = vmul.f32 %v13733_v55, %v13733_v55  ;;  %9812 = vrsqrt.f32 %v5727_v61  ;;  %vm5982_vm12 = vmor %vm5980_vm11, %vm5981_vm10  ;;  %vm5990_vm14 = vweird.f32 %v5727_v61 }
 0xd90   : > { %v5973_v58 = vsel %vm5972_vm9, %v9807_v30, %v5969_v60  ;;  %v5976_v53 = vmul.f32 %v9809_v40, %v5975_v49  ;;  %v13767_v56 = vpop.f32.mrf.mxu1 }
 0xd91   : > { %v6077_v24 = vmul.f32 %v5973_v58, %v13542_v3  ;;  %5668 = vadd.xlane.f32.xlu2 %v5605_v2  ;;  %v13760_v3 = vpop.f32.mrf.mxu3 }
 0xd92   : > { %v5977_v57 = vmul.f32 0.5, %v5976_v53 }
 0xd93   : > { %v6110_v33 = vmul.f32 %v13040_v4, %v6077_v24  ;;  %v13758_v51 = vpop.eup %9810  ;;  %v13776_v20 = vpop.f32.mrf.mxu2 }
 0xd94   : > { %v5978_v0 = vsub.f32 1.5, %v5977_v57  ;;  %v5659_v9 = vpop.xlane.xlu0 %5658  ;;  %v6005_v2 = vmul.f32 %v13758_v51, %v13738_v28  ;;  %v5663_v53 = vpop.xlane.xlu2 %5662  ;;  %vm6011_vm0 = vweird.f32 %v13758_v51 }
 0xd95   : > { %v13754_v30 = vadd.f32 %v13068_v43, %v6110_v33  ;;  %v9813_v60 = vpop.eup %9812  ;;  %v5696_v24 = vmul.f32 %v5659_v9, %v12835_v63  ;;  %v5698_v57 = vmul.f32 %v5663_v53, %v12835_v63  ;;  %v13771_v33 = vpop.f32.mrf.mxu0  ;;  %vm13812_vm3 = vmor %vm6010_vm2, %vm6011_vm0 }
 0xd96   : > { %v5979_v49 = vmul.f32 %v9809_v40, %v5978_v0  ;;  %v5985_v58 = vmul.f32 %v9813_v60, %v5727_v61  ;;  %v6006_v18 = vmul.f32 %v13758_v51, %v6005_v2  ;;  %vm5991_vm13 = vweird.f32 %v9813_v60 }
 0xd97   : > { %15326 = vst [vmem:[#allocation66_spill] sm:$0xff] %v13754_v30  ;;  %v6163_v27 = vpack.c.bf16 %v13754_v30, %v13751_v23  ;;  %v5728_v30 = vadd.f32 1e-05, %v5696_v24  ;;  %v13774_v9 = vadd.f32 1e-05, %v5698_v57  ;;  %vm5992_vm15 = vmor %vm5990_vm14, %vm5991_vm13 }
 0xd98   : > { %v5986_v0 = vmul.f32 %v9813_v60, %v5985_v58  ;;  %v5983_v23 = vsel %vm5982_vm12, %v9809_v40, %v5979_v49  ;;  %v6007_v5 = vmul.f32 0.5, %v6006_v18 }
 0xd99   : > { %6433 = vmatmul.bf16.gmra.mxu1 %v6163_v27  ;;  %6522 = vmatmul.bf16.gmra.mxu2 %v6163_v27  ;;  %9814 = vrsqrt.f32 %v5728_v30  ;;  %v6078_v8 = vmul.f32 %v5983_v23, %v13568_v1  ;;  %v13779_v53 = vpop.f32.mrf.mxu3  ;;  %vm6000_vm4 = vweird.f32 %v5728_v30  ;;  %vm6020_vm10 = vweird.f32 %v13774_v9 }
 0xd9a   : > { %6611 = vmatmul.bf16.gmra.mxu3 %v6163_v27  ;;  %6700 = vmatmul.bf16.gmra.mxu0 %v6163_v27  ;;  %v5987_v35 = vmul.f32 0.5, %v5986_v0  ;;  %9816 = vrsqrt.f32 %v13774_v9  ;;  %v6008_v23 = vsub.f32 1.5, %v6007_v5 }
 0xd9b   : > { %v13803_v5 = vpop.f32.mrf.mxu2 }
 0xd9c   : > { %v5988_v45 = vsub.f32 1.5, %v5987_v35  ;;  %v13785_v35 = vpop.f32.mrf.mxu1 }
 0xd9d   : > { %v13788_v61 = vpop.f32.mrf.mxu0 }
 0xd9e   : > { %v5665_v27 = vpop.xlane.xlu0 %5664  ;;  %v5989_v58 = vmul.f32 %v9813_v60, %v5988_v45  ;;  %v6111_v45 = vmul.f32 %v13040_v4, %v6078_v8 }
 0xd9f   : > { %v5699_v40 = vmul.f32 %v5665_v27, %v12835_v63  ;;  %v9815_v49 = vpop.eup %9814 }
 0xda0   : > { %v5993_v2 = vsel %vm5992_vm15, %v9813_v60, %v5989_v58  ;;  %v5995_v1 = vmul.f32 %v9815_v49, %v5728_v30  ;;  %v13793_v27 = vpop.eup %9816  ;;  %v6009_v58 = vmul.f32 %v13758_v51, %v6008_v23  ;;  %vm6001_vm1 = vweird.f32 %v9815_v49 }
 0xda1   : > { %v13783_v24 = vadd.f32 1e-05, %v5699_v40  ;;  %v6079_v57 = vmul.f32 %v5993_v2, %v13615_v39  ;;  %v13798_v39 = vadd.f32 %v13068_v43, %v6111_v45  ;;  %v6015_v8 = vmul.f32 %v13793_v27, %v13774_v9  ;;  %vm6002_vm5 = vmor %vm6000_vm4, %vm6001_vm1  ;;  %v9081_v45 = vld [vmem:[#allocation13 + $0x78] sm:$0xff] }
 0xda2   : > { %v5996_v18 = vmul.f32 %v9815_v49, %v5995_v1  ;;  %v13807_v1 = vpop.f32.mrf.mxu3  ;;  %7264 = vmatpush.bf16.msra.mxu2 %v9081_v45  ;;  %vm6021_vm7 = vweird.f32 %v13793_v27 }
 0xda3   : > { %9818 = vrsqrt.f32 %v13783_v24  ;;  %v6112_v0 = vmul.f32 %v13040_v4, %v6079_v57  ;;  %15327 = vst [vmem:[#allocation62_spill] sm:$0xff] %v13798_v39  ;;  %v6016_v28 = vmul.f32 %v13793_v27, %v6015_v8  ;;  %vm6030_vm8 = vweird.f32 %v13783_v24  ;;  %vm6022_vm11 = vmor %vm6020_vm10, %vm6021_vm7 }
 0xda4   : > { %v5997_v60 = vmul.f32 0.5, %v5996_v18  ;;  %v13820_v14 = vpop.f32.mrf.mxu1 }
 0xda5   : > { %v13801_v40 = vadd.f32 %v13068_v43, %v6112_v0  ;;  %v13823_v54 = vpop.f32.mrf.mxu0  ;;  %v6017_v59 = vmul.f32 0.5, %v6016_v28 }
 0xda6   : > { %v5998_v2 = vsub.f32 1.5, %v5997_v60  ;;  %v6013_v60 = vsel %vm13812_vm3, %v13758_v51, %v6009_v58  ;;  %v9089_v51 = vld [vmem:[#allocation13 + $0xb8] sm:$0xff]  ;;  %7265 = vmatpush.bf16.msra.mxu2 %v9080_v62 }
 0xda7   : > { %15328 = vst [vmem:[#allocation30_spill] sm:$0xff] %v13801_v40  ;;  %v6164_v23 = vpack.c.bf16 %v13801_v40, %v13798_v39  ;;  %v6081_v48 = vmul.f32 %v6013_v60, %v13604_v29  ;;  %v9073_v58 = vld [vmem:[#allocation13 + $0x38] sm:$0xff]  ;;  %7353 = vmatpush.bf16.msra.mxu3 %v9089_v51  ;;  %v6018_v29 = vsub.f32 1.5, %v6017_v59 }
 0xda8   : > { %v5999_v18 = vmul.f32 %v9815_v49, %v5998_v2  ;;  %7175 = vmatpush.bf16.msra.mxu1 %v9073_v58 }
 0xda9   : > { %v9819_v57 = vpop.eup %9818  ;;  %6438 = vmatmul.bf16.gmra.mxu1 %v6164_v23  ;;  %6527 = vmatmul.bf16.gmra.mxu2 %v6164_v23  ;;  %v6019_v28 = vmul.f32 %v13793_v27, %v6018_v29 }
 0xdaa   : > { %v6025_v0 = vmul.f32 %v9819_v57, %v13783_v24  ;;  %v6003_v40 = vsel %vm6002_vm5, %v9815_v49, %v5999_v18  ;;  %6616 = vmatmul.bf16.gmra.mxu3 %v6164_v23  ;;  %6705 = vmatmul.bf16.gmra.mxu0 %v6164_v23  ;;  %v13828_v49 = vpop.f32.mrf.mxu2  ;;  %v13830_v23 = vpop.f32.mrf.mxu3  ;;  %vm6031_vm6 = vweird.f32 %v9819_v57 }
 0xdab   : > { %v6080_v30 = vmul.f32 %v6003_v40, %v13648_v16  ;;  %v6114_v16 = vmul.f32 %v13040_v4, %v6081_v48  ;;  %vm6032_vm9 = vmor %vm6030_vm8, %vm6031_vm6  ;;  %7354 = vmatpush.bf16.msra.mxu3 %v9088_v34  ;;  %v9086_v34 = vld [vmem:[#allocation13 + $0xa0] sm:$0xff] }
 0xdac   : > { %v6026_v39 = vmul.f32 %v9819_v57, %v6025_v0  ;;  %7176 = vmatpush.bf16.msra.mxu1 %v9072_v11  ;;  %v9094_v11 = vld [vmem:[#allocation13 + $0xe0] sm:$0xff] }
 0xdad   : > { %v6113_v31 = vmul.f32 %v13040_v4, %v6080_v30  ;;  %v13835_v40 = vpop.f32.mrf.mxu0  ;;  %v13841_v60 = vadd.f32 %v13068_v43, %v6114_v16  ;;  %v6023_v30 = vsel %vm6022_vm11, %v13793_v27, %v6019_v28 }
 0xdae   : > { %v6027_v2 = vmul.f32 0.5, %v6026_v39  ;;  %v13833_v39 = vpop.f32.mrf.mxu1  ;;  %v6082_v51 = vmul.f32 %v6023_v30, %v13651_v25 }
 0xdaf   : > { %v13838_v18 = vadd.f32 %v13068_v43, %v6113_v31  ;;  %15332 = vst [vmem:[#allocation26_spill] sm:$0xff] %v13841_v60 }
 0xdb0   : > { %v6028_v8 = vsub.f32 1.5, %v6027_v2 }
 0xdb1   : > { %15331 = vst [vmem:[#allocation58_spill] sm:$0xff] %v13838_v18  ;;  %v6165_v59 = vpack.c.bf16 %v13841_v60, %v13838_v18  ;;  %v5667_v60 = vpop.xlane.xlu1 %5666 }
 0xdb2   : > { %v6029_v0 = vmul.f32 %v9819_v57, %v6028_v8  ;;  %v13848_v42 = vpop.f32.mrf.mxu2  ;;  %v13851_v48 = vpop.f32.mrf.mxu3  ;;  %v5700_v17 = vmul.f32 %v5667_v60, %v12835_v63 }
 0xdb4   : > { %v6033_v31 = vsel %vm6032_vm9, %v9819_v57, %v6029_v0  ;;  %v6115_v57 = vmul.f32 %v13040_v4, %v6082_v51  ;;  %v13911_v12 = vadd.f32 1e-05, %v5700_v17 }
 0xdb5   : > { %v6083_v24 = vmul.f32 %v6033_v31, %v13667_v50  ;;  %v13857_v45 = vpop.f32.mrf.mxu0 }
 0xdb6   : > { %v13855_v2 = vpop.f32.mrf.mxu1  ;;  %v13870_v16 = vadd.f32 %v13068_v43, %v6115_v57  ;;  %9820 = vrsqrt.f32 %v13911_v12  ;;  %vm6040_vm13 = vweird.f32 %v13911_v12 }
 0xdb7   : > { %v6116_v9 = vmul.f32 %v13040_v4, %v6083_v24 }
 0xdb8   : > { %15334 = vst [vmem:[#allocation67_spill] sm:$0xff] %v13870_v16 }
 0xdb9   : > { %6443 = vmatmul.bf16.gmra.mxu1 %v6165_v59  ;;  %6532 = vmatmul.bf16.gmra.mxu2 %v6165_v59  ;;  %v13867_v27 = vadd.f32 %v13068_v43, %v6116_v9 }
 0xdba   : > { %6621 = vmatmul.bf16.gmra.mxu3 %v6165_v59  ;;  %6710 = vmatmul.bf16.gmra.mxu0 %v6165_v59  ;;  %v13862_v58 = vpop.f32.mrf.mxu2  ;;  %v13864_v8 = vpop.f32.mrf.mxu3 }
 0xdbb   : > { %15333 = vst [vmem:[#allocation70_spill] sm:$0xff] %v13867_v27  ;;  %v6166_v25 = vpack.c.bf16 %v13867_v27, %v13870_v16 }
 0xdbd   : > { %v13874_v29 = vpop.f32.mrf.mxu0 }
 0xdbe   : > { %v13872_v50 = vpop.f32.mrf.mxu1 }
 0xdc2   : > { %v13878_v0 = vpop.f32.mrf.mxu2  ;;  %v13880_v28 = vpop.f32.mrf.mxu3 }
 0xdc5   : > { %v13884_v31 = vpop.f32.mrf.mxu0 }
 0xdc6   : > { %v13882_v59 = vpop.f32.mrf.mxu1 }
 0xdc9   : > { %6448 = vmatmul.bf16.gmra.mxu1 %v6166_v25  ;;  %6537 = vmatmul.bf16.gmra.mxu2 %v6166_v25 }
 0xdca   : > { %6626 = vmatmul.bf16.gmra.mxu3 %v6166_v25  ;;  %6715 = vmatmul.bf16.gmra.mxu0 %v6166_v25  ;;  %v13886_v30 = vpop.f32.mrf.mxu2  ;;  %v13888_v24 = vpop.f32.mrf.mxu3 }
 0xdcd   : > { %v13892_v9 = vpop.f32.mrf.mxu0 }
 0xdce   : > { %v13890_v51 = vpop.f32.mrf.mxu1  ;;  %15336 = vst [vmem:[#allocation68_spill] sm:$0xff] %v13892_v9  ;;  %v13920_v9 = vpop.eup %9820 }
 0xdcf   : > { %15335 = vst [vmem:[#allocation60_spill] sm:$0xff] %v13890_v51  ;;  %v6035_v17 = vmul.f32 %v13920_v9, %v13911_v12  ;;  %v9078_v51 = vld [vmem:[#allocation13 + $0x60] sm:$0xff]  ;;  %vm6041_vm12 = vweird.f32 %v13920_v9 }
 0xdd0   : > { %vm6042_vm14 = vmor %vm6040_vm13, %vm6041_vm12 }
 0xdd2   : > { %v13894_v57 = vpop.f32.mrf.mxu2  ;;  %v13896_v27 = vpop.f32.mrf.mxu3 }
 0xdd3   : > { %15337 = vst [vmem:[#allocation71_spill] sm:$0xff] %v13894_v57 }
 0xdd4   : > { %15338 = vst [vmem:[#allocation57_spill] sm:$0xff] %v13896_v27  ;;  %v9096_v27 = vld [vmem:[#allocation13 + $0xf0] sm:$0xff] }
 0xdd5   : > { %v13900_v16 = vpop.f32.mrf.mxu0  ;;  %7443 = vmatpush.bf16.msrb.mxu0 %v9096_v27  ;;  %v6036_v27 = vmul.f32 %v13920_v9, %v6035_v17 }
 0xdd6   : > { %v13898_v25 = vpop.f32.mrf.mxu1  ;;  %15340 = vst [vmem:[#allocation55_spill] sm:$0xff] %v13900_v16 }
 0xdd7   : > { %15339 = vst [vmem:[#allocation72_spill] sm:$0xff] %v13898_v25 }
 0xdda   : > { %v13902_v18 = vpop.f32.mrf.mxu2  ;;  %v13904_v32 = vpop.f32.mrf.mxu3 }
 0xddb   : > { %15341 = vst [vmem:[#allocation73_spill] sm:$0xff] %v13902_v18 }
 0xddc   : > { %15342 = vst [vmem:[#allocation49_spill] sm:$0xff] %v13904_v32 }
 0xddd   : > { %v13909_v15 = vpop.f32.mrf.mxu0 }
 0xdde   : > { %v13907_v37 = vpop.f32.mrf.mxu1  ;;  %15344 = vst [vmem:[#allocation46_spill] sm:$0xff] %v13909_v15  ;;  %v9071_v15 = vld [vmem:[#allocation13 + $0x28] sm:$0xff] }
 0xddf   : > { %15343 = vst [vmem:[#allocation74_spill] sm:$0xff] %v13907_v37  ;;  %v9095_v37 = vld [vmem:[#allocation13 + $0xe8] sm:$0xff]  ;;  %7177 = vmatpush.bf16.msra.mxu1 %v9071_v15  ;;  %v6037_v15 = vmul.f32 0.5, %v6036_v27 }
 0xde0   : > { %7444 = vmatpush.bf16.msrb.mxu0 %v9095_v37  ;;  %v9085_v37 = vld [vmem:[#allocation13 + $0x98] sm:$0xff] }
 0xde2   : > { %v13914_v44 = vpop.f32.mrf.mxu2  ;;  %v13916_v7 = vpop.f32.mrf.mxu3 }
 0xde3   : > { %15345 = vst [vmem:[#allocation48_spill] sm:$0xff] %v13914_v44  ;;  %v9079_v44 = vld [vmem:[#allocation13 + $0x68] sm:$0xff] }
 0xde4   : > { %15346 = vst [vmem:[#allocation47_spill] sm:$0xff] %v13916_v7  ;;  %v9087_v7 = vld [vmem:[#allocation13 + $0xa8] sm:$0xff]  ;;  %7266 = vmatpush.bf16.msra.mxu2 %v9079_v44  ;;  %7445 = vmatpush.bf16.msrb.mxu0 %v9094_v11 }
 0xde5   : > { %v13922_v60 = vpop.f32.mrf.mxu0  ;;  %7355 = vmatpush.bf16.msra.mxu3 %v9087_v7  ;;  %v9077_v7 = vld [vmem:[#allocation13 + $0x58] sm:$0xff] }
 0xde6   : > { %v13918_v38 = vpop.f32.mrf.mxu1  ;;  %15348 = vst [vmem:[#allocation45_spill] sm:$0xff] %v13922_v60 }
 0xde7   : > { %15347 = vst [vmem:[#allocation75_spill] sm:$0xff] %v13918_v38  ;;  %v9070_v38 = vld [vmem:[#allocation13 + $0x20] sm:$0xff] }
 0xde8   : > { %7178 = vmatpush.bf16.msra.mxu1 %v9070_v38  ;;  %7267 = vmatpush.bf16.msra.mxu2 %v9078_v51  ;;  %v9076_v51 = vld [vmem:[#allocation13 + $0x50] sm:$0xff] }
 0xde9   : > { %7356 = vmatpush.bf16.msra.mxu3 %v9086_v34  ;;  %v9084_v34 = vld [vmem:[#allocation13 + $0x90] sm:$0xff] }
 0xdea   : > { %v13926_v57 = vpop.f32.mrf.mxu2  ;;  %v13928_v32 = vpop.f32.mrf.mxu3 }
 0xdeb   : > { %15349 = vst [vmem:[#allocation63_spill] sm:$0xff] %v13926_v57  ;;  %v9093_v57 = vld [vmem:[#allocation13 + $0xd8] sm:$0xff] }
 0xdec   : > { %15350 = vst [vmem:[#allocation52_spill] sm:$0xff] %v13928_v32  ;;  %v9069_v32 = vld [vmem:[#allocation13 + $0x18] sm:$0xff]  ;;  %7268 = vmatpush.bf16.msra.mxu2 %v9077_v7  ;;  %7446 = vmatpush.bf16.msrb.mxu0 %v9093_v57 }
 0xded   : > { %v13933_v16 = vpop.f32.mrf.mxu0  ;;  %7179 = vmatpush.bf16.msra.mxu1 %v9069_v32  ;;  %7357 = vmatpush.bf16.msra.mxu3 %v9085_v37 }
 0xdee   : > { %v13930_v62 = vpop.f32.mrf.mxu1  ;;  %15352 = vst [vmem:[#allocation43_spill] sm:$0xff] %v13933_v16 }
 0xdef   : > { %15351 = vst [vmem:[#allocation76_spill] sm:$0xff] %v13930_v62  ;;  %v9083_v62 = vld [vmem:[#allocation13 + $0x88] sm:$0xff] }
 0xdf0   : > { %7269 = vmatpush.bf16.msra.mxu2 %v9076_v51  ;;  %v9082_v51 = vld [vmem:[#allocation13 + $0x80] sm:$0xff] }
 0xdf1   : > { %7358 = vmatpush.bf16.msra.mxu3 %v9084_v34  ;;  %v9090_v34 = vld [vmem:[#allocation13 + $0xc0] sm:$0xff] }
 0xdf2   : > { %v13936_v25 = vpop.f32.mrf.mxu2  ;;  %v13938_v17 = vpop.f32.mrf.mxu3 }
 0xdf3   : > { %15353 = vst [vmem:[#allocation33_spill] sm:$0xff] %v13936_v25  ;;  %v9075_v25 = vld [vmem:[#allocation13 + $0x48] sm:$0xff] }
 0xdf4   : > { %15354 = vst [vmem:[#allocation61_spill] sm:$0xff] %v13938_v17  ;;  %v9067_v17 = vld [vmem:[#allocation13 + $0x8] sm:$0xff]  ;;  %7270 = vmatpush.bf16.msra.mxu2 %v9075_v25 }
 0xdf5   : > { %v13942_v27 = vpop.f32.mrf.mxu0  ;;  %7359 = vmatpush.bf16.msra.mxu3 %v9083_v62 }
 0xdf6   : > { %v13940_v38 = vpop.f32.mrf.mxu1  ;;  %15356 = vst [vmem:[#allocation59_spill] sm:$0xff] %v13942_v27  ;;  %v9091_v27 = vld [vmem:[#allocation13 + $0xc8] sm:$0xff] }
 0xdf7   : > { %15355 = vst [vmem:[#allocation50_spill] sm:$0xff] %v13940_v38 }
 0xdf9   : > { %7360 = vmatpush.bf16.msra.mxu3 %v9082_v51 }
 0xe04   : > { %v5669_v60 = vpop.xlane.xlu2 %5668 }
 0xe05   : > { %v5701_v18 = vmul.f32 %v5669_v60, %v12835_v63  ;;  %v6038_v60 = vsub.f32 1.5, %v6037_v15  ;;  %v9092_v63 = vld [vmem:[#allocation13 + $0xd0] sm:$0xff]  ;;  %v13947_v15 = vpop.f32.mrf.mxu2 }
 0xe06   : > { %7447 = vmatpush.bf16.msrb.mxu0 %v9092_v63  ;;  %v9066_v63 = vld [vmem:[#allocation13] sm:$0xff] }
 0xe07   : > { %v5733_v44 = vadd.f32 1e-05, %v5701_v18  ;;  %v9068_v18 = vld [vmem:[#allocation13 + $0x10] sm:$0xff]  ;;  %v6039_v16 = vmul.f32 %v13920_v9, %v6038_v60  ;;  %v13950_v60 = vpop.f32.mrf.mxu3 }
 0xe08   : > { %7180 = vmatpush.bf16.msra.mxu1 %v9068_v18  ;;  %v9074_v18 = vld [vmem:[#allocation13 + $0x40] sm:$0xff] }
 0xe09   : > { %9822 = vrsqrt.f32 %v5733_v44  ;;  %v6043_v7 = vsel %vm6042_vm14, %v13920_v9, %v6039_v16  ;;  %v13953_v16 = vpop.f32.mrf.mxu1  ;;  %vm6050_vm0 = vweird.f32 %v5733_v44  ;;  %7271 = vmatpush.bf16.msra.mxu2 %v9074_v18 }
 0xe0a   : > { %v6084_v12 = vmul.f32 %v6043_v7, %v13686_v47  ;;  %7448 = vmatpush.bf16.msrb.mxu0 %v9091_v27  ;;  %15357 = vst [vmem:[#allocation53_spill] sm:$0xff] %v13953_v16 }
 0xe0c   : > { %7181 = vmatpush.bf16.msra.mxu1 %v9067_v17  ;;  %v6117_v17 = vmul.f32 %v13040_v4, %v6084_v12 }
 0xe0d   : > { %v13960_v62 = vpop.f32.mrf.mxu2 }
 0xe0e   : > { %7449 = vmatpush.bf16.msrb.mxu0 %v9090_v34  ;;  %15359 = vst [vmem:[#allocation78_spill] sm:$0xff] %v13960_v62 }
 0xe0f   : > { %v9823_v11 = vpop.eup %9822  ;;  %v13962_v27 = vpop.f32.mrf.mxu3 }
 0xe10   : > { %v6045_v32 = vmul.f32 %v9823_v11, %v5733_v44  ;;  %vm6051_vm15 = vweird.f32 %v9823_v11  ;;  %7182 = vmatpush.bf16.msra.mxu1 %v9066_v63  ;;  %15360 = vst [vmem:[#allocation79_spill] sm:$0xff] %v13962_v27  ;;  %v13965_v44 = vadd.f32 %v13068_v43, %v6117_v17 }
 0xe11   : > { %vm6052_vm1 = vmor %vm6050_vm0, %vm6051_vm15 }
 0xe12   : > { %v6046_v57 = vmul.f32 %v9823_v11, %v6045_v32  ;;  %v13955_v32 = vpop.f32.mrf.mxu0  ;;  %15361 = vst [vmem:[#allocation80_spill] sm:$0xff] %v13965_v44 }
 0xe13   : > { %15358 = vst [vmem:[#allocation77_spill] sm:$0xff] %v13955_v32 }
 0xe14   : > { %v6047_v37 = vmul.f32 0.5, %v6046_v57 }
 0xe15   : > { %v13987_v12 = vpop.f32.mrf.mxu2 }
 0xe16   : > { %v6048_v38 = vsub.f32 1.5, %v6047_v37  ;;  %15364 = vst [vmem:[#allocation83_spill] sm:$0xff] %v13987_v12 }
 0xe18   : > { %v6049_v9 = vmul.f32 %v9823_v11, %v6048_v38 }
 0xe1a   : > { %v6053_v57 = vsel %vm6052_vm1, %v9823_v11, %v6049_v9  ;;  %v13974_v7 = vpop.f32.mrf.mxu0  ;;  %v13993_v9 = vpop.f32.mrf.mxu3 }
 0xe1b   : > { %v6085_v25 = vmul.f32 %v6053_v57, %v13733_v55  ;;  %v13972_v55 = vpop.f32.mrf.mxu1  ;;  %15363 = vst [vmem:[#allocation82_spill] sm:$0xff] %v13974_v7 }
 0xe1c   : > { %15365 = vst [vmem:[#allocation84_spill] sm:$0xff] %v13993_v9 }
 0xe1d   : > { %v6118_v47 = vmul.f32 %v13040_v4, %v6085_v25  ;;  %v6200_v4 = vld [vmem:[%s14913_s8] sm:$0xf] }
 0xe1e   : > { %v13979_v37 = vperm.slane %v6200_v4, 0  ;;  %v13981_v63 = vperm.slane %v6200_v4, 1  ;;  %v13985_v18 = vperm.slane %v6200_v4, 3 }
 0xe1f   : > { %v13968_v38 = vadd.f32 %v13068_v43, %v6118_v47  ;;  %v13983_v43 = vperm.slane %v6200_v4, 2 }
 0xe20   : > { %v6382_v51 = vadd.f32 %v13721_v21, %v13979_v37  ;;  %v6471_v34 = vadd.f32 %v13727_v36, %v13981_v63  ;;  %v6649_v25 = vadd.f32 %v13723_v19, %v13985_v18  ;;  %v6380_v17 = vadd.f32 %v13710_v6, %v13979_v37 }
 0xe21   : > { %15362 = vst [vmem:[#allocation81_spill] sm:$0xff] %v13968_v38  ;;  %v6167_v11 = vpack.c.bf16 %v13968_v38, %v13965_v44  ;;  %v6560_v57 = vadd.f32 %v13729_v52, %v13983_v43  ;;  %v6469_v47 = vadd.f32 %v13714_v10, %v13981_v63  ;;  %v6558_v21 = vadd.f32 %v13716_v26, %v13983_v43  ;;  %v14011_v26 = vpop.f32.mrf.mxu2 }
 0xe22   : > { %v6647_v36 = vadd.f32 %v13712_v41, %v13985_v18  ;;  %v6730_v4 = vmax.f32 %v6382_v51, 0.0  ;;  %v6731_v38 = vmax.f32 %v6471_v34, 0.0  ;;  %v14009_v52 = vpop.f32.mrf.mxu0  ;;  %v6733_v19 = vmax.f32 %v6649_v25, 0.0  ;;  %v14013_v16 = vpop.f32.mrf.mxu3 }
 0xe23   : > { %6453 = vmatmul.bf16.gmra.mxu1 %v6167_v11  ;;  %6542 = vmatmul.bf16.gmra.mxu2 %v6167_v11  ;;  %v6732_v44 = vmax.f32 %v6560_v57, 0.0  ;;  %v6726_v27 = vmax.f32 %v6380_v17, 0.0  ;;  %v6727_v62 = vmax.f32 %v6469_v47, 0.0  ;;  %v6728_v6 = vmax.f32 %v6558_v21, 0.0 }
 0xe24   : > { %6631 = vmatmul.bf16.gmra.mxu3 %v6167_v11  ;;  %6720 = vmatmul.bf16.gmra.mxu0 %v6167_v11  ;;  %v14007_v11 = vpop.f32.mrf.mxu1  ;;  %v6729_v32 = vmax.f32 %v6647_v36, 0.0  ;;  %v6387_v34 = vadd.f32 %v13767_v56, %v13979_v37  ;;  %v6652_v56 = vadd.f32 %v13744_v22, %v13985_v18 }
 0xe25   : > { %v6854_v9 = vpack.c.bf16 %v6730_v4, %v6726_v27  ;;  %v6855_v10 = vpack.c.bf16 %v6731_v38, %v6727_v62  ;;  %v6856_v7 = vpack.c.bf16 %v6732_v44, %v6728_v6  ;;  %v6476_v62 = vadd.f32 %v13776_v20, %v13981_v63 }
 0xe26   : > { %v6857_v12 = vpack.c.bf16 %v6733_v19, %v6729_v32  ;;  %v6565_v32 = vadd.f32 %v13779_v53, %v13983_v43  ;;  %v6654_v27 = vadd.f32 %v13771_v33, %v13985_v18  ;;  %v6385_v44 = vadd.f32 %v13742_v13, %v13979_v37 }
 0xe27   : > { %v6474_v38 = vadd.f32 %v13756_v46, %v13981_v63  ;;  %v6738_v20 = vmax.f32 %v6387_v34, 0.0  ;;  %v6737_v47 = vmax.f32 %v6652_v56, 0.0  ;;  %v6481_v34 = vadd.f32 %v13828_v49, %v13981_v63 }
 0xe28   : > { %v6740_v57 = vmax.f32 %v6565_v32, 0.0  ;;  %v6741_v33 = vmax.f32 %v6654_v27, 0.0  ;;  %v6734_v25 = vmax.f32 %v6385_v44, 0.0  ;;  %v6659_v32 = vadd.f32 %v13823_v54, %v13985_v18 }
 0xe29   : > { %v6735_v17 = vmax.f32 %v6474_v38, 0.0  ;;  %v6390_v44 = vadd.f32 %v13785_v35, %v13979_v37  ;;  %v6479_v38 = vadd.f32 %v13803_v5, %v13981_v63  ;;  %v6657_v49 = vadd.f32 %v13788_v61, %v13985_v18 }
 0xe2a   : > { %v14017_v51 = vpop.f32.mrf.mxu0  ;;  %v14037_v53 = vpop.f32.mrf.mxu3  ;;  %v6861_v22 = vpack.c.bf16 %v6741_v33, %v6737_v47  ;;  %v6747_v56 = vmax.f32 %v6481_v34, 0.0  ;;  %v6749_v54 = vmax.f32 %v6659_v32, 0.0  ;;  %v6664_v34 = vadd.f32 %v13857_v45, %v13985_v18 }
 0xe2b   : > { %v6395_v32 = vadd.f32 %v13833_v39, %v13979_v37 }
 0xe2c   : > { %v14015_v41 = vpop.f32.mrf.mxu1 }
 0xe32   : > { %v14041_v46 = vpop.f32.mrf.mxu0  ;;  %v14045_v6 = vpop.f32.mrf.mxu3 }
 0xe33   : > { %7183 = vmatmul.bf16.vlgmr.msra.gmra.mxu1 %v6854_v9  ;;  %7272 = vmatmul.bf16.vlgmr.msra.gmra.mxu2 %v6855_v10  ;;  %v6739_v9 = vmax.f32 %v6476_v62, 0.0  ;;  %v6392_v10 = vadd.f32 %v13820_v14, %v13979_v37  ;;  %v6570_v62 = vadd.f32 %v13830_v23, %v13983_v43  ;;  %v6568_v14 = vadd.f32 %v13807_v1, %v13983_v43 }
 0xe34   : > { %7361 = vmatmul.bf16.vlgmr.msra.gmra.mxu3 %v6856_v7  ;;  %7450 = vmatmul.bf16.vlgmr.msrb.gmra.mxu0 %v6857_v12  ;;  %v6563_v7 = vadd.f32 %v13760_v3, %v13983_v43  ;;  %v14035_v12 = vpop.f32.mrf.mxu2  ;;  %v14039_v21 = vpop.f32.mrf.mxu1  ;;  %v6858_v3 = vpack.c.bf16 %v6738_v20, %v6734_v25  ;;  %v6745_v25 = vmax.f32 %v6657_v49, 0.0 }
 0xe35   : > { %v6859_v36 = vpack.c.bf16 %v6739_v9, %v6735_v17  ;;  %v6746_v23 = vmax.f32 %v6392_v10, 0.0  ;;  %v6748_v20 = vmax.f32 %v6570_v62, 0.0  ;;  %v6742_v9 = vmax.f32 %v6390_v44, 0.0 }
 0xe36   : > { %v6736_v13 = vmax.f32 %v6563_v7, 0.0  ;;  %v6744_v33 = vmax.f32 %v6568_v14, 0.0  ;;  %v6575_v62 = vadd.f32 %v13864_v8, %v13983_v43  ;;  %v6484_v44 = vadd.f32 %v13848_v42, %v13981_v63 }
 0xe37   : > { %v6862_v5 = vpack.c.bf16 %v6746_v23, %v6742_v9  ;;  %v6757_v23 = vmax.f32 %v6664_v34, 0.0  ;;  %v6489_v34 = vadd.f32 %v13878_v0, %v13981_v63 }
 0xe38   : > { %v6860_v4 = vpack.c.bf16 %v6740_v57, %v6736_v13  ;;  %v6743_v57 = vmax.f32 %v6479_v38, 0.0  ;;  %v6864_v1 = vpack.c.bf16 %v6748_v20, %v6744_v33  ;;  %v6756_v8 = vmax.f32 %v6575_v62, 0.0 }
 0xe39   : > { %v6751_v20 = vmax.f32 %v6484_v44, 0.0  ;;  %v6667_v62 = vadd.f32 %v13874_v29, %v13985_v18 }
 0xe3a   : > { %v14061_v7 = vpop.f32.mrf.mxu0  ;;  %v14069_v17 = vpop.f32.mrf.mxu3  ;;  %v6863_v13 = vpack.c.bf16 %v6747_v56, %v6743_v57  ;;  %v6750_v56 = vmax.f32 %v6395_v32, 0.0 }
 0xe3c   : > { %v14043_v19 = vpop.f32.mrf.mxu2  ;;  %v14055_v27 = vpop.f32.mrf.mxu1 }
 0xe42   : > { %v14081_v10 = vpop.f32.mrf.mxu3 }
 0xe43   : > { %7188 = vmatmul.bf16.gmra.mxu1 %v6858_v3  ;;  %7277 = vmatmul.bf16.gmra.mxu2 %v6859_v36  ;;  %v6865_v3 = vpack.c.bf16 %v6749_v54, %v6745_v25  ;;  %v14073_v36 = vpop.f32.mrf.mxu0 }
 0xe44   : > { %7366 = vmatmul.bf16.gmra.mxu3 %v6860_v4  ;;  %7455 = vmatmul.bf16.gmra.mxu0 %v6861_v22  ;;  %v14067_v35 = vpop.f32.mrf.mxu2  ;;  %v14071_v47 = vpop.f32.mrf.mxu1  ;;  %v6397_v4 = vadd.f32 %v13855_v2, %v13979_v37  ;;  %v6486_v22 = vadd.f32 %v13862_v58, %v13981_v63  ;;  %v6662_v2 = vadd.f32 %v13835_v40, %v13985_v18 }
 0xe45   : > { %v6573_v58 = vadd.f32 %v13851_v48, %v13983_v43 }
 0xe46   : > { %v6754_v14 = vmax.f32 %v6397_v4, 0.0  ;;  %v6755_v49 = vmax.f32 %v6486_v22, 0.0  ;;  %v6753_v39 = vmax.f32 %v6662_v2, 0.0  ;;  %v6580_v4 = vadd.f32 %v13888_v24, %v13983_v43 }
 0xe47   : > { %v6752_v54 = vmax.f32 %v6573_v58, 0.0  ;;  %v6400_v22 = vadd.f32 %v13872_v50, %v13979_v37  ;;  %v6761_v50 = vmax.f32 %v6667_v62, 0.0  ;;  %v15373_v62 = vld [vmem:[#allocation71_spill] sm:$0xff] }
 0xe48   : > { %v6866_v9 = vpack.c.bf16 %v6754_v14, %v6750_v56  ;;  %v6867_v42 = vpack.c.bf16 %v6755_v49, %v6751_v20  ;;  %v6869_v33 = vpack.c.bf16 %v6757_v23, %v6753_v39  ;;  %v6764_v24 = vmax.f32 %v6580_v4, 0.0 }
 0xe49   : > { %v6868_v40 = vpack.c.bf16 %v6756_v8, %v6752_v54  ;;  %v6758_v58 = vmax.f32 %v6400_v22, 0.0  ;;  %v6759_v14 = vmax.f32 %v6489_v34, 0.0  ;;  %v15367_v54 = vld [vmem:[#allocation72_spill] sm:$0xff] }
 0xe4a   : > { %v14101_v25 = vpop.f32.mrf.mxu3  ;;  %v15372_v22 = vld [vmem:[#allocation60_spill] sm:$0xff] }
 0xe4b   : > { %v14097_v45 = vpop.f32.mrf.mxu0  ;;  %v6405_v34 = vadd.f32 %v15372_v22, %v13979_v37 }
 0xe4c   : > { %v14075_v61 = vpop.f32.mrf.mxu2  ;;  %v14095_v38 = vpop.f32.mrf.mxu1 }
 0xe53   : > { %7193 = vmatmul.bf16.gmra.mxu1 %v6862_v5  ;;  %7282 = vmatmul.bf16.gmra.mxu2 %v6863_v13  ;;  %v14105_v5 = vpop.f32.mrf.mxu0  ;;  %v6402_v13 = vadd.f32 %v13882_v59, %v13979_v37  ;;  %v6578_v59 = vadd.f32 %v13880_v28, %v13983_v43 }
 0xe54   : > { %7371 = vmatmul.bf16.gmra.mxu3 %v6864_v1  ;;  %7460 = vmatmul.bf16.gmra.mxu0 %v6865_v3  ;;  %v14099_v57 = vpop.f32.mrf.mxu2  ;;  %v14103_v48 = vpop.f32.mrf.mxu1  ;;  %v6491_v1 = vadd.f32 %v13886_v30, %v13981_v63  ;;  %v6669_v3 = vadd.f32 %v13884_v31, %v13985_v18 }
 0xe55   : > { %v6762_v30 = vmax.f32 %v6402_v13, 0.0  ;;  %v14125_v31 = vpop.f32.mrf.mxu3  ;;  %v6760_v49 = vmax.f32 %v6578_v59, 0.0  ;;  %v6494_v59 = vadd.f32 %v15373_v62, %v13981_v63 }
 0xe56   : > { %v6763_v44 = vmax.f32 %v6491_v1, 0.0  ;;  %15366 = vst [vmem:[#allocation85_spill] sm:$0xff] %v14125_v31  ;;  %v6765_v2 = vmax.f32 %v6669_v3, 0.0  ;;  %v15370_v1 = vld [vmem:[#allocation49_spill] sm:$0xff] }
 0xe57   : > { %v6870_v29 = vpack.c.bf16 %v6762_v30, %v6758_v58  ;;  %v6872_v56 = vpack.c.bf16 %v6764_v24, %v6760_v49  ;;  %v6585_v3 = vadd.f32 %v15370_v1, %v13983_v43  ;;  %v15376_v24 = vld [vmem:[#allocation57_spill] sm:$0xff] }
 0xe58   : > { %v6871_v8 = vpack.c.bf16 %v6763_v44, %v6759_v14  ;;  %v6873_v28 = vpack.c.bf16 %v6765_v2, %v6761_v50  ;;  %v15375_v44 = vld [vmem:[#allocation68_spill] sm:$0xff]  ;;  %v6583_v58 = vadd.f32 %v15376_v24, %v13983_v43 }
 0xe59   : > { %v6672_v2 = vadd.f32 %v15375_v44, %v13985_v18  ;;  %v15384_v24 = vld [vmem:[#allocation52_spill] sm:$0xff] }
 0xe5b   : > { %v14129_v0 = vpop.f32.mrf.mxu0 }
 0xe5c   : > { %v14123_v32 = vpop.f32.mrf.mxu2  ;;  %v14127_v23 = vpop.f32.mrf.mxu1 }
 0xe5d   : > { %v14133_v39 = vpop.f32.mrf.mxu3 }
 0xe63   : > { %7198 = vmatmul.bf16.gmra.mxu1 %v6866_v9  ;;  %7287 = vmatmul.bf16.gmra.mxu2 %v6867_v42  ;;  %v6407_v9 = vadd.f32 %v15367_v54, %v13979_v37  ;;  %v15368_v42 = vld [vmem:[#allocation73_spill] sm:$0xff]  ;;  %v14149_v30 = vpop.f32.mrf.mxu0  ;;  %v6768_v54 = vmax.f32 %v6583_v58, 0.0  ;;  %v6590_v58 = vadd.f32 %v15384_v24, %v13983_v43 }
 0xe64   : > { %7376 = vmatmul.bf16.gmra.mxu3 %v6868_v40  ;;  %7465 = vmatmul.bf16.gmra.mxu0 %v6869_v33  ;;  %v14131_v20 = vpop.f32.mrf.mxu2  ;;  %v6496_v40 = vadd.f32 %v15368_v42, %v13981_v63  ;;  %v15369_v33 = vld [vmem:[#allocation55_spill] sm:$0xff]  ;;  %v14143_v4 = vpop.f32.mrf.mxu1  ;;  %15374 = vst [vmem:[#allocation73_spill] sm:$0xff] %v14149_v30 }
 0xe65   : > { %v6674_v13 = vadd.f32 %v15369_v33, %v13985_v18  ;;  %15371 = vst [vmem:[#allocation72_spill] sm:$0xff] %v14143_v4  ;;  %v6770_v14 = vmax.f32 %v6407_v9, 0.0  ;;  %v14157_v33 = vpop.f32.mrf.mxu3 }
 0xe66   : > { %v6771_v50 = vmax.f32 %v6496_v40, 0.0  ;;  %15378 = vst [vmem:[#allocation49_spill] sm:$0xff] %v14157_v33  ;;  %v15381_v40 = vld [vmem:[#allocation75_spill] sm:$0xff] }
 0xe67   : > { %v6773_v49 = vmax.f32 %v6674_v13, 0.0  ;;  %v6412_v13 = vadd.f32 %v15381_v40, %v13979_v37 }
 0xe6b   : > { %v14161_v9 = vpop.f32.mrf.mxu0 }
 0xe6c   : > { %v14155_v42 = vpop.f32.mrf.mxu2  ;;  %v14159_v44 = vpop.f32.mrf.mxu1  ;;  %15380 = vst [vmem:[#allocation71_spill] sm:$0xff] %v14161_v9 }
 0xe6d   : > { %15377 = vst [vmem:[#allocation55_spill] sm:$0xff] %v14155_v42 }
 0xe6e   : > { %15379 = vst [vmem:[#allocation60_spill] sm:$0xff] %v14159_v44 }
 0xe73   : > { %7203 = vmatmul.bf16.gmra.mxu1 %v6870_v29  ;;  %7292 = vmatmul.bf16.gmra.mxu2 %v6871_v8  ;;  %v6772_v29 = vmax.f32 %v6585_v3, 0.0  ;;  %v6766_v8 = vmax.f32 %v6405_v34, 0.0  ;;  %v15382_v3 = vld [vmem:[#allocation63_spill] sm:$0xff] }
 0xe74   : > { %7381 = vmatmul.bf16.gmra.mxu3 %v6872_v56  ;;  %7470 = vmatmul.bf16.gmra.mxu0 %v6873_v28  ;;  %v6767_v56 = vmax.f32 %v6494_v59, 0.0  ;;  %v6769_v28 = vmax.f32 %v6672_v2, 0.0  ;;  %v6501_v34 = vadd.f32 %v15382_v3, %v13981_v63  ;;  %v15383_v59 = vld [vmem:[#allocation45_spill] sm:$0xff]  ;;  %v6780_v3 = vmax.f32 %v6590_v58, 0.0 }
 0xe75   : > { %v6874_v1 = vpack.c.bf16 %v6770_v14, %v6766_v8  ;;  %v6876_v62 = vpack.c.bf16 %v6772_v29, %v6768_v54  ;;  %v6679_v2 = vadd.f32 %v15383_v59, %v13985_v18  ;;  %v14171_v14 = vpop.f32.mrf.mxu2  ;;  %v14177_v8 = vpop.f32.mrf.mxu3  ;;  %v15390_v54 = vld [vmem:[#allocation47_spill] sm:$0xff] }
 0xe76   : > { %v6875_v22 = vpack.c.bf16 %v6771_v50, %v6767_v56  ;;  %v6877_v30 = vpack.c.bf16 %v6773_v49, %v6769_v28  ;;  %15385 = vst [vmem:[#allocation68_spill] sm:$0xff] %v14171_v14  ;;  %v15386_v50 = vld [vmem:[#allocation74_spill] sm:$0xff]  ;;  %v14183_v59 = vpop.f32.mrf.mxu1 }
 0xe77   : > { %v6410_v49 = vadd.f32 %v15386_v50, %v13979_v37  ;;  %15388 = vst [vmem:[#allocation57_spill] sm:$0xff] %v14177_v8  ;;  %v15389_v56 = vld [vmem:[#allocation46_spill] sm:$0xff]  ;;  %v6781_v40 = vmax.f32 %v6679_v2, 0.0  ;;  %v14185_v50 = vpop.f32.mrf.mxu0 }
 0xe78   : > { %v6677_v28 = vadd.f32 %v15389_v56, %v13985_v18  ;;  %15391 = vst [vmem:[#allocation75_spill] sm:$0xff] %v14183_v59  ;;  %v15396_v2 = vld [vmem:[#allocation50_spill] sm:$0xff] }
 0xe79   : > { %v6774_v24 = vmax.f32 %v6410_v49, 0.0  ;;  %15392 = vst [vmem:[#allocation63_spill] sm:$0xff] %v14185_v50  ;;  %v6417_v58 = vadd.f32 %v15396_v2, %v13979_v37  ;;  %v6506_v49 = vadd.f32 %v13947_v15, %v13981_v63 }
 0xe7a   : > { %v6777_v42 = vmax.f32 %v6677_v28, 0.0 }
 0xe7c   : > { %v6881_v14 = vpack.c.bf16 %v6781_v40, %v6777_v42  ;;  %v15398_v42 = vld [vmem:[#allocation59_spill] sm:$0xff]  ;;  %v6787_v40 = vmax.f32 %v6506_v49, 0.0 }
 0xe7d   : > { %v14187_v56 = vpop.f32.mrf.mxu2 }
 0xe7e   : > { %15393 = vst [vmem:[#allocation45_spill] sm:$0xff] %v14187_v56 }
 0xe83   : > { %7208 = vmatmul.bf16.gmra.mxu1 %v6874_v1  ;;  %7297 = vmatmul.bf16.gmra.mxu2 %v6875_v22  ;;  %v6588_v1 = vadd.f32 %v15390_v54, %v13983_v43  ;;  %v6778_v22 = vmax.f32 %v6412_v13, 0.0  ;;  %v14189_v13 = vpop.f32.mrf.mxu3  ;;  %v15401_v54 = vld [vmem:[#allocation43_spill] sm:$0xff] }
 0xe84   : > { %7386 = vmatmul.bf16.gmra.mxu3 %v6876_v62  ;;  %7475 = vmatmul.bf16.gmra.mxu0 %v6877_v30  ;;  %v15387_v30 = vld [vmem:[#allocation48_spill] sm:$0xff]  ;;  %v6779_v62 = vmax.f32 %v6501_v34, 0.0  ;;  %15394 = vst [vmem:[#allocation52_spill] sm:$0xff] %v14189_v13  ;;  %v14191_v34 = vpop.f32.mrf.mxu1 }
 0xe85   : > { %v6499_v29 = vadd.f32 %v15387_v30, %v13981_v63  ;;  %v6776_v30 = vmax.f32 %v6588_v1, 0.0  ;;  %v6878_v4 = vpack.c.bf16 %v6778_v22, %v6774_v24  ;;  %15395 = vst [vmem:[#allocation74_spill] sm:$0xff] %v14191_v34  ;;  %v6682_v1 = vadd.f32 %v15401_v54, %v13985_v18  ;;  %v15402_v22 = vld [vmem:[#allocation61_spill] sm:$0xff] }
 0xe86   : > { %v6593_v15 = vadd.f32 %v15402_v22, %v13983_v43 }
 0xe87   : > { %v6775_v33 = vmax.f32 %v6499_v29, 0.0  ;;  %v6880_v9 = vpack.c.bf16 %v6780_v3, %v6776_v30  ;;  %v14197_v29 = vpop.f32.mrf.mxu0  ;;  %v14211_v30 = vpop.f32.mrf.mxu2 }
 0xe88   : > { %15397 = vst [vmem:[#allocation48_spill] sm:$0xff] %v14197_v29  ;;  %v6784_v13 = vmax.f32 %v6593_v15, 0.0 }
 0xe89   : > { %v6879_v8 = vpack.c.bf16 %v6779_v62, %v6775_v33  ;;  %v6595_v33 = vadd.f32 %v13950_v60, %v13983_v43  ;;  %v6786_v62 = vmax.f32 %v6417_v58, 0.0  ;;  %15403 = vst [vmem:[#allocation46_spill] sm:$0xff] %v14211_v30 }
 0xe8b   : > { %v6788_v24 = vmax.f32 %v6595_v33, 0.0  ;;  %v6422_v33 = vadd.f32 %v13972_v55, %v13979_v37 }
 0xe8d   : > { %v6884_v54 = vpack.c.bf16 %v6788_v24, %v6784_v13  ;;  %v15406_v13 = vld [vmem:[#allocation83_spill] sm:$0xff] }
 0xe8e   : > { %v6511_v15 = vadd.f32 %v15406_v13, %v13981_v63 }
 0xe90   : > { %v6795_v30 = vmax.f32 %v6511_v15, 0.0 }
 0xe93   : > { %7213 = vmatmul.bf16.gmra.mxu1 %v6878_v4  ;;  %7302 = vmatmul.bf16.gmra.mxu2 %v6879_v8  ;;  %v6684_v4 = vadd.f32 %v15398_v42, %v13985_v18  ;;  %v15400_v8 = vld [vmem:[#allocation33_spill] sm:$0xff]  ;;  %v14213_v42 = vpop.f32.mrf.mxu3 }
 0xe94   : > { %7391 = vmatmul.bf16.gmra.mxu3 %v6880_v9  ;;  %7480 = vmatmul.bf16.gmra.mxu0 %v6881_v14  ;;  %v15399_v9 = vld [vmem:[#allocation76_spill] sm:$0xff]  ;;  %v6504_v28 = vadd.f32 %v15400_v8, %v13981_v63  ;;  %15404 = vst [vmem:[#allocation47_spill] sm:$0xff] %v14213_v42 }
 0xe95   : > { %v6415_v14 = vadd.f32 %v15399_v9, %v13979_v37  ;;  %v6789_v3 = vmax.f32 %v6684_v4, 0.0  ;;  %v6785_v9 = vmax.f32 %v6682_v1, 0.0  ;;  %v15405_v1 = vld [vmem:[#allocation53_spill] sm:$0xff] }
 0xe96   : > { %v6783_v60 = vmax.f32 %v6504_v28, 0.0  ;;  %v6420_v22 = vadd.f32 %v15405_v1, %v13979_v37  ;;  %v6794_v1 = vmax.f32 %v6422_v33, 0.0 }
 0xe97   : > { %v6782_v2 = vmax.f32 %v6415_v14, 0.0  ;;  %v6885_v29 = vpack.c.bf16 %v6789_v3, %v6785_v9  ;;  %v15409_v3 = vld [vmem:[#allocation77_spill] sm:$0xff] }
 0xe98   : > { %v6883_v59 = vpack.c.bf16 %v6787_v40, %v6783_v60  ;;  %v6687_v24 = vadd.f32 %v15409_v3, %v13985_v18 }
 0xe99   : > { %v6882_v56 = vpack.c.bf16 %v6786_v62, %v6782_v2  ;;  %v15410_v2 = vld [vmem:[#allocation78_spill] sm:$0xff] }
 0xe9a   : > { %v6509_v60 = vadd.f32 %v15410_v2, %v13981_v63  ;;  %v6793_v33 = vmax.f32 %v6687_v24, 0.0 }
 0xea0   : > { %v6454_v50 = vpop.f32.mrf.mxu1 }
 0xea1   : > { %v6721_v8 = vpop.f32.mrf.mxu0  ;;  %v6455_v49 = vadd.f32 %v6454_v50, %v13979_v37  ;;  %v15408_v50 = vld [vmem:[#allocation84_spill] sm:$0xff] }
 0xea2   : > { %v6722_v14 = vadd.f32 %v6721_v8, %v13985_v18  ;;  %v6600_v40 = vadd.f32 %v15408_v50, %v13983_v43 }
 0xea3   : > { %7218 = vmatmul.bf16.gmra.mxu1 %v6882_v56  ;;  %7307 = vmatmul.bf16.gmra.mxu2 %v6883_v59  ;;  %v6846_v9 = vmax.f32 %v6455_v49, 0.0  ;;  %v6791_v49 = vmax.f32 %v6509_v60, 0.0 }
 0xea4   : > { %7396 = vmatmul.bf16.gmra.mxu3 %v6884_v54  ;;  %7485 = vmatmul.bf16.gmra.mxu0 %v6885_v29  ;;  %v15407_v29 = vld [vmem:[#allocation82_spill] sm:$0xff]  ;;  %v15411_v54 = vld [vmem:[#allocation79_spill] sm:$0xff]  ;;  %v6849_v13 = vmax.f32 %v6722_v14, 0.0  ;;  %v6796_v44 = vmax.f32 %v6600_v40, 0.0 }
 0xea5   : > { %v6689_v62 = vadd.f32 %v15407_v29, %v13985_v18  ;;  %v6790_v29 = vmax.f32 %v6420_v22, 0.0 }
 0xea6   : > { %v6543_v58 = vpop.f32.mrf.mxu2 }
 0xea7   : > { %v6632_v4 = vpop.f32.mrf.mxu3  ;;  %v6544_v50 = vadd.f32 %v6543_v58, %v13981_v63 }
 0xea8   : > { %v6456_v28 = vpop.f32.mrf.mxu1  ;;  %v6633_v3 = vadd.f32 %v6632_v4, %v13983_v43  ;;  %v6887_v4 = vpack.c.bf16 %v6795_v30, %v6791_v49  ;;  %v6427_v30 = vadd.f32 %v14015_v41, %v13979_v37  ;;  %v6694_v49 = vadd.f32 %v14017_v51, %v13985_v18 }
 0xea9   : > { %v6457_v59 = vadd.f32 %v6456_v28, %v13979_v37  ;;  %v6723_v56 = vpop.f32.mrf.mxu0  ;;  %v6598_v28 = vadd.f32 %v15411_v54, %v13983_v43  ;;  %v6847_v58 = vmax.f32 %v6544_v50, 0.0  ;;  %v6692_v41 = vadd.f32 %v14009_v52, %v13985_v18 }
 0xeaa   : > { %v6724_v55 = vadd.f32 %v6723_v56, %v13985_v18  ;;  %v6797_v56 = vmax.f32 %v6689_v62, 0.0 }
 0xeab   : > { %v6850_v8 = vmax.f32 %v6457_v59, 0.0  ;;  %v6792_v14 = vmax.f32 %v6598_v28, 0.0  ;;  %v6801_v52 = vmax.f32 %v6692_v41, 0.0 }
 0xeac   : > { %v6853_v42 = vmax.f32 %v6724_v55, 0.0  ;;  %v6886_v55 = vpack.c.bf16 %v6794_v1, %v6790_v29  ;;  %v6889_v60 = vpack.c.bf16 %v6797_v56, %v6793_v33  ;;  %v6514_v33 = vadd.f32 %v14011_v26, %v13981_v63 }
 0xead   : > { %v14236_v34 = vpack.c.bf16 %v6850_v8, %v6846_v9  ;;  %v9921_v8 = vld [vmem:[#allocation14] sm:$0xff] }
 0xeae   : > { %v6545_v31 = vpop.f32.mrf.mxu2  ;;  %v14239_v2 = vpack.c.bf16 %v6853_v42, %v6849_v13  ;;  %v14243_v62 = vperm.slane %v9921_v8, 4  ;;  %v6888_v13 = vpack.c.bf16 %v6796_v44, %v6792_v14  ;;  %v6516_v44 = vadd.f32 %v14035_v12, %v13981_v63 }
 0xeaf   : > { %15412 = vst [vmem:[#allocation50_spill] sm:$0xff] %v14236_v34  ;;  %v6546_v59 = vadd.f32 %v6545_v31, %v13981_v63  ;;  %v6634_v54 = vpop.f32.mrf.mxu3  ;;  %v6848_v34 = vmax.f32 %v6633_v3, 0.0  ;;  %v6603_v12 = vadd.f32 %v14013_v16, %v13983_v43 }
 0xeb0   : > { %v6635_v22 = vadd.f32 %v6634_v54, %v13983_v43  ;;  %v7184_v15 = vpop.f32.mrf.mxu1  ;;  %v6425_v54 = vadd.f32 %v14007_v11, %v13979_v37 }
 0xeb1   : > { %v6851_v9 = vmax.f32 %v6546_v59, 0.0  ;;  %v7451_v40 = vpop.f32.mrf.mxu0  ;;  %v7185_v28 = vadd.f32 %v7184_v15, %v14243_v62  ;;  %v6803_v15 = vmax.f32 %v6516_v44, 0.0  ;;  %v15414_v44 = vld [vmem:[#allocation42_spill] sm:$0xff] }
 0xeb2   : > { %v6852_v42 = vmax.f32 %v6635_v22, 0.0  ;;  %v6802_v22 = vmax.f32 %v6427_v30, 0.0  ;;  %v6798_v8 = vmax.f32 %v6425_v54, 0.0 }
 0xeb3   : > { %7223 = vmatmul.bf16.gmra.mxu1 %v6886_v55  ;;  %7312 = vmatmul.bf16.gmra.mxu2 %v6887_v4  ;;  %v14245_v31 = vpack.c.bf16 %v6851_v9, %v6847_v58  ;;  %v15413_v55 = vld [vmem:[#allocation44_spill] sm:$0xff]  ;;  %v6799_v4 = vmax.f32 %v6514_v33, 0.0 }
 0xeb4   : > { %7401 = vmatmul.bf16.gmra.mxu3 %v6888_v13  ;;  %7490 = vmatmul.bf16.gmra.mxu0 %v6889_v60  ;;  %v14247_v24 = vpack.c.bf16 %v6852_v42, %v6848_v34  ;;  %v6605_v34 = vadd.f32 %v14037_v53, %v13983_v43  ;;  %v6805_v53 = vmax.f32 %v6694_v49, 0.0  ;;  %v6800_v42 = vmax.f32 %v6603_v12, 0.0 }
 0xeb6   : > { %v7273_v1 = vpop.f32.mrf.mxu2  ;;  %v6804_v9 = vmax.f32 %v6605_v34, 0.0 }
 0xeb7   : > { %v7274_v29 = vadd.f32 %v7273_v1, %v7185_v28  ;;  %v7362_v50 = vpop.f32.mrf.mxu3  ;;  %v6890_v28 = vpack.c.bf16 %v6802_v22, %v6798_v8  ;;  %v6891_v1 = vpack.c.bf16 %v6803_v15, %v6799_v4  ;;  %v6699_v22 = vadd.f32 %v14061_v7, %v13985_v18  ;;  %v15415_v8 = vld [vmem:[#allocation38_spill] sm:$0xff] }
 0xeb8   : > { %v7186_v59 = vpop.f32.mrf.mxu1  ;;  %v6610_v15 = vadd.f32 %v14069_v17, %v13983_v43 }
 0xeb9   : > { %v7363_v56 = vadd.f32 %v7362_v50, %v7274_v29  ;;  %v7453_v3 = vpop.f32.mrf.mxu0  ;;  %v7187_v51 = vadd.f32 %v7186_v59, %v14243_v62  ;;  %v6892_v29 = vpack.c.bf16 %v6804_v9, %v6800_v42  ;;  %v6893_v50 = vpack.c.bf16 %v6805_v53, %v6801_v52 }
 0xeba   : > { %v6813_v17 = vmax.f32 %v6699_v22, 0.0 }
 0xebb   : > { %v7452_v14 = vadd.f32 %v7451_v40, %v7363_v56 }
 0xebd   : > { %v14268_v58 = vadd.f32 %v7452_v14, %v15413_v55  ;;  %v6432_v14 = vadd.f32 %v14055_v27, %v13979_v37  ;;  %v6519_v55 = vadd.f32 %v14043_v19, %v13981_v63  ;;  %v6697_v27 = vadd.f32 %v14041_v46, %v13985_v18 }
 0xebe   : > { %v7275_v11 = vpop.f32.mrf.mxu2 }
 0xebf   : > { %v7276_v26 = vadd.f32 %v7275_v11, %v7187_v51  ;;  %v7364_v40 = vpop.f32.mrf.mxu3  ;;  %7563 = vadd.xlane.f32.xlu0 %v14268_v58  ;;  %v6430_v51 = vadd.f32 %v14039_v21, %v13979_v37  ;;  %v6810_v9 = vmax.f32 %v6432_v14, 0.0  ;;  %v6807_v52 = vmax.f32 %v6519_v55, 0.0 }
 0xec0   : > { %v7189_v13 = vpop.f32.mrf.mxu1  ;;  %v6809_v46 = vmax.f32 %v6697_v27, 0.0  ;;  %v6435_v55 = vadd.f32 %v14071_v47, %v13979_v37 }
 0xec1   : > { %v7365_v16 = vadd.f32 %v7364_v40, %v7276_v26  ;;  %v7456_v60 = vpop.f32.mrf.mxu0  ;;  %v7190_v30 = vadd.f32 %v7189_v13, %v14243_v62  ;;  %v6812_v26 = vmax.f32 %v6610_v15, 0.0  ;;  %v6806_v40 = vmax.f32 %v6430_v51, 0.0 }
 0xec2   : > { %v6704_v15 = vadd.f32 %v14097_v45, %v13985_v18  ;;  %v6615_v51 = vadd.f32 %v14101_v25, %v13983_v43 }
 0xec3   : > { %v7454_v59 = vadd.f32 %v7453_v3, %v7365_v16  ;;  %7228 = vmatmul.bf16.gmra.mxu1 %v6890_v28  ;;  %7317 = vmatmul.bf16.gmra.mxu2 %v6891_v1  ;;  %v6521_v3 = vadd.f32 %v14067_v35, %v13981_v63  ;;  %v6608_v35 = vadd.f32 %v14045_v6, %v13983_v43 }
 0xec4   : > { %7406 = vmatmul.bf16.gmra.mxu3 %v6892_v29  ;;  %7495 = vmatmul.bf16.gmra.mxu0 %v6893_v50  ;;  %v6894_v28 = vpack.c.bf16 %v6810_v9, %v6806_v40  ;;  %v6897_v50 = vpack.c.bf16 %v6813_v17, %v6809_v46  ;;  %v6821_v25 = vmax.f32 %v6704_v15, 0.0  ;;  %v6814_v17 = vmax.f32 %v6435_v55, 0.0 }
 0xec5   : > { %v14273_v56 = vadd.f32 %v7454_v59, %v15414_v44  ;;  %v6811_v11 = vmax.f32 %v6521_v3, 0.0  ;;  %v6808_v13 = vmax.f32 %v6608_v35, 0.0  ;;  %v15416_v44 = vld [vmem:[#allocation64_spill] sm:$0xff]  ;;  %v6437_v3 = vadd.f32 %v14095_v38, %v13979_v37 }
 0xec6   : > { %v7278_v49 = vpop.f32.mrf.mxu2  ;;  %v6702_v38 = vadd.f32 %v14073_v36, %v13985_v18 }
 0xec7   : > { %v7279_v34 = vadd.f32 %v7278_v49, %v7190_v30  ;;  %v7367_v54 = vpop.f32.mrf.mxu3  ;;  %7565 = vadd.xlane.f32.xlu1 %v14273_v56  ;;  %v6895_v1 = vpack.c.bf16 %v6811_v11, %v6807_v52  ;;  %v6896_v29 = vpack.c.bf16 %v6812_v26, %v6808_v13  ;;  %v6818_v35 = vmax.f32 %v6437_v3, 0.0  ;;  %v15417_v11 = vld [vmem:[#allocation32_spill] sm:$0xff] }
 0xec8   : > { %v7191_v33 = vpop.f32.mrf.mxu1  ;;  %v6817_v36 = vmax.f32 %v6702_v38, 0.0  ;;  %v6620_v3 = vadd.f32 %v14133_v39, %v13983_v43 }
 0xec9   : > { %v7368_v41 = vadd.f32 %v7367_v54, %v7279_v34  ;;  %v7458_v12 = vpop.f32.mrf.mxu0  ;;  %v7192_v7 = vadd.f32 %v7191_v33, %v14243_v62 }
 0xeca   : > { %v6828_v38 = vmax.f32 %v6620_v3, 0.0 }
 0xecb   : > { %v7457_v53 = vadd.f32 %v7456_v60, %v7368_v41  ;;  %v6526_v41 = vadd.f32 %v14099_v57, %v13981_v63  ;;  %v6613_v57 = vadd.f32 %v14081_v10, %v13983_v43 }
 0xecd   : > { %v14294_v4 = vadd.f32 %v7457_v53, %v15415_v8  ;;  %v6524_v53 = vadd.f32 %v14075_v61, %v13981_v63  ;;  %v6819_v9 = vmax.f32 %v6526_v41, 0.0  ;;  %v6820_v8 = vmax.f32 %v6615_v51, 0.0 }
 0xece   : > { %v7280_v21 = vpop.f32.mrf.mxu2  ;;  %v6816_v40 = vmax.f32 %v6613_v57, 0.0  ;;  %v6440_v41 = vadd.f32 %v14103_v48, %v13979_v37 }
 0xecf   : > { %v7281_v19 = vadd.f32 %v7280_v21, %v7192_v7  ;;  %v7369_v42 = vpop.f32.mrf.mxu3  ;;  %7567 = vadd.xlane.f32.xlu2 %v14294_v4  ;;  %v6815_v26 = vmax.f32 %v6524_v53, 0.0  ;;  %v15420_v53 = vld [vmem:[#allocation28_spill] sm:$0xff] }
 0xed0   : > { %v7194_v16 = vpop.f32.mrf.mxu1  ;;  %v6900_v13 = vpack.c.bf16 %v6820_v8, %v6816_v40  ;;  %v6822_v57 = vmax.f32 %v6440_v41, 0.0  ;;  %v15421_v40 = vld [vmem:[#allocation25_spill] sm:$0xff] }
 0xed1   : > { %v7370_v6 = vadd.f32 %v7369_v42, %v7281_v19  ;;  %v7461_v60 = vpop.f32.mrf.mxu0  ;;  %v7195_v30 = vadd.f32 %v7194_v16, %v14243_v62  ;;  %v6898_v42 = vpack.c.bf16 %v6818_v35, %v6814_v17  ;;  %v6899_v46 = vpack.c.bf16 %v6819_v9, %v6815_v26  ;;  %v15428_v41 = vld [vmem:[#allocation73_spill] sm:$0xff] }
 0xed2   : > { %v6901_v16 = vpack.c.bf16 %v6821_v25, %v6817_v36 }
 0xed3   : > { %v7459_v59 = vadd.f32 %v7458_v12, %v7370_v6  ;;  %7233 = vmatmul.bf16.gmra.mxu1 %v6894_v28  ;;  %7322 = vmatmul.bf16.gmra.mxu2 %v6895_v1  ;;  %v15418_v28 = vld [vmem:[#allocation41_spill] sm:$0xff] }
 0xed4   : > { %7411 = vmatmul.bf16.gmra.mxu3 %v6896_v29  ;;  %7500 = vmatmul.bf16.gmra.mxu0 %v6897_v50 }
 0xed5   : > { %v14299_v49 = vadd.f32 %v7459_v59, %v15416_v44  ;;  %v6442_v44 = vadd.f32 %v14127_v23, %v13979_v37  ;;  %v6707_v23 = vadd.f32 %v14105_v5, %v13985_v18 }
 0xed6   : > { %v7283_v34 = vpop.f32.mrf.mxu2 }
 0xed7   : > { %v7284_v54 = vadd.f32 %v7283_v34, %v7195_v30  ;;  %v7372_v33 = vpop.f32.mrf.mxu3  ;;  %7569 = vadd.xlane.f32.xlu0 %v14299_v49  ;;  %v6531_v34 = vadd.f32 %v14131_v20, %v13981_v63  ;;  %v15419_v20 = vld [vmem:[#allocation85_spill] sm:$0xff]  ;;  %v6826_v51 = vmax.f32 %v6442_v44, 0.0  ;;  %v6825_v5 = vmax.f32 %v6707_v23, 0.0 }
 0xed8   : > { %v7196_v14 = vpop.f32.mrf.mxu1  ;;  %v6618_v15 = vadd.f32 %v15419_v20, %v13983_v43 }
 0xed9   : > { %v7373_v12 = vadd.f32 %v7372_v33, %v7284_v54  ;;  %v7463_v22 = vpop.f32.mrf.mxu0  ;;  %v7197_v45 = vadd.f32 %v7196_v14, %v14243_v62  ;;  %v6709_v14 = vadd.f32 %v14129_v0, %v13985_v18  ;;  %v6827_v55 = vmax.f32 %v6531_v34, 0.0  ;;  %v15426_v34 = vld [vmem:[#allocation72_spill] sm:$0xff] }
 0xedb   : > { %v7462_v27 = vadd.f32 %v7461_v60, %v7373_v12  ;;  %v6529_v12 = vadd.f32 %v14123_v32, %v13981_v63  ;;  %v6829_v39 = vmax.f32 %v6709_v14, 0.0 }
 0xedd   : > { %v14320_v7 = vadd.f32 %v7462_v27, %v15417_v11  ;;  %v6823_v35 = vmax.f32 %v6529_v12, 0.0  ;;  %v6712_v12 = vadd.f32 %v15428_v41, %v13985_v18  ;;  %v15438_v41 = vld [vmem:[#allocation63_spill] sm:$0xff] }
 0xede   : > { %v7285_v47 = vpop.f32.mrf.mxu2 }
 0xedf   : > { %v7286_v61 = vadd.f32 %v7285_v47, %v7197_v45  ;;  %v7374_v21 = vpop.f32.mrf.mxu3  ;;  %7571 = vadd.xlane.f32.xlu1 %v14320_v7  ;;  %v6824_v45 = vmax.f32 %v6618_v15, 0.0  ;;  %v6902_v47 = vpack.c.bf16 %v6826_v51, %v6822_v57  ;;  %v6903_v17 = vpack.c.bf16 %v6827_v55, %v6823_v35  ;;  %v15430_v55 = vld [vmem:[#allocation51_spill] sm:$0xff] }
 0xee0   : > { %v7199_v52 = vpop.f32.mrf.mxu1 }
 0xee1   : > { %v7375_v10 = vadd.f32 %v7374_v21, %v7286_v61  ;;  %v7466_v19 = vpop.f32.mrf.mxu0  ;;  %v7200_v60 = vadd.f32 %v7199_v52, %v14243_v62  ;;  %v6904_v26 = vpack.c.bf16 %v6828_v38, %v6824_v45  ;;  %v6905_v61 = vpack.c.bf16 %v6829_v39, %v6825_v5 }
 0xee3   : > { %v7464_v6 = vadd.f32 %v7463_v22, %v7375_v10  ;;  %7238 = vmatmul.bf16.gmra.mxu1 %v6898_v42  ;;  %7327 = vmatmul.bf16.gmra.mxu2 %v6899_v46 }
 0xee4   : > { %7416 = vmatmul.bf16.gmra.mxu3 %v6900_v13  ;;  %7505 = vmatmul.bf16.gmra.mxu0 %v6901_v16  ;;  %v15422_v13 = vld [vmem:[#allocation60_spill] sm:$0xff] }
 0xee5   : > { %v14325_v1 = vadd.f32 %v7464_v6, %v15418_v28  ;;  %v6447_v16 = vadd.f32 %v15422_v13, %v13979_v37  ;;  %v15423_v6 = vld [vmem:[#allocation68_spill] sm:$0xff]  ;;  %v15432_v13 = vld [vmem:[#allocation74_spill] sm:$0xff] }
 0xee6   : > { %v7288_v29 = vpop.f32.mrf.mxu2 }
 0xee7   : > { %v7289_v50 = vadd.f32 %v7288_v29, %v7200_v60  ;;  %v7377_v59 = vpop.f32.mrf.mxu3  ;;  %7573 = vadd.xlane.f32.xlu2 %v14325_v1  ;;  %v6536_v60 = vadd.f32 %v15423_v6, %v13981_v63  ;;  %v6834_v20 = vmax.f32 %v6447_v16, 0.0  ;;  %v6452_v16 = vadd.f32 %v15432_v13, %v13979_v37  ;;  %v15433_v6 = vld [vmem:[#allocation46_spill] sm:$0xff] }
 0xee8   : > { %v7201_v30 = vpop.f32.mrf.mxu1 }
 0xee9   : > { %v7378_v54 = vadd.f32 %v7377_v59, %v7289_v50  ;;  %v7468_v33 = vpop.f32.mrf.mxu0  ;;  %v7202_v0 = vadd.f32 %v7201_v30, %v14243_v62  ;;  %v15424_v50 = vld [vmem:[#allocation71_spill] sm:$0xff]  ;;  %v15425_v30 = vld [vmem:[#allocation57_spill] sm:$0xff]  ;;  %v6835_v15 = vmax.f32 %v6536_v60, 0.0  ;;  %v6541_v60 = vadd.f32 %v15433_v6, %v13981_v63 }
 0xeea   : > { %v6714_v59 = vadd.f32 %v15424_v50, %v13985_v18  ;;  %v6625_v44 = vadd.f32 %v15425_v30, %v13983_v43  ;;  %v15434_v50 = vld [vmem:[#allocation48_spill] sm:$0xff]  ;;  %v15435_v30 = vld [vmem:[#allocation47_spill] sm:$0xff] }
 0xeeb   : > { %v7467_v22 = vadd.f32 %v7466_v19, %v7378_v54  ;;  %v6445_v54 = vadd.f32 %v15426_v34, %v13979_v37  ;;  %v15436_v34 = vld [vmem:[#allocation75_spill] sm:$0xff] }
 0xeec   : > { %v6836_v39 = vmax.f32 %v6625_v44, 0.0  ;;  %v6630_v44 = vadd.f32 %v15435_v30, %v13983_v43  ;;  %v15442_v6 = vld [vmem:[#allocation23_spill] sm:$0xff] }
 0xeed   : > { %v14346_v27 = vadd.f32 %v7467_v22, %v15420_v53  ;;  %v15429_v22 = vld [vmem:[#allocation49_spill] sm:$0xff]  ;;  %v6837_v53 = vmax.f32 %v6714_v59, 0.0  ;;  %v6719_v59 = vadd.f32 %v15434_v50, %v13985_v18 }
 0xeee   : > { %v7290_v48 = vpop.f32.mrf.mxu2  ;;  %v6623_v23 = vadd.f32 %v15429_v22, %v13983_v43  ;;  %v15439_v22 = vld [vmem:[#allocation52_spill] sm:$0xff] }
 0xeef   : > { %v7291_v32 = vadd.f32 %v7290_v48, %v7202_v0  ;;  %v7379_v9 = vpop.f32.mrf.mxu3  ;;  %7575 = vadd.xlane.f32.xlu0 %v14346_v27  ;;  %v6830_v48 = vmax.f32 %v6445_v54, 0.0  ;;  %v6450_v54 = vadd.f32 %v15436_v34, %v13979_v37 }
 0xef0   : > { %v7204_v11 = vpop.f32.mrf.mxu1  ;;  %v6832_v5 = vmax.f32 %v6623_v23, 0.0  ;;  %v6628_v23 = vadd.f32 %v15439_v22, %v13983_v43 }
 0xef1   : > { %v7380_v25 = vadd.f32 %v7379_v9, %v7291_v32  ;;  %v7471_v8 = vpop.f32.mrf.mxu0  ;;  %v7205_v36 = vadd.f32 %v7204_v11, %v14243_v62  ;;  %v6833_v9 = vmax.f32 %v6712_v12, 0.0  ;;  %v6717_v12 = vadd.f32 %v15438_v41, %v13985_v18 }
 0xef3   : > { %v7469_v21 = vadd.f32 %v7468_v33, %v7380_v25  ;;  %7243 = vmatmul.bf16.gmra.mxu1 %v6902_v47  ;;  %7332 = vmatmul.bf16.gmra.mxu2 %v6903_v17  ;;  %v15427_v33 = vld [vmem:[#allocation55_spill] sm:$0xff]  ;;  %v6908_v17 = vpack.c.bf16 %v6836_v39, %v6832_v5  ;;  %v6845_v39 = vmax.f32 %v6719_v59, 0.0  ;;  %v6841_v18 = vmax.f32 %v6717_v12, 0.0 }
 0xef4   : > { %7421 = vmatmul.bf16.gmra.mxu3 %v6904_v26  ;;  %7510 = vmatmul.bf16.gmra.mxu0 %v6905_v61  ;;  %v6534_v14 = vadd.f32 %v15427_v33, %v13981_v63  ;;  %v6909_v26 = vpack.c.bf16 %v6837_v53, %v6833_v9  ;;  %v15437_v33 = vld [vmem:[#allocation45_spill] sm:$0xff] }
 0xef5   : > { %v14351_v52 = vadd.f32 %v7469_v21, %v15421_v40 }
 0xef6   : > { %v7293_v10 = vpop.f32.mrf.mxu2  ;;  %v6831_v57 = vmax.f32 %v6534_v14, 0.0  ;;  %v6539_v14 = vadd.f32 %v15437_v33, %v13981_v63 }
 0xef7   : > { %v7294_v19 = vadd.f32 %v7293_v10, %v7205_v36  ;;  %v7382_v42 = vpop.f32.mrf.mxu3  ;;  %7577 = vadd.xlane.f32.xlu1 %v14351_v52  ;;  %v15431_v36 = vld [vmem:[#allocation24_spill] sm:$0xff] }
 0xef8   : > { %v7206_v46 = vpop.f32.mrf.mxu1  ;;  %v6907_v47 = vpack.c.bf16 %v6835_v15, %v6831_v57  ;;  %v6843_v15 = vmax.f32 %v6541_v60, 0.0  ;;  %v6839_v57 = vmax.f32 %v6539_v14, 0.0  ;;  %v15444_v14 = vld [vmem:[#allocation27_spill] sm:$0xff] }
 0xef9   : > { %v7383_v28 = vadd.f32 %v7382_v42, %v7294_v19  ;;  %v7473_v29 = vpop.f32.mrf.mxu0  ;;  %v7207_v51 = vadd.f32 %v7206_v46, %v14243_v62 }
 0xefb   : > { %v7472_v3 = vadd.f32 %v7471_v8, %v7383_v28  ;;  %v6906_v8 = vpack.c.bf16 %v6834_v20, %v6830_v48  ;;  %v6842_v20 = vmax.f32 %v6452_v16, 0.0  ;;  %v6838_v48 = vmax.f32 %v6450_v54, 0.0  ;;  %v15443_v54 = vld [vmem:[#allocation50_spill] sm:$0xff] }
 0xefd   : > { %v14372_v0 = vadd.f32 %v7472_v3, %v15430_v55  ;;  %v15440_v55 = vld [vmem:[#allocation54_spill] sm:$0xff] }
 0xefe   : > { %v7295_v38 = vpop.f32.mrf.mxu2 }
 0xeff   : > { %v7296_v35 = vadd.f32 %v7295_v38, %v7207_v51  ;;  %v7384_v32 = vpop.f32.mrf.mxu3  ;;  %7579 = vadd.xlane.f32.xlu2 %v14372_v0  ;;  %v6844_v38 = vmax.f32 %v6630_v44, 0.0 }
 0xf00   : > { %v7209_v45 = vpop.f32.mrf.mxu1 }
 0xf01   : > { %v7385_v11 = vadd.f32 %v7384_v32, %v7296_v35  ;;  %v7476_v25 = vpop.f32.mrf.mxu0  ;;  %v7210_v21 = vadd.f32 %v7209_v45, %v14243_v62  ;;  %v6840_v32 = vmax.f32 %v6628_v23, 0.0  ;;  %v6910_v45 = vpack.c.bf16 %v6842_v20, %v6838_v48 }
 0xf03   : > { %v7474_v61 = vadd.f32 %v7473_v29, %v7385_v11  ;;  %7248 = vmatmul.bf16.gmra.mxu1 %v6906_v8  ;;  %7337 = vmatmul.bf16.gmra.mxu2 %v6907_v47  ;;  %v6911_v11 = vpack.c.bf16 %v6843_v15, %v6839_v57  ;;  %v6913_v8 = vpack.c.bf16 %v6845_v39, %v6841_v18  ;;  %v15446_v18 = vld [vmem:[#allocation40_spill] sm:$0xff] }
 0xf04   : > { %7426 = vmatmul.bf16.gmra.mxu3 %v6908_v17  ;;  %7515 = vmatmul.bf16.gmra.mxu0 %v6909_v26  ;;  %v15441_v26 = vld [vmem:[#allocation29_spill] sm:$0xff] }
 0xf05   : > { %v14377_v40 = vadd.f32 %v7474_v61, %v15431_v36 }
 0xf06   : > { %v7298_v10 = vpop.f32.mrf.mxu2 }
 0xf07   : > { %v7299_v19 = vadd.f32 %v7298_v10, %v7210_v21  ;;  %v7387_v42 = vpop.f32.mrf.mxu3  ;;  %7581 = vadd.xlane.f32.xlu0 %v14377_v40 }
 0xf08   : > { %v7211_v46 = vpop.f32.mrf.mxu1 }
 0xf09   : > { %v7388_v28 = vadd.f32 %v7387_v42, %v7299_v19  ;;  %v7478_v29 = vpop.f32.mrf.mxu0  ;;  %v7212_v51 = vadd.f32 %v7211_v46, %v14243_v62 }
 0xf0b   : > { %v7477_v3 = vadd.f32 %v7476_v25, %v7388_v28  ;;  %v6912_v25 = vpack.c.bf16 %v6844_v38, %v6840_v32 }
 0xf0d   : > { %v14398_v53 = vadd.f32 %v7477_v3, %v15440_v55  ;;  %v15445_v55 = vld [vmem:[#allocation31_spill] sm:$0xff] }
 0xf0e   : > { %v7300_v37 = vpop.f32.mrf.mxu2 }
 0xf0f   : > { %v7301_v63 = vadd.f32 %v7300_v37, %v7212_v51  ;;  %v7389_v35 = vpop.f32.mrf.mxu3  ;;  %7583 = vadd.xlane.f32.xlu1 %v14398_v53 }
 0xf10   : > { %v7214_v9 = vpop.f32.mrf.mxu1 }
 0xf11   : > { %v7390_v43 = vadd.f32 %v7389_v35, %v7301_v63  ;;  %v7481_v5 = vpop.f32.mrf.mxu0  ;;  %v7215_v17 = vadd.f32 %v7214_v9, %v14243_v62 }
 0xf13   : > { %v7479_v47 = vadd.f32 %v7478_v29, %v7390_v43  ;;  %7253 = vmatmul.bf16.gmra.mxu1 %v6910_v45  ;;  %7342 = vmatmul.bf16.gmra.mxu2 %v6911_v11 }
 0xf14   : > { %7431 = vmatmul.bf16.gmra.mxu3 %v6912_v25  ;;  %7520 = vmatmul.bf16.gmra.mxu0 %v6913_v8 }
 0xf15   : > { %v14403_v61 = vadd.f32 %v7479_v47, %v15441_v26 }
 0xf16   : > { %v7303_v21 = vpop.f32.mrf.mxu2 }
 0xf17   : > { %v7304_v36 = vadd.f32 %v7303_v21, %v7215_v17  ;;  %v7392_v10 = vpop.f32.mrf.mxu3  ;;  %7585 = vadd.xlane.f32.xlu2 %v14403_v61 }
 0xf18   : > { %v7216_v19 = vpop.f32.mrf.mxu1 }
 0xf19   : > { %v7393_v42 = vadd.f32 %v7392_v10, %v7304_v36  ;;  %v7483_v46 = vpop.f32.mrf.mxu0  ;;  %v7217_v16 = vadd.f32 %v7216_v19, %v14243_v62 }
 0xf1b   : > { %v7482_v13 = vadd.f32 %v7481_v5, %v7393_v42  ;;  %v15447_v5 = vld [vmem:[#allocation39_spill] sm:$0xff] }
 0xf1d   : > { %v14408_v60 = vadd.f32 %v7482_v13, %v15442_v6 }
 0xf1e   : > { %v7305_v28 = vpop.f32.mrf.mxu2 }
 0xf1f   : > { %v7306_v29 = vadd.f32 %v7305_v28, %v7217_v16  ;;  %v7394_v50 = vpop.f32.mrf.mxu3  ;;  %7587 = vadd.xlane.f32.xlu0 %v14408_v60 }
 0xf20   : > { %v7219_v59 = vpop.f32.mrf.mxu1 }
 0xf21   : > { %v7395_v30 = vadd.f32 %v7394_v50, %v7306_v29  ;;  %v7486_v44 = vpop.f32.mrf.mxu0  ;;  %v7220_v33 = vadd.f32 %v7219_v59, %v14243_v62 }
 0xf23   : > { %v7484_v34 = vadd.f32 %v7483_v46, %v7395_v30  ;;  %7258 = vmatmul.bf16.gmra.mxu1 %v15443_v54  ;;  %7347 = vmatmul.bf16.gmra.mxu2 %v14245_v31  ;;  %v15448_v46 = vld [vmem:[#allocation37_spill] sm:$0xff] }
 0xf24   : > { %7436 = vmatmul.bf16.gmra.mxu3 %v14247_v24  ;;  %7525 = vmatmul.bf16.gmra.mxu0 %v14239_v2 }
 0xf25   : > { %v14417_v3 = vadd.f32 %v7484_v34, %v15444_v14  ;;  %v15449_v14 = vld [vmem:[#allocation35_spill] sm:$0xff] }
 0xf26   : > { %v7308_v41 = vpop.f32.mrf.mxu2 }
 0xf27   : > { %v7309_v12 = vadd.f32 %v7308_v41, %v7220_v33  ;;  %v7397_v22 = vpop.f32.mrf.mxu3  ;;  %7589 = vadd.xlane.f32.xlu1 %v14417_v3 }
 0xf28   : > { %v7221_v23 = vpop.f32.mrf.mxu1 }
 0xf29   : > { %v7398_v20 = vadd.f32 %v7397_v22, %v7309_v12  ;;  %v7488_v15 = vpop.f32.mrf.mxu0  ;;  %v7222_v31 = vadd.f32 %v7221_v23, %v14243_v62 }
 0xf2b   : > { %v7487_v51 = vadd.f32 %v7486_v44, %v7398_v20 }
 0xf2d   : > { %v14422_v24 = vadd.f32 %v7487_v51, %v15445_v55 }
 0xf2e   : > { %v7310_v2 = vpop.f32.mrf.mxu2 }
 0xf2f   : > { %v7311_v39 = vadd.f32 %v7310_v2, %v7222_v31  ;;  %v7399_v38 = vpop.f32.mrf.mxu3  ;;  %7591 = vadd.xlane.f32.xlu2 %v14422_v24 }
 0xf30   : > { %v7224_v37 = vpop.f32.mrf.mxu1 }
 0xf31   : > { %v7400_v48 = vadd.f32 %v7399_v38, %v7311_v39  ;;  %v7491_v57 = vpop.f32.mrf.mxu0  ;;  %v7225_v9 = vadd.f32 %v7224_v37, %v14243_v62  ;;  %v15450_v37 = vld [vmem:[#allocation34_spill] sm:$0xff] }
 0xf32   : > { %v7564_v63 = vpop.xlane.xlu0 %7563 }
 0xf33   : > { %v7489_v35 = vadd.f32 %v7488_v15, %v7400_v48  ;;  %v7627_v32 = vmul.f32 %v7564_v63, %v15446_v18 }
 0xf35   : > { %v14428_v43 = vsub.f32 %v14268_v58, %v7627_v32  ;;  %v14431_v45 = vadd.f32 %v7489_v35, %v15447_v5 }
 0xf36   : > { %v7313_v11 = vpop.f32.mrf.mxu2 }
 0xf37   : > { %v7314_v25 = vadd.f32 %v7313_v11, %v7225_v9  ;;  %v7402_v8 = vpop.f32.mrf.mxu3  ;;  %7593 = vadd.xlane.f32.xlu0 %v14431_v45  ;;  %v7691_v47 = vmul.f32 %v14428_v43, %v14428_v43 }
 0xf38   : > { %v7226_v17 = vpop.f32.mrf.mxu1 }
 0xf39   : > { %v7403_v26 = vadd.f32 %v7402_v8, %v7314_v25  ;;  %v7493_v21 = vpop.f32.mrf.mxu0  ;;  %7723 = vadd.xlane.f32.xlu2 %v7691_v47  ;;  %v7227_v19 = vadd.f32 %v7226_v17, %v14243_v62 }
 0xf3a   : > { %v7566_v36 = vpop.xlane.xlu1 %7565 }
 0xf3b   : > { %v7492_v10 = vadd.f32 %v7491_v57, %v7403_v26  ;;  %v7628_v58 = vmul.f32 %v7566_v36, %v15446_v18  ;;  %v15451_v26 = vld [vmem:[#allocation56_spill] sm:$0xff] }
 0xf3d   : > { %v14439_v42 = vsub.f32 %v14273_v56, %v7628_v58  ;;  %v14442_v13 = vadd.f32 %v7492_v10, %v15448_v46 }
 0xf3e   : > { %v7315_v16 = vpop.f32.mrf.mxu2 }
 0xf3f   : > { %v7316_v6 = vadd.f32 %v7315_v16, %v7227_v19  ;;  %v7404_v28 = vpop.f32.mrf.mxu3  ;;  %7595 = vadd.xlane.f32.xlu1 %v14442_v13  ;;  %v7692_v29 = vmul.f32 %v14439_v42, %v14439_v42 }
 0xf40   : > { %v7229_v50 = vpop.f32.mrf.mxu1 }
 0xf41   : > { %v7405_v59 = vadd.f32 %v7404_v28, %v7316_v6  ;;  %v7496_v30 = vpop.f32.mrf.mxu0  ;;  %7725 = vadd.xlane.f32.xlu0 %v7692_v29  ;;  %v7230_v54 = vadd.f32 %v7229_v50, %v14243_v62 }
 0xf42   : > { %v7568_v44 = vpop.xlane.xlu2 %7567 }
 0xf43   : > { %v7494_v34 = vadd.f32 %v7493_v21, %v7405_v59  ;;  %v7629_v56 = vmul.f32 %v7568_v44, %v15446_v18 }
 0xf45   : > { %v14450_v33 = vsub.f32 %v14294_v4, %v7629_v56  ;;  %v14453_v41 = vadd.f32 %v7494_v34, %v15449_v14 }
 0xf46   : > { %v7318_v12 = vpop.f32.mrf.mxu2 }
 0xf47   : > { %v7319_v22 = vadd.f32 %v7318_v12, %v7230_v54  ;;  %v7407_v23 = vpop.f32.mrf.mxu3  ;;  %7597 = vadd.xlane.f32.xlu2 %v14453_v41  ;;  %v7693_v20 = vmul.f32 %v14450_v33, %v14450_v33 }
 0xf48   : > { %v7231_v15 = vpop.f32.mrf.mxu1 }
 0xf49   : > { %v7408_v51 = vadd.f32 %v7407_v23, %v7319_v22  ;;  %v7498_v31 = vpop.f32.mrf.mxu0  ;;  %7727 = vadd.xlane.f32.xlu1 %v7693_v20  ;;  %v7232_v39 = vadd.f32 %v7231_v15, %v14243_v62 }
 0xf4a   : > { %v7570_v55 = vpop.xlane.xlu0 %7569 }
 0xf4b   : > { %v7497_v2 = vadd.f32 %v7496_v30, %v7408_v51  ;;  %v7630_v4 = vmul.f32 %v7570_v55, %v15446_v18  ;;  %v15452_v30 = vld [vmem:[#allocation36_spill] sm:$0xff]  ;;  %v15453_v55 = vld [vmem:[#allocation69_spill] sm:$0xff] }
 0xf4d   : > { %v14461_v38 = vsub.f32 %v14299_v49, %v7630_v4  ;;  %v14464_v48 = vadd.f32 %v7497_v2, %v15450_v37 }
 0xf4e   : > { %v7320_v57 = vpop.f32.mrf.mxu2 }
 0xf4f   : > { %v7321_v63 = vadd.f32 %v7320_v57, %v7232_v39  ;;  %v7409_v35 = vpop.f32.mrf.mxu3  ;;  %7599 = vadd.xlane.f32.xlu0 %v14464_v48  ;;  %v7694_v32 = vmul.f32 %v14461_v38, %v14461_v38 }
 0xf50   : > { %v7234_v9 = vpop.f32.mrf.mxu1 }
 0xf51   : > { %v7410_v5 = vadd.f32 %v7409_v35, %v7321_v63  ;;  %v7501_v11 = vpop.f32.mrf.mxu0  ;;  %7729 = vadd.xlane.f32.xlu2 %v7694_v32  ;;  %v7235_v47 = vadd.f32 %v7234_v9, %v14243_v62 }
 0xf52   : > { %v7572_v25 = vpop.xlane.xlu1 %7571 }
 0xf53   : > { %v7499_v8 = vadd.f32 %v7498_v31, %v7410_v5  ;;  %v7631_v49 = vmul.f32 %v7572_v25, %v15446_v18 }
 0xf55   : > { %v14472_v17 = vsub.f32 %v14320_v7, %v7631_v49  ;;  %v14475_v21 = vadd.f32 %v7499_v8, %v15451_v26  ;;  %v15454_v8 = vld [vmem:[#allocation65_spill] sm:$0xff] }
 0xf56   : > { %v7323_v36 = vpop.f32.mrf.mxu2 }
 0xf57   : > { %v7324_v10 = vadd.f32 %v7323_v36, %v7235_v47  ;;  %v7412_v58 = vpop.f32.mrf.mxu3  ;;  %7601 = vadd.xlane.f32.xlu1 %v14475_v21  ;;  %v7695_v19 = vmul.f32 %v14472_v17, %v14472_v17 }
 0xf58   : > { %v7236_v46 = vpop.f32.mrf.mxu1 }
 0xf59   : > { %v7413_v16 = vadd.f32 %v7412_v58, %v7324_v10  ;;  %v7503_v6 = vpop.f32.mrf.mxu0  ;;  %7731 = vadd.xlane.f32.xlu0 %v7695_v19  ;;  %v7237_v50 = vadd.f32 %v7236_v46, %v14243_v62 }
 0xf5a   : > { %v7574_v28 = vpop.xlane.xlu2 %7573 }
 0xf5b   : > { %v7502_v29 = vadd.f32 %v7501_v11, %v7413_v16  ;;  %v7632_v7 = vmul.f32 %v7574_v28, %v15446_v18 }
 0xf5d   : > { %v14483_v59 = vsub.f32 %v14325_v1, %v7632_v7  ;;  %v14486_v44 = vadd.f32 %v7502_v29, %v15452_v30  ;;  %v15455_v7 = vld [vmem:[#allocation66_spill] sm:$0xff] }
 0xf5e   : > { %v7325_v34 = vpop.f32.mrf.mxu2 }
 0xf5f   : > { %v7326_v56 = vadd.f32 %v7325_v34, %v7237_v50  ;;  %v7414_v54 = vpop.f32.mrf.mxu3  ;;  %7603 = vadd.xlane.f32.xlu2 %v14486_v44  ;;  %v7696_v14 = vmul.f32 %v14483_v59, %v14483_v59 }
 0xf60   : > { %v7239_v12 = vpop.f32.mrf.mxu1 }
 0xf61   : > { %v7415_v22 = vadd.f32 %v7414_v54, %v7326_v56  ;;  %v7506_v23 = vpop.f32.mrf.mxu0  ;;  %7733 = vadd.xlane.f32.xlu1 %v7696_v14  ;;  %v7240_v51 = vadd.f32 %v7239_v12, %v14243_v62 }
 0xf62   : > { %v7576_v20 = vpop.xlane.xlu0 %7575 }
 0xf63   : > { %v7504_v15 = vadd.f32 %v7503_v6, %v7415_v22  ;;  %v7633_v1 = vmul.f32 %v7576_v20, %v15446_v18 }
 0xf65   : > { %v14494_v31 = vsub.f32 %v14346_v27, %v7633_v1  ;;  %v14497_v2 = vadd.f32 %v7504_v15, %v15453_v55 }
 0xf66   : > { %v7328_v4 = vpop.f32.mrf.mxu2 }
 0xf67   : > { %v7329_v39 = vadd.f32 %v7328_v4, %v7240_v51  ;;  %v7417_v37 = vpop.f32.mrf.mxu3  ;;  %7605 = vadd.xlane.f32.xlu0 %v14497_v2  ;;  %v7697_v57 = vmul.f32 %v14494_v31, %v14494_v31  ;;  %v15456_v51 = vld [vmem:[#allocation62_spill] sm:$0xff] }
 0xf68   : > { %v7241_v63 = vpop.f32.mrf.mxu1 }
 0xf69   : > { %v7418_v35 = vadd.f32 %v7417_v37, %v7329_v39  ;;  %v7508_v32 = vpop.f32.mrf.mxu0  ;;  %7735 = vadd.xlane.f32.xlu2 %v7697_v57  ;;  %v7242_v11 = vadd.f32 %v7241_v63, %v14243_v62 }
 0xf6a   : > { %v7578_v9 = vpop.xlane.xlu1 %7577 }
 0xf6b   : > { %v7507_v5 = vadd.f32 %v7506_v23, %v7418_v35  ;;  %v7634_v27 = vmul.f32 %v7578_v9, %v15446_v18 }
 0xf6d   : > { %v14505_v25 = vsub.f32 %v14351_v52, %v7634_v27  ;;  %v14508_v49 = vadd.f32 %v7507_v5, %v15454_v8  ;;  %v15457_v8 = vld [vmem:[#allocation30_spill] sm:$0xff] }
 0xf6e   : > { %v7330_v47 = vpop.f32.mrf.mxu2 }
 0xf6f   : > { %v7331_v26 = vadd.f32 %v7330_v47, %v7242_v11  ;;  %v7419_v36 = vpop.f32.mrf.mxu3  ;;  %7607 = vadd.xlane.f32.xlu1 %v14508_v49  ;;  %v7698_v10 = vmul.f32 %v14505_v25, %v14505_v25 }
 0xf70   : > { %v7244_v58 = vpop.f32.mrf.mxu1 }
 0xf71   : > { %v7420_v19 = vadd.f32 %v7419_v36, %v7331_v26  ;;  %v7511_v46 = vpop.f32.mrf.mxu0  ;;  %7737 = vadd.xlane.f32.xlu0 %v7698_v10  ;;  %v7245_v28 = vadd.f32 %v7244_v58, %v14243_v62 }
 0xf72   : > { %v7580_v16 = vpop.xlane.xlu2 %7579 }
 0xf73   : > { %v7509_v6 = vadd.f32 %v7508_v32, %v7420_v19  ;;  %v7635_v52 = vmul.f32 %v7580_v16, %v15446_v18 }
 0xf75   : > { %v14516_v29 = vsub.f32 %v14372_v0, %v7635_v52  ;;  %v14519_v50 = vadd.f32 %v7509_v6, %v15455_v7 }
 0xf76   : > { %v7333_v30 = vpop.f32.mrf.mxu2 }
 0xf77   : > { %v7334_v34 = vadd.f32 %v7333_v30, %v7245_v28  ;;  %v7422_v56 = vpop.f32.mrf.mxu3  ;;  %7609 = vadd.xlane.f32.xlu2 %v14519_v50  ;;  %v7699_v54 = vmul.f32 %v14516_v29, %v14516_v29  ;;  %v15458_v30 = vld [vmem:[#allocation58_spill] sm:$0xff] }
 0xf78   : > { %v7246_v14 = vpop.f32.mrf.mxu1 }
 0xf79   : > { %v7423_v12 = vadd.f32 %v7422_v56, %v7334_v34  ;;  %v7513_v22 = vpop.f32.mrf.mxu0  ;;  %7739 = vadd.xlane.f32.xlu1 %v7699_v54  ;;  %v7247_v15 = vadd.f32 %v7246_v14, %v14243_v62 }
 0xf7a   : > { %v7582_v23 = vpop.xlane.xlu0 %7581 }
 0xf7b   : > { %v7512_v20 = vadd.f32 %v7511_v46, %v7423_v12  ;;  %v7636_v0 = vmul.f32 %v7582_v23, %v15446_v18 }
 0xf7d   : > { %v14527_v1 = vsub.f32 %v14377_v40, %v7636_v0  ;;  %v14530_v55 = vadd.f32 %v7512_v20, %v15456_v51 }
 0xf7e   : > { %v7335_v4 = vpop.f32.mrf.mxu2 }
 0xf7f   : > { %v7336_v39 = vadd.f32 %v7335_v4, %v7247_v15  ;;  %v7424_v37 = vpop.f32.mrf.mxu3  ;;  %7611 = vadd.xlane.f32.xlu0 %v14530_v55  ;;  %v7700_v57 = vmul.f32 %v14527_v1, %v14527_v1 }
 0xf80   : > { %v7249_v63 = vpop.f32.mrf.mxu1 }
 0xf81   : > { %v7425_v35 = vadd.f32 %v7424_v37, %v7336_v39  ;;  %v7516_v32 = vpop.f32.mrf.mxu0  ;;  %7741 = vadd.xlane.f32.xlu2 %v7700_v57  ;;  %v7250_v27 = vadd.f32 %v7249_v63, %v14243_v62  ;;  %v15459_v39 = vld [vmem:[#allocation26_spill] sm:$0xff] }
 0xf82   : > { %v7584_v9 = vpop.xlane.xlu1 %7583 }
 0xf83   : > { %v7514_v5 = vadd.f32 %v7513_v22, %v7425_v35  ;;  %v7637_v40 = vmul.f32 %v7584_v9, %v15446_v18 }
 0xf85   : > { %v14538_v11 = vsub.f32 %v14398_v53, %v7637_v40  ;;  %v14541_v47 = vadd.f32 %v7514_v5, %v15457_v8 }
 0xf86   : > { %v7338_v26 = vpop.f32.mrf.mxu2 }
 0xf87   : > { %v7339_v36 = vadd.f32 %v7338_v26, %v7250_v27  ;;  %v7427_v10 = vpop.f32.mrf.mxu3  ;;  %7613 = vadd.xlane.f32.xlu1 %v14541_v47  ;;  %v7701_v58 = vmul.f32 %v14538_v11, %v14538_v11 }
 0xf88   : > { %v7251_v19 = vpop.f32.mrf.mxu1 }
 0xf89   : > { %v7428_v46 = vadd.f32 %v7427_v10, %v7339_v36  ;;  %7743 = vadd.xlane.f32.xlu0 %v7701_v58  ;;  %v7518_v16 = vpop.f32.mrf.mxu0  ;;  %v7252_v28 = vadd.f32 %v7251_v19, %v14243_v62  ;;  %v15460_v36 = vld [vmem:[#allocation67_spill] sm:$0xff] }
 0xf8a   : > { %v7586_v6 = vpop.xlane.xlu2 %7585 }
 0xf8b   : > { %v7517_v52 = vadd.f32 %v7516_v32, %v7428_v46  ;;  %v7638_v53 = vmul.f32 %v7586_v6, %v15446_v18 }
 0xf8d   : > { %v14549_v7 = vsub.f32 %v14403_v61, %v7638_v53  ;;  %v14552_v34 = vadd.f32 %v7517_v52, %v15458_v30 }
 0xf8e   : > { %v7340_v56 = vpop.f32.mrf.mxu2 }
 0xf8f   : > { %v7341_v54 = vadd.f32 %v7340_v56, %v7252_v28  ;;  %v7429_v14 = vpop.f32.mrf.mxu3  ;;  %7615 = vadd.xlane.f32.xlu2 %v14552_v34  ;;  %v7702_v12 = vmul.f32 %v14549_v7, %v14549_v7  ;;  %v15461_v56 = vld [vmem:[#allocation70_spill] sm:$0xff] }
 0xf90   : > { %v7254_v22 = vpop.f32.mrf.mxu1 }
 0xf91   : > { %v7430_v23 = vadd.f32 %v7429_v14, %v7341_v54  ;;  %7745 = vadd.xlane.f32.xlu1 %v7702_v12  ;;  %v7521_v61 = vpop.f32.mrf.mxu0  ;;  %v7255_v51 = vadd.f32 %v7254_v22, %v14243_v62 }
 0xf92   : > { %v7588_v20 = vpop.xlane.xlu0 %7587 }
 0xf93   : > { %v7519_v0 = vadd.f32 %v7518_v16, %v7430_v23  ;;  %v7639_v15 = vmul.f32 %v7588_v20, %v15446_v18 }
 0xf95   : > { %v14560_v4 = vsub.f32 %v14408_v60, %v7639_v15  ;;  %v14563_v37 = vadd.f32 %v7519_v0, %v15459_v39 }
 0xf96   : > { %v7343_v57 = vpop.f32.mrf.mxu2 }
 0xf97   : > { %v7344_v63 = vadd.f32 %v7343_v57, %v7255_v51  ;;  %v7432_v35 = vpop.f32.mrf.mxu3  ;;  %7617 = vadd.xlane.f32.xlu0 %v14563_v37  ;;  %v7703_v32 = vmul.f32 %v14560_v4, %v14560_v4 }
 0xf98   : > { %v7256_v9 = vpop.f32.mrf.mxu1 }
 0xf99   : > { %v7433_v5 = vadd.f32 %v7432_v35, %v7344_v63  ;;  %7747 = vadd.xlane.f32.xlu2 %v7703_v32  ;;  %v7257_v60 = vadd.f32 %v7256_v9, %v14243_v62  ;;  %v7523_v58 = vpop.f32.mrf.mxu0  ;;  %v15462_v32 = vld [vmem:[#allocation80_spill] sm:$0xff] }
 0xf9a   : > { %v7590_v40 = vpop.xlane.xlu1 %7589 }
 0xf9b   : > { %v7522_v27 = vadd.f32 %v7521_v61, %v7433_v5  ;;  %v7640_v8 = vmul.f32 %v7590_v40, %v15446_v18 }
 0xf9d   : > { %v14571_v26 = vsub.f32 %v14417_v3, %v7640_v8  ;;  %v14574_v10 = vadd.f32 %v7522_v27, %v15460_v36 }
 0xf9e   : > { %v7345_v19 = vpop.f32.mrf.mxu2 }
 0xf9f   : > { %v7346_v46 = vadd.f32 %v7345_v19, %v7257_v60  ;;  %v7434_v16 = vpop.f32.mrf.mxu3  ;;  %7619 = vadd.xlane.f32.xlu1 %v14574_v10  ;;  %v7704_v6 = vmul.f32 %v14571_v26, %v14571_v26 }
 0xfa0   : > { %v7259_v52 = vpop.f32.mrf.mxu1 }
 0xfa1   : > { %v7435_v53 = vadd.f32 %v7434_v16, %v7346_v46  ;;  %7749 = vadd.xlane.f32.xlu0 %v7704_v6  ;;  %v7260_v3 = vadd.f32 %v7259_v52, %v14243_v62  ;;  %v7526_v23 = vpop.f32.mrf.mxu0 }
 0xfa2   : > { %v7592_v30 = vpop.xlane.xlu2 %7591 }
 0xfa3   : > { %v7524_v28 = vadd.f32 %v7523_v58, %v7435_v53  ;;  %v7641_v16 = vmul.f32 %v7592_v30, %v15446_v18  ;;  %v15463_v53 = vld [vmem:[#allocation81_spill] sm:$0xff] }
 0xfa5   : > { %v14581_v54 = vadd.f32 %v7524_v28, %v15461_v56 }
 0xfa6   : > { %v7348_v14 = vpop.f32.mrf.mxu2 }
 0xfa7   : > { %v7349_v12 = vadd.f32 %v7348_v14, %v7260_v3  ;;  %v7437_v22 = vpop.f32.mrf.mxu3  ;;  %7621 = vadd.xlane.f32.xlu2 %v14581_v54 }
 0xfa8   : > { %v7261_v0 = vpop.f32.mrf.mxu1 }
 0xfa9   : > { %v7438_v20 = vadd.f32 %v7437_v22, %v7349_v12  ;;  %v7262_v57 = vadd.f32 %v7261_v0, %v14243_v62  ;;  %v7528_v62 = vpop.f32.mrf.mxu0  ;;  %v14609_v22 = vsub.f32 %v14422_v24, %v7641_v16 }
 0xfaa   : > { %v7594_v15 = vpop.xlane.xlu0 %7593 }
 0xfab   : > { %v7527_v61 = vadd.f32 %v7526_v23, %v7438_v20  ;;  %v7642_v51 = vmul.f32 %v7594_v15, %v15446_v18 }
 0xfac   : > { %v7724_v39 = vpop.xlane.xlu2 %7723 }
 0xfad   : > { %v14587_v63 = vsub.f32 %v14431_v45, %v7642_v51  ;;  %v7787_v35 = vmul.f32 %v7724_v39, %v15446_v18  ;;  %v14591_v9 = vadd.f32 %v7527_v61, %v15462_v32  ;;  %v7705_v61 = vmul.f32 %v14609_v22, %v14609_v22  ;;  %v9922_v32 = vld [vmem:[#allocation14] sm:$0xff] }
 0xfae   : > { %v7350_v5 = vpop.f32.mrf.mxu2 }
 0xfaf   : > { %v7819_v40 = vadd.f32 1e-05, %v7787_v35  ;;  %v7351_v27 = vadd.f32 %v7350_v5, %v7262_v57  ;;  %7623 = vadd.xlane.f32.xlu0 %v14591_v9  ;;  %v7706_v8 = vmul.f32 %v14587_v63, %v14587_v63  ;;  %v7439_v60 = vpop.f32.mrf.mxu3  ;;  %v14615_v5 = vperm.slane %v9922_v32, 7 }
 0xfb1   : > { %9824 = vrsqrt.f32 %v7819_v40  ;;  %v7440_v36 = vadd.f32 %v7439_v60, %v7351_v27  ;;  %7753 = vadd.xlane.f32.xlu2 %v7706_v8  ;;  %vm7857_vm3 = vweird.f32 %v7819_v40 }
 0xfb2   : > { %v7596_v45 = vpop.xlane.xlu1 %7595 }
 0xfb3   : > { %v7529_v58 = vadd.f32 %v7528_v62, %v7440_v36  ;;  %v7643_v19 = vmul.f32 %v7596_v45, %v15446_v18  ;;  %v14620_v62 = vld [vmem:[#allocation14 + $0x8] ss:$0 sm:$0xff] }
 0xfb4   : > { %v7726_v46 = vpop.xlane.xlu0 %7725 }
 0xfb5   : > { %v14599_v6 = vsub.f32 %v14442_v13, %v7643_v19  ;;  %v7788_v52 = vmul.f32 %v7726_v46, %v15446_v18  ;;  %v14603_v28 = vadd.f32 %v7529_v58, %v15463_v53 }
 0xfb7   : > { %v9825_v3 = vpop.eup %9824  ;;  %v7820_v56 = vadd.f32 1e-05, %v7788_v52  ;;  %7625 = vadd.xlane.f32.xlu1 %v14603_v28  ;;  %v7707_v14 = vmul.f32 %v14599_v6, %v14599_v6 }
 0xfb8   : > { %v7852_v12 = vmul.f32 %v9825_v3, %v7819_v40  ;;  %vm7858_vm2 = vweird.f32 %v9825_v3 }
 0xfb9   : > { %9826 = vrsqrt.f32 %v7820_v56  ;;  %7755 = vadd.xlane.f32.xlu0 %v7707_v14  ;;  %vm7859_vm4 = vmor %vm7857_vm3, %vm7858_vm2  ;;  %vm7867_vm6 = vweird.f32 %v7820_v56 }
 0xfba   : > { %v7853_v13 = vmul.f32 %v9825_v3, %v7852_v12  ;;  %v7598_v30 = vpop.xlane.xlu2 %7597 }
 0xfbb   : > { %v7644_v0 = vmul.f32 %v7598_v30, %v15446_v18 }
 0xfbc   : > { %v7854_v23 = vmul.f32 0.5, %v7853_v13  ;;  %v7728_v20 = vpop.xlane.xlu1 %7727 }
 0xfbd   : > { %v7789_v15 = vmul.f32 %v7728_v20, %v15446_v18  ;;  %v14618_v27 = vsub.f32 %v14453_v41, %v7644_v0 }
 0xfbe   : > { %v7855_v51 = vsub.f32 1.5, %v7854_v23 }
 0xfbf   : > { %v9827_v39 = vpop.eup %9826  ;;  %v7821_v57 = vadd.f32 1e-05, %v7789_v15  ;;  %7751 = vadd.xlane.f32.xlu1 %v7705_v61  ;;  %v7708_v52 = vmul.f32 %v14618_v27, %v14618_v27 }
 0xfc0   : > { %v7856_v24 = vmul.f32 %v9825_v3, %v7855_v51  ;;  %v7862_v35 = vmul.f32 %v9827_v39, %v7820_v56  ;;  %vm7868_vm5 = vweird.f32 %v9827_v39 }
 0xfc1   : > { %9828 = vrsqrt.f32 %v7821_v57  ;;  %vm7869_vm7 = vmor %vm7867_vm6, %vm7868_vm5  ;;  %vm7877_vm9 = vweird.f32 %v7821_v57 }
 0xfc2   : > { %v7860_v8 = vsel %vm7859_vm4, %v9825_v3, %v7856_v24  ;;  %v7863_v60 = vmul.f32 %v9827_v39, %v7862_v35  ;;  %v7600_v36 = vpop.xlane.xlu0 %7599 }
 0xfc3   : > { %v8171_v45 = vmul.f32 %v7860_v8, %v14428_v43  ;;  %v7645_v58 = vmul.f32 %v7600_v36, %v15446_v18 }
 0xfc4   : > { %v7864_v19 = vmul.f32 0.5, %v7863_v60  ;;  %v7730_v40 = vpop.xlane.xlu2 %7729 }
 0xfc5   : > { %v8204_v46 = vmul.f32 %v14615_v5, %v8171_v45  ;;  %v14626_v16 = vsub.f32 %v14464_v48, %v7645_v58  ;;  %v7790_v41 = vmul.f32 %v7730_v40, %v15446_v18 }
 0xfc6   : > { %v7865_v53 = vsub.f32 1.5, %v7864_v19 }
 0xfc7   : > { %v9829_v3 = vpop.eup %9828  ;;  %v8237_v43 = vadd.f32 %v14620_v62, %v8204_v46  ;;  %v7822_v14 = vadd.f32 1e-05, %v7790_v41  ;;  %7757 = vadd.xlane.f32.xlu1 %v7708_v52  ;;  %v7709_v12 = vmul.f32 %v14626_v16, %v14626_v16 }
 0xfc8   : > { %v7866_v13 = vmul.f32 %v9827_v39, %v7865_v53  ;;  %v7872_v30 = vmul.f32 %v9829_v3, %v7821_v57  ;;  %vm7878_vm8 = vweird.f32 %v9829_v3 }
 0xfc9   : > { %8269 = vst [vmem:[%s14636_s28] sm:$0xff] %v8237_v43  ;;  %9830 = vrsqrt.f32 %v7822_v14  ;;  %7759 = vadd.xlane.f32.xlu2 %v7709_v12  ;;  %vm7879_vm10 = vmor %vm7877_vm9, %vm7878_vm8  ;;  %vm7887_vm12 = vweird.f32 %v7822_v14 }
 0xfca   : > { %v7870_v48 = vsel %vm7869_vm7, %v9827_v39, %v7866_v13  ;;  %v7873_v23 = vmul.f32 %v9829_v3, %v7872_v30  ;;  %v7602_v20 = vpop.xlane.xlu1 %7601 }
 0xfcb   : > { %v8172_v0 = vmul.f32 %v7870_v48, %v14439_v42  ;;  %v7646_v15 = vmul.f32 %v7602_v20, %v15446_v18 }
 0xfcc   : > { %v7874_v61 = vmul.f32 0.5, %v7873_v23  ;;  %v7732_v51 = vpop.xlane.xlu0 %7731 }
 0xfcd   : > { %v8205_v56 = vmul.f32 %v14615_v5, %v8172_v0  ;;  %v14643_v24 = vsub.f32 %v14475_v21, %v7646_v15  ;;  %v7791_v35 = vmul.f32 %v7732_v51, %v15446_v18 }
 0xfce   : > { %v7875_v32 = vsub.f32 1.5, %v7874_v61 }
 0xfcf   : > { %v9831_v8 = vpop.eup %9830  ;;  %v8238_v39 = vadd.f32 %v14620_v62, %v8205_v56  ;;  %v7823_v60 = vadd.f32 1e-05, %v7791_v35  ;;  %v7710_v42 = vmul.f32 %v14643_v24, %v14643_v24 }
 0xfd0   : > { %v7876_v36 = vmul.f32 %v9829_v3, %v7875_v32  ;;  %v7882_v45 = vmul.f32 %v9831_v8, %v7822_v14  ;;  %vm7888_vm11 = vweird.f32 %v9831_v8 }
 0xfd1   : > { %8270 = vst [vmem:[%s14636_s28 + $0x8] sm:$0xff] %v8238_v39  ;;  %9832 = vrsqrt.f32 %v7823_v60  ;;  %7761 = vadd.xlane.f32.xlu0 %v7710_v42  ;;  %vm7889_vm13 = vmor %vm7887_vm12, %vm7888_vm11  ;;  %vm7897_vm15 = vweird.f32 %v7823_v60 }
 0xfd2   : > { %v7880_v21 = vsel %vm7879_vm10, %v9829_v3, %v7876_v36  ;;  %v7883_v58 = vmul.f32 %v9831_v8, %v7882_v45  ;;  %v7604_v19 = vpop.xlane.xlu2 %7603 }
 0xfd3   : > { %v8173_v40 = vmul.f32 %v7880_v21, %v14450_v33  ;;  %v7647_v46 = vmul.f32 %v7604_v19, %v15446_v18 }
 0xfd4   : > { %v7884_v41 = vmul.f32 0.5, %v7883_v58  ;;  %v7734_v52 = vpop.xlane.xlu1 %7733 }
 0xfd5   : > { %v8206_v53 = vmul.f32 %v14615_v5, %v8173_v40  ;;  %v14654_v43 = vsub.f32 %v14486_v44, %v7647_v46  ;;  %v7792_v57 = vmul.f32 %v7734_v52, %v15446_v18 }
 0xfd6   : > { %v7885_v12 = vsub.f32 1.5, %v7884_v41 }
 0xfd7   : > { %v9833_v13 = vpop.eup %9832  ;;  %v8239_v3 = vadd.f32 %v14620_v62, %v8206_v53  ;;  %v7824_v30 = vadd.f32 1e-05, %v7792_v57  ;;  %v7711_v33 = vmul.f32 %v14654_v43, %v14654_v43 }
 0xfd8   : > { %v7886_v48 = vmul.f32 %v9831_v8, %v7885_v12  ;;  %v7892_v23 = vmul.f32 %v9833_v13, %v7823_v60  ;;  %vm7898_vm14 = vweird.f32 %v9833_v13 }
 0xfd9   : > { %8271 = vst [vmem:[%s14636_s28 + $0x10] sm:$0xff] %v8239_v3  ;;  %9834 = vrsqrt.f32 %v7824_v30  ;;  %7763 = vadd.xlane.f32.xlu1 %v7711_v33  ;;  %vm7899_vm0 = vmor %vm7897_vm15, %vm7898_vm14  ;;  %vm7907_vm2 = vweird.f32 %v7824_v30 }
 0xfda   : > { %v7890_v44 = vsel %vm7889_vm13, %v9831_v8, %v7886_v48  ;;  %v7893_v20 = vmul.f32 %v9833_v13, %v7892_v23  ;;  %v7606_v0 = vpop.xlane.xlu0 %7605 }
 0xfdb   : > { %v8174_v15 = vmul.f32 %v7890_v44, %v14461_v38  ;;  %v7648_v61 = vmul.f32 %v7606_v0, %v15446_v18 }
 0xfdc   : > { %v7894_v51 = vmul.f32 0.5, %v7893_v20  ;;  %v7736_v56 = vpop.xlane.xlu2 %7735 }
 0xfdd   : > { %v8207_v35 = vmul.f32 %v14615_v5, %v8174_v15  ;;  %v14665_v32 = vsub.f32 %v14497_v2, %v7648_v61  ;;  %v7793_v14 = vmul.f32 %v7736_v56, %v15446_v18 }
 0xfde   : > { %v7895_v39 = vsub.f32 1.5, %v7894_v51 }
 0xfdf   : > { %v9835_v42 = vpop.eup %9834  ;;  %v8240_v8 = vadd.f32 %v14620_v62, %v8207_v35  ;;  %v7825_v36 = vadd.f32 1e-05, %v7793_v14  ;;  %v7712_v38 = vmul.f32 %v14665_v32, %v14665_v32 }
 0xfe0   : > { %v7896_v45 = vmul.f32 %v9833_v13, %v7895_v39  ;;  %v7902_v21 = vmul.f32 %v9835_v42, %v7824_v30  ;;  %vm7908_vm1 = vweird.f32 %v9835_v42 }
 0xfe1   : > { %8272 = vst [vmem:[%s14636_s28 + $0x18] sm:$0xff] %v8240_v8  ;;  %9836 = vrsqrt.f32 %v7825_v36  ;;  %7765 = vadd.xlane.f32.xlu2 %v7712_v38  ;;  %vm7909_vm3 = vmor %vm7907_vm2, %vm7908_vm1  ;;  %vm7917_vm5 = vweird.f32 %v7825_v36 }
 0xfe2   : > { %v7900_v2 = vsel %vm7899_vm0, %v9833_v13, %v7896_v45  ;;  %v7903_v58 = vmul.f32 %v9835_v42, %v7902_v21  ;;  %v7608_v19 = vpop.xlane.xlu1 %7607 }
 0xfe3   : > { %v8175_v40 = vmul.f32 %v7900_v2, %v14472_v17  ;;  %v7649_v46 = vmul.f32 %v7608_v19, %v15446_v18 }
 0xfe4   : > { %v7904_v41 = vmul.f32 0.5, %v7903_v58  ;;  %v7738_v52 = vpop.xlane.xlu0 %7737 }
 0xfe5   : > { %v8208_v53 = vmul.f32 %v14615_v5, %v8175_v40  ;;  %v14676_v57 = vsub.f32 %v14508_v49, %v7649_v46  ;;  %v7794_v60 = vmul.f32 %v7738_v52, %v15446_v18 }
 0xfe6   : > { %v7905_v12 = vsub.f32 1.5, %v7904_v41 }
 0xfe7   : > { %v9837_v3 = vpop.eup %9836  ;;  %v8241_v13 = vadd.f32 %v14620_v62, %v8208_v53  ;;  %v7826_v33 = vadd.f32 1e-05, %v7794_v60  ;;  %v7713_v17 = vmul.f32 %v14676_v57, %v14676_v57 }
 0xfe8   : > { %v7906_v48 = vmul.f32 %v9835_v42, %v7905_v12  ;;  %v7912_v23 = vmul.f32 %v9837_v3, %v7825_v36  ;;  %vm7918_vm4 = vweird.f32 %v9837_v3 }
 0xfe9   : > { %8273 = vst [vmem:[%s14636_s28 + $0x20] sm:$0xff] %v8241_v13  ;;  %9838 = vrsqrt.f32 %v7826_v33  ;;  %7767 = vadd.xlane.f32.xlu0 %v7713_v17  ;;  %vm7919_vm6 = vmor %vm7917_vm5, %vm7918_vm4  ;;  %vm7927_vm8 = vweird.f32 %v7826_v33 }
 0xfea   : > { %v7910_v49 = vsel %vm7909_vm3, %v9835_v42, %v7906_v48  ;;  %v7913_v44 = vmul.f32 %v9837_v3, %v7912_v23  ;;  %v7610_v20 = vpop.xlane.xlu2 %7609 }
 0xfeb   : > { %v8176_v0 = vmul.f32 %v7910_v49, %v14483_v59  ;;  %v7650_v15 = vmul.f32 %v7610_v20, %v15446_v18 }
 0xfec   : > { %v7914_v61 = vmul.f32 0.5, %v7913_v44  ;;  %v7740_v51 = vpop.xlane.xlu1 %7739 }
 0xfed   : > { %v8209_v56 = vmul.f32 %v14615_v5, %v8176_v0  ;;  %v14687_v35 = vsub.f32 %v14519_v50, %v7650_v15  ;;  %v7795_v30 = vmul.f32 %v7740_v51, %v15446_v18 }
 0xfee   : > { %v7915_v14 = vsub.f32 1.5, %v7914_v61 }
 0xfef   : > { %v9839_v39 = vpop.eup %9838  ;;  %v8242_v42 = vadd.f32 %v14620_v62, %v8209_v56  ;;  %v7827_v8 = vadd.f32 1e-05, %v7795_v30  ;;  %v7714_v59 = vmul.f32 %v14687_v35, %v14687_v35 }
 0xff0   : > { %v7916_v38 = vmul.f32 %v9837_v3, %v7915_v14  ;;  %v7922_v45 = vmul.f32 %v9839_v39, %v7826_v33  ;;  %vm7928_vm7 = vweird.f32 %v9839_v39 }
 0xff1   : > { %8274 = vst [vmem:[%s14636_s28 + $0x28] sm:$0xff] %v8242_v42  ;;  %9840 = vrsqrt.f32 %v7827_v8  ;;  %7769 = vadd.xlane.f32.xlu1 %v7714_v59  ;;  %vm7929_vm9 = vmor %vm7927_vm8, %vm7928_vm7  ;;  %vm7937_vm11 = vweird.f32 %v7827_v8 }
 0xff2   : > { %v7920_v50 = vsel %vm7919_vm6, %v9837_v3, %v7916_v38  ;;  %v7923_v21 = vmul.f32 %v9839_v39, %v7922_v45  ;;  %v7612_v2 = vpop.xlane.xlu0 %7611 }
 0xff3   : > { %v8177_v58 = vmul.f32 %v7920_v50, %v14494_v31  ;;  %v7651_v19 = vmul.f32 %v7612_v2, %v15446_v18 }
 0xff4   : > { %v7924_v40 = vmul.f32 0.5, %v7923_v21  ;;  %v7742_v46 = vpop.xlane.xlu2 %7741 }
 0xff5   : > { %v8210_v41 = vmul.f32 %v14615_v5, %v8177_v58  ;;  %v14698_v52 = vsub.f32 %v14530_v55, %v7651_v19  ;;  %v7796_v36 = vmul.f32 %v7742_v46, %v15446_v18 }
 0xff6   : > { %v7925_v53 = vsub.f32 1.5, %v7924_v40 }
 0xff7   : > { %v9841_v60 = vpop.eup %9840  ;;  %v8243_v12 = vadd.f32 %v14620_v62, %v8210_v41  ;;  %v7828_v3 = vadd.f32 1e-05, %v7796_v36  ;;  %v7715_v31 = vmul.f32 %v14698_v52, %v14698_v52 }
 0xff8   : > { %v7926_v13 = vmul.f32 %v9839_v39, %v7925_v53  ;;  %v7932_v17 = vmul.f32 %v9841_v60, %v7827_v8  ;;  %vm7938_vm10 = vweird.f32 %v9841_v60 }
 0xff9   : > { %8275 = vst [vmem:[%s14636_s28 + $0x30] sm:$0xff] %v8243_v12  ;;  %9842 = vrsqrt.f32 %v7828_v3  ;;  %7771 = vadd.xlane.f32.xlu2 %v7715_v31  ;;  %vm7939_vm12 = vmor %vm7937_vm11, %vm7938_vm10  ;;  %vm7947_vm14 = vweird.f32 %v7828_v3 }
 0xffa   : > { %v7930_v55 = vsel %vm7929_vm9, %v9839_v39, %v7926_v13  ;;  %v7933_v48 = vmul.f32 %v9841_v60, %v7932_v17  ;;  %v7614_v23 = vpop.xlane.xlu1 %7613 }
 0xffb   : > { %v8178_v49 = vmul.f32 %v7930_v55, %v14505_v25  ;;  %v7652_v44 = vmul.f32 %v7614_v23, %v15446_v18 }
 0xffc   : > { %v7934_v20 = vmul.f32 0.5, %v7933_v48  ;;  %v7744_v0 = vpop.xlane.xlu0 %7743 }
 0xffd   : > { %v8211_v15 = vmul.f32 %v14615_v5, %v8178_v49  ;;  %v14709_v61 = vsub.f32 %v14541_v47, %v7652_v44  ;;  %v7797_v33 = vmul.f32 %v7744_v0, %v15446_v18 }
 0xffe   : > { %v7935_v51 = vsub.f32 1.5, %v7934_v20 }
 0xfff   : > { %v9843_v56 = vpop.eup %9842  ;;  %v8244_v30 = vadd.f32 %v14620_v62, %v8211_v15  ;;  %v7829_v14 = vadd.f32 1e-05, %v7797_v33  ;;  %v7716_v25 = vmul.f32 %v14709_v61, %v14709_v61 }
0x1000   : > { %v7936_v39 = vmul.f32 %v9841_v60, %v7935_v51  ;;  %v7942_v42 = vmul.f32 %v9843_v56, %v7828_v3  ;;  %vm7948_vm13 = vweird.f32 %v9843_v56 }
0x1001   : > { %8276 = vst [vmem:[%s14636_s28 + $0x38] sm:$0xff] %v8244_v30  ;;  %9844 = vrsqrt.f32 %v7829_v14  ;;  %7773 = vadd.xlane.f32.xlu0 %v7716_v25  ;;  %vm7949_vm15 = vmor %vm7947_vm14, %vm7948_vm13  ;;  %vm7957_vm1 = vweird.f32 %v7829_v14 }
0x1002   : > { %v7940_v47 = vsel %vm7939_vm12, %v9841_v60, %v7936_v39  ;;  %v7943_v59 = vmul.f32 %v9843_v56, %v7942_v42  ;;  %v7616_v38 = vpop.xlane.xlu2 %7615 }
0x1003   : > { %v8179_v45 = vmul.f32 %v7940_v47, %v14516_v29  ;;  %v7653_v50 = vmul.f32 %v7616_v38, %v15446_v18 }
0x1004   : > { %v7944_v21 = vmul.f32 0.5, %v7943_v59  ;;  %v7746_v2 = vpop.xlane.xlu1 %7745 }
0x1005   : > { %v8212_v58 = vmul.f32 %v14615_v5, %v8179_v45  ;;  %v14720_v19 = vsub.f32 %v14552_v34, %v7653_v50  ;;  %v7798_v8 = vmul.f32 %v7746_v2, %v15446_v18 }
0x1006   : > { %v7945_v40 = vsub.f32 1.5, %v7944_v21 }
0x1007   : > { %v9845_v46 = vpop.eup %9844  ;;  %v8245_v41 = vadd.f32 %v14620_v62, %v8212_v58  ;;  %v7830_v36 = vadd.f32 1e-05, %v7798_v8  ;;  %v7717_v29 = vmul.f32 %v14720_v19, %v14720_v19 }
0x1008   : > { %v7946_v53 = vmul.f32 %v9843_v56, %v7945_v40  ;;  %v7952_v60 = vmul.f32 %v9845_v46, %v7829_v14  ;;  %vm7958_vm0 = vweird.f32 %v9845_v46 }
0x1009   : > { %8277 = vst [vmem:[%s14636_s28 + $0x40] sm:$0xff] %v8245_v41  ;;  %9846 = vrsqrt.f32 %v7830_v36  ;;  %7775 = vadd.xlane.f32.xlu1 %v7717_v29  ;;  %vm7959_vm2 = vmor %vm7957_vm1, %vm7958_vm0  ;;  %vm7967_vm4 = vweird.f32 %v7830_v36 }
0x100a   : > { %v7950_v34 = vsel %vm7949_vm15, %v9843_v56, %v7946_v53  ;;  %v7953_v12 = vmul.f32 %v9845_v46, %v7952_v60  ;;  %v7618_v31 = vpop.xlane.xlu0 %7617 }
0x100b   : > { %v8180_v13 = vmul.f32 %v7950_v34, %v14527_v1  ;;  %v7654_v17 = vmul.f32 %v7618_v31, %v15446_v18 }
0x100c   : > { %v7954_v55 = vmul.f32 0.5, %v7953_v12  ;;  %v7748_v48 = vpop.xlane.xlu2 %7747 }
0x100d   : > { %v8213_v23 = vmul.f32 %v14615_v5, %v8180_v13  ;;  %v14731_v49 = vsub.f32 %v14563_v37, %v7654_v17  ;;  %v7799_v3 = vmul.f32 %v7748_v48, %v15446_v18 }
0x100e   : > { %v7955_v44 = vsub.f32 1.5, %v7954_v55 }
0x100f   : > { %v9847_v20 = vpop.eup %9846  ;;  %v8246_v0 = vadd.f32 %v14620_v62, %v8213_v23  ;;  %v7831_v15 = vadd.f32 1e-05, %v7799_v3  ;;  %v7718_v1 = vmul.f32 %v14731_v49, %v14731_v49 }
0x1010   : > { %v7956_v33 = vmul.f32 %v9845_v46, %v7955_v44  ;;  %v7962_v51 = vmul.f32 %v9847_v20, %v7830_v36  ;;  %vm7968_vm3 = vweird.f32 %v9847_v20 }
0x1011   : > { %8278 = vst [vmem:[%s14636_s28 + $0x48] sm:$0xff] %v8246_v0  ;;  %9848 = vrsqrt.f32 %v7831_v15  ;;  %7777 = vadd.xlane.f32.xlu2 %v7718_v1  ;;  %vm7969_vm5 = vmor %vm7967_vm4, %vm7968_vm3  ;;  %vm7977_vm7 = vweird.f32 %v7831_v15 }
0x1012   : > { %v7960_v37 = vsel %vm7959_vm2, %v9845_v46, %v7956_v33  ;;  %v7963_v56 = vmul.f32 %v9847_v20, %v7962_v51  ;;  %v7620_v30 = vpop.xlane.xlu1 %7619 }
0x1013   : > { %v8181_v25 = vmul.f32 %v7960_v37, %v14538_v11  ;;  %v7655_v39 = vmul.f32 %v7620_v30, %v15446_v18 }
0x1014   : > { %v7964_v42 = vmul.f32 0.5, %v7963_v56  ;;  %v7750_v47 = vpop.xlane.xlu0 %7749 }
0x1015   : > { %v8214_v59 = vmul.f32 %v14615_v5, %v8181_v25  ;;  %v14742_v38 = vsub.f32 %v14574_v10, %v7655_v39  ;;  %v7800_v14 = vmul.f32 %v7750_v47, %v15446_v18 }
0x1016   : > { %v7965_v45 = vsub.f32 1.5, %v7964_v42 }
0x1017   : > { %v9849_v50 = vpop.eup %9848  ;;  %v8247_v21 = vadd.f32 %v14620_v62, %v8214_v59  ;;  %v7832_v2 = vadd.f32 1e-05, %v7800_v14  ;;  %v7719_v11 = vmul.f32 %v14742_v38, %v14742_v38 }
0x1018   : > { %v7966_v58 = vmul.f32 %v9847_v20, %v7965_v45  ;;  %v7972_v8 = vmul.f32 %v9849_v50, %v7831_v15  ;;  %vm7978_vm6 = vweird.f32 %v9849_v50 }
0x1019   : > { %8279 = vst [vmem:[%s14636_s28 + $0x50] sm:$0xff] %v8247_v21  ;;  %9850 = vrsqrt.f32 %v7832_v2  ;;  %7779 = vadd.xlane.f32.xlu0 %v7719_v11  ;;  %vm7979_vm8 = vmor %vm7977_vm7, %vm7978_vm6  ;;  %vm7987_vm10 = vweird.f32 %v7832_v2 }
0x101a   : > { %v7970_v10 = vsel %vm7969_vm5, %v9847_v20, %v7966_v58  ;;  %v7973_v40 = vmul.f32 %v9849_v50, %v7972_v8  ;;  %v7622_v46 = vpop.xlane.xlu2 %7621 }
0x101b   : > { %v8182_v41 = vmul.f32 %v7970_v10, %v14549_v7  ;;  %v7656_v29 = vmul.f32 %v7622_v46, %v15446_v18 }
0x101c   : > { %v7974_v53 = vmul.f32 0.5, %v7973_v40 }
0x101d   : > { %v8215_v60 = vmul.f32 %v14615_v5, %v8182_v41  ;;  %v14753_v34 = vsub.f32 %v14581_v54, %v7656_v29 }
0x101e   : > { %v7975_v36 = vsub.f32 1.5, %v7974_v53 }
0x101f   : > { %v9851_v12 = vpop.eup %9850  ;;  %v8248_v31 = vadd.f32 %v14620_v62, %v8215_v60  ;;  %v7720_v13 = vmul.f32 %v14753_v34, %v14753_v34 }
0x1020   : > { %v7976_v17 = vmul.f32 %v9849_v50, %v7975_v36  ;;  %v7982_v55 = vmul.f32 %v9851_v12, %v7832_v2  ;;  %vm7988_vm9 = vweird.f32 %v9851_v12 }
0x1021   : > { %8280 = vst [vmem:[%s14636_s28 + $0x58] sm:$0xff] %v8248_v31  ;;  %7781 = vadd.xlane.f32.xlu1 %v7720_v13  ;;  %vm7989_vm11 = vmor %vm7987_vm10, %vm7988_vm9 }
0x1022   : > { %v7980_v7 = vsel %vm7979_vm8, %v9849_v50, %v7976_v17  ;;  %v7983_v48 = vmul.f32 %v9851_v12, %v7982_v55  ;;  %v7624_v23 = vpop.xlane.xlu0 %7623 }
0x1023   : > { %v8183_v54 = vmul.f32 %v7980_v7, %v14560_v4  ;;  %v7657_v3 = vmul.f32 %v7624_v23, %v15446_v18 }
0x1024   : > { %v7984_v44 = vmul.f32 0.5, %v7983_v48  ;;  %v7754_v20 = vpop.xlane.xlu2 %7753 }
0x1025   : > { %v8216_v0 = vmul.f32 %v14615_v5, %v8183_v54  ;;  %v14763_v1 = vsub.f32 %v14591_v9, %v7657_v3  ;;  %v7802_v15 = vmul.f32 %v7754_v20, %v15446_v18 }
0x1026   : > { %v7985_v33 = vsub.f32 1.5, %v7984_v44 }
0x1027   : > { %v8249_v51 = vadd.f32 %v14620_v62, %v8216_v0  ;;  %v7834_v37 = vadd.f32 1e-05, %v7802_v15  ;;  %v7721_v56 = vmul.f32 %v14763_v1, %v14763_v1 }
0x1028   : > { %v7986_v4 = vmul.f32 %v9851_v12, %v7985_v33 }
0x1029   : > { %8281 = vst [vmem:[%s14636_s28 + $0x60] sm:$0xff] %v8249_v51  ;;  %9852 = vrsqrt.f32 %v7834_v37  ;;  %7783 = vadd.xlane.f32.xlu2 %v7721_v56  ;;  %vm8007_vm13 = vweird.f32 %v7834_v37 }
0x102a   : > { %v7990_v30 = vsel %vm7989_vm11, %v9851_v12, %v7986_v4  ;;  %v7626_v9 = vpop.xlane.xlu1 %7625 }
0x102b   : > { %v8184_v25 = vmul.f32 %v7990_v30, %v14571_v26  ;;  %v7658_v39 = vmul.f32 %v7626_v9, %v15446_v18 }
0x102c   : > { %v7756_v42 = vpop.xlane.xlu0 %7755 }
0x102d   : > { %v8217_v47 = vmul.f32 %v14615_v5, %v8184_v25  ;;  %v14774_v59 = vsub.f32 %v14603_v28, %v7658_v39  ;;  %v7803_v14 = vmul.f32 %v7756_v42, %v15446_v18 }
0x102f   : > { %v9853_v45 = vpop.eup %9852  ;;  %v8250_v50 = vadd.f32 %v14620_v62, %v8217_v47  ;;  %v7835_v21 = vadd.f32 1e-05, %v7803_v14  ;;  %v7722_v2 = vmul.f32 %v14774_v59, %v14774_v59 }
0x1030   : > { %v8002_v11 = vmul.f32 %v9853_v45, %v7834_v37  ;;  %vm8008_vm12 = vweird.f32 %v9853_v45 }
0x1031   : > { %8282 = vst [vmem:[%s14636_s28 + $0x68] sm:$0xff] %v8250_v50  ;;  %9854 = vrsqrt.f32 %v7835_v21  ;;  %7785 = vadd.xlane.f32.xlu0 %v7722_v2  ;;  %vm8009_vm14 = vmor %vm8007_vm13, %vm8008_vm12  ;;  %vm8017_vm0 = vweird.f32 %v7835_v21 }
0x1032   : > { %v8003_v26 = vmul.f32 %v9853_v45, %v8002_v11  ;;  %v7752_v58 = vpop.xlane.xlu1 %7751 }
0x1033   : > { %v7801_v8 = vmul.f32 %v7752_v58, %v15446_v18 }
0x1034   : > { %v8004_v10 = vmul.f32 0.5, %v8003_v26 }
0x1035   : > { %v7833_v28 = vadd.f32 1e-05, %v7801_v8 }
0x1036   : > { %v8005_v40 = vsub.f32 1.5, %v8004_v10 }
0x1037   : > { %v9855_v46 = vpop.eup %9854  ;;  %9856 = vrsqrt.f32 %v7833_v28  ;;  %vm7997_vm3 = vweird.f32 %v7833_v28 }
0x1038   : > { %v8006_v41 = vmul.f32 %v9853_v45, %v8005_v40  ;;  %v8012_v29 = vmul.f32 %v9855_v46, %v7835_v21  ;;  %vm8018_vm15 = vweird.f32 %v9855_v46 }
0x1039   : > { %vm8019_vm1 = vmor %vm8017_vm0, %vm8018_vm15 }
0x103a   : > { %v8010_v53 = vsel %vm8009_vm14, %v9853_v45, %v8006_v41  ;;  %v8013_v60 = vmul.f32 %v9855_v46, %v8012_v29  ;;  %v7758_v36 = vpop.xlane.xlu1 %7757 }
0x103b   : > { %v8186_v12 = vmul.f32 %v8010_v53, %v14587_v63  ;;  %v7804_v31 = vmul.f32 %v7758_v36, %v15446_v18 }
0x103c   : > { %v8014_v13 = vmul.f32 0.5, %v8013_v60  ;;  %v7760_v17 = vpop.xlane.xlu2 %7759 }
0x103d   : > { %v9857_v55 = vpop.eup %9856  ;;  %v8219_v7 = vmul.f32 %v14615_v5, %v8186_v12  ;;  %v7836_v48 = vadd.f32 1e-05, %v7804_v31  ;;  %v7805_v23 = vmul.f32 %v7760_v17, %v15446_v18 }
0x103e   : > { %v8015_v54 = vsub.f32 1.5, %v8014_v13  ;;  %v7992_v3 = vmul.f32 %v9857_v55, %v7833_v28  ;;  %vm7998_vm2 = vweird.f32 %v9857_v55 }
0x103f   : > { %v8252_v44 = vadd.f32 %v14620_v62, %v8219_v7  ;;  %9858 = vrsqrt.f32 %v7836_v48  ;;  %v7837_v20 = vadd.f32 1e-05, %v7805_v23  ;;  %vm7999_vm4 = vmor %vm7997_vm3, %vm7998_vm2  ;;  %vm8027_vm6 = vweird.f32 %v7836_v48 }
0x1040   : > { %v8016_v0 = vmul.f32 %v9855_v46, %v8015_v54  ;;  %v7993_v63 = vmul.f32 %v9857_v55, %v7992_v3 }
0x1041   : > { %8284 = vst [vmem:[%s14636_s28 + $0x78] sm:$0xff] %v8252_v44  ;;  %9860 = vrsqrt.f32 %v7837_v20  ;;  %vm8037_vm9 = vweird.f32 %v7837_v20 }
0x1042   : > { %v8020_v15 = vsel %vm8019_vm1, %v9855_v46, %v8016_v0  ;;  %v7994_v33 = vmul.f32 0.5, %v7993_v63 }
0x1043   : > { %v8187_v51 = vmul.f32 %v8020_v15, %v14599_v6 }
0x1044   : > { %v7995_v37 = vsub.f32 1.5, %v7994_v33  ;;  %v7762_v56 = vpop.xlane.xlu0 %7761 }
0x1045   : > { %v9859_v4 = vpop.eup %9858  ;;  %v8220_v30 = vmul.f32 %v14615_v5, %v8187_v51  ;;  %v7806_v9 = vmul.f32 %v7762_v56, %v15446_v18 }
0x1046   : > { %v7996_v25 = vmul.f32 %v9857_v55, %v7995_v37  ;;  %v8022_v39 = vmul.f32 %v9859_v4, %v7836_v48  ;;  %vm8028_vm5 = vweird.f32 %v9859_v4 }
0x1047   : > { %v9861_v42 = vpop.eup %9860  ;;  %v8253_v47 = vadd.f32 %v14620_v62, %v8220_v30  ;;  %v7838_v14 = vadd.f32 1e-05, %v7806_v9  ;;  %vm8029_vm8 = vmor %vm8027_vm6, %vm8028_vm5 }
0x1048   : > { %v8000_v45 = vsel %vm7999_vm4, %v9857_v55, %v7996_v25  ;;  %v8023_v50 = vmul.f32 %v9859_v4, %v8022_v39  ;;  %v8032_v6 = vmul.f32 %v9861_v42, %v7837_v20  ;;  %vm8038_vm7 = vweird.f32 %v9861_v42 }
0x1049   : > { %8285 = vst [vmem:[%s14636_s28 + $0x80] sm:$0xff] %v8253_v47  ;;  %v8185_v21 = vmul.f32 %v8000_v45, %v14609_v22  ;;  %9862 = vrsqrt.f32 %v7838_v14  ;;  %vm8039_vm10 = vmor %vm8037_vm9, %vm8038_vm7  ;;  %vm8047_vm12 = vweird.f32 %v7838_v14 }
0x104a   : > { %v8024_v2 = vmul.f32 0.5, %v8023_v50  ;;  %v8033_v11 = vmul.f32 %v9861_v42, %v8032_v6 }
0x104b   : > { %v8218_v26 = vmul.f32 %v14615_v5, %v8185_v21 }
0x104c   : > { %v8025_v58 = vsub.f32 1.5, %v8024_v2  ;;  %v8034_v8 = vmul.f32 0.5, %v8033_v11  ;;  %v7764_v10 = vpop.xlane.xlu1 %7763 }
0x104d   : > { %v8251_v28 = vadd.f32 %v14620_v62, %v8218_v26  ;;  %v7807_v40 = vmul.f32 %v7764_v10, %v15446_v18 }
0x104e   : > { %v8026_v46 = vmul.f32 %v9859_v4, %v8025_v58  ;;  %v8035_v41 = vsub.f32 1.5, %v8034_v8 }
0x104f   : > { %v9863_v29 = vpop.eup %9862  ;;  %8283 = vst [vmem:[%s14636_s28 + $0x70] sm:$0xff] %v8251_v28  ;;  %v7839_v22 = vadd.f32 1e-05, %v7807_v40 }
0x1050   : > { %v8030_v53 = vsel %vm8029_vm8, %v9859_v4, %v8026_v46  ;;  %v8036_v60 = vmul.f32 %v9861_v42, %v8035_v41  ;;  %v8042_v36 = vmul.f32 %v9863_v29, %v7838_v14  ;;  %vm8048_vm11 = vweird.f32 %v9863_v29 }
0x1051   : > { %v8188_v12 = vmul.f32 %v8030_v53, %v14618_v27  ;;  %9864 = vrsqrt.f32 %v7839_v22  ;;  %vm8049_vm13 = vmor %vm8047_vm12, %vm8048_vm11  ;;  %vm8057_vm15 = vweird.f32 %v7839_v22 }
0x1052   : > { %v8040_v31 = vsel %vm8039_vm10, %v9861_v42, %v8036_v60  ;;  %v8043_v13 = vmul.f32 %v9863_v29, %v8042_v36 }
0x1053   : > { %v8221_v17 = vmul.f32 %v14615_v5, %v8188_v12  ;;  %v8189_v55 = vmul.f32 %v8040_v31, %v14626_v16 }
0x1054   : > { %v8044_v7 = vmul.f32 0.5, %v8043_v13  ;;  %v7766_v48 = vpop.xlane.xlu2 %7765 }
0x1055   : > { %v8254_v23 = vadd.f32 %v14620_v62, %v8221_v17  ;;  %v8222_v54 = vmul.f32 %v14615_v5, %v8189_v55  ;;  %v7808_v3 = vmul.f32 %v7766_v48, %v15446_v18 }
0x1056   : > { %v8045_v44 = vsub.f32 1.5, %v8044_v7 }
0x1057   : > { %v9865_v27 = vpop.eup %9864  ;;  %8286 = vst [vmem:[%s14636_s28 + $0x88] sm:$0xff] %v8254_v23  ;;  %v8255_v20 = vadd.f32 %v14620_v62, %v8222_v54  ;;  %v7840_v0 = vadd.f32 1e-05, %v7808_v3 }
0x1058   : > { %v8046_v63 = vmul.f32 %v9863_v29, %v8045_v44  ;;  %v8052_v15 = vmul.f32 %v9865_v27, %v7839_v22  ;;  %vm8058_vm14 = vweird.f32 %v9865_v27 }
0x1059   : > { %8287 = vst [vmem:[%s14636_s28 + $0x90] sm:$0xff] %v8255_v20  ;;  %9866 = vrsqrt.f32 %v7840_v0  ;;  %vm8059_vm0 = vmor %vm8057_vm15, %vm8058_vm14  ;;  %vm8067_vm2 = vweird.f32 %v7840_v0 }
0x105a   : > { %v8050_v16 = vsel %vm8049_vm13, %v9863_v29, %v8046_v63  ;;  %v8053_v33 = vmul.f32 %v9865_v27, %v8052_v15 }
0x105b   : > { %v8190_v51 = vmul.f32 %v8050_v16, %v14643_v24 }
0x105c   : > { %v8054_v37 = vmul.f32 0.5, %v8053_v33  ;;  %v7768_v56 = vpop.xlane.xlu0 %7767 }
0x105d   : > { %v8223_v4 = vmul.f32 %v14615_v5, %v8190_v51  ;;  %v7809_v30 = vmul.f32 %v7768_v56, %v15446_v18 }
0x105e   : > { %v8055_v9 = vsub.f32 1.5, %v8054_v37 }
0x105f   : > { %v9867_v25 = vpop.eup %9866  ;;  %v8256_v39 = vadd.f32 %v14620_v62, %v8223_v4  ;;  %v7841_v42 = vadd.f32 1e-05, %v7809_v30 }
0x1060   : > { %v8056_v47 = vmul.f32 %v9865_v27, %v8055_v9  ;;  %v8062_v14 = vmul.f32 %v9867_v25, %v7840_v0  ;;  %vm8068_vm1 = vweird.f32 %v9867_v25 }
0x1061   : > { %8288 = vst [vmem:[%s14636_s28 + $0x98] sm:$0xff] %v8256_v39  ;;  %9868 = vrsqrt.f32 %v7841_v42  ;;  %vm8069_vm3 = vmor %vm8067_vm2, %vm8068_vm1  ;;  %vm8077_vm5 = vweird.f32 %v7841_v42 }
0x1062   : > { %v8060_v24 = vsel %vm8059_vm0, %v9865_v27, %v8056_v47  ;;  %v8063_v45 = vmul.f32 %v9867_v25, %v8062_v14 }
0x1063   : > { %v8191_v50 = vmul.f32 %v8060_v24, %v14654_v43 }
0x1064   : > { %v8064_v6 = vmul.f32 0.5, %v8063_v45  ;;  %v7770_v21 = vpop.xlane.xlu1 %7769 }
0x1065   : > { %v8224_v2 = vmul.f32 %v14615_v5, %v8191_v50  ;;  %v7810_v11 = vmul.f32 %v7770_v21, %v15446_v18 }
0x1066   : > { %v8065_v26 = vsub.f32 1.5, %v8064_v6 }
0x1067   : > { %v9869_v58 = vpop.eup %9868  ;;  %v8257_v8 = vadd.f32 %v14620_v62, %v8224_v2  ;;  %v7842_v10 = vadd.f32 1e-05, %v7810_v11 }
0x1068   : > { %v8066_v28 = vmul.f32 %v9867_v25, %v8065_v26  ;;  %v8072_v40 = vmul.f32 %v9869_v58, %v7841_v42  ;;  %vm8078_vm4 = vweird.f32 %v9869_v58  ;;  %v14835_v26 = vld [vmem:[#allocation14 + $0x8] ss:$0 sm:$0xff] }
0x1069   : > { %8289 = vst [vmem:[%s14636_s28 + $0xa0] sm:$0xff] %v8257_v8  ;;  %9870 = vrsqrt.f32 %v7842_v10  ;;  %vm8079_vm6 = vmor %vm8077_vm5, %vm8078_vm4  ;;  %vm8087_vm8 = vweird.f32 %v7842_v10 }
0x106a   : > { %v8070_v43 = vsel %vm8069_vm3, %v9867_v25, %v8066_v28  ;;  %v8073_v46 = vmul.f32 %v9869_v58, %v8072_v40 }
0x106b   : > { %v8192_v41 = vmul.f32 %v8070_v43, %v14665_v32 }
0x106c   : > { %v8074_v29 = vmul.f32 0.5, %v8073_v46  ;;  %v7772_v22 = vpop.xlane.xlu2 %7771 }
0x106d   : > { %v8225_v53 = vmul.f32 %v14615_v5, %v8192_v41  ;;  %v7811_v60 = vmul.f32 %v7772_v22, %v15446_v18 }
0x106e   : > { %v8075_v36 = vsub.f32 1.5, %v8074_v29 }
0x106f   : > { %v9871_v12 = vpop.eup %9870  ;;  %v8258_v31 = vadd.f32 %v14620_v62, %v8225_v53  ;;  %v7843_v13 = vadd.f32 1e-05, %v7811_v60 }
0x1070   : > { %v8076_v17 = vmul.f32 %v9869_v58, %v8075_v36  ;;  %v8082_v55 = vmul.f32 %v9871_v12, %v7842_v10  ;;  %vm8088_vm7 = vweird.f32 %v9871_v12 }
0x1071   : > { %8290 = vst [vmem:[%s14636_s28 + $0xa8] sm:$0xff] %v8258_v31  ;;  %9872 = vrsqrt.f32 %v7843_v13  ;;  %vm8089_vm9 = vmor %vm8087_vm8, %vm8088_vm7  ;;  %vm8097_vm11 = vweird.f32 %v7843_v13 }
0x1072   : > { %v8080_v32 = vsel %vm8079_vm6, %v9869_v58, %v8076_v17  ;;  %v8083_v7 = vmul.f32 %v9871_v12, %v8082_v55 }
0x1073   : > { %v8193_v48 = vmul.f32 %v8080_v32, %v14676_v57 }
0x1074   : > { %v8084_v23 = vmul.f32 0.5, %v8083_v7  ;;  %v7774_v54 = vpop.xlane.xlu0 %7773 }
0x1075   : > { %v8226_v3 = vmul.f32 %v14615_v5, %v8193_v48  ;;  %v7812_v44 = vmul.f32 %v7774_v54, %v15446_v18 }
0x1076   : > { %v8085_v27 = vsub.f32 1.5, %v8084_v23 }
0x1077   : > { %v9873_v20 = vpop.eup %9872  ;;  %v8259_v0 = vadd.f32 %v14620_v62, %v8226_v3  ;;  %v7844_v63 = vadd.f32 1e-05, %v7812_v44 }
0x1078   : > { %v8086_v15 = vmul.f32 %v9871_v12, %v8085_v27  ;;  %v8092_v16 = vmul.f32 %v9873_v20, %v7843_v13  ;;  %vm8098_vm10 = vweird.f32 %v9873_v20 }
0x1079   : > { %8291 = vst [vmem:[%s14636_s28 + $0xb0] sm:$0xff] %v8259_v0  ;;  %9874 = vrsqrt.f32 %v7844_v63  ;;  %vm8099_vm12 = vmor %vm8097_vm11, %vm8098_vm10  ;;  %vm8107_vm14 = vweird.f32 %v7844_v63 }
0x107a   : > { %v8090_v57 = vsel %vm8089_vm9, %v9871_v12, %v8086_v15  ;;  %v8093_v33 = vmul.f32 %v9873_v20, %v8092_v16 }
0x107b   : > { %v8194_v51 = vmul.f32 %v8090_v57, %v14687_v35 }
0x107c   : > { %v8094_v37 = vmul.f32 0.5, %v8093_v33  ;;  %v7776_v56 = vpop.xlane.xlu1 %7775 }
0x107d   : > { %v8227_v4 = vmul.f32 %v14615_v5, %v8194_v51  ;;  %v7813_v30 = vmul.f32 %v7776_v56, %v15446_v18 }
0x107e   : > { %v8095_v9 = vsub.f32 1.5, %v8094_v37 }
0x107f   : > { %v9875_v25 = vpop.eup %9874  ;;  %v8260_v39 = vadd.f32 %v14620_v62, %v8227_v4  ;;  %v7845_v42 = vadd.f32 1e-05, %v7813_v30 }
0x1080   : > { %v8096_v47 = vmul.f32 %v9873_v20, %v8095_v9  ;;  %v8102_v14 = vmul.f32 %v9875_v25, %v7844_v63  ;;  %vm8108_vm13 = vweird.f32 %v9875_v25 }
0x1081   : > { %8292 = vst [vmem:[%s14636_s28 + $0xb8] sm:$0xff] %v8260_v39  ;;  %9876 = vrsqrt.f32 %v7845_v42  ;;  %vm8109_vm15 = vmor %vm8107_vm14, %vm8108_vm13  ;;  %vm8117_vm1 = vweird.f32 %v7845_v42 }
0x1082   : > { %v8100_v24 = vsel %vm8099_vm12, %v9873_v20, %v8096_v47  ;;  %v8103_v35 = vmul.f32 %v9875_v25, %v8102_v14 }
0x1083   : > { %v8195_v45 = vmul.f32 %v8100_v24, %v14698_v52 }
0x1084   : > { %v8104_v50 = vmul.f32 0.5, %v8103_v35  ;;  %v7778_v6 = vpop.xlane.xlu2 %7777 }
0x1085   : > { %v8228_v21 = vmul.f32 %v14615_v5, %v8195_v45  ;;  %v7814_v2 = vmul.f32 %v7778_v6, %v15446_v18 }
0x1086   : > { %v8105_v11 = vsub.f32 1.5, %v8104_v50 }
0x1087   : > { %v9877_v62 = vpop.eup %9876  ;;  %v8261_v58 = vadd.f32 %v14835_v26, %v8228_v21  ;;  %v7846_v8 = vadd.f32 1e-05, %v7814_v2 }
0x1088   : > { %v8106_v10 = vmul.f32 %v9875_v25, %v8105_v11  ;;  %v8112_v28 = vmul.f32 %v9877_v62, %v7845_v42  ;;  %vm8118_vm0 = vweird.f32 %v9877_v62 }
0x1089   : > { %8293 = vst [vmem:[%s14636_s28 + $0xc0] sm:$0xff] %v8261_v58  ;;  %9878 = vrsqrt.f32 %v7846_v8  ;;  %vm8119_vm2 = vmor %vm8117_vm1, %vm8118_vm0  ;;  %vm8127_vm4 = vweird.f32 %v7846_v8 }
0x108a   : > { %v8110_v52 = vsel %vm8109_vm15, %v9875_v25, %v8106_v10  ;;  %v8113_v40 = vmul.f32 %v9877_v62, %v8112_v28 }
0x108b   : > { %v8196_v43 = vmul.f32 %v8110_v52, %v14709_v61 }
0x108c   : > { %v8114_v46 = vmul.f32 0.5, %v8113_v40  ;;  %v7780_v41 = vpop.xlane.xlu0 %7779 }
0x108d   : > { %v8229_v29 = vmul.f32 %v14615_v5, %v8196_v43  ;;  %v7815_v22 = vmul.f32 %v7780_v41, %v15446_v18 }
0x108e   : > { %v8115_v53 = vsub.f32 1.5, %v8114_v46 }
0x108f   : > { %v9879_v60 = vpop.eup %9878  ;;  %v8262_v36 = vadd.f32 %v14835_v26, %v8229_v29  ;;  %v7847_v12 = vadd.f32 1e-05, %v7815_v22 }
0x1090   : > { %v8116_v31 = vmul.f32 %v9877_v62, %v8115_v53  ;;  %v8122_v13 = vmul.f32 %v9879_v60, %v7846_v8  ;;  %vm8128_vm3 = vweird.f32 %v9879_v60 }
0x1091   : > { %8294 = vst [vmem:[%s14636_s28 + $0xc8] sm:$0xff] %v8262_v36  ;;  %9880 = vrsqrt.f32 %v7847_v12  ;;  %vm8129_vm5 = vmor %vm8127_vm4, %vm8128_vm3  ;;  %vm8137_vm7 = vweird.f32 %v7847_v12 }
0x1092   : > { %v8120_v61 = vsel %vm8119_vm2, %v9877_v62, %v8116_v31  ;;  %v8123_v17 = vmul.f32 %v9879_v60, %v8122_v13 }
0x1093   : > { %v8197_v55 = vmul.f32 %v8120_v61, %v14720_v19 }
0x1094   : > { %v8124_v32 = vmul.f32 0.5, %v8123_v17  ;;  %v7782_v7 = vpop.xlane.xlu1 %7781 }
0x1095   : > { %v8230_v48 = vmul.f32 %v14615_v5, %v8197_v55  ;;  %v7816_v23 = vmul.f32 %v7782_v7, %v15446_v18 }
0x1096   : > { %v8125_v54 = vsub.f32 1.5, %v8124_v32 }
0x1097   : > { %v9881_v3 = vpop.eup %9880  ;;  %v8263_v44 = vadd.f32 %v14835_v26, %v8230_v48  ;;  %v7848_v27 = vadd.f32 1e-05, %v7816_v23 }
0x1098   : > { %v8126_v20 = vmul.f32 %v9879_v60, %v8125_v54  ;;  %v8132_v0 = vmul.f32 %v9881_v3, %v7847_v12  ;;  %vm8138_vm6 = vweird.f32 %v9881_v3 }
0x1099   : > { %8295 = vst [vmem:[%s14636_s28 + $0xd0] sm:$0xff] %v8263_v44  ;;  %9882 = vrsqrt.f32 %v7848_v27  ;;  %vm8139_vm8 = vmor %vm8137_vm7, %vm8138_vm6  ;;  %vm8147_vm10 = vweird.f32 %v7848_v27 }
0x109a   : > { %v8130_v19 = vsel %vm8129_vm5, %v9879_v60, %v8126_v20  ;;  %v8133_v63 = vmul.f32 %v9881_v3, %v8132_v0 }
0x109b   : > { %v8198_v15 = vmul.f32 %v8130_v19, %v14731_v49 }
0x109c   : > { %v8134_v16 = vmul.f32 0.5, %v8133_v63  ;;  %v7784_v57 = vpop.xlane.xlu2 %7783 }
0x109d   : > { %v8231_v33 = vmul.f32 %v14615_v5, %v8198_v15  ;;  %v7817_v51 = vmul.f32 %v7784_v57, %v15446_v18 }
0x109e   : > { %v8135_v37 = vsub.f32 1.5, %v8134_v16 }
0x109f   : > { %v9883_v56 = vpop.eup %9882  ;;  %v8264_v4 = vadd.f32 %v14835_v26, %v8231_v33  ;;  %v7849_v30 = vadd.f32 1e-05, %v7817_v51 }
0x10a0   : > { %v8136_v9 = vmul.f32 %v9881_v3, %v8135_v37  ;;  %v8142_v25 = vmul.f32 %v9883_v56, %v7848_v27  ;;  %vm8148_vm9 = vweird.f32 %v9883_v56 }
0x10a1   : > { %8296 = vst [vmem:[%s14636_s28 + $0xd8] sm:$0xff] %v8264_v4  ;;  %9884 = vrsqrt.f32 %v7849_v30  ;;  %vm8149_vm11 = vmor %vm8147_vm10, %vm8148_vm9  ;;  %vm8157_vm13 = vweird.f32 %v7849_v30 }
0x10a2   : > { %v8140_v49 = vsel %vm8139_vm8, %v9881_v3, %v8136_v9  ;;  %v8143_v39 = vmul.f32 %v9883_v56, %v8142_v25 }
0x10a3   : > { %v8199_v42 = vmul.f32 %v8140_v49, %v14742_v38 }
0x10a4   : > { %v8144_v47 = vmul.f32 0.5, %v8143_v39  ;;  %v7786_v14 = vpop.xlane.xlu0 %7785 }
0x10a5   : > { %v8232_v24 = vmul.f32 %v14615_v5, %v8199_v42  ;;  %v7818_v35 = vmul.f32 %v7786_v14, %v15446_v18 }
0x10a6   : > { %v8145_v45 = vsub.f32 1.5, %v8144_v47 }
0x10a7   : > { %v9885_v50 = vpop.eup %9884  ;;  %v8265_v6 = vadd.f32 %v14835_v26, %v8232_v24  ;;  %v7850_v21 = vadd.f32 1e-05, %v7818_v35 }
0x10a8   : > { %v8146_v2 = vmul.f32 %v9883_v56, %v8145_v45  ;;  %v8152_v11 = vmul.f32 %v9885_v50, %v7849_v30  ;;  %vm8158_vm12 = vweird.f32 %v9885_v50 }
0x10a9   : > { %8297 = vst [vmem:[%s14636_s28 + $0xe0] sm:$0xff] %v8265_v6  ;;  %9886 = vrsqrt.f32 %v7850_v21  ;;  %vm8159_vm14 = vmor %vm8157_vm13, %vm8158_vm12  ;;  %vm8167_vm0 = vweird.f32 %v7850_v21 }
0x10aa   : > { %v8150_v38 = vsel %vm8149_vm11, %v9883_v56, %v8146_v2  ;;  %v8153_v62 = vmul.f32 %v9885_v50, %v8152_v11 }
0x10ab   : > { %v8200_v58 = vmul.f32 %v8150_v38, %v14753_v34 }
0x10ac   : > { %v8154_v8 = vmul.f32 0.5, %v8153_v62 }
0x10ad   : > { %v8233_v18 = vmul.f32 %v14615_v5, %v8200_v58 }
0x10ae   : > { %v8155_v10 = vsub.f32 1.5, %v8154_v8 }
0x10af   : > { %v9887_v28 = vpop.eup %9886  ;;  %v8266_v52 = vadd.f32 %v14835_v26, %v8233_v18 }
0x10b0   : > { %v8156_v40 = vmul.f32 %v9885_v50, %v8155_v10  ;;  %v8162_v43 = vmul.f32 %v9887_v28, %v7850_v21  ;;  %vm8168_vm15 = vweird.f32 %v9887_v28 }
0x10b1   : > { %8298 = vst [vmem:[%s14636_s28 + $0xe8] sm:$0xff] %v8266_v52  ;;  %vm8169_vm1 = vmor %vm8167_vm0, %vm8168_vm15 }
0x10b2   : > { %v8160_v46 = vsel %vm8159_vm14, %v9885_v50, %v8156_v40  ;;  %v8163_v41 = vmul.f32 %v9887_v28, %v8162_v43 }
0x10b3   : > { %v8201_v34 = vmul.f32 %v8160_v46, %v14763_v1 }
0x10b4   : > { %v8164_v29 = vmul.f32 0.5, %v8163_v41 }
0x10b5   : > { %v8234_v22 = vmul.f32 %v14615_v5, %v8201_v34 }
0x10b6   : > { %v8165_v53 = vsub.f32 1.5, %v8164_v29 }
0x10b7   : > { %v8267_v60 = vadd.f32 %v14835_v26, %v8234_v22 }
0x10b8   : > { %v8166_v36 = vmul.f32 %v9887_v28, %v8165_v53 }
0x10b9   : > { %8299 = vst [vmem:[%s14636_s28 + $0xf0] sm:$0xff] %v8267_v60 }
0x10ba   : > { %v8170_v1 = vsel %vm8169_vm1, %v9887_v28, %v8166_v36 }
0x10bb   : > { %v8202_v12 = vmul.f32 %v8170_v1, %v14774_v59 }
0x10bd   : > { %v8235_v31 = vmul.f32 %v14615_v5, %v8202_v12 }
0x10bf   : > { %v8268_v13 = vadd.f32 %v14835_v26, %v8235_v31 }
0x10c1   : > { %8300 = vst [vmem:[%s14636_s28 + $0xf8] sm:$0xff] %v8268_v13 }
0x10c2   : > { %10191 = shalt.err (!%p10188_p9)
}
0x10c3   : > { %s10265_s21 = smov 128   ;;  %s10266_s28 = smov 8  }
0x10c4   : > { %9146 = dma.vmem_to_hbm [thread:$0]  (%p10431_p13), %s8316_s26, 4096, %s8318_s16, %s8302_s2, %s10265_s21, %s10265_s21, %s10266_s28  }
0x10c5 PF: > { %s8332_s3 = sand.u32 1, %s10234_s30   ;;  %p15464_p10 = scmp.ge.s32.totalorder %s10246_s12, 2 }
0x10c6   : > { %s8333_s25 = scalar_lea.sflag [#allocation4], %s8332_s3 }
0x10c7   : > { %p9175_p11 = pnand %p15464_p10, %p10436_p4 }
0x10c9   : > { %p9176_p0 = pneg %p9175_p11 }
0x10cb   : > { %10229 = dma.done.wait (%p9176_p0), %s8333_s25, 4096  }
0x10cc   : > { %10231 = vsyncadd (%p9176_p0), %s8333_s25, 4294963200  ;;  %p26_p2 = scmp.ge.s32.totalorder %s10411_s14, 4   ;;  %s15465_s30 = smov %s10238_s10 }
0x10cd   : > { %s15466_s10 = smov %s10242_s11  ;;  %s15467_s11 = smov %s10423_s13 }
0x10ce   : > { %s15468_s12 = smov %s10411_s14  ;;  %28 = sbr.rel (!%p26_p2) target bundleno = 13 (0xd), region = 129 }
0x10d3   :  { %8339 = vsyncpa [#allocation3], 1 }
0x10d4   :  { %8341 = vsyncpa [#allocation3 + $0x1], 1 }
0x10d5   :  { %8342 = vsyncpa [#allocation6], 1 }
0x10d6   :  { %8343 = vsyncpa [#allocation9], 1 }
0x10d7   :  { %8344 = vsyncpa [#allocation12], 1 }
0x10d8   :  { %8345 = vsyncpa [#allocation15], 1 }
0x10d9   :  { %8346 = vsyncpa [#allocation4], 1 }
0x10da   :  { %8348 = vsyncpa [#allocation4 + $0x1], 1 }

</bundles_post_ra>
